<compile_context>
chip_gen: v5e
topology: v5e:2x2
jax: 0.10.0
libtpu: 0.0.40
codegen_flags: <defaults>
</compile_context>

<pallas_src>
import numpy as np
import jax
import jax.numpy as jnp
from jax import lax
from jax.experimental import pallas as pl
from jax.experimental.pallas import tpu as pltpu


def _make_ema3d_kernel(cg, bb, d, h, w, pad):
    """Builds the EMA3D kernel for static (cg, Bb, d, h, w, pad)."""
    s = d * h * w
    hw = h * w
    nt = (((1,), (1,)), ((), ()))            # contract last dims: A @ B^T

    def kernel(w1_s, b1_s, w3_s, b3_s, gnw_s, gnb_s,       # SMEM scalar prefetch
               xp_ref, mh_ref, mw_ref, md_ref, msk_ref, o_ref):
        f32 = jnp.float32

        mh = mh_ref[...]                      # (d, S) 0/1: same depth plane
        mw = mw_ref[...]                      # (h, S) 0/1: same height row
        md = md_ref[...]                      # (w, S) 0/1: same width column

        # ---- per-channel loads + directional avg pools (lane-dense) ----
        xg, ph, pw_, pd_, xc = [], [], [], [], []
        for i in range(cg):
            xi = xp_ref[i, :, pad:pad + s]                 # (Bb, S), aligned
            xg.append(xi)
            ph.append(lax.dot_general(xi, mh, nt, preferred_element_type=f32)
                      * (1.0 / hw))                        # (Bb, d)
            pw_.append(lax.dot_general(xi, mw, nt, preferred_element_type=f32)
                       * (1.0 / (d * w)))                  # (Bb, h)
            pd_.append(lax.dot_general(xi, md, nt, preferred_element_type=f32)
                       * (1.0 / (d * h)))                  # (Bb, w)
            xc.append(jnp.max(xi, axis=1, keepdims=True))  # (Bb, 1)

        # ---- 3x3x3 conv (+folded BN): shift-based 'same' convolution.
        # Taps outer: each shifted window and its boundary mask are loaded
        # exactly once and reused for every output channel.
        acc = [jnp.zeros((bb, s), f32) for _ in range(cg)]
        for kd in (-1, 0, 1):
            for kh in (-1, 0, 1):
                for kw in (-1, 0, 1):
                    t = (kd + 1) * 9 + (kh + 1) * 3 + (kw + 1)
                    delta = kd * hw + kh * w + kw
                    if delta == 0:
                        shs = xg                           # center tap, no mask
                    else:
                        m = msk_ref[t:t + 1, :]            # (1, S) kill h/w wraps
                        shs = [xp_ref[i, :, pad + delta:pad + delta + s] * m
                               for i in range(cg)]
                    for o in range(cg):
                        for i in range(cg):
                            acc[o] = acc[o] + w3_s[(o * cg + i) * 27 + t] * shs[i]

        # ---- 1x1x1 conv (+BN) + ReLU + sigmoid in the POOLED domain, then
        # broadcast the tiny gates back to full res with small MXU matmuls.
        x1l, x2l, m1l, m2l = [], [], [], []
        for o in range(cg):
            fh = ph[0] * w1_s[o * cg]
            fw = pw_[0] * w1_s[o * cg]
            fd = pd_[0] * w1_s[o * cg]
            for i in range(1, cg):
                fh = fh + ph[i] * w1_s[o * cg + i]
                fw = fw + pw_[i] * w1_s[o * cg + i]
                fd = fd + pd_[i] * w1_s[o * cg + i]
            ah = jax.nn.sigmoid(jnp.maximum(fh + b1_s[o], 0.0))   # (Bb, d)
            aw = jax.nn.sigmoid(jnp.maximum(fw + b1_s[o], 0.0))   # (Bb, h)
            ad = jax.nn.sigmoid(jnp.maximum(fd + b1_s[o], 0.0))   # (Bb, w)
            gh = jnp.dot(ah, mh, preferred_element_type=f32)      # (Bb, S)
            gw = jnp.dot(aw, mw, preferred_element_type=f32)      # (Bb, S)
            gd = jnp.dot(ad, md, preferred_element_type=f32)      # (Bb, S)
            ac = jax.nn.sigmoid(xc[o])                            # (Bb, 1)

            z = xg[o] * xg[o] * (gh * gw * gd * ac)               # group_x * x_attended

            # GroupNorm(cg, cg) == per-channel instance norm over (d, h, w)
            mu = jnp.sum(z, axis=1, keepdims=True) * (1.0 / s)
            zc = z - mu
            var = jnp.sum(zc * zc, axis=1, keepdims=True) * (1.0 / s)
            x1 = zc * lax.rsqrt(var + 1e-5) * gnw_s[o] + gnb_s[o]
            x1l.append(x1)
            m1l.append(jnp.sum(x1, axis=1, keepdims=True) * (1.0 / s))

            x2 = jnp.maximum(acc[o] + b3_s[o], 0.0)
            x2l.append(x2)
            m2l.append(jnp.sum(x2, axis=1, keepdims=True) * (1.0 / s))

        # ---- channel softmax of pooled means + cross weighting ----
        mx1, mx2 = m1l[0], m2l[0]
        for o in range(1, cg):
            mx1 = jnp.maximum(mx1, m1l[o])
            mx2 = jnp.maximum(mx2, m2l[o])
        e1 = [jnp.exp(m - mx1) for m in m1l]
        e2 = [jnp.exp(m - mx2) for m in m2l]
        s1, s2 = e1[0], e2[0]
        for o in range(1, cg):
            s1 = s1 + e1[o]
            s2 = s2 + e2[o]
        # one reciprocal each, then multiplies (exact keeps 1e-3 comfortable)
        inv1 = pl.reciprocal(s1, approx=False)
        inv2 = pl.reciprocal(s2, approx=False)

        wts = jnp.zeros((bb, s), f32)
        for o in range(cg):
            wts = wts + (e1[o] * inv1) * x2l[o] + (e2[o] * inv2) * x1l[o]
        sig = jax.nn.sigmoid(wts)                          # shared across channels

        for o in range(cg):
            o_ref[o] = xg[o] * sig

    return kernel


def ema3d_pallas(x, w1e, b1e, w3e, b3e, gn_w, gn_b, factor=8):
    b, c, d, h, w = x.shape
    assert c % factor == 0, "channels must be divisible by factor"
    cg = c // factor
    bg = b * factor
    s = d * h * w
    hw = h * w

    # grouped-batch rows per grid step: 8 keeps sublanes dense; >=2 grid steps
    # lets the "parallel" axis shard across v7x's two TensorCores.
    bb = 8 if bg % 8 == 0 else bg
    grid = (bg // bb,)

    # halo for the shift-based 3x3x3 conv, rounded up to a 128-lane multiple
    # so the interior window starts tile-aligned.
    pad = ((hw + w + 1 + 127) // 128) * 128

    # channel-major, spatially-flattened, zero-padded input: (cg, bg, S+2*pad)
    gx = jnp.transpose(x.reshape(bg, cg, s), (1, 0, 2)).astype(jnp.float32)
    gxp = jnp.pad(gx, ((0, 0), (0, 0), (pad, pad)))

    # host-built exact 0/1 indicator matrices (pool + broadcast-back) and the
    # 27 conv-tap validity masks; constant block index -> fetched once.
    idx = np.arange(s)
    p, q, r = idx // hw, (idx // w) % h, idx % w
    mh = (p[None, :] == np.arange(d)[:, None]).astype(np.float32)    # (d, S)
    mw = (q[None, :] == np.arange(h)[:, None]).astype(np.float32)    # (h, S)
    md = (r[None, :] == np.arange(w)[:, None]).astype(np.float32)    # (w, S)
    msk = np.zeros((27, s), np.float32)
    for kd in (-1, 0, 1):
        for kh in (-1, 0, 1):
            for kw in (-1, 0, 1):
                t = (kd + 1) * 9 + (kh + 1) * 3 + (kw + 1)
                ok = ((p + kd >= 0) & (p + kd < d)
                      & (q + kh >= 0) & (q + kh < h)
                      & (r + kw >= 0) & (r + kw < w))
                msk[t] = ok.astype(np.float32)

    const = lambda i, *_: (0, 0)
    grid_spec = pltpu.PrefetchScalarGridSpec(
        num_scalar_prefetch=6,
        grid=grid,
        in_specs=[pl.BlockSpec((cg, bb, s + 2 * pad), lambda i, *_: (0, i, 0)),
                  pl.BlockSpec((d, s), const),
                  pl.BlockSpec((h, s), const),
                  pl.BlockSpec((w, s), const),
                  pl.BlockSpec((27, s), const)],
        out_specs=pl.BlockSpec((cg, bb, s), lambda i, *_: (0, i, 0)),
    )
    out = pl.pallas_call(
        _make_ema3d_kernel(cg, bb, d, h, w, pad),
        out_shape=jax.ShapeDtypeStruct((cg, bg, s), jnp.float32),
        grid_spec=grid_spec,
        compiler_params=pltpu.CompilerParams(
            dimension_semantics=("parallel",)),
    )(w1e.reshape(-1).astype(jnp.float32),
      b1e.astype(jnp.float32),
      w3e.reshape(-1).astype(jnp.float32),
      b3e.astype(jnp.float32),
      gn_w.astype(jnp.float32),
      gn_b.astype(jnp.float32),
      gxp, jnp.asarray(mh), jnp.asarray(mw), jnp.asarray(md), jnp.asarray(msk))
    return jnp.transpose(out, (1, 0, 2)).reshape(b, c, d, h, w)


def ema3d_ref(x, w1e, b1e, w3e, b3e, gn_w, gn_b, factor=8):
    """Pure-JAX reference mirroring the PyTorch forward (BN folded/eval)."""
    b, c, d, h, w = x.shape
    cg = c // factor
    bg = b * factor
    gx = x.reshape(bg, cg, d, h, w)

    x_c = jnp.max(gx, axis=(2, 3, 4), keepdims=True)
    x_h = jnp.mean(gx, axis=(3, 4), keepdims=True)                                   # (bg,cg,d,1,1)
    x_w = jnp.transpose(jnp.mean(gx, axis=(2, 4), keepdims=True), (0, 1, 3, 2, 4))   # (bg,cg,h,1,1)
    x_d = jnp.transpose(jnp.mean(gx, axis=(2, 3), keepdims=True), (0, 1, 4, 3, 2))   # (bg,cg,w,1,1)

    cat = jnp.concatenate([x_h, x_w, x_d], axis=2)
    hwd = jnp.einsum('oi,bisuv->bosuv', w1e, cat,
                     precision=lax.Precision.HIGHEST) + b1e[None, :, None, None, None]
    hwd = jnp.maximum(hwd, 0.0)
    xh, xw, xd = jnp.split(hwd, [d, d + h], axis=2)

    a = (gx
         * jax.nn.sigmoid(xh)
         * jax.nn.sigmoid(xw).reshape(bg, cg, 1, h, 1)
         * jax.nn.sigmoid(xd).reshape(bg, cg, 1, 1, w)
         * jax.nn.sigmoid(x_c))
    z = gx * a
    mu = jnp.mean(z, axis=(2, 3, 4), keepdims=True)
    var = jnp.mean((z - mu) ** 2, axis=(2, 3, 4), keepdims=True)
    x1 = (z - mu) / jnp.sqrt(var + 1e-5) * gn_w[None, :, None, None, None] \
        + gn_b[None, :, None, None, None]

    dn = lax.conv_dimension_numbers(gx.shape, w3e.shape, ('NCDHW', 'OIDHW', 'NCDHW'))
    x2 = lax.conv_general_dilated(gx, w3e, (1, 1, 1), [(1, 1)] * 3,
                                  dimension_numbers=dn,
                                  precision=lax.Precision.HIGHEST)
    x2 = jnp.maximum(x2 + b3e[None, :, None, None, None], 0.0)

    p1 = jax.nn.softmax(jnp.mean(x1, axis=(2, 3, 4)), axis=-1)   # (bg,cg)
    p2 = jax.nn.softmax(jnp.mean(x2, axis=(2, 3, 4)), axis=-1)
    x12 = x1.reshape(bg, cg, -1)
    x22 = x2.reshape(bg, cg, -1)
    wts = (jnp.einsum('bc,bcs->bs', p1, x22, precision=lax.Precision.HIGHEST)
           + jnp.einsum('bc,bcs->bs', p2, x12, precision=lax.Precision.HIGHEST))
    wts = wts.reshape(bg, 1, d, h, w)
    return (gx * jax.nn.sigmoid(wts)).reshape(b, c, d, h, w)


if __name__ == "__main__":
    B, C, D, H, W = 2, 16, 8, 8, 8
    FACTOR = 8
    CG = C // FACTOR

    key = jax.random.PRNGKey(0)
    ks = jax.random.split(key, 16)

    x = jax.random.normal(ks[0], (B, C, D, H, W), jnp.float32)

    # Deterministic parameter init (conv / BN / GroupNorm)
    w1 = 0.5 * jax.random.normal(ks[1], (CG, CG), jnp.float32)
    b1 = 0.1 * jax.random.normal(ks[2], (CG,), jnp.float32)
    bn1_g = 1.0 + 0.1 * jax.random.normal(ks[3], (CG,), jnp.float32)
    bn1_b = 0.1 * jax.random.normal(ks[4], (CG,), jnp.float32)
    bn1_m = 0.1 * jax.random.normal(ks[5], (CG,), jnp.float32)
    bn1_v = 1.0 + 0.1 * jnp.abs(jax.random.normal(ks[6], (CG,), jnp.float32))

    w3 = 0.2 * jax.random.normal(ks[7], (CG, CG, 3, 3, 3), jnp.float32)
    b3 = 0.1 * jax.random.normal(ks[8], (CG,), jnp.float32)
    bn2_g = 1.0 + 0.1 * jax.random.normal(ks[9], (CG,), jnp.float32)
    bn2_b = 0.1 * jax.random.normal(ks[10], (CG,), jnp.float32)
    bn2_m = 0.1 * jax.random.normal(ks[11], (CG,), jnp.float32)
    bn2_v = 1.0 + 0.1 * jnp.abs(jax.random.normal(ks[12], (CG,), jnp.float32))

    gn_w = 1.0 + 0.1 * jax.random.normal(ks[13], (CG,), jnp.float32)
    gn_b = 0.1 * jax.random.normal(ks[14], (CG,), jnp.float32)

    # Fold BatchNorm (inference mode) into the conv weights/biases.
    s1 = bn1_g / jnp.sqrt(bn1_v + 1e-5)
    w1e = w1 * s1[:, None]
    b1e = (b1 - bn1_m) * s1 + bn1_b
    s3 = bn2_g / jnp.sqrt(bn2_v + 1e-5)
    w3e = w3 * s3[:, None, None, None, None]
    b3e = (b3 - bn2_m) * s3 + bn2_b

    out = ema3d_pallas(x, w1e, b1e, w3e, b3e, gn_w, gn_b, factor=FACTOR)
    out = jax.block_until_ready(out)

    ref = ema3d_ref(x, w1e, b1e, w3e, b3e, gn_w, gn_b, factor=FACTOR)
    ref = jax.block_until_ready(ref)

    assert out.shape == (B, C, D, H, W)
    assert jnp.allclose(out, ref, atol=1e-3, rtol=1e-3), \
        f"max abs err = {float(jnp.max(jnp.abs(out - ref)))}"

    print("KERNEL_OK")
</pallas_src>

<mosaic_0001>
module attributes {stable_mosaic.version = 11 : i64} {
  func.func @kernel(%arg0: i32, %arg1: memref<4xf32, #tpu.memory_space<smem>>, %arg2: memref<2xf32, #tpu.memory_space<smem>>, %arg3: memref<108xf32, #tpu.memory_space<smem>>, %arg4: memref<2xf32, #tpu.memory_space<smem>>, %arg5: memref<2xf32, #tpu.memory_space<smem>>, %arg6: memref<2xf32, #tpu.memory_space<smem>>, %arg7: memref<2x8x768xf32, #tpu.memory_space<vmem>>, %arg8: memref<8x512xf32, #tpu.memory_space<vmem>>, %arg9: memref<8x512xf32, #tpu.memory_space<vmem>>, %arg10: memref<8x512xf32, #tpu.memory_space<vmem>>, %arg11: memref<27x512xf32, #tpu.memory_space<vmem>>, %arg12: memref<2x8x512xf32, #tpu.memory_space<vmem>>) attributes {dimension_semantics = [#tpu.dimension_semantics<parallel>], iteration_bounds = array<i64: 2>, scalar_prefetch = 6 : i64, scratch_operands = 0 : i64, tpu.core_type = #tpu.core_type<tc>, window_params = [{transform_indices = @transform_0, window_bounds = array<i64: 2, 8, 768>}, {pipeline_mode = #tpu.pipeline_mode<synchronous>, transform_indices = @transform_1, window_bounds = array<i64: 8, 512>}, {pipeline_mode = #tpu.pipeline_mode<synchronous>, transform_indices = @transform_2, window_bounds = array<i64: 8, 512>}, {pipeline_mode = #tpu.pipeline_mode<synchronous>, transform_indices = @transform_3, window_bounds = array<i64: 8, 512>}, {pipeline_mode = #tpu.pipeline_mode<synchronous>, transform_indices = @transform_4, window_bounds = array<i64: 27, 512>}, {transform_indices = @transform_5, window_bounds = array<i64: 2, 8, 512>}]} {
    %c0 = arith.constant 0 : index
    %c0_0 = arith.constant 0 : index
    %0 = vector.load %arg8[%c0, %c0_0] : memref<8x512xf32, #tpu.memory_space<vmem>>, vector<8x512xf32>
    %c0_1 = arith.constant 0 : index
    %c0_2 = arith.constant 0 : index
    %1 = vector.load %arg9[%c0_1, %c0_2] : memref<8x512xf32, #tpu.memory_space<vmem>>, vector<8x512xf32>
    %c0_3 = arith.constant 0 : index
    %c0_4 = arith.constant 0 : index
    %2 = vector.load %arg10[%c0_3, %c0_4] : memref<8x512xf32, #tpu.memory_space<vmem>>, vector<8x512xf32>
    %c0_5 = arith.constant 0 : index
    %c0_6 = arith.constant 0 : index
    %c128 = arith.constant 128 : index
    %3 = vector.load %arg7[%c0_5, %c0_6, %c128] : memref<2x8x768xf32, #tpu.memory_space<vmem>>, vector<1x8x512xf32>
    %4 = vector.shape_cast %3 : vector<1x8x512xf32> to vector<8x512xf32>
    %cst = arith.constant dense<0.000000e+00> : vector<8x8xf32>
    %5 = tpu.matmul %4, %0, %cst {dimension_numbers = #tpu.dot_dimension_numbers<[1], [1], [0], [0], [0, 0, 1, 0], [], []>} : vector<8x512xf32>, vector<8x512xf32>, vector<8x8xf32> -> vector<8x8xf32>
    %cst_7 = arith.constant 1.562500e-02 : f32
    %6 = vector.broadcast %cst_7 : f32 to vector<8x8xf32>
    %7 = arith.mulf %5, %6 : vector<8x8xf32>
    %cst_8 = arith.constant dense<0.000000e+00> : vector<8x8xf32>
    %8 = tpu.matmul %4, %1, %cst_8 {dimension_numbers = #tpu.dot_dimension_numbers<[1], [1], [0], [0], [0, 0, 1, 0], [], []>} : vector<8x512xf32>, vector<8x512xf32>, vector<8x8xf32> -> vector<8x8xf32>
    %cst_9 = arith.constant 1.562500e-02 : f32
    %9 = vector.broadcast %cst_9 : f32 to vector<8x8xf32>
    %10 = arith.mulf %8, %9 : vector<8x8xf32>
    %cst_10 = arith.constant dense<0.000000e+00> : vector<8x8xf32>
    %11 = tpu.matmul %4, %2, %cst_10 {dimension_numbers = #tpu.dot_dimension_numbers<[1], [1], [0], [0], [0, 0, 1, 0], [], []>} : vector<8x512xf32>, vector<8x512xf32>, vector<8x8xf32> -> vector<8x8xf32>
    %cst_11 = arith.constant 1.562500e-02 : f32
    %12 = vector.broadcast %cst_11 : f32 to vector<8x8xf32>
    %13 = arith.mulf %11, %12 : vector<8x8xf32>
    %cst_12 = arith.constant dense<0xFF800000> : vector<8xf32>
    %14 = vector.multi_reduction <maximumf>, %4, %cst_12 [1] : vector<8x512xf32> to vector<8xf32>
    %15 = vector.shape_cast %14 : vector<8xf32> to vector<8x1xf32>
    %c1 = arith.constant 1 : index
    %c0_13 = arith.constant 0 : index
    %c128_14 = arith.constant 128 : index
    %16 = vector.load %arg7[%c1, %c0_13, %c128_14] : memref<2x8x768xf32, #tpu.memory_space<vmem>>, vector<1x8x512xf32>
    %17 = vector.shape_cast %16 : vector<1x8x512xf32> to vector<8x512xf32>
    %cst_15 = arith.constant dense<0.000000e+00> : vector<8x8xf32>
    %18 = tpu.matmul %17, %0, %cst_15 {dimension_numbers = #tpu.dot_dimension_numbers<[1], [1], [0], [0], [0, 0, 1, 0], [], []>} : vector<8x512xf32>, vector<8x512xf32>, vector<8x8xf32> -> vector<8x8xf32>
    %cst_16 = arith.constant 1.562500e-02 : f32
    %19 = vector.broadcast %cst_16 : f32 to vector<8x8xf32>
    %20 = arith.mulf %18, %19 : vector<8x8xf32>
    %cst_17 = arith.constant dense<0.000000e+00> : vector<8x8xf32>
    %21 = tpu.matmul %17, %1, %cst_17 {dimension_numbers = #tpu.dot_dimension_numbers<[1], [1], [0], [0], [0, 0, 1, 0], [], []>} : vector<8x512xf32>, vector<8x512xf32>, vector<8x8xf32> -> vector<8x8xf32>
    %cst_18 = arith.constant 1.562500e-02 : f32
    %22 = vector.broadcast %cst_18 : f32 to vector<8x8xf32>
    %23 = arith.mulf %21, %22 : vector<8x8xf32>
    %cst_19 = arith.constant dense<0.000000e+00> : vector<8x8xf32>
    %24 = tpu.matmul %17, %2, %cst_19 {dimension_numbers = #tpu.dot_dimension_numbers<[1], [1], [0], [0], [0, 0, 1, 0], [], []>} : vector<8x512xf32>, vector<8x512xf32>, vector<8x8xf32> -> vector<8x8xf32>
    %cst_20 = arith.constant 1.562500e-02 : f32
    %25 = vector.broadcast %cst_20 : f32 to vector<8x8xf32>
    %26 = arith.mulf %24, %25 : vector<8x8xf32>
    %cst_21 = arith.constant dense<0xFF800000> : vector<8xf32>
    %27 = vector.multi_reduction <maximumf>, %17, %cst_21 [1] : vector<8x512xf32> to vector<8xf32>
    %28 = vector.shape_cast %27 : vector<8xf32> to vector<8x1xf32>
    %cst_22 = arith.constant 0.000000e+00 : f32
    %29 = vector.broadcast %cst_22 : f32 to vector<8x512xf32>
    %cst_23 = arith.constant 0.000000e+00 : f32
    %30 = vector.broadcast %cst_23 : f32 to vector<8x512xf32>
    %c0_24 = arith.constant 0 : index
    %c0_25 = arith.constant 0 : index
    %31 = vector.load %arg11[%c0_24, %c0_25] : memref<27x512xf32, #tpu.memory_space<vmem>>, vector<1x512xf32>
    %c0_26 = arith.constant 0 : index
    %c0_27 = arith.constant 0 : index
    %c55 = arith.constant 55 : index
    %32 = vector.load %arg7[%c0_26, %c0_27, %c55] : memref<2x8x768xf32, #tpu.memory_space<vmem>>, vector<1x8x512xf32>
    %33 = vector.shape_cast %32 : vector<1x8x512xf32> to vector<8x512xf32>
    %34 = vector.broadcast %31 : vector<1x512xf32> to vector<8x512xf32>
    %35 = arith.mulf %33, %34 : vector<8x512xf32>
    %c1_28 = arith.constant 1 : index
    %c0_29 = arith.constant 0 : index
    %c55_30 = arith.constant 55 : index
    %36 = vector.load %arg7[%c1_28, %c0_29, %c55_30] : memref<2x8x768xf32, #tpu.memory_space<vmem>>, vector<1x8x512xf32>
    %37 = vector.shape_cast %36 : vector<1x8x512xf32> to vector<8x512xf32>
    %38 = vector.broadcast %31 : vector<1x512xf32> to vector<8x512xf32>
    %39 = arith.mulf %37, %38 : vector<8x512xf32>
    %c0_31 = arith.constant 0 : index
    %40 = memref.load %arg3[%c0_31] : memref<108xf32, #tpu.memory_space<smem>>
    %41 = vector.broadcast %40 : f32 to vector<8x512xf32>
    %42 = arith.mulf %41, %35 : vector<8x512xf32>
    %43 = arith.addf %29, %42 : vector<8x512xf32>
    %c27 = arith.constant 27 : index
    %44 = memref.load %arg3[%c27] : memref<108xf32, #tpu.memory_space<smem>>
    %45 = vector.broadcast %44 : f32 to vector<8x512xf32>
    %46 = arith.mulf %45, %39 : vector<8x512xf32>
    %47 = arith.addf %43, %46 : vector<8x512xf32>
    %c54 = arith.constant 54 : index
    %48 = memref.load %arg3[%c54] : memref<108xf32, #tpu.memory_space<smem>>
    %49 = vector.broadcast %48 : f32 to vector<8x512xf32>
    %50 = arith.mulf %49, %35 : vector<8x512xf32>
    %51 = arith.addf %30, %50 : vector<8x512xf32>
    %c81 = arith.constant 81 : index
    %52 = memref.load %arg3[%c81] : memref<108xf32, #tpu.memory_space<smem>>
    %53 = vector.broadcast %52 : f32 to vector<8x512xf32>
    %54 = arith.mulf %53, %39 : vector<8x512xf32>
    %55 = arith.addf %51, %54 : vector<8x512xf32>
    %c1_32 = arith.constant 1 : index
    %c0_33 = arith.constant 0 : index
    %56 = vector.load %arg11[%c1_32, %c0_33] : memref<27x512xf32, #tpu.memory_space<vmem>>, vector<1x512xf32>
    %c0_34 = arith.constant 0 : index
    %c0_35 = arith.constant 0 : index
    %c56 = arith.constant 56 : index
    %57 = vector.load %arg7[%c0_34, %c0_35, %c56] : memref<2x8x768xf32, #tpu.memory_space<vmem>>, vector<1x8x512xf32>
    %58 = vector.shape_cast %57 : vector<1x8x512xf32> to vector<8x512xf32>
    %59 = vector.broadcast %56 : vector<1x512xf32> to vector<8x512xf32>
    %60 = arith.mulf %58, %59 : vector<8x512xf32>
    %c1_36 = arith.constant 1 : index
    %c0_37 = arith.constant 0 : index
    %c56_38 = arith.constant 56 : index
    %61 = vector.load %arg7[%c1_36, %c0_37, %c56_38] : memref<2x8x768xf32, #tpu.memory_space<vmem>>, vector<1x8x512xf32>
    %62 = vector.shape_cast %61 : vector<1x8x512xf32> to vector<8x512xf32>
    %63 = vector.broadcast %56 : vector<1x512xf32> to vector<8x512xf32>
    %64 = arith.mulf %62, %63 : vector<8x512xf32>
    %c1_39 = arith.constant 1 : index
    %65 = memref.load %arg3[%c1_39] : memref<108xf32, #tpu.memory_space<smem>>
    %66 = vector.broadcast %65 : f32 to vector<8x512xf32>
    %67 = arith.mulf %66, %60 : vector<8x512xf32>
    %68 = arith.addf %47, %67 : vector<8x512xf32>
    %c28 = arith.constant 28 : index
    %69 = memref.load %arg3[%c28] : memref<108xf32, #tpu.memory_space<smem>>
    %70 = vector.broadcast %69 : f32 to vector<8x512xf32>
    %71 = arith.mulf %70, %64 : vector<8x512xf32>
    %72 = arith.addf %68, %71 : vector<8x512xf32>
    %c55_40 = arith.constant 55 : index
    %73 = memref.load %arg3[%c55_40] : memref<108xf32, #tpu.memory_space<smem>>
    %74 = vector.broadcast %73 : f32 to vector<8x512xf32>
    %75 = arith.mulf %74, %60 : vector<8x512xf32>
    %76 = arith.addf %55, %75 : vector<8x512xf32>
    %c82 = arith.constant 82 : index
    %77 = memref.load %arg3[%c82] : memref<108xf32, #tpu.memory_space<smem>>
    %78 = vector.broadcast %77 : f32 to vector<8x512xf32>
    %79 = arith.mulf %78, %64 : vector<8x512xf32>
    %80 = arith.addf %76, %79 : vector<8x512xf32>
    %c2 = arith.constant 2 : index
    %c0_41 = arith.constant 0 : index
    %81 = vector.load %arg11[%c2, %c0_41] : memref<27x512xf32, #tpu.memory_space<vmem>>, vector<1x512xf32>
    %c0_42 = arith.constant 0 : index
    %c0_43 = arith.constant 0 : index
    %c57 = arith.constant 57 : index
    %82 = vector.load %arg7[%c0_42, %c0_43, %c57] : memref<2x8x768xf32, #tpu.memory_space<vmem>>, vector<1x8x512xf32>
    %83 = vector.shape_cast %82 : vector<1x8x512xf32> to vector<8x512xf32>
    %84 = vector.broadcast %81 : vector<1x512xf32> to vector<8x512xf32>
    %85 = arith.mulf %83, %84 : vector<8x512xf32>
    %c1_44 = arith.constant 1 : index
    %c0_45 = arith.constant 0 : index
    %c57_46 = arith.constant 57 : index
    %86 = vector.load %arg7[%c1_44, %c0_45, %c57_46] : memref<2x8x768xf32, #tpu.memory_space<vmem>>, vector<1x8x512xf32>
    %87 = vector.shape_cast %86 : vector<1x8x512xf32> to vector<8x512xf32>
    %88 = vector.broadcast %81 : vector<1x512xf32> to vector<8x512xf32>
    %89 = arith.mulf %87, %88 : vector<8x512xf32>
    %c2_47 = arith.constant 2 : index
    %90 = memref.load %arg3[%c2_47] : memref<108xf32, #tpu.memory_space<smem>>
    %91 = vector.broadcast %90 : f32 to vector<8x512xf32>
    %92 = arith.mulf %91, %85 : vector<8x512xf32>
    %93 = arith.addf %72, %92 : vector<8x512xf32>
    %c29 = arith.constant 29 : index
    %94 = memref.load %arg3[%c29] : memref<108xf32, #tpu.memory_space<smem>>
    %95 = vector.broadcast %94 : f32 to vector<8x512xf32>
    %96 = arith.mulf %95, %89 : vector<8x512xf32>
    %97 = arith.addf %93, %96 : vector<8x512xf32>
    %c56_48 = arith.constant 56 : index
    %98 = memref.load %arg3[%c56_48] : memref<108xf32, #tpu.memory_space<smem>>
    %99 = vector.broadcast %98 : f32 to vector<8x512xf32>
    %100 = arith.mulf %99, %85 : vector<8x512xf32>
    %101 = arith.addf %80, %100 : vector<8x512xf32>
    %c83 = arith.constant 83 : index
    %102 = memref.load %arg3[%c83] : memref<108xf32, #tpu.memory_space<smem>>
    %103 = vector.broadcast %102 : f32 to vector<8x512xf32>
    %104 = arith.mulf %103, %89 : vector<8x512xf32>
    %105 = arith.addf %101, %104 : vector<8x512xf32>
    %c3 = arith.constant 3 : index
    %c0_49 = arith.constant 0 : index
    %106 = vector.load %arg11[%c3, %c0_49] : memref<27x512xf32, #tpu.memory_space<vmem>>, vector<1x512xf32>
    %c0_50 = arith.constant 0 : index
    %c0_51 = arith.constant 0 : index
    %c63 = arith.constant 63 : index
    %107 = vector.load %arg7[%c0_50, %c0_51, %c63] : memref<2x8x768xf32, #tpu.memory_space<vmem>>, vector<1x8x512xf32>
    %108 = vector.shape_cast %107 : vector<1x8x512xf32> to vector<8x512xf32>
    %109 = vector.broadcast %106 : vector<1x512xf32> to vector<8x512xf32>
    %110 = arith.mulf %108, %109 : vector<8x512xf32>
    %c1_52 = arith.constant 1 : index
    %c0_53 = arith.constant 0 : index
    %c63_54 = arith.constant 63 : index
    %111 = vector.load %arg7[%c1_52, %c0_53, %c63_54] : memref<2x8x768xf32, #tpu.memory_space<vmem>>, vector<1x8x512xf32>
    %112 = vector.shape_cast %111 : vector<1x8x512xf32> to vector<8x512xf32>
    %113 = vector.broadcast %106 : vector<1x512xf32> to vector<8x512xf32>
    %114 = arith.mulf %112, %113 : vector<8x512xf32>
    %c3_55 = arith.constant 3 : index
    %115 = memref.load %arg3[%c3_55] : memref<108xf32, #tpu.memory_space<smem>>
    %116 = vector.broadcast %115 : f32 to vector<8x512xf32>
    %117 = arith.mulf %116, %110 : vector<8x512xf32>
    %118 = arith.addf %97, %117 : vector<8x512xf32>
    %c30 = arith.constant 30 : index
    %119 = memref.load %arg3[%c30] : memref<108xf32, #tpu.memory_space<smem>>
    %120 = vector.broadcast %119 : f32 to vector<8x512xf32>
    %121 = arith.mulf %120, %114 : vector<8x512xf32>
    %122 = arith.addf %118, %121 : vector<8x512xf32>
    %c57_56 = arith.constant 57 : index
    %123 = memref.load %arg3[%c57_56] : memref<108xf32, #tpu.memory_space<smem>>
    %124 = vector.broadcast %123 : f32 to vector<8x512xf32>
    %125 = arith.mulf %124, %110 : vector<8x512xf32>
    %126 = arith.addf %105, %125 : vector<8x512xf32>
    %c84 = arith.constant 84 : index
    %127 = memref.load %arg3[%c84] : memref<108xf32, #tpu.memory_space<smem>>
    %128 = vector.broadcast %127 : f32 to vector<8x512xf32>
    %129 = arith.mulf %128, %114 : vector<8x512xf32>
    %130 = arith.addf %126, %129 : vector<8x512xf32>
    %c4 = arith.constant 4 : index
    %c0_57 = arith.constant 0 : index
    %131 = vector.load %arg11[%c4, %c0_57] : memref<27x512xf32, #tpu.memory_space<vmem>>, vector<1x512xf32>
    %c0_58 = arith.constant 0 : index
    %c0_59 = arith.constant 0 : index
    %c64 = arith.constant 64 : index
    %132 = vector.load %arg7[%c0_58, %c0_59, %c64] : memref<2x8x768xf32, #tpu.memory_space<vmem>>, vector<1x8x512xf32>
    %133 = vector.shape_cast %132 : vector<1x8x512xf32> to vector<8x512xf32>
    %134 = vector.broadcast %131 : vector<1x512xf32> to vector<8x512xf32>
    %135 = arith.mulf %133, %134 : vector<8x512xf32>
    %c1_60 = arith.constant 1 : index
    %c0_61 = arith.constant 0 : index
    %c64_62 = arith.constant 64 : index
    %136 = vector.load %arg7[%c1_60, %c0_61, %c64_62] : memref<2x8x768xf32, #tpu.memory_space<vmem>>, vector<1x8x512xf32>
    %137 = vector.shape_cast %136 : vector<1x8x512xf32> to vector<8x512xf32>
    %138 = vector.broadcast %131 : vector<1x512xf32> to vector<8x512xf32>
    %139 = arith.mulf %137, %138 : vector<8x512xf32>
    %c4_63 = arith.constant 4 : index
    %140 = memref.load %arg3[%c4_63] : memref<108xf32, #tpu.memory_space<smem>>
    %141 = vector.broadcast %140 : f32 to vector<8x512xf32>
    %142 = arith.mulf %141, %135 : vector<8x512xf32>
    %143 = arith.addf %122, %142 : vector<8x512xf32>
    %c31 = arith.constant 31 : index
    %144 = memref.load %arg3[%c31] : memref<108xf32, #tpu.memory_space<smem>>
    %145 = vector.broadcast %144 : f32 to vector<8x512xf32>
    %146 = arith.mulf %145, %139 : vector<8x512xf32>
    %147 = arith.addf %143, %146 : vector<8x512xf32>
    %c58 = arith.constant 58 : index
    %148 = memref.load %arg3[%c58] : memref<108xf32, #tpu.memory_space<smem>>
    %149 = vector.broadcast %148 : f32 to vector<8x512xf32>
    %150 = arith.mulf %149, %135 : vector<8x512xf32>
    %151 = arith.addf %130, %150 : vector<8x512xf32>
    %c85 = arith.constant 85 : index
    %152 = memref.load %arg3[%c85] : memref<108xf32, #tpu.memory_space<smem>>
    %153 = vector.broadcast %152 : f32 to vector<8x512xf32>
    %154 = arith.mulf %153, %139 : vector<8x512xf32>
    %155 = arith.addf %151, %154 : vector<8x512xf32>
    %c5 = arith.constant 5 : index
    %c0_64 = arith.constant 0 : index
    %156 = vector.load %arg11[%c5, %c0_64] : memref<27x512xf32, #tpu.memory_space<vmem>>, vector<1x512xf32>
    %c0_65 = arith.constant 0 : index
    %c0_66 = arith.constant 0 : index
    %c65 = arith.constant 65 : index
    %157 = vector.load %arg7[%c0_65, %c0_66, %c65] : memref<2x8x768xf32, #tpu.memory_space<vmem>>, vector<1x8x512xf32>
    %158 = vector.shape_cast %157 : vector<1x8x512xf32> to vector<8x512xf32>
    %159 = vector.broadcast %156 : vector<1x512xf32> to vector<8x512xf32>
    %160 = arith.mulf %158, %159 : vector<8x512xf32>
    %c1_67 = arith.constant 1 : index
    %c0_68 = arith.constant 0 : index
    %c65_69 = arith.constant 65 : index
    %161 = vector.load %arg7[%c1_67, %c0_68, %c65_69] : memref<2x8x768xf32, #tpu.memory_space<vmem>>, vector<1x8x512xf32>
    %162 = vector.shape_cast %161 : vector<1x8x512xf32> to vector<8x512xf32>
    %163 = vector.broadcast %156 : vector<1x512xf32> to vector<8x512xf32>
    %164 = arith.mulf %162, %163 : vector<8x512xf32>
    %c5_70 = arith.constant 5 : index
    %165 = memref.load %arg3[%c5_70] : memref<108xf32, #tpu.memory_space<smem>>
    %166 = vector.broadcast %165 : f32 to vector<8x512xf32>
    %167 = arith.mulf %166, %160 : vector<8x512xf32>
    %168 = arith.addf %147, %167 : vector<8x512xf32>
    %c32 = arith.constant 32 : index
    %169 = memref.load %arg3[%c32] : memref<108xf32, #tpu.memory_space<smem>>
    %170 = vector.broadcast %169 : f32 to vector<8x512xf32>
    %171 = arith.mulf %170, %164 : vector<8x512xf32>
    %172 = arith.addf %168, %171 : vector<8x512xf32>
    %c59 = arith.constant 59 : index
    %173 = memref.load %arg3[%c59] : memref<108xf32, #tpu.memory_space<smem>>
    %174 = vector.broadcast %173 : f32 to vector<8x512xf32>
    %175 = arith.mulf %174, %160 : vector<8x512xf32>
    %176 = arith.addf %155, %175 : vector<8x512xf32>
    %c86 = arith.constant 86 : index
    %177 = memref.load %arg3[%c86] : memref<108xf32, #tpu.memory_space<smem>>
    %178 = vector.broadcast %177 : f32 to vector<8x512xf32>
    %179 = arith.mulf %178, %164 : vector<8x512xf32>
    %180 = arith.addf %176, %179 : vector<8x512xf32>
    %c6 = arith.constant 6 : index
    %c0_71 = arith.constant 0 : index
    %181 = vector.load %arg11[%c6, %c0_71] : memref<27x512xf32, #tpu.memory_space<vmem>>, vector<1x512xf32>
    %c0_72 = arith.constant 0 : index
    %c0_73 = arith.constant 0 : index
    %c71 = arith.constant 71 : index
    %182 = vector.load %arg7[%c0_72, %c0_73, %c71] : memref<2x8x768xf32, #tpu.memory_space<vmem>>, vector<1x8x512xf32>
    %183 = vector.shape_cast %182 : vector<1x8x512xf32> to vector<8x512xf32>
    %184 = vector.broadcast %181 : vector<1x512xf32> to vector<8x512xf32>
    %185 = arith.mulf %183, %184 : vector<8x512xf32>
    %c1_74 = arith.constant 1 : index
    %c0_75 = arith.constant 0 : index
    %c71_76 = arith.constant 71 : index
    %186 = vector.load %arg7[%c1_74, %c0_75, %c71_76] : memref<2x8x768xf32, #tpu.memory_space<vmem>>, vector<1x8x512xf32>
    %187 = vector.shape_cast %186 : vector<1x8x512xf32> to vector<8x512xf32>
    %188 = vector.broadcast %181 : vector<1x512xf32> to vector<8x512xf32>
    %189 = arith.mulf %187, %188 : vector<8x512xf32>
    %c6_77 = arith.constant 6 : index
    %190 = memref.load %arg3[%c6_77] : memref<108xf32, #tpu.memory_space<smem>>
    %191 = vector.broadcast %190 : f32 to vector<8x512xf32>
    %192 = arith.mulf %191, %185 : vector<8x512xf32>
    %193 = arith.addf %172, %192 : vector<8x512xf32>
    %c33 = arith.constant 33 : index
    %194 = memref.load %arg3[%c33] : memref<108xf32, #tpu.memory_space<smem>>
    %195 = vector.broadcast %194 : f32 to vector<8x512xf32>
    %196 = arith.mulf %195, %189 : vector<8x512xf32>
    %197 = arith.addf %193, %196 : vector<8x512xf32>
    %c60 = arith.constant 60 : index
    %198 = memref.load %arg3[%c60] : memref<108xf32, #tpu.memory_space<smem>>
    %199 = vector.broadcast %198 : f32 to vector<8x512xf32>
    %200 = arith.mulf %199, %185 : vector<8x512xf32>
    %201 = arith.addf %180, %200 : vector<8x512xf32>
    %c87 = arith.constant 87 : index
    %202 = memref.load %arg3[%c87] : memref<108xf32, #tpu.memory_space<smem>>
    %203 = vector.broadcast %202 : f32 to vector<8x512xf32>
    %204 = arith.mulf %203, %189 : vector<8x512xf32>
    %205 = arith.addf %201, %204 : vector<8x512xf32>
    %c7 = arith.constant 7 : index
    %c0_78 = arith.constant 0 : index
    %206 = vector.load %arg11[%c7, %c0_78] : memref<27x512xf32, #tpu.memory_space<vmem>>, vector<1x512xf32>
    %c0_79 = arith.constant 0 : index
    %c0_80 = arith.constant 0 : index
    %c72 = arith.constant 72 : index
    %207 = vector.load %arg7[%c0_79, %c0_80, %c72] : memref<2x8x768xf32, #tpu.memory_space<vmem>>, vector<1x8x512xf32>
    %208 = vector.shape_cast %207 : vector<1x8x512xf32> to vector<8x512xf32>
    %209 = vector.broadcast %206 : vector<1x512xf32> to vector<8x512xf32>
    %210 = arith.mulf %208, %209 : vector<8x512xf32>
    %c1_81 = arith.constant 1 : index
    %c0_82 = arith.constant 0 : index
    %c72_83 = arith.constant 72 : index
    %211 = vector.load %arg7[%c1_81, %c0_82, %c72_83] : memref<2x8x768xf32, #tpu.memory_space<vmem>>, vector<1x8x512xf32>
    %212 = vector.shape_cast %211 : vector<1x8x512xf32> to vector<8x512xf32>
    %213 = vector.broadcast %206 : vector<1x512xf32> to vector<8x512xf32>
    %214 = arith.mulf %212, %213 : vector<8x512xf32>
    %c7_84 = arith.constant 7 : index
    %215 = memref.load %arg3[%c7_84] : memref<108xf32, #tpu.memory_space<smem>>
    %216 = vector.broadcast %215 : f32 to vector<8x512xf32>
    %217 = arith.mulf %216, %210 : vector<8x512xf32>
    %218 = arith.addf %197, %217 : vector<8x512xf32>
    %c34 = arith.constant 34 : index
    %219 = memref.load %arg3[%c34] : memref<108xf32, #tpu.memory_space<smem>>
    %220 = vector.broadcast %219 : f32 to vector<8x512xf32>
    %221 = arith.mulf %220, %214 : vector<8x512xf32>
    %222 = arith.addf %218, %221 : vector<8x512xf32>
    %c61 = arith.constant 61 : index
    %223 = memref.load %arg3[%c61] : memref<108xf32, #tpu.memory_space<smem>>
    %224 = vector.broadcast %223 : f32 to vector<8x512xf32>
    %225 = arith.mulf %224, %210 : vector<8x512xf32>
    %226 = arith.addf %205, %225 : vector<8x512xf32>
    %c88 = arith.constant 88 : index
    %227 = memref.load %arg3[%c88] : memref<108xf32, #tpu.memory_space<smem>>
    %228 = vector.broadcast %227 : f32 to vector<8x512xf32>
    %229 = arith.mulf %228, %214 : vector<8x512xf32>
    %230 = arith.addf %226, %229 : vector<8x512xf32>
    %c8 = arith.constant 8 : index
    %c0_85 = arith.constant 0 : index
    %231 = vector.load %arg11[%c8, %c0_85] : memref<27x512xf32, #tpu.memory_space<vmem>>, vector<1x512xf32>
    %c0_86 = arith.constant 0 : index
    %c0_87 = arith.constant 0 : index
    %c73 = arith.constant 73 : index
    %232 = vector.load %arg7[%c0_86, %c0_87, %c73] : memref<2x8x768xf32, #tpu.memory_space<vmem>>, vector<1x8x512xf32>
    %233 = vector.shape_cast %232 : vector<1x8x512xf32> to vector<8x512xf32>
    %234 = vector.broadcast %231 : vector<1x512xf32> to vector<8x512xf32>
    %235 = arith.mulf %233, %234 : vector<8x512xf32>
    %c1_88 = arith.constant 1 : index
    %c0_89 = arith.constant 0 : index
    %c73_90 = arith.constant 73 : index
    %236 = vector.load %arg7[%c1_88, %c0_89, %c73_90] : memref<2x8x768xf32, #tpu.memory_space<vmem>>, vector<1x8x512xf32>
    %237 = vector.shape_cast %236 : vector<1x8x512xf32> to vector<8x512xf32>
    %238 = vector.broadcast %231 : vector<1x512xf32> to vector<8x512xf32>
    %239 = arith.mulf %237, %238 : vector<8x512xf32>
    %c8_91 = arith.constant 8 : index
    %240 = memref.load %arg3[%c8_91] : memref<108xf32, #tpu.memory_space<smem>>
    %241 = vector.broadcast %240 : f32 to vector<8x512xf32>
    %242 = arith.mulf %241, %235 : vector<8x512xf32>
    %243 = arith.addf %222, %242 : vector<8x512xf32>
    %c35 = arith.constant 35 : index
    %244 = memref.load %arg3[%c35] : memref<108xf32, #tpu.memory_space<smem>>
    %245 = vector.broadcast %244 : f32 to vector<8x512xf32>
    %246 = arith.mulf %245, %239 : vector<8x512xf32>
    %247 = arith.addf %243, %246 : vector<8x512xf32>
    %c62 = arith.constant 62 : index
    %248 = memref.load %arg3[%c62] : memref<108xf32, #tpu.memory_space<smem>>
    %249 = vector.broadcast %248 : f32 to vector<8x512xf32>
    %250 = arith.mulf %249, %235 : vector<8x512xf32>
    %251 = arith.addf %230, %250 : vector<8x512xf32>
    %c89 = arith.constant 89 : index
    %252 = memref.load %arg3[%c89] : memref<108xf32, #tpu.memory_space<smem>>
    %253 = vector.broadcast %252 : f32 to vector<8x512xf32>
    %254 = arith.mulf %253, %239 : vector<8x512xf32>
    %255 = arith.addf %251, %254 : vector<8x512xf32>
    %c9 = arith.constant 9 : index
    %c0_92 = arith.constant 0 : index
    %256 = vector.load %arg11[%c9, %c0_92] : memref<27x512xf32, #tpu.memory_space<vmem>>, vector<1x512xf32>
    %c0_93 = arith.constant 0 : index
    %c0_94 = arith.constant 0 : index
    %c119 = arith.constant 119 : index
    %257 = vector.load %arg7[%c0_93, %c0_94, %c119] : memref<2x8x768xf32, #tpu.memory_space<vmem>>, vector<1x8x512xf32>
    %258 = vector.shape_cast %257 : vector<1x8x512xf32> to vector<8x512xf32>
    %259 = vector.broadcast %256 : vector<1x512xf32> to vector<8x512xf32>
    %260 = arith.mulf %258, %259 : vector<8x512xf32>
    %c1_95 = arith.constant 1 : index
    %c0_96 = arith.constant 0 : index
    %c119_97 = arith.constant 119 : index
    %261 = vector.load %arg7[%c1_95, %c0_96, %c119_97] : memref<2x8x768xf32, #tpu.memory_space<vmem>>, vector<1x8x512xf32>
    %262 = vector.shape_cast %261 : vector<1x8x512xf32> to vector<8x512xf32>
    %263 = vector.broadcast %256 : vector<1x512xf32> to vector<8x512xf32>
    %264 = arith.mulf %262, %263 : vector<8x512xf32>
    %c9_98 = arith.constant 9 : index
    %265 = memref.load %arg3[%c9_98] : memref<108xf32, #tpu.memory_space<smem>>
    %266 = vector.broadcast %265 : f32 to vector<8x512xf32>
    %267 = arith.mulf %266, %260 : vector<8x512xf32>
    %268 = arith.addf %247, %267 : vector<8x512xf32>
    %c36 = arith.constant 36 : index
    %269 = memref.load %arg3[%c36] : memref<108xf32, #tpu.memory_space<smem>>
    %270 = vector.broadcast %269 : f32 to vector<8x512xf32>
    %271 = arith.mulf %270, %264 : vector<8x512xf32>
    %272 = arith.addf %268, %271 : vector<8x512xf32>
    %c63_99 = arith.constant 63 : index
    %273 = memref.load %arg3[%c63_99] : memref<108xf32, #tpu.memory_space<smem>>
    %274 = vector.broadcast %273 : f32 to vector<8x512xf32>
    %275 = arith.mulf %274, %260 : vector<8x512xf32>
    %276 = arith.addf %255, %275 : vector<8x512xf32>
    %c90 = arith.constant 90 : index
    %277 = memref.load %arg3[%c90] : memref<108xf32, #tpu.memory_space<smem>>
    %278 = vector.broadcast %277 : f32 to vector<8x512xf32>
    %279 = arith.mulf %278, %264 : vector<8x512xf32>
    %280 = arith.addf %276, %279 : vector<8x512xf32>
    %c10 = arith.constant 10 : index
    %c0_100 = arith.constant 0 : index
    %281 = vector.load %arg11[%c10, %c0_100] : memref<27x512xf32, #tpu.memory_space<vmem>>, vector<1x512xf32>
    %c0_101 = arith.constant 0 : index
    %c0_102 = arith.constant 0 : index
    %c120 = arith.constant 120 : index
    %282 = vector.load %arg7[%c0_101, %c0_102, %c120] : memref<2x8x768xf32, #tpu.memory_space<vmem>>, vector<1x8x512xf32>
    %283 = vector.shape_cast %282 : vector<1x8x512xf32> to vector<8x512xf32>
    %284 = vector.broadcast %281 : vector<1x512xf32> to vector<8x512xf32>
    %285 = arith.mulf %283, %284 : vector<8x512xf32>
    %c1_103 = arith.constant 1 : index
    %c0_104 = arith.constant 0 : index
    %c120_105 = arith.constant 120 : index
    %286 = vector.load %arg7[%c1_103, %c0_104, %c120_105] : memref<2x8x768xf32, #tpu.memory_space<vmem>>, vector<1x8x512xf32>
    %287 = vector.shape_cast %286 : vector<1x8x512xf32> to vector<8x512xf32>
    %288 = vector.broadcast %281 : vector<1x512xf32> to vector<8x512xf32>
    %289 = arith.mulf %287, %288 : vector<8x512xf32>
    %c10_106 = arith.constant 10 : index
    %290 = memref.load %arg3[%c10_106] : memref<108xf32, #tpu.memory_space<smem>>
    %291 = vector.broadcast %290 : f32 to vector<8x512xf32>
    %292 = arith.mulf %291, %285 : vector<8x512xf32>
    %293 = arith.addf %272, %292 : vector<8x512xf32>
    %c37 = arith.constant 37 : index
    %294 = memref.load %arg3[%c37] : memref<108xf32, #tpu.memory_space<smem>>
    %295 = vector.broadcast %294 : f32 to vector<8x512xf32>
    %296 = arith.mulf %295, %289 : vector<8x512xf32>
    %297 = arith.addf %293, %296 : vector<8x512xf32>
    %c64_107 = arith.constant 64 : index
    %298 = memref.load %arg3[%c64_107] : memref<108xf32, #tpu.memory_space<smem>>
    %299 = vector.broadcast %298 : f32 to vector<8x512xf32>
    %300 = arith.mulf %299, %285 : vector<8x512xf32>
    %301 = arith.addf %280, %300 : vector<8x512xf32>
    %c91 = arith.constant 91 : index
    %302 = memref.load %arg3[%c91] : memref<108xf32, #tpu.memory_space<smem>>
    %303 = vector.broadcast %302 : f32 to vector<8x512xf32>
    %304 = arith.mulf %303, %289 : vector<8x512xf32>
    %305 = arith.addf %301, %304 : vector<8x512xf32>
    %c11 = arith.constant 11 : index
    %c0_108 = arith.constant 0 : index
    %306 = vector.load %arg11[%c11, %c0_108] : memref<27x512xf32, #tpu.memory_space<vmem>>, vector<1x512xf32>
    %c0_109 = arith.constant 0 : index
    %c0_110 = arith.constant 0 : index
    %c121 = arith.constant 121 : index
    %307 = vector.load %arg7[%c0_109, %c0_110, %c121] : memref<2x8x768xf32, #tpu.memory_space<vmem>>, vector<1x8x512xf32>
    %308 = vector.shape_cast %307 : vector<1x8x512xf32> to vector<8x512xf32>
    %309 = vector.broadcast %306 : vector<1x512xf32> to vector<8x512xf32>
    %310 = arith.mulf %308, %309 : vector<8x512xf32>
    %c1_111 = arith.constant 1 : index
    %c0_112 = arith.constant 0 : index
    %c121_113 = arith.constant 121 : index
    %311 = vector.load %arg7[%c1_111, %c0_112, %c121_113] : memref<2x8x768xf32, #tpu.memory_space<vmem>>, vector<1x8x512xf32>
    %312 = vector.shape_cast %311 : vector<1x8x512xf32> to vector<8x512xf32>
    %313 = vector.broadcast %306 : vector<1x512xf32> to vector<8x512xf32>
    %314 = arith.mulf %312, %313 : vector<8x512xf32>
    %c11_114 = arith.constant 11 : index
    %315 = memref.load %arg3[%c11_114] : memref<108xf32, #tpu.memory_space<smem>>
    %316 = vector.broadcast %315 : f32 to vector<8x512xf32>
    %317 = arith.mulf %316, %310 : vector<8x512xf32>
    %318 = arith.addf %297, %317 : vector<8x512xf32>
    %c38 = arith.constant 38 : index
    %319 = memref.load %arg3[%c38] : memref<108xf32, #tpu.memory_space<smem>>
    %320 = vector.broadcast %319 : f32 to vector<8x512xf32>
    %321 = arith.mulf %320, %314 : vector<8x512xf32>
    %322 = arith.addf %318, %321 : vector<8x512xf32>
    %c65_115 = arith.constant 65 : index
    %323 = memref.load %arg3[%c65_115] : memref<108xf32, #tpu.memory_space<smem>>
    %324 = vector.broadcast %323 : f32 to vector<8x512xf32>
    %325 = arith.mulf %324, %310 : vector<8x512xf32>
    %326 = arith.addf %305, %325 : vector<8x512xf32>
    %c92 = arith.constant 92 : index
    %327 = memref.load %arg3[%c92] : memref<108xf32, #tpu.memory_space<smem>>
    %328 = vector.broadcast %327 : f32 to vector<8x512xf32>
    %329 = arith.mulf %328, %314 : vector<8x512xf32>
    %330 = arith.addf %326, %329 : vector<8x512xf32>
    %c12 = arith.constant 12 : index
    %c0_116 = arith.constant 0 : index
    %331 = vector.load %arg11[%c12, %c0_116] : memref<27x512xf32, #tpu.memory_space<vmem>>, vector<1x512xf32>
    %c0_117 = arith.constant 0 : index
    %c0_118 = arith.constant 0 : index
    %c127 = arith.constant 127 : index
    %332 = vector.load %arg7[%c0_117, %c0_118, %c127] : memref<2x8x768xf32, #tpu.memory_space<vmem>>, vector<1x8x512xf32>
    %333 = vector.shape_cast %332 : vector<1x8x512xf32> to vector<8x512xf32>
    %334 = vector.broadcast %331 : vector<1x512xf32> to vector<8x512xf32>
    %335 = arith.mulf %333, %334 : vector<8x512xf32>
    %c1_119 = arith.constant 1 : index
    %c0_120 = arith.constant 0 : index
    %c127_121 = arith.constant 127 : index
    %336 = vector.load %arg7[%c1_119, %c0_120, %c127_121] : memref<2x8x768xf32, #tpu.memory_space<vmem>>, vector<1x8x512xf32>
    %337 = vector.shape_cast %336 : vector<1x8x512xf32> to vector<8x512xf32>
    %338 = vector.broadcast %331 : vector<1x512xf32> to vector<8x512xf32>
    %339 = arith.mulf %337, %338 : vector<8x512xf32>
    %c12_122 = arith.constant 12 : index
    %340 = memref.load %arg3[%c12_122] : memref<108xf32, #tpu.memory_space<smem>>
    %341 = vector.broadcast %340 : f32 to vector<8x512xf32>
    %342 = arith.mulf %341, %335 : vector<8x512xf32>
    %343 = arith.addf %322, %342 : vector<8x512xf32>
    %c39 = arith.constant 39 : index
    %344 = memref.load %arg3[%c39] : memref<108xf32, #tpu.memory_space<smem>>
    %345 = vector.broadcast %344 : f32 to vector<8x512xf32>
    %346 = arith.mulf %345, %339 : vector<8x512xf32>
    %347 = arith.addf %343, %346 : vector<8x512xf32>
    %c66 = arith.constant 66 : index
    %348 = memref.load %arg3[%c66] : memref<108xf32, #tpu.memory_space<smem>>
    %349 = vector.broadcast %348 : f32 to vector<8x512xf32>
    %350 = arith.mulf %349, %335 : vector<8x512xf32>
    %351 = arith.addf %330, %350 : vector<8x512xf32>
    %c93 = arith.constant 93 : index
    %352 = memref.load %arg3[%c93] : memref<108xf32, #tpu.memory_space<smem>>
    %353 = vector.broadcast %352 : f32 to vector<8x512xf32>
    %354 = arith.mulf %353, %339 : vector<8x512xf32>
    %355 = arith.addf %351, %354 : vector<8x512xf32>
    %c13 = arith.constant 13 : index
    %356 = memref.load %arg3[%c13] : memref<108xf32, #tpu.memory_space<smem>>
    %357 = vector.broadcast %356 : f32 to vector<8x512xf32>
    %358 = arith.mulf %357, %4 : vector<8x512xf32>
    %359 = arith.addf %347, %358 : vector<8x512xf32>
    %c40 = arith.constant 40 : index
    %360 = memref.load %arg3[%c40] : memref<108xf32, #tpu.memory_space<smem>>
    %361 = vector.broadcast %360 : f32 to vector<8x512xf32>
    %362 = arith.mulf %361, %17 : vector<8x512xf32>
    %363 = arith.addf %359, %362 : vector<8x512xf32>
    %c67 = arith.constant 67 : index
    %364 = memref.load %arg3[%c67] : memref<108xf32, #tpu.memory_space<smem>>
    %365 = vector.broadcast %364 : f32 to vector<8x512xf32>
    %366 = arith.mulf %365, %4 : vector<8x512xf32>
    %367 = arith.addf %355, %366 : vector<8x512xf32>
    %c94 = arith.constant 94 : index
    %368 = memref.load %arg3[%c94] : memref<108xf32, #tpu.memory_space<smem>>
    %369 = vector.broadcast %368 : f32 to vector<8x512xf32>
    %370 = arith.mulf %369, %17 : vector<8x512xf32>
    %371 = arith.addf %367, %370 : vector<8x512xf32>
    %c14 = arith.constant 14 : index
    %c0_123 = arith.constant 0 : index
    %372 = vector.load %arg11[%c14, %c0_123] : memref<27x512xf32, #tpu.memory_space<vmem>>, vector<1x512xf32>
    %c0_124 = arith.constant 0 : index
    %c0_125 = arith.constant 0 : index
    %c129 = arith.constant 129 : index
    %373 = vector.load %arg7[%c0_124, %c0_125, %c129] : memref<2x8x768xf32, #tpu.memory_space<vmem>>, vector<1x8x512xf32>
    %374 = vector.shape_cast %373 : vector<1x8x512xf32> to vector<8x512xf32>
    %375 = vector.broadcast %372 : vector<1x512xf32> to vector<8x512xf32>
    %376 = arith.mulf %374, %375 : vector<8x512xf32>
    %c1_126 = arith.constant 1 : index
    %c0_127 = arith.constant 0 : index
    %c129_128 = arith.constant 129 : index
    %377 = vector.load %arg7[%c1_126, %c0_127, %c129_128] : memref<2x8x768xf32, #tpu.memory_space<vmem>>, vector<1x8x512xf32>
    %378 = vector.shape_cast %377 : vector<1x8x512xf32> to vector<8x512xf32>
    %379 = vector.broadcast %372 : vector<1x512xf32> to vector<8x512xf32>
    %380 = arith.mulf %378, %379 : vector<8x512xf32>
    %c14_129 = arith.constant 14 : index
    %381 = memref.load %arg3[%c14_129] : memref<108xf32, #tpu.memory_space<smem>>
    %382 = vector.broadcast %381 : f32 to vector<8x512xf32>
    %383 = arith.mulf %382, %376 : vector<8x512xf32>
    %384 = arith.addf %363, %383 : vector<8x512xf32>
    %c41 = arith.constant 41 : index
    %385 = memref.load %arg3[%c41] : memref<108xf32, #tpu.memory_space<smem>>
    %386 = vector.broadcast %385 : f32 to vector<8x512xf32>
    %387 = arith.mulf %386, %380 : vector<8x512xf32>
    %388 = arith.addf %384, %387 : vector<8x512xf32>
    %c68 = arith.constant 68 : index
    %389 = memref.load %arg3[%c68] : memref<108xf32, #tpu.memory_space<smem>>
    %390 = vector.broadcast %389 : f32 to vector<8x512xf32>
    %391 = arith.mulf %390, %376 : vector<8x512xf32>
    %392 = arith.addf %371, %391 : vector<8x512xf32>
    %c95 = arith.constant 95 : index
    %393 = memref.load %arg3[%c95] : memref<108xf32, #tpu.memory_space<smem>>
    %394 = vector.broadcast %393 : f32 to vector<8x512xf32>
    %395 = arith.mulf %394, %380 : vector<8x512xf32>
    %396 = arith.addf %392, %395 : vector<8x512xf32>
    %c15 = arith.constant 15 : index
    %c0_130 = arith.constant 0 : index
    %397 = vector.load %arg11[%c15, %c0_130] : memref<27x512xf32, #tpu.memory_space<vmem>>, vector<1x512xf32>
    %c0_131 = arith.constant 0 : index
    %c0_132 = arith.constant 0 : index
    %c135 = arith.constant 135 : index
    %398 = vector.load %arg7[%c0_131, %c0_132, %c135] : memref<2x8x768xf32, #tpu.memory_space<vmem>>, vector<1x8x512xf32>
    %399 = vector.shape_cast %398 : vector<1x8x512xf32> to vector<8x512xf32>
    %400 = vector.broadcast %397 : vector<1x512xf32> to vector<8x512xf32>
    %401 = arith.mulf %399, %400 : vector<8x512xf32>
    %c1_133 = arith.constant 1 : index
    %c0_134 = arith.constant 0 : index
    %c135_135 = arith.constant 135 : index
    %402 = vector.load %arg7[%c1_133, %c0_134, %c135_135] : memref<2x8x768xf32, #tpu.memory_space<vmem>>, vector<1x8x512xf32>
    %403 = vector.shape_cast %402 : vector<1x8x512xf32> to vector<8x512xf32>
    %404 = vector.broadcast %397 : vector<1x512xf32> to vector<8x512xf32>
    %405 = arith.mulf %403, %404 : vector<8x512xf32>
    %c15_136 = arith.constant 15 : index
    %406 = memref.load %arg3[%c15_136] : memref<108xf32, #tpu.memory_space<smem>>
    %407 = vector.broadcast %406 : f32 to vector<8x512xf32>
    %408 = arith.mulf %407, %401 : vector<8x512xf32>
    %409 = arith.addf %388, %408 : vector<8x512xf32>
    %c42 = arith.constant 42 : index
    %410 = memref.load %arg3[%c42] : memref<108xf32, #tpu.memory_space<smem>>
    %411 = vector.broadcast %410 : f32 to vector<8x512xf32>
    %412 = arith.mulf %411, %405 : vector<8x512xf32>
    %413 = arith.addf %409, %412 : vector<8x512xf32>
    %c69 = arith.constant 69 : index
    %414 = memref.load %arg3[%c69] : memref<108xf32, #tpu.memory_space<smem>>
    %415 = vector.broadcast %414 : f32 to vector<8x512xf32>
    %416 = arith.mulf %415, %401 : vector<8x512xf32>
    %417 = arith.addf %396, %416 : vector<8x512xf32>
    %c96 = arith.constant 96 : index
    %418 = memref.load %arg3[%c96] : memref<108xf32, #tpu.memory_space<smem>>
    %419 = vector.broadcast %418 : f32 to vector<8x512xf32>
    %420 = arith.mulf %419, %405 : vector<8x512xf32>
    %421 = arith.addf %417, %420 : vector<8x512xf32>
    %c16 = arith.constant 16 : index
    %c0_137 = arith.constant 0 : index
    %422 = vector.load %arg11[%c16, %c0_137] : memref<27x512xf32, #tpu.memory_space<vmem>>, vector<1x512xf32>
    %c0_138 = arith.constant 0 : index
    %c0_139 = arith.constant 0 : index
    %c136 = arith.constant 136 : index
    %423 = vector.load %arg7[%c0_138, %c0_139, %c136] : memref<2x8x768xf32, #tpu.memory_space<vmem>>, vector<1x8x512xf32>
    %424 = vector.shape_cast %423 : vector<1x8x512xf32> to vector<8x512xf32>
    %425 = vector.broadcast %422 : vector<1x512xf32> to vector<8x512xf32>
    %426 = arith.mulf %424, %425 : vector<8x512xf32>
    %c1_140 = arith.constant 1 : index
    %c0_141 = arith.constant 0 : index
    %c136_142 = arith.constant 136 : index
    %427 = vector.load %arg7[%c1_140, %c0_141, %c136_142] : memref<2x8x768xf32, #tpu.memory_space<vmem>>, vector<1x8x512xf32>
    %428 = vector.shape_cast %427 : vector<1x8x512xf32> to vector<8x512xf32>
    %429 = vector.broadcast %422 : vector<1x512xf32> to vector<8x512xf32>
    %430 = arith.mulf %428, %429 : vector<8x512xf32>
    %c16_143 = arith.constant 16 : index
    %431 = memref.load %arg3[%c16_143] : memref<108xf32, #tpu.memory_space<smem>>
    %432 = vector.broadcast %431 : f32 to vector<8x512xf32>
    %433 = arith.mulf %432, %426 : vector<8x512xf32>
    %434 = arith.addf %413, %433 : vector<8x512xf32>
    %c43 = arith.constant 43 : index
    %435 = memref.load %arg3[%c43] : memref<108xf32, #tpu.memory_space<smem>>
    %436 = vector.broadcast %435 : f32 to vector<8x512xf32>
    %437 = arith.mulf %436, %430 : vector<8x512xf32>
    %438 = arith.addf %434, %437 : vector<8x512xf32>
    %c70 = arith.constant 70 : index
    %439 = memref.load %arg3[%c70] : memref<108xf32, #tpu.memory_space<smem>>
    %440 = vector.broadcast %439 : f32 to vector<8x512xf32>
    %441 = arith.mulf %440, %426 : vector<8x512xf32>
    %442 = arith.addf %421, %441 : vector<8x512xf32>
    %c97 = arith.constant 97 : index
    %443 = memref.load %arg3[%c97] : memref<108xf32, #tpu.memory_space<smem>>
    %444 = vector.broadcast %443 : f32 to vector<8x512xf32>
    %445 = arith.mulf %444, %430 : vector<8x512xf32>
    %446 = arith.addf %442, %445 : vector<8x512xf32>
    %c17 = arith.constant 17 : index
    %c0_144 = arith.constant 0 : index
    %447 = vector.load %arg11[%c17, %c0_144] : memref<27x512xf32, #tpu.memory_space<vmem>>, vector<1x512xf32>
    %c0_145 = arith.constant 0 : index
    %c0_146 = arith.constant 0 : index
    %c137 = arith.constant 137 : index
    %448 = vector.load %arg7[%c0_145, %c0_146, %c137] : memref<2x8x768xf32, #tpu.memory_space<vmem>>, vector<1x8x512xf32>
    %449 = vector.shape_cast %448 : vector<1x8x512xf32> to vector<8x512xf32>
    %450 = vector.broadcast %447 : vector<1x512xf32> to vector<8x512xf32>
    %451 = arith.mulf %449, %450 : vector<8x512xf32>
    %c1_147 = arith.constant 1 : index
    %c0_148 = arith.constant 0 : index
    %c137_149 = arith.constant 137 : index
    %452 = vector.load %arg7[%c1_147, %c0_148, %c137_149] : memref<2x8x768xf32, #tpu.memory_space<vmem>>, vector<1x8x512xf32>
    %453 = vector.shape_cast %452 : vector<1x8x512xf32> to vector<8x512xf32>
    %454 = vector.broadcast %447 : vector<1x512xf32> to vector<8x512xf32>
    %455 = arith.mulf %453, %454 : vector<8x512xf32>
    %c17_150 = arith.constant 17 : index
    %456 = memref.load %arg3[%c17_150] : memref<108xf32, #tpu.memory_space<smem>>
    %457 = vector.broadcast %456 : f32 to vector<8x512xf32>
    %458 = arith.mulf %457, %451 : vector<8x512xf32>
    %459 = arith.addf %438, %458 : vector<8x512xf32>
    %c44 = arith.constant 44 : index
    %460 = memref.load %arg3[%c44] : memref<108xf32, #tpu.memory_space<smem>>
    %461 = vector.broadcast %460 : f32 to vector<8x512xf32>
    %462 = arith.mulf %461, %455 : vector<8x512xf32>
    %463 = arith.addf %459, %462 : vector<8x512xf32>
    %c71_151 = arith.constant 71 : index
    %464 = memref.load %arg3[%c71_151] : memref<108xf32, #tpu.memory_space<smem>>
    %465 = vector.broadcast %464 : f32 to vector<8x512xf32>
    %466 = arith.mulf %465, %451 : vector<8x512xf32>
    %467 = arith.addf %446, %466 : vector<8x512xf32>
    %c98 = arith.constant 98 : index
    %468 = memref.load %arg3[%c98] : memref<108xf32, #tpu.memory_space<smem>>
    %469 = vector.broadcast %468 : f32 to vector<8x512xf32>
    %470 = arith.mulf %469, %455 : vector<8x512xf32>
    %471 = arith.addf %467, %470 : vector<8x512xf32>
    %c18 = arith.constant 18 : index
    %c0_152 = arith.constant 0 : index
    %472 = vector.load %arg11[%c18, %c0_152] : memref<27x512xf32, #tpu.memory_space<vmem>>, vector<1x512xf32>
    %c0_153 = arith.constant 0 : index
    %c0_154 = arith.constant 0 : index
    %c183 = arith.constant 183 : index
    %473 = vector.load %arg7[%c0_153, %c0_154, %c183] : memref<2x8x768xf32, #tpu.memory_space<vmem>>, vector<1x8x512xf32>
    %474 = vector.shape_cast %473 : vector<1x8x512xf32> to vector<8x512xf32>
    %475 = vector.broadcast %472 : vector<1x512xf32> to vector<8x512xf32>
    %476 = arith.mulf %474, %475 : vector<8x512xf32>
    %c1_155 = arith.constant 1 : index
    %c0_156 = arith.constant 0 : index
    %c183_157 = arith.constant 183 : index
    %477 = vector.load %arg7[%c1_155, %c0_156, %c183_157] : memref<2x8x768xf32, #tpu.memory_space<vmem>>, vector<1x8x512xf32>
    %478 = vector.shape_cast %477 : vector<1x8x512xf32> to vector<8x512xf32>
    %479 = vector.broadcast %472 : vector<1x512xf32> to vector<8x512xf32>
    %480 = arith.mulf %478, %479 : vector<8x512xf32>
    %c18_158 = arith.constant 18 : index
    %481 = memref.load %arg3[%c18_158] : memref<108xf32, #tpu.memory_space<smem>>
    %482 = vector.broadcast %481 : f32 to vector<8x512xf32>
    %483 = arith.mulf %482, %476 : vector<8x512xf32>
    %484 = arith.addf %463, %483 : vector<8x512xf32>
    %c45 = arith.constant 45 : index
    %485 = memref.load %arg3[%c45] : memref<108xf32, #tpu.memory_space<smem>>
    %486 = vector.broadcast %485 : f32 to vector<8x512xf32>
    %487 = arith.mulf %486, %480 : vector<8x512xf32>
    %488 = arith.addf %484, %487 : vector<8x512xf32>
    %c72_159 = arith.constant 72 : index
    %489 = memref.load %arg3[%c72_159] : memref<108xf32, #tpu.memory_space<smem>>
    %490 = vector.broadcast %489 : f32 to vector<8x512xf32>
    %491 = arith.mulf %490, %476 : vector<8x512xf32>
    %492 = arith.addf %471, %491 : vector<8x512xf32>
    %c99 = arith.constant 99 : index
    %493 = memref.load %arg3[%c99] : memref<108xf32, #tpu.memory_space<smem>>
    %494 = vector.broadcast %493 : f32 to vector<8x512xf32>
    %495 = arith.mulf %494, %480 : vector<8x512xf32>
    %496 = arith.addf %492, %495 : vector<8x512xf32>
    %c19 = arith.constant 19 : index
    %c0_160 = arith.constant 0 : index
    %497 = vector.load %arg11[%c19, %c0_160] : memref<27x512xf32, #tpu.memory_space<vmem>>, vector<1x512xf32>
    %c0_161 = arith.constant 0 : index
    %c0_162 = arith.constant 0 : index
    %c184 = arith.constant 184 : index
    %498 = vector.load %arg7[%c0_161, %c0_162, %c184] : memref<2x8x768xf32, #tpu.memory_space<vmem>>, vector<1x8x512xf32>
    %499 = vector.shape_cast %498 : vector<1x8x512xf32> to vector<8x512xf32>
    %500 = vector.broadcast %497 : vector<1x512xf32> to vector<8x512xf32>
    %501 = arith.mulf %499, %500 : vector<8x512xf32>
    %c1_163 = arith.constant 1 : index
    %c0_164 = arith.constant 0 : index
    %c184_165 = arith.constant 184 : index
    %502 = vector.load %arg7[%c1_163, %c0_164, %c184_165] : memref<2x8x768xf32, #tpu.memory_space<vmem>>, vector<1x8x512xf32>
    %503 = vector.shape_cast %502 : vector<1x8x512xf32> to vector<8x512xf32>
    %504 = vector.broadcast %497 : vector<1x512xf32> to vector<8x512xf32>
    %505 = arith.mulf %503, %504 : vector<8x512xf32>
    %c19_166 = arith.constant 19 : index
    %506 = memref.load %arg3[%c19_166] : memref<108xf32, #tpu.memory_space<smem>>
    %507 = vector.broadcast %506 : f32 to vector<8x512xf32>
    %508 = arith.mulf %507, %501 : vector<8x512xf32>
    %509 = arith.addf %488, %508 : vector<8x512xf32>
    %c46 = arith.constant 46 : index
    %510 = memref.load %arg3[%c46] : memref<108xf32, #tpu.memory_space<smem>>
    %511 = vector.broadcast %510 : f32 to vector<8x512xf32>
    %512 = arith.mulf %511, %505 : vector<8x512xf32>
    %513 = arith.addf %509, %512 : vector<8x512xf32>
    %c73_167 = arith.constant 73 : index
    %514 = memref.load %arg3[%c73_167] : memref<108xf32, #tpu.memory_space<smem>>
    %515 = vector.broadcast %514 : f32 to vector<8x512xf32>
    %516 = arith.mulf %515, %501 : vector<8x512xf32>
    %517 = arith.addf %496, %516 : vector<8x512xf32>
    %c100 = arith.constant 100 : index
    %518 = memref.load %arg3[%c100] : memref<108xf32, #tpu.memory_space<smem>>
    %519 = vector.broadcast %518 : f32 to vector<8x512xf32>
    %520 = arith.mulf %519, %505 : vector<8x512xf32>
    %521 = arith.addf %517, %520 : vector<8x512xf32>
    %c20 = arith.constant 20 : index
    %c0_168 = arith.constant 0 : index
    %522 = vector.load %arg11[%c20, %c0_168] : memref<27x512xf32, #tpu.memory_space<vmem>>, vector<1x512xf32>
    %c0_169 = arith.constant 0 : index
    %c0_170 = arith.constant 0 : index
    %c185 = arith.constant 185 : index
    %523 = vector.load %arg7[%c0_169, %c0_170, %c185] : memref<2x8x768xf32, #tpu.memory_space<vmem>>, vector<1x8x512xf32>
    %524 = vector.shape_cast %523 : vector<1x8x512xf32> to vector<8x512xf32>
    %525 = vector.broadcast %522 : vector<1x512xf32> to vector<8x512xf32>
    %526 = arith.mulf %524, %525 : vector<8x512xf32>
    %c1_171 = arith.constant 1 : index
    %c0_172 = arith.constant 0 : index
    %c185_173 = arith.constant 185 : index
    %527 = vector.load %arg7[%c1_171, %c0_172, %c185_173] : memref<2x8x768xf32, #tpu.memory_space<vmem>>, vector<1x8x512xf32>
    %528 = vector.shape_cast %527 : vector<1x8x512xf32> to vector<8x512xf32>
    %529 = vector.broadcast %522 : vector<1x512xf32> to vector<8x512xf32>
    %530 = arith.mulf %528, %529 : vector<8x512xf32>
    %c20_174 = arith.constant 20 : index
    %531 = memref.load %arg3[%c20_174] : memref<108xf32, #tpu.memory_space<smem>>
    %532 = vector.broadcast %531 : f32 to vector<8x512xf32>
    %533 = arith.mulf %532, %526 : vector<8x512xf32>
    %534 = arith.addf %513, %533 : vector<8x512xf32>
    %c47 = arith.constant 47 : index
    %535 = memref.load %arg3[%c47] : memref<108xf32, #tpu.memory_space<smem>>
    %536 = vector.broadcast %535 : f32 to vector<8x512xf32>
    %537 = arith.mulf %536, %530 : vector<8x512xf32>
    %538 = arith.addf %534, %537 : vector<8x512xf32>
    %c74 = arith.constant 74 : index
    %539 = memref.load %arg3[%c74] : memref<108xf32, #tpu.memory_space<smem>>
    %540 = vector.broadcast %539 : f32 to vector<8x512xf32>
    %541 = arith.mulf %540, %526 : vector<8x512xf32>
    %542 = arith.addf %521, %541 : vector<8x512xf32>
    %c101 = arith.constant 101 : index
    %543 = memref.load %arg3[%c101] : memref<108xf32, #tpu.memory_space<smem>>
    %544 = vector.broadcast %543 : f32 to vector<8x512xf32>
    %545 = arith.mulf %544, %530 : vector<8x512xf32>
    %546 = arith.addf %542, %545 : vector<8x512xf32>
    %c21 = arith.constant 21 : index
    %c0_175 = arith.constant 0 : index
    %547 = vector.load %arg11[%c21, %c0_175] : memref<27x512xf32, #tpu.memory_space<vmem>>, vector<1x512xf32>
    %c0_176 = arith.constant 0 : index
    %c0_177 = arith.constant 0 : index
    %c191 = arith.constant 191 : index
    %548 = vector.load %arg7[%c0_176, %c0_177, %c191] : memref<2x8x768xf32, #tpu.memory_space<vmem>>, vector<1x8x512xf32>
    %549 = vector.shape_cast %548 : vector<1x8x512xf32> to vector<8x512xf32>
    %550 = vector.broadcast %547 : vector<1x512xf32> to vector<8x512xf32>
    %551 = arith.mulf %549, %550 : vector<8x512xf32>
    %c1_178 = arith.constant 1 : index
    %c0_179 = arith.constant 0 : index
    %c191_180 = arith.constant 191 : index
    %552 = vector.load %arg7[%c1_178, %c0_179, %c191_180] : memref<2x8x768xf32, #tpu.memory_space<vmem>>, vector<1x8x512xf32>
    %553 = vector.shape_cast %552 : vector<1x8x512xf32> to vector<8x512xf32>
    %554 = vector.broadcast %547 : vector<1x512xf32> to vector<8x512xf32>
    %555 = arith.mulf %553, %554 : vector<8x512xf32>
    %c21_181 = arith.constant 21 : index
    %556 = memref.load %arg3[%c21_181] : memref<108xf32, #tpu.memory_space<smem>>
    %557 = vector.broadcast %556 : f32 to vector<8x512xf32>
    %558 = arith.mulf %557, %551 : vector<8x512xf32>
    %559 = arith.addf %538, %558 : vector<8x512xf32>
    %c48 = arith.constant 48 : index
    %560 = memref.load %arg3[%c48] : memref<108xf32, #tpu.memory_space<smem>>
    %561 = vector.broadcast %560 : f32 to vector<8x512xf32>
    %562 = arith.mulf %561, %555 : vector<8x512xf32>
    %563 = arith.addf %559, %562 : vector<8x512xf32>
    %c75 = arith.constant 75 : index
    %564 = memref.load %arg3[%c75] : memref<108xf32, #tpu.memory_space<smem>>
    %565 = vector.broadcast %564 : f32 to vector<8x512xf32>
    %566 = arith.mulf %565, %551 : vector<8x512xf32>
    %567 = arith.addf %546, %566 : vector<8x512xf32>
    %c102 = arith.constant 102 : index
    %568 = memref.load %arg3[%c102] : memref<108xf32, #tpu.memory_space<smem>>
    %569 = vector.broadcast %568 : f32 to vector<8x512xf32>
    %570 = arith.mulf %569, %555 : vector<8x512xf32>
    %571 = arith.addf %567, %570 : vector<8x512xf32>
    %c22 = arith.constant 22 : index
    %c0_182 = arith.constant 0 : index
    %572 = vector.load %arg11[%c22, %c0_182] : memref<27x512xf32, #tpu.memory_space<vmem>>, vector<1x512xf32>
    %c0_183 = arith.constant 0 : index
    %c0_184 = arith.constant 0 : index
    %c192 = arith.constant 192 : index
    %573 = vector.load %arg7[%c0_183, %c0_184, %c192] : memref<2x8x768xf32, #tpu.memory_space<vmem>>, vector<1x8x512xf32>
    %574 = vector.shape_cast %573 : vector<1x8x512xf32> to vector<8x512xf32>
    %575 = vector.broadcast %572 : vector<1x512xf32> to vector<8x512xf32>
    %576 = arith.mulf %574, %575 : vector<8x512xf32>
    %c1_185 = arith.constant 1 : index
    %c0_186 = arith.constant 0 : index
    %c192_187 = arith.constant 192 : index
    %577 = vector.load %arg7[%c1_185, %c0_186, %c192_187] : memref<2x8x768xf32, #tpu.memory_space<vmem>>, vector<1x8x512xf32>
    %578 = vector.shape_cast %577 : vector<1x8x512xf32> to vector<8x512xf32>
    %579 = vector.broadcast %572 : vector<1x512xf32> to vector<8x512xf32>
    %580 = arith.mulf %578, %579 : vector<8x512xf32>
    %c22_188 = arith.constant 22 : index
    %581 = memref.load %arg3[%c22_188] : memref<108xf32, #tpu.memory_space<smem>>
    %582 = vector.broadcast %581 : f32 to vector<8x512xf32>
    %583 = arith.mulf %582, %576 : vector<8x512xf32>
    %584 = arith.addf %563, %583 : vector<8x512xf32>
    %c49 = arith.constant 49 : index
    %585 = memref.load %arg3[%c49] : memref<108xf32, #tpu.memory_space<smem>>
    %586 = vector.broadcast %585 : f32 to vector<8x512xf32>
    %587 = arith.mulf %586, %580 : vector<8x512xf32>
    %588 = arith.addf %584, %587 : vector<8x512xf32>
    %c76 = arith.constant 76 : index
    %589 = memref.load %arg3[%c76] : memref<108xf32, #tpu.memory_space<smem>>
    %590 = vector.broadcast %589 : f32 to vector<8x512xf32>
    %591 = arith.mulf %590, %576 : vector<8x512xf32>
    %592 = arith.addf %571, %591 : vector<8x512xf32>
    %c103 = arith.constant 103 : index
    %593 = memref.load %arg3[%c103] : memref<108xf32, #tpu.memory_space<smem>>
    %594 = vector.broadcast %593 : f32 to vector<8x512xf32>
    %595 = arith.mulf %594, %580 : vector<8x512xf32>
    %596 = arith.addf %592, %595 : vector<8x512xf32>
    %c23 = arith.constant 23 : index
    %c0_189 = arith.constant 0 : index
    %597 = vector.load %arg11[%c23, %c0_189] : memref<27x512xf32, #tpu.memory_space<vmem>>, vector<1x512xf32>
    %c0_190 = arith.constant 0 : index
    %c0_191 = arith.constant 0 : index
    %c193 = arith.constant 193 : index
    %598 = vector.load %arg7[%c0_190, %c0_191, %c193] : memref<2x8x768xf32, #tpu.memory_space<vmem>>, vector<1x8x512xf32>
    %599 = vector.shape_cast %598 : vector<1x8x512xf32> to vector<8x512xf32>
    %600 = vector.broadcast %597 : vector<1x512xf32> to vector<8x512xf32>
    %601 = arith.mulf %599, %600 : vector<8x512xf32>
    %c1_192 = arith.constant 1 : index
    %c0_193 = arith.constant 0 : index
    %c193_194 = arith.constant 193 : index
    %602 = vector.load %arg7[%c1_192, %c0_193, %c193_194] : memref<2x8x768xf32, #tpu.memory_space<vmem>>, vector<1x8x512xf32>
    %603 = vector.shape_cast %602 : vector<1x8x512xf32> to vector<8x512xf32>
    %604 = vector.broadcast %597 : vector<1x512xf32> to vector<8x512xf32>
    %605 = arith.mulf %603, %604 : vector<8x512xf32>
    %c23_195 = arith.constant 23 : index
    %606 = memref.load %arg3[%c23_195] : memref<108xf32, #tpu.memory_space<smem>>
    %607 = vector.broadcast %606 : f32 to vector<8x512xf32>
    %608 = arith.mulf %607, %601 : vector<8x512xf32>
    %609 = arith.addf %588, %608 : vector<8x512xf32>
    %c50 = arith.constant 50 : index
    %610 = memref.load %arg3[%c50] : memref<108xf32, #tpu.memory_space<smem>>
    %611 = vector.broadcast %610 : f32 to vector<8x512xf32>
    %612 = arith.mulf %611, %605 : vector<8x512xf32>
    %613 = arith.addf %609, %612 : vector<8x512xf32>
    %c77 = arith.constant 77 : index
    %614 = memref.load %arg3[%c77] : memref<108xf32, #tpu.memory_space<smem>>
    %615 = vector.broadcast %614 : f32 to vector<8x512xf32>
    %616 = arith.mulf %615, %601 : vector<8x512xf32>
    %617 = arith.addf %596, %616 : vector<8x512xf32>
    %c104 = arith.constant 104 : index
    %618 = memref.load %arg3[%c104] : memref<108xf32, #tpu.memory_space<smem>>
    %619 = vector.broadcast %618 : f32 to vector<8x512xf32>
    %620 = arith.mulf %619, %605 : vector<8x512xf32>
    %621 = arith.addf %617, %620 : vector<8x512xf32>
    %c24 = arith.constant 24 : index
    %c0_196 = arith.constant 0 : index
    %622 = vector.load %arg11[%c24, %c0_196] : memref<27x512xf32, #tpu.memory_space<vmem>>, vector<1x512xf32>
    %c0_197 = arith.constant 0 : index
    %c0_198 = arith.constant 0 : index
    %c199 = arith.constant 199 : index
    %623 = vector.load %arg7[%c0_197, %c0_198, %c199] : memref<2x8x768xf32, #tpu.memory_space<vmem>>, vector<1x8x512xf32>
    %624 = vector.shape_cast %623 : vector<1x8x512xf32> to vector<8x512xf32>
    %625 = vector.broadcast %622 : vector<1x512xf32> to vector<8x512xf32>
    %626 = arith.mulf %624, %625 : vector<8x512xf32>
    %c1_199 = arith.constant 1 : index
    %c0_200 = arith.constant 0 : index
    %c199_201 = arith.constant 199 : index
    %627 = vector.load %arg7[%c1_199, %c0_200, %c199_201] : memref<2x8x768xf32, #tpu.memory_space<vmem>>, vector<1x8x512xf32>
    %628 = vector.shape_cast %627 : vector<1x8x512xf32> to vector<8x512xf32>
    %629 = vector.broadcast %622 : vector<1x512xf32> to vector<8x512xf32>
    %630 = arith.mulf %628, %629 : vector<8x512xf32>
    %c24_202 = arith.constant 24 : index
    %631 = memref.load %arg3[%c24_202] : memref<108xf32, #tpu.memory_space<smem>>
    %632 = vector.broadcast %631 : f32 to vector<8x512xf32>
    %633 = arith.mulf %632, %626 : vector<8x512xf32>
    %634 = arith.addf %613, %633 : vector<8x512xf32>
    %c51 = arith.constant 51 : index
    %635 = memref.load %arg3[%c51] : memref<108xf32, #tpu.memory_space<smem>>
    %636 = vector.broadcast %635 : f32 to vector<8x512xf32>
    %637 = arith.mulf %636, %630 : vector<8x512xf32>
    %638 = arith.addf %634, %637 : vector<8x512xf32>
    %c78 = arith.constant 78 : index
    %639 = memref.load %arg3[%c78] : memref<108xf32, #tpu.memory_space<smem>>
    %640 = vector.broadcast %639 : f32 to vector<8x512xf32>
    %641 = arith.mulf %640, %626 : vector<8x512xf32>
    %642 = arith.addf %621, %641 : vector<8x512xf32>
    %c105 = arith.constant 105 : index
    %643 = memref.load %arg3[%c105] : memref<108xf32, #tpu.memory_space<smem>>
    %644 = vector.broadcast %643 : f32 to vector<8x512xf32>
    %645 = arith.mulf %644, %630 : vector<8x512xf32>
    %646 = arith.addf %642, %645 : vector<8x512xf32>
    %c25 = arith.constant 25 : index
    %c0_203 = arith.constant 0 : index
    %647 = vector.load %arg11[%c25, %c0_203] : memref<27x512xf32, #tpu.memory_space<vmem>>, vector<1x512xf32>
    %c0_204 = arith.constant 0 : index
    %c0_205 = arith.constant 0 : index
    %c200 = arith.constant 200 : index
    %648 = vector.load %arg7[%c0_204, %c0_205, %c200] : memref<2x8x768xf32, #tpu.memory_space<vmem>>, vector<1x8x512xf32>
    %649 = vector.shape_cast %648 : vector<1x8x512xf32> to vector<8x512xf32>
    %650 = vector.broadcast %647 : vector<1x512xf32> to vector<8x512xf32>
    %651 = arith.mulf %649, %650 : vector<8x512xf32>
    %c1_206 = arith.constant 1 : index
    %c0_207 = arith.constant 0 : index
    %c200_208 = arith.constant 200 : index
    %652 = vector.load %arg7[%c1_206, %c0_207, %c200_208] : memref<2x8x768xf32, #tpu.memory_space<vmem>>, vector<1x8x512xf32>
    %653 = vector.shape_cast %652 : vector<1x8x512xf32> to vector<8x512xf32>
    %654 = vector.broadcast %647 : vector<1x512xf32> to vector<8x512xf32>
    %655 = arith.mulf %653, %654 : vector<8x512xf32>
    %c25_209 = arith.constant 25 : index
    %656 = memref.load %arg3[%c25_209] : memref<108xf32, #tpu.memory_space<smem>>
    %657 = vector.broadcast %656 : f32 to vector<8x512xf32>
    %658 = arith.mulf %657, %651 : vector<8x512xf32>
    %659 = arith.addf %638, %658 : vector<8x512xf32>
    %c52 = arith.constant 52 : index
    %660 = memref.load %arg3[%c52] : memref<108xf32, #tpu.memory_space<smem>>
    %661 = vector.broadcast %660 : f32 to vector<8x512xf32>
    %662 = arith.mulf %661, %655 : vector<8x512xf32>
    %663 = arith.addf %659, %662 : vector<8x512xf32>
    %c79 = arith.constant 79 : index
    %664 = memref.load %arg3[%c79] : memref<108xf32, #tpu.memory_space<smem>>
    %665 = vector.broadcast %664 : f32 to vector<8x512xf32>
    %666 = arith.mulf %665, %651 : vector<8x512xf32>
    %667 = arith.addf %646, %666 : vector<8x512xf32>
    %c106 = arith.constant 106 : index
    %668 = memref.load %arg3[%c106] : memref<108xf32, #tpu.memory_space<smem>>
    %669 = vector.broadcast %668 : f32 to vector<8x512xf32>
    %670 = arith.mulf %669, %655 : vector<8x512xf32>
    %671 = arith.addf %667, %670 : vector<8x512xf32>
    %c26 = arith.constant 26 : index
    %c0_210 = arith.constant 0 : index
    %672 = vector.load %arg11[%c26, %c0_210] : memref<27x512xf32, #tpu.memory_space<vmem>>, vector<1x512xf32>
    %c0_211 = arith.constant 0 : index
    %c0_212 = arith.constant 0 : index
    %c201 = arith.constant 201 : index
    %673 = vector.load %arg7[%c0_211, %c0_212, %c201] : memref<2x8x768xf32, #tpu.memory_space<vmem>>, vector<1x8x512xf32>
    %674 = vector.shape_cast %673 : vector<1x8x512xf32> to vector<8x512xf32>
    %675 = vector.broadcast %672 : vector<1x512xf32> to vector<8x512xf32>
    %676 = arith.mulf %674, %675 : vector<8x512xf32>
    %c1_213 = arith.constant 1 : index
    %c0_214 = arith.constant 0 : index
    %c201_215 = arith.constant 201 : index
    %677 = vector.load %arg7[%c1_213, %c0_214, %c201_215] : memref<2x8x768xf32, #tpu.memory_space<vmem>>, vector<1x8x512xf32>
    %678 = vector.shape_cast %677 : vector<1x8x512xf32> to vector<8x512xf32>
    %679 = vector.broadcast %672 : vector<1x512xf32> to vector<8x512xf32>
    %680 = arith.mulf %678, %679 : vector<8x512xf32>
    %c26_216 = arith.constant 26 : index
    %681 = memref.load %arg3[%c26_216] : memref<108xf32, #tpu.memory_space<smem>>
    %682 = vector.broadcast %681 : f32 to vector<8x512xf32>
    %683 = arith.mulf %682, %676 : vector<8x512xf32>
    %684 = arith.addf %663, %683 : vector<8x512xf32>
    %c53 = arith.constant 53 : index
    %685 = memref.load %arg3[%c53] : memref<108xf32, #tpu.memory_space<smem>>
    %686 = vector.broadcast %685 : f32 to vector<8x512xf32>
    %687 = arith.mulf %686, %680 : vector<8x512xf32>
    %688 = arith.addf %684, %687 : vector<8x512xf32>
    %c80 = arith.constant 80 : index
    %689 = memref.load %arg3[%c80] : memref<108xf32, #tpu.memory_space<smem>>
    %690 = vector.broadcast %689 : f32 to vector<8x512xf32>
    %691 = arith.mulf %690, %676 : vector<8x512xf32>
    %692 = arith.addf %671, %691 : vector<8x512xf32>
    %c107 = arith.constant 107 : index
    %693 = memref.load %arg3[%c107] : memref<108xf32, #tpu.memory_space<smem>>
    %694 = vector.broadcast %693 : f32 to vector<8x512xf32>
    %695 = arith.mulf %694, %680 : vector<8x512xf32>
    %696 = arith.addf %692, %695 : vector<8x512xf32>
    %c0_217 = arith.constant 0 : index
    %697 = memref.load %arg1[%c0_217] : memref<4xf32, #tpu.memory_space<smem>>
    %698 = vector.broadcast %697 : f32 to vector<8x8xf32>
    %699 = arith.mulf %7, %698 : vector<8x8xf32>
    %c0_218 = arith.constant 0 : index
    %700 = memref.load %arg1[%c0_218] : memref<4xf32, #tpu.memory_space<smem>>
    %701 = vector.broadcast %700 : f32 to vector<8x8xf32>
    %702 = arith.mulf %10, %701 : vector<8x8xf32>
    %c0_219 = arith.constant 0 : index
    %703 = memref.load %arg1[%c0_219] : memref<4xf32, #tpu.memory_space<smem>>
    %704 = vector.broadcast %703 : f32 to vector<8x8xf32>
    %705 = arith.mulf %13, %704 : vector<8x8xf32>
    %c1_220 = arith.constant 1 : index
    %706 = memref.load %arg1[%c1_220] : memref<4xf32, #tpu.memory_space<smem>>
    %707 = vector.broadcast %706 : f32 to vector<8x8xf32>
    %708 = arith.mulf %20, %707 : vector<8x8xf32>
    %709 = arith.addf %699, %708 : vector<8x8xf32>
    %c1_221 = arith.constant 1 : index
    %710 = memref.load %arg1[%c1_221] : memref<4xf32, #tpu.memory_space<smem>>
    %711 = vector.broadcast %710 : f32 to vector<8x8xf32>
    %712 = arith.mulf %23, %711 : vector<8x8xf32>
    %713 = arith.addf %702, %712 : vector<8x8xf32>
    %c1_222 = arith.constant 1 : index
    %714 = memref.load %arg1[%c1_222] : memref<4xf32, #tpu.memory_space<smem>>
    %715 = vector.broadcast %714 : f32 to vector<8x8xf32>
    %716 = arith.mulf %26, %715 : vector<8x8xf32>
    %717 = arith.addf %705, %716 : vector<8x8xf32>
    %c0_223 = arith.constant 0 : index
    %718 = memref.load %arg2[%c0_223] : memref<2xf32, #tpu.memory_space<smem>>
    %719 = vector.broadcast %718 : f32 to vector<8x8xf32>
    %720 = arith.addf %709, %719 : vector<8x8xf32>
    %cst_224 = arith.constant 0.000000e+00 : f32
    %721 = vector.broadcast %cst_224 : f32 to vector<8x8xf32>
    %722 = arith.maximumf %720, %721 : vector<8x8xf32>
    %723 = arith.negf %722 : vector<8x8xf32>
    %724 = math.exp %723 : vector<8x8xf32>
    %cst_225 = arith.constant 1.000000e+00 : f32
    %725 = vector.broadcast %cst_225 : f32 to vector<8x8xf32>
    %726 = arith.addf %725, %724 : vector<8x8xf32>
    %727 = arith.divf %725, %726 : vector<8x8xf32>
    %c0_226 = arith.constant 0 : index
    %728 = memref.load %arg2[%c0_226] : memref<2xf32, #tpu.memory_space<smem>>
    %729 = vector.broadcast %728 : f32 to vector<8x8xf32>
    %730 = arith.addf %713, %729 : vector<8x8xf32>
    %cst_227 = arith.constant 0.000000e+00 : f32
    %731 = vector.broadcast %cst_227 : f32 to vector<8x8xf32>
    %732 = arith.maximumf %730, %731 : vector<8x8xf32>
    %733 = arith.negf %732 : vector<8x8xf32>
    %734 = math.exp %733 : vector<8x8xf32>
    %cst_228 = arith.constant 1.000000e+00 : f32
    %735 = vector.broadcast %cst_228 : f32 to vector<8x8xf32>
    %736 = arith.addf %735, %734 : vector<8x8xf32>
    %737 = arith.divf %735, %736 : vector<8x8xf32>
    %c0_229 = arith.constant 0 : index
    %738 = memref.load %arg2[%c0_229] : memref<2xf32, #tpu.memory_space<smem>>
    %739 = vector.broadcast %738 : f32 to vector<8x8xf32>
    %740 = arith.addf %717, %739 : vector<8x8xf32>
    %cst_230 = arith.constant 0.000000e+00 : f32
    %741 = vector.broadcast %cst_230 : f32 to vector<8x8xf32>
    %742 = arith.maximumf %740, %741 : vector<8x8xf32>
    %743 = arith.negf %742 : vector<8x8xf32>
    %744 = math.exp %743 : vector<8x8xf32>
    %cst_231 = arith.constant 1.000000e+00 : f32
    %745 = vector.broadcast %cst_231 : f32 to vector<8x8xf32>
    %746 = arith.addf %745, %744 : vector<8x8xf32>
    %747 = arith.divf %745, %746 : vector<8x8xf32>
    %cst_232 = arith.constant dense<0.000000e+00> : vector<8x512xf32>
    %748 = tpu.matmul %727, %0, %cst_232 {dimension_numbers = #tpu.dot_dimension_numbers<[1], [0], [0], [1], [0, 0, 1, 1], [], []>} : vector<8x8xf32>, vector<8x512xf32>, vector<8x512xf32> -> vector<8x512xf32>
    %cst_233 = arith.constant dense<0.000000e+00> : vector<8x512xf32>
    %749 = tpu.matmul %737, %1, %cst_233 {dimension_numbers = #tpu.dot_dimension_numbers<[1], [0], [0], [1], [0, 0, 1, 1], [], []>} : vector<8x8xf32>, vector<8x512xf32>, vector<8x512xf32> -> vector<8x512xf32>
    %cst_234 = arith.constant dense<0.000000e+00> : vector<8x512xf32>
    %750 = tpu.matmul %747, %2, %cst_234 {dimension_numbers = #tpu.dot_dimension_numbers<[1], [0], [0], [1], [0, 0, 1, 1], [], []>} : vector<8x8xf32>, vector<8x512xf32>, vector<8x512xf32> -> vector<8x512xf32>
    %751 = arith.negf %15 : vector<8x1xf32>
    %752 = math.exp %751 : vector<8x1xf32>
    %cst_235 = arith.constant 1.000000e+00 : f32
    %753 = vector.broadcast %cst_235 : f32 to vector<8x1xf32>
    %754 = arith.addf %753, %752 : vector<8x1xf32>
    %755 = arith.divf %753, %754 : vector<8x1xf32>
    %756 = arith.mulf %4, %4 : vector<8x512xf32>
    %757 = arith.mulf %748, %749 : vector<8x512xf32>
    %758 = arith.mulf %757, %750 : vector<8x512xf32>
    %759 = vector.broadcast %755 : vector<8x1xf32> to vector<8x512xf32>
    %760 = arith.mulf %758, %759 : vector<8x512xf32>
    %761 = arith.mulf %756, %760 : vector<8x512xf32>
    %cst_236 = arith.constant dense<0.000000e+00> : vector<8xf32>
    %762 = vector.multi_reduction <add>, %761, %cst_236 [1] : vector<8x512xf32> to vector<8xf32>
    %763 = vector.shape_cast %762 : vector<8xf32> to vector<8x1xf32>
    %cst_237 = arith.constant 0.001953125 : f32
    %764 = vector.broadcast %cst_237 : f32 to vector<8x1xf32>
    %765 = arith.mulf %763, %764 : vector<8x1xf32>
    %766 = vector.broadcast %765 : vector<8x1xf32> to vector<8x512xf32>
    %767 = arith.subf %761, %766 : vector<8x512xf32>
    %768 = arith.mulf %767, %767 : vector<8x512xf32>
    %cst_238 = arith.constant dense<0.000000e+00> : vector<8xf32>
    %769 = vector.multi_reduction <add>, %768, %cst_238 [1] : vector<8x512xf32> to vector<8xf32>
    %770 = vector.shape_cast %769 : vector<8xf32> to vector<8x1xf32>
    %cst_239 = arith.constant 0.001953125 : f32
    %771 = vector.broadcast %cst_239 : f32 to vector<8x1xf32>
    %772 = arith.mulf %770, %771 : vector<8x1xf32>
    %cst_240 = arith.constant 9.99999974E-6 : f32
    %773 = vector.broadcast %cst_240 : f32 to vector<8x1xf32>
    %774 = arith.addf %772, %773 : vector<8x1xf32>
    %775 = math.rsqrt %774 : vector<8x1xf32>
    %776 = vector.broadcast %775 : vector<8x1xf32> to vector<8x512xf32>
    %777 = arith.mulf %767, %776 : vector<8x512xf32>
    %c0_241 = arith.constant 0 : index
    %778 = memref.load %arg5[%c0_241] : memref<2xf32, #tpu.memory_space<smem>>
    %779 = vector.broadcast %778 : f32 to vector<8x512xf32>
    %780 = arith.mulf %777, %779 : vector<8x512xf32>
    %c0_242 = arith.constant 0 : index
    %781 = memref.load %arg6[%c0_242] : memref<2xf32, #tpu.memory_space<smem>>
    %782 = vector.broadcast %781 : f32 to vector<8x512xf32>
    %783 = arith.addf %780, %782 : vector<8x512xf32>
    %cst_243 = arith.constant dense<0.000000e+00> : vector<8xf32>
    %784 = vector.multi_reduction <add>, %783, %cst_243 [1] : vector<8x512xf32> to vector<8xf32>
    %785 = vector.shape_cast %784 : vector<8xf32> to vector<8x1xf32>
    %cst_244 = arith.constant 0.001953125 : f32
    %786 = vector.broadcast %cst_244 : f32 to vector<8x1xf32>
    %787 = arith.mulf %785, %786 : vector<8x1xf32>
    %c0_245 = arith.constant 0 : index
    %788 = memref.load %arg4[%c0_245] : memref<2xf32, #tpu.memory_space<smem>>
    %789 = vector.broadcast %788 : f32 to vector<8x512xf32>
    %790 = arith.addf %688, %789 : vector<8x512xf32>
    %cst_246 = arith.constant 0.000000e+00 : f32
    %791 = vector.broadcast %cst_246 : f32 to vector<8x512xf32>
    %792 = arith.maximumf %790, %791 : vector<8x512xf32>
    %cst_247 = arith.constant dense<0.000000e+00> : vector<8xf32>
    %793 = vector.multi_reduction <add>, %792, %cst_247 [1] : vector<8x512xf32> to vector<8xf32>
    %794 = vector.shape_cast %793 : vector<8xf32> to vector<8x1xf32>
    %cst_248 = arith.constant 0.001953125 : f32
    %795 = vector.broadcast %cst_248 : f32 to vector<8x1xf32>
    %796 = arith.mulf %794, %795 : vector<8x1xf32>
    %c2_249 = arith.constant 2 : index
    %797 = memref.load %arg1[%c2_249] : memref<4xf32, #tpu.memory_space<smem>>
    %798 = vector.broadcast %797 : f32 to vector<8x8xf32>
    %799 = arith.mulf %7, %798 : vector<8x8xf32>
    %c2_250 = arith.constant 2 : index
    %800 = memref.load %arg1[%c2_250] : memref<4xf32, #tpu.memory_space<smem>>
    %801 = vector.broadcast %800 : f32 to vector<8x8xf32>
    %802 = arith.mulf %10, %801 : vector<8x8xf32>
    %c2_251 = arith.constant 2 : index
    %803 = memref.load %arg1[%c2_251] : memref<4xf32, #tpu.memory_space<smem>>
    %804 = vector.broadcast %803 : f32 to vector<8x8xf32>
    %805 = arith.mulf %13, %804 : vector<8x8xf32>
    %c3_252 = arith.constant 3 : index
    %806 = memref.load %arg1[%c3_252] : memref<4xf32, #tpu.memory_space<smem>>
    %807 = vector.broadcast %806 : f32 to vector<8x8xf32>
    %808 = arith.mulf %20, %807 : vector<8x8xf32>
    %809 = arith.addf %799, %808 : vector<8x8xf32>
    %c3_253 = arith.constant 3 : index
    %810 = memref.load %arg1[%c3_253] : memref<4xf32, #tpu.memory_space<smem>>
    %811 = vector.broadcast %810 : f32 to vector<8x8xf32>
    %812 = arith.mulf %23, %811 : vector<8x8xf32>
    %813 = arith.addf %802, %812 : vector<8x8xf32>
    %c3_254 = arith.constant 3 : index
    %814 = memref.load %arg1[%c3_254] : memref<4xf32, #tpu.memory_space<smem>>
    %815 = vector.broadcast %814 : f32 to vector<8x8xf32>
    %816 = arith.mulf %26, %815 : vector<8x8xf32>
    %817 = arith.addf %805, %816 : vector<8x8xf32>
    %c1_255 = arith.constant 1 : index
    %818 = memref.load %arg2[%c1_255] : memref<2xf32, #tpu.memory_space<smem>>
    %819 = vector.broadcast %818 : f32 to vector<8x8xf32>
    %820 = arith.addf %809, %819 : vector<8x8xf32>
    %cst_256 = arith.constant 0.000000e+00 : f32
    %821 = vector.broadcast %cst_256 : f32 to vector<8x8xf32>
    %822 = arith.maximumf %820, %821 : vector<8x8xf32>
    %823 = arith.negf %822 : vector<8x8xf32>
    %824 = math.exp %823 : vector<8x8xf32>
    %cst_257 = arith.constant 1.000000e+00 : f32
    %825 = vector.broadcast %cst_257 : f32 to vector<8x8xf32>
    %826 = arith.addf %825, %824 : vector<8x8xf32>
    %827 = arith.divf %825, %826 : vector<8x8xf32>
    %c1_258 = arith.constant 1 : index
    %828 = memref.load %arg2[%c1_258] : memref<2xf32, #tpu.memory_space<smem>>
    %829 = vector.broadcast %828 : f32 to vector<8x8xf32>
    %830 = arith.addf %813, %829 : vector<8x8xf32>
    %cst_259 = arith.constant 0.000000e+00 : f32
    %831 = vector.broadcast %cst_259 : f32 to vector<8x8xf32>
    %832 = arith.maximumf %830, %831 : vector<8x8xf32>
    %833 = arith.negf %832 : vector<8x8xf32>
    %834 = math.exp %833 : vector<8x8xf32>
    %cst_260 = arith.constant 1.000000e+00 : f32
    %835 = vector.broadcast %cst_260 : f32 to vector<8x8xf32>
    %836 = arith.addf %835, %834 : vector<8x8xf32>
    %837 = arith.divf %835, %836 : vector<8x8xf32>
    %c1_261 = arith.constant 1 : index
    %838 = memref.load %arg2[%c1_261] : memref<2xf32, #tpu.memory_space<smem>>
    %839 = vector.broadcast %838 : f32 to vector<8x8xf32>
    %840 = arith.addf %817, %839 : vector<8x8xf32>
    %cst_262 = arith.constant 0.000000e+00 : f32
    %841 = vector.broadcast %cst_262 : f32 to vector<8x8xf32>
    %842 = arith.maximumf %840, %841 : vector<8x8xf32>
    %843 = arith.negf %842 : vector<8x8xf32>
    %844 = math.exp %843 : vector<8x8xf32>
    %cst_263 = arith.constant 1.000000e+00 : f32
    %845 = vector.broadcast %cst_263 : f32 to vector<8x8xf32>
    %846 = arith.addf %845, %844 : vector<8x8xf32>
    %847 = arith.divf %845, %846 : vector<8x8xf32>
    %cst_264 = arith.constant dense<0.000000e+00> : vector<8x512xf32>
    %848 = tpu.matmul %827, %0, %cst_264 {dimension_numbers = #tpu.dot_dimension_numbers<[1], [0], [0], [1], [0, 0, 1, 1], [], []>} : vector<8x8xf32>, vector<8x512xf32>, vector<8x512xf32> -> vector<8x512xf32>
    %cst_265 = arith.constant dense<0.000000e+00> : vector<8x512xf32>
    %849 = tpu.matmul %837, %1, %cst_265 {dimension_numbers = #tpu.dot_dimension_numbers<[1], [0], [0], [1], [0, 0, 1, 1], [], []>} : vector<8x8xf32>, vector<8x512xf32>, vector<8x512xf32> -> vector<8x512xf32>
    %cst_266 = arith.constant dense<0.000000e+00> : vector<8x512xf32>
    %850 = tpu.matmul %847, %2, %cst_266 {dimension_numbers = #tpu.dot_dimension_numbers<[1], [0], [0], [1], [0, 0, 1, 1], [], []>} : vector<8x8xf32>, vector<8x512xf32>, vector<8x512xf32> -> vector<8x512xf32>
    %851 = arith.negf %28 : vector<8x1xf32>
    %852 = math.exp %851 : vector<8x1xf32>
    %cst_267 = arith.constant 1.000000e+00 : f32
    %853 = vector.broadcast %cst_267 : f32 to vector<8x1xf32>
    %854 = arith.addf %853, %852 : vector<8x1xf32>
    %855 = arith.divf %853, %854 : vector<8x1xf32>
    %856 = arith.mulf %17, %17 : vector<8x512xf32>
    %857 = arith.mulf %848, %849 : vector<8x512xf32>
    %858 = arith.mulf %857, %850 : vector<8x512xf32>
    %859 = vector.broadcast %855 : vector<8x1xf32> to vector<8x512xf32>
    %860 = arith.mulf %858, %859 : vector<8x512xf32>
    %861 = arith.mulf %856, %860 : vector<8x512xf32>
    %cst_268 = arith.constant dense<0.000000e+00> : vector<8xf32>
    %862 = vector.multi_reduction <add>, %861, %cst_268 [1] : vector<8x512xf32> to vector<8xf32>
    %863 = vector.shape_cast %862 : vector<8xf32> to vector<8x1xf32>
    %cst_269 = arith.constant 0.001953125 : f32
    %864 = vector.broadcast %cst_269 : f32 to vector<8x1xf32>
    %865 = arith.mulf %863, %864 : vector<8x1xf32>
    %866 = vector.broadcast %865 : vector<8x1xf32> to vector<8x512xf32>
    %867 = arith.subf %861, %866 : vector<8x512xf32>
    %868 = arith.mulf %867, %867 : vector<8x512xf32>
    %cst_270 = arith.constant dense<0.000000e+00> : vector<8xf32>
    %869 = vector.multi_reduction <add>, %868, %cst_270 [1] : vector<8x512xf32> to vector<8xf32>
    %870 = vector.shape_cast %869 : vector<8xf32> to vector<8x1xf32>
    %cst_271 = arith.constant 0.001953125 : f32
    %871 = vector.broadcast %cst_271 : f32 to vector<8x1xf32>
    %872 = arith.mulf %870, %871 : vector<8x1xf32>
    %cst_272 = arith.constant 9.99999974E-6 : f32
    %873 = vector.broadcast %cst_272 : f32 to vector<8x1xf32>
    %874 = arith.addf %872, %873 : vector<8x1xf32>
    %875 = math.rsqrt %874 : vector<8x1xf32>
    %876 = vector.broadcast %875 : vector<8x1xf32> to vector<8x512xf32>
    %877 = arith.mulf %867, %876 : vector<8x512xf32>
    %c1_273 = arith.constant 1 : index
    %878 = memref.load %arg5[%c1_273] : memref<2xf32, #tpu.memory_space<smem>>
    %879 = vector.broadcast %878 : f32 to vector<8x512xf32>
    %880 = arith.mulf %877, %879 : vector<8x512xf32>
    %c1_274 = arith.constant 1 : index
    %881 = memref.load %arg6[%c1_274] : memref<2xf32, #tpu.memory_space<smem>>
    %882 = vector.broadcast %881 : f32 to vector<8x512xf32>
    %883 = arith.addf %880, %882 : vector<8x512xf32>
    %cst_275 = arith.constant dense<0.000000e+00> : vector<8xf32>
    %884 = vector.multi_reduction <add>, %883, %cst_275 [1] : vector<8x512xf32> to vector<8xf32>
    %885 = vector.shape_cast %884 : vector<8xf32> to vector<8x1xf32>
    %cst_276 = arith.constant 0.001953125 : f32
    %886 = vector.broadcast %cst_276 : f32 to vector<8x1xf32>
    %887 = arith.mulf %885, %886 : vector<8x1xf32>
    %c1_277 = arith.constant 1 : index
    %888 = memref.load %arg4[%c1_277] : memref<2xf32, #tpu.memory_space<smem>>
    %889 = vector.broadcast %888 : f32 to vector<8x512xf32>
    %890 = arith.addf %696, %889 : vector<8x512xf32>
    %cst_278 = arith.constant 0.000000e+00 : f32
    %891 = vector.broadcast %cst_278 : f32 to vector<8x512xf32>
    %892 = arith.maximumf %890, %891 : vector<8x512xf32>
    %cst_279 = arith.constant dense<0.000000e+00> : vector<8xf32>
    %893 = vector.multi_reduction <add>, %892, %cst_279 [1] : vector<8x512xf32> to vector<8xf32>
    %894 = vector.shape_cast %893 : vector<8xf32> to vector<8x1xf32>
    %cst_280 = arith.constant 0.001953125 : f32
    %895 = vector.broadcast %cst_280 : f32 to vector<8x1xf32>
    %896 = arith.mulf %894, %895 : vector<8x1xf32>
    %897 = arith.maximumf %787, %887 : vector<8x1xf32>
    %898 = arith.maximumf %796, %896 : vector<8x1xf32>
    %899 = arith.subf %787, %897 : vector<8x1xf32>
    %900 = math.exp %899 : vector<8x1xf32>
    %901 = arith.subf %887, %897 : vector<8x1xf32>
    %902 = math.exp %901 : vector<8x1xf32>
    %903 = arith.subf %796, %898 : vector<8x1xf32>
    %904 = math.exp %903 : vector<8x1xf32>
    %905 = arith.subf %896, %898 : vector<8x1xf32>
    %906 = math.exp %905 : vector<8x1xf32>
    %907 = arith.addf %900, %902 : vector<8x1xf32>
    %908 = arith.addf %904, %906 : vector<8x1xf32>
    %909 = tpu.reciprocal %907 : vector<8x1xf32> -> vector<8x1xf32>
    %910 = tpu.reciprocal %908 : vector<8x1xf32> -> vector<8x1xf32>
    %cst_281 = arith.constant 0.000000e+00 : f32
    %911 = vector.broadcast %cst_281 : f32 to vector<8x512xf32>
    %912 = arith.mulf %900, %909 : vector<8x1xf32>
    %913 = vector.broadcast %912 : vector<8x1xf32> to vector<8x512xf32>
    %914 = arith.mulf %913, %792 : vector<8x512xf32>
    %915 = arith.addf %911, %914 : vector<8x512xf32>
    %916 = arith.mulf %904, %910 : vector<8x1xf32>
    %917 = vector.broadcast %916 : vector<8x1xf32> to vector<8x512xf32>
    %918 = arith.mulf %917, %783 : vector<8x512xf32>
    %919 = arith.addf %915, %918 : vector<8x512xf32>
    %920 = arith.mulf %902, %909 : vector<8x1xf32>
    %921 = vector.broadcast %920 : vector<8x1xf32> to vector<8x512xf32>
    %922 = arith.mulf %921, %892 : vector<8x512xf32>
    %923 = arith.addf %919, %922 : vector<8x512xf32>
    %924 = arith.mulf %906, %910 : vector<8x1xf32>
    %925 = vector.broadcast %924 : vector<8x1xf32> to vector<8x512xf32>
    %926 = arith.mulf %925, %883 : vector<8x512xf32>
    %927 = arith.addf %923, %926 : vector<8x512xf32>
    %928 = arith.negf %927 : vector<8x512xf32>
    %929 = math.exp %928 : vector<8x512xf32>
    %cst_282 = arith.constant 1.000000e+00 : f32
    %930 = vector.broadcast %cst_282 : f32 to vector<8x512xf32>
    %931 = arith.addf %930, %929 : vector<8x512xf32>
    %932 = arith.divf %930, %931 : vector<8x512xf32>
    %933 = arith.mulf %4, %932 : vector<8x512xf32>
    %c0_283 = arith.constant 0 : index
    %c0_284 = arith.constant 0 : index
    %c0_285 = arith.constant 0 : index
    %934 = vector.load %arg12[%c0_283, %c0_284, %c0_285] : memref<2x8x512xf32, #tpu.memory_space<vmem>>, vector<1x8x512xf32>
    %935 = vector.shape_cast %934 : vector<1x8x512xf32> to vector<8x512xf32>
    %936 = vector.shape_cast %933 : vector<8x512xf32> to vector<1x8x512xf32>
    tpu.vector_store %arg12[%c0_283, %c0_284, %c0_285], %936 {strides = array<i32>} : memref<2x8x512xf32, #tpu.memory_space<vmem>>, vector<1x8x512xf32>,
    %937 = arith.mulf %17, %932 : vector<8x512xf32>
    %c1_286 = arith.constant 1 : index
    %c0_287 = arith.constant 0 : index
    %c0_288 = arith.constant 0 : index
    %938 = vector.load %arg12[%c1_286, %c0_287, %c0_288] : memref<2x8x512xf32, #tpu.memory_space<vmem>>, vector<1x8x512xf32>
    %939 = vector.shape_cast %938 : vector<1x8x512xf32> to vector<8x512xf32>
    %940 = vector.shape_cast %937 : vector<8x512xf32> to vector<1x8x512xf32>
    tpu.vector_store %arg12[%c1_286, %c0_287, %c0_288], %940 {strides = array<i32>} : memref<2x8x512xf32, #tpu.memory_space<vmem>>, vector<1x8x512xf32>,
    return
  }
  func.func @transform_0(%arg0: i32, %arg1: memref<4xf32, #tpu.memory_space<smem>>, %arg2: memref<2xf32, #tpu.memory_space<smem>>, %arg3: memref<108xf32, #tpu.memory_space<smem>>, %arg4: memref<2xf32, #tpu.memory_space<smem>>, %arg5: memref<2xf32, #tpu.memory_space<smem>>, %arg6: memref<2xf32, #tpu.memory_space<smem>>) -> (i32, i32, i32) {
    %c0_i32 = arith.constant 0 : i32
    %c0_i32_0 = arith.constant 0 : i32
    %c0_i32_1 = arith.constant 0 : i32
    return %c0_i32, %arg0, %c0_i32_0 : i32, i32, i32
  }
  func.func @transform_1(%arg0: i32, %arg1: memref<4xf32, #tpu.memory_space<smem>>, %arg2: memref<2xf32, #tpu.memory_space<smem>>, %arg3: memref<108xf32, #tpu.memory_space<smem>>, %arg4: memref<2xf32, #tpu.memory_space<smem>>, %arg5: memref<2xf32, #tpu.memory_space<smem>>, %arg6: memref<2xf32, #tpu.memory_space<smem>>) -> (i32, i32) {
    %c0_i32 = arith.constant 0 : i32
    %c0_i32_0 = arith.constant 0 : i32
    %c0_i32_1 = arith.constant 0 : i32
    return %c0_i32, %c0_i32_0 : i32, i32
  }
  func.func @transform_2(%arg0: i32, %arg1: memref<4xf32, #tpu.memory_space<smem>>, %arg2: memref<2xf32, #tpu.memory_space<smem>>, %arg3: memref<108xf32, #tpu.memory_space<smem>>, %arg4: memref<2xf32, #tpu.memory_space<smem>>, %arg5: memref<2xf32, #tpu.memory_space<smem>>, %arg6: memref<2xf32, #tpu.memory_space<smem>>) -> (i32, i32) {
    %c0_i32 = arith.constant 0 : i32
    %c0_i32_0 = arith.constant 0 : i32
    %c0_i32_1 = arith.constant 0 : i32
    return %c0_i32, %c0_i32_0 : i32, i32
  }
  func.func @transform_3(%arg0: i32, %arg1: memref<4xf32, #tpu.memory_space<smem>>, %arg2: memref<2xf32, #tpu.memory_space<smem>>, %arg3: memref<108xf32, #tpu.memory_space<smem>>, %arg4: memref<2xf32, #tpu.memory_space<smem>>, %arg5: memref<2xf32, #tpu.memory_space<smem>>, %arg6: memref<2xf32, #tpu.memory_space<smem>>) -> (i32, i32) {
    %c0_i32 = arith.constant 0 : i32
    %c0_i32_0 = arith.constant 0 : i32
    %c0_i32_1 = arith.constant 0 : i32
    return %c0_i32, %c0_i32_0 : i32, i32
  }
  func.func @transform_4(%arg0: i32, %arg1: memref<4xf32, #tpu.memory_space<smem>>, %arg2: memref<2xf32, #tpu.memory_space<smem>>, %arg3: memref<108xf32, #tpu.memory_space<smem>>, %arg4: memref<2xf32, #tpu.memory_space<smem>>, %arg5: memref<2xf32, #tpu.memory_space<smem>>, %arg6: memref<2xf32, #tpu.memory_space<smem>>) -> (i32, i32) {
    %c0_i32 = arith.constant 0 : i32
    %c0_i32_0 = arith.constant 0 : i32
    %c0_i32_1 = arith.constant 0 : i32
    return %c0_i32, %c0_i32_0 : i32, i32
  }
  func.func @transform_5(%arg0: i32, %arg1: memref<4xf32, #tpu.memory_space<smem>>, %arg2: memref<2xf32, #tpu.memory_space<smem>>, %arg3: memref<108xf32, #tpu.memory_space<smem>>, %arg4: memref<2xf32, #tpu.memory_space<smem>>, %arg5: memref<2xf32, #tpu.memory_space<smem>>, %arg6: memref<2xf32, #tpu.memory_space<smem>>) -> (i32, i32, i32) {
    %c0_i32 = arith.constant 0 : i32
    %c0_i32_0 = arith.constant 0 : i32
    %c0_i32_1 = arith.constant 0 : i32
    return %c0_i32, %arg0, %c0_i32_0 : i32, i32, i32
  }
}

</mosaic_0001>

<bundles_post_ra>
// kernel: tpu_custom_call.1
= control target key start
LH: loop header
LB: loop body
LE: loop exit
PB: predicated region body
PF: predicated region fallthrough
CT: control target
= control target key end

     0   :  { %s7497_s23 = smov [#allocation3]   ;;  %s7498_s24 = smov [#allocation4]   ;;  %s11966_s0 = inlined_call_operand.hbm [shape: f32[4], index: 0, kind: input, shape index: {}]   ;;  %s11967_s6 = inlined_call_operand.hbm [shape: f32[2,16,768], index: 6, kind: input, shape index: {}]   ;;  %s11968_s7 = inlined_call_operand.hbm [shape: f32[8,512], index: 7, kind: input, shape index: {}]   ;;  %s11969_s8 = inlined_call_operand.hbm [shape: f32[8,512], index: 8, kind: input, shape index: {}]   ;;  %s11970_s9 = inlined_call_operand.hbm [shape: f32[8,512], index: 9, kind: input, shape index: {}]   ;;  %s11971_s10 = inlined_call_operand.hbm [shape: f32[27,512], index: 10, kind: input, shape index: {}]   ;;  %s11972_s11 = inlined_call_operand.hbm [shape: f32[2,16,512], index: 11, kind: output, shape index: {}]   ;;  %s11973_s1 = inlined_call_operand.hbm [shape: f32[2], index: 1, kind: input, shape index: {}]   ;;  %s11974_s2 = inlined_call_operand.vmem [shape: f32[108], index: 2, kind: input, shape index: {}]   ;;  %s11975_s3 = inlined_call_operand.vmem [shape: f32[2], index: 3, kind: input, shape index: {}]   ;;  %s11976_s4 = inlined_call_operand.vmem [shape: f32[2], index: 4, kind: input, shape index: {}]   ;;  %s11977_s5 = inlined_call_operand.vmem [shape: f32[2], index: 5, kind: input, shape index: {}]  }
   0x1   :  { %12314 = sst [smem:[#allocation396_spill]] %s11968_s7  ;;  %s17_s19 = sshll.u32 %s11966_s0, 4  ;;  %s18_s19 = int_to_ptr.hbm [resolvable:$true] %s17_s19 }
   0x2   :  { %s22_s22 = sshll.u32 %s11973_s1, 4  ;;  %s27_s27 = sshll.u32 %s11974_s2, 4  ;;  %s23_s22 = int_to_ptr.hbm [resolvable:$true] %s22_s22  ;;  %s28_s27 = int_to_ptr.vmem [resolvable:$true] %s27_s27 }
   0x3   :  { %20 = dma.hbm_to_smem %s18_s19, 16, %s7497_s23, [#allocation2] }
   0x4   :  { %25 = dma.hbm_to_smem %s23_s22, 16, %s7498_s24, [#allocation2] }
   0x5   :  { %s32_s30 = sshll.u32 %s11975_s3, 4  ;;  %s7499_s0 = smov [#allocation5]   ;;  %s33_s30 = int_to_ptr.vmem [resolvable:$true] %s32_s30 }
   0x6   :  { %30 = dma.vmem_to_smem %s28_s27, 16, %s7499_s0, [#allocation2] }
   0x7   :  { %s7500_s12 = smov [#allocation6]   ;;  %s37_s14 = sshll.u32 %s11976_s4, 4  ;;  %s38_s14 = int_to_ptr.vmem [resolvable:$true] %s37_s14 }
   0x8   :  { %35 = dma.vmem_to_smem %s33_s30, 16, %s7500_s12, [#allocation2] }
   0x9   :  { %s42_s17 = sshll.u32 %s11977_s5, 4  ;;  %s7501_s2 = smov [#allocation7]   ;;  %s43_s17 = int_to_ptr.vmem [resolvable:$true] %s42_s17 }
   0xa   :  { %40 = dma.vmem_to_smem %s38_s14, 16, %s7501_s2, [#allocation2] }
   0xb   :  { %s7502_s18 = smov [#allocation8]  }
   0xc   :  { %45 = dma.vmem_to_smem %s43_s17, 16, %s7502_s18, [#allocation2] }
   0xd   :  { %7463 = dma.done.wait [#allocation2], 96 }
   0xe   :  { %7464 = vsyncadd [#allocation2], 4294967200 }
   0xf   :  { %48 = sfence }
  0x10   :  { %49 = vsyncpa [#allocation10], 0 }
  0x11   :  { %51 = vsyncpa [#allocation10 + $0x1], 0 }
  0x12   :  { %52 = vsyncpa [#allocation13], 0 }
  0x13   :  { %53 = vsyncpa [#allocation16], 0 }
  0x14   :  { %54 = vsyncpa [#allocation11], 0 }
  0x15   :  { %56 = vsyncpa [#allocation11 + $0x1], 0  ;;  %s7620_s3 = smov 0   ;;  %s7622_s4 = smov 0  }
  0x16   :  { %s7624_s19 = smov 0   ;;  %s7626_s5 = smov 0  }
  0x17 LB: > { %s7641_s20 = sadd.s32 4294967295, %s7495_s5   ;;  %s6741_s21 = sadd.s32 4294967294, %s7495_s5   ;;  %s7495_s5 = sphi %s7626_s5, %s13164_s5   ;;  %s7491_s19 = sphi %s7624_s19, %s13163_s19   ;;  %s7487_s4 = sphi %s7622_s4, %s13162_s4   ;;  %s7483_s3 = sphi %s7620_s3, %s13161_s3  }
  0x18   : > { %p82_p0 = scmp.ne.s32.totalorder %s7487_s4, %s7483_s3  ;;  %p83_p1 = scmp.eq.s32.totalorder %s7641_s20, 0 }
  0x19   : > { %p190_p2 = scmp.eq.s32.totalorder %s7641_s20, 1  ;;  %p196_p3 = scmp.eq.s32.totalorder %s6741_s21, 1 }
  0x1a   : > { %p7650_p4 = por %p83_p1, %p82_p0  ;;  %p6742_p5 = scmp.ge.s32.totalorder %s7495_s5, 1 }
  0x1b   : > { %p7655_p6 = por %p196_p3, %p82_p0  ;;  %p203_p7 = scmp.lt.s32.totalorder %s7495_s5, 3 }
  0x1c   : > { %s12317_s7 = sld [smem:[#allocation396_spill]]  ;;  %s7503_s28 = smov [#allocation12]  }
  0x1d   : > { %p7663_p8 = pnand %p6742_p5, %p203_p7  ;;  %s217_s29 = sshll.u32 %s7503_s28, 4  ;;  %s218_s29 = int_to_ptr.vmem [resolvable:$true] %s217_s29 }
  0x1e   : > { %s239_s12 = sshll.u32 %s11970_s9, 4  ;;  %s227_s15 = sshll.u32 %s11969_s8, 4  ;;  %s240_s12 = int_to_ptr.hbm [resolvable:$true] %s239_s12  ;;  %s228_s15 = int_to_ptr.hbm [resolvable:$true] %s227_s15 }
  0x1f   : > { %p6949_p10 = pneg %p7663_p8  ;;  %s7504_s16 = smov [#allocation15]  }
  0x20   : > { %s241_s17 = sshll.u32 %s7504_s16, 4  ;;  %s250_s21 = sshll.u32 %s11971_s10, 4  ;;  %s242_s17 = int_to_ptr.vmem [resolvable:$true] %s241_s17  ;;  %s251_s21 = int_to_ptr.hbm [resolvable:$true] %s250_s21 }
  0x21   : > { %p7675_p11 = pnand %p6949_p10, %p83_p1  ;;  %s7505_s24 = smov [#allocation14]  }
  0x22   : > { %s215_s26 = sshll.u32 %s12317_s7, 4  ;;  %s229_s25 = sshll.u32 %s7505_s24, 4  ;;  %s216_s26 = int_to_ptr.hbm [resolvable:$true] %s215_s26  ;;  %s230_s25 = int_to_ptr.vmem [resolvable:$true] %s229_s25 }
  0x23   : > { %6952 = dma.hbm_to_vmem [thread:$0]  (!%p7675_p11), %s216_s26, 512, %s218_s29, [#allocation13]  }
  0x24   : > { %6958 = dma.hbm_to_vmem [thread:$0]  (!%p7675_p11), %s240_s12, 512, %s242_s17, [#allocation16]  }
  0x25   : > { %6955 = dma.hbm_to_vmem [thread:$0]  (!%p7675_p11), %s228_s15, 512, %s230_s25, [#allocation13]  }
  0x26   : > { %s7506_s26 = smov [#allocation17]   ;;  %s7507_s29 = smov 512  }
  0x27   : > { %s252_s28 = sshll.u32 %s7506_s26, 4  ;;  %s7508_s30 = smov 32   ;;  %s253_s28 = int_to_ptr.vmem [resolvable:$true] %s252_s28 }
  0x28   : > { %6961 = dma.hbm_to_vmem [thread:$0]  (!%p7675_p11), %s251_s21, 2048, %s253_s28, [#allocation16], %s7507_s29, %s7507_s29, %s7508_s30  }
  0x29   : > { %s7694_s0 = sadd.s32 1, %s7495_s5   ;;  %s69_s13 = sadd.s32 1, %s7491_s19 }
  0x2a   : > { %s66_s12 = ssub.s32 %s7495_s5, %s7694_s0  ;;  %p76_p13 = scmp.ne.s32.totalorder %s7491_s19, %s7487_s4 }
  0x2b   : > { %p67_p12 = scmp.eq.s32.totalorder %s66_s12, 0  ;;  %p77_p0 = scmp.eq.s32.totalorder %s7495_s5, 0 }
  0x2c   : > { %p7707_p5 = por %p190_p2, %p76_p13  ;;  %p6974_p7 = scmp.lt.s32.totalorder %s7495_s5, 2 }
  0x2d   : > { %s7703_s14 = scalar_select %p67_p12, %s7491_s19, %s69_s13  }
  0x2e   : > { %p78_p3 = por %p77_p0, %p76_p13  ;;  %s266_s16 = sand.u32 1, %s7491_s19  }
  0x2f   : > { %s6926_s1 = smul.u32 96, %s266_s16  ;;  %s267_s29 = scalar_lea.sflag [#allocation10], %s266_s16 }
  0x30   : > { %s6927_s17 = smul.u32 48, %s7495_s5  ;;  %p7714_p10 = pnand %p6974_p7, %p78_p3 }
  0x31   : > { %s270_s25 = scalar_lea.vmem [#allocation9], %s6926_s1  ;;  %s7396_s18 = scalar_lea.hbm %s11967_s6, 192 }
  0x32   : > { %s275_s24 = scalar_lea.hbm %s11967_s6, %s6927_s17  ;;  %s278_s26 = sshll.u32 %s270_s25, 4  ;;  %s279_s26 = int_to_ptr.vmem [resolvable:$true] %s278_s26 }
  0x33   : > { %s276_s28 = sshll.u32 %s275_s24, 4  ;;  %p7393_p11 = pneg %p7714_p10  ;;  %s277_s28 = int_to_ptr.hbm [resolvable:$true] %s276_s28 }
  0x34   : > { %s7389_s30 = sshra.s32 %s277_s28, 4  ;;  %s7390_s30 = int_to_ptr.hbm [resolvable:$true] %s7389_s30 }
  0x35   : > { %s7391_s12 = scalar_lea.hbm %s7390_s30, 96  ;;  %p7397_p0 = scmp.lt.s32.totalorder %s7390_s30, %s11967_s6 }
  0x36   : > { %p7392_p2 = scmp.ne.s32.totalorder %s7390_s30, %s7391_s12  ;;  %p7398_p3 = scmp.lt.s32.totalorder %s7396_s18, %s7391_s12 }
  0x38   : > { %p7394_p12 = pnand %p7393_p11, %p7392_p2  ;;  %p7399_p7 = por %p7398_p3, %p7397_p0 }
  0x3a   : > { %p7395_p13 = pneg %p7394_p12 }
  0x3c   : > { %p7400_p9 = pnand %p7399_p7, %p7395_p13 }
  0x3e   : > { %7403 = shalt.err (!%p7400_p9)
}
  0x3f   : > { %s7509_s16 = smov 1536   ;;  %s7510_s1 = smov 768  }
  0x40   : > { %s7511_s24 = smov 48   ;;  %290 = sbr.rel (%p7663_p8) target bundleno = 4714 (0x126a), region = 40 }
  0x41   : > { %6965 = dma.hbm_to_vmem [thread:$0]  (!%p7714_p10), %s277_s28, 1536, %s279_s26, %s267_s29, %s7509_s16, %s7510_s1, %s7511_s24  }
  0x45   : > { %s7734_s7 = sand.u32 1, %s7487_s4  }
  0x46   : > { %s6928_s25 = smul.u32 96, %s7734_s7  ;;  %s293_s30 = scalar_lea.sflag [#allocation10], %s7734_s7 }
  0x48   : > { %s7738_s12 = scalar_lea.vmem [#allocation9], %s6928_s25 }
  0x49   : > { %7466 = dma.done.wait (%p7650_p4), %s293_s30, 1536  }
  0x4a   : > { %7468 = vsyncadd (%p7650_p4), %s293_s30, 4294965760 }
  0x4b   : > { %7470 = dma.done.wait (%p83_p1), [#allocation13], 1024  }
  0x4c   : > { %7472 = vsyncadd (%p83_p1), [#allocation13], 4294966272 }
  0x4d   : > { %7474 = dma.done.wait (%p83_p1), [#allocation16], 2560  }
  0x4e   : > { %7476 = vsyncadd (%p83_p1), [#allocation16], 4294964736  ;;  %v7752_v0 = vld [vmem:[#allocation12 + $0x10] sm:$0xff]  ;;  %v7756_v2 = vld [vmem:[#allocation12 + $0x18] sm:$0xff]  ;;  %s7512_s22 = smov 55   ;;  %s7513_s27 = smov 56  }
  0x4f   : > { %v7754_v1 = vld [vmem:[#allocation17] ss:$8 sm:$0xf]  ;;  %415 = vmatpush.xpose.msra.mxu2 %v7752_v0  ;;  %435 = vmatpush.xpose.msra.mxu3 %v7756_v2  ;;  %v945_v30 = vld [vmem:[#allocation17 + $0x1] ss:$8 sm:$0xf] }
  0x50   : > { %v864_v3 = vperm.slane %v7754_v1, 0  ;;  %v7762_v4 = vld [vmem:[%s7738_s12 + $0x18] sm:$0xff]  ;;  %v7765_v5 = vld [vmem:[%s7738_s12 + $0x8] sm:$0xff]  ;;  %v7768_v6 = vld [vmem:[%s7738_s12 + $0x10] sm:$0xff]  ;;  %v865_v23 = vperm.slane %v7754_v1, 1  ;;  %v866_v28 = vperm.slane %v7754_v1, 2 }
  0x51   : > { %v7771_v7 = vld [vmem:[%s7738_s12 + $0x20] sm:$0xff]  ;;  %v603_v8 = vmax.f32 %v7765_v5, %v7768_v6  ;;  %v7777_v10 = vld [vmem:[#allocation12 + $0x8] sm:$0xff]  ;;  %v7783_v12 = vld [vmem:[#allocation14 + $0x10] sm:$0xff]  ;;  %v948_v31 = vperm.slane %v945_v30, 1  ;;  %v867_v32 = vperm.slane %v7754_v1, 3  ;;  %v950_v33 = vperm.slane %v945_v30, 3 }
  0x52   : > { %v7775_v9 = vld [vmem:[#allocation12] sm:$0xff]  ;;  %868 = vrot.lane.b32.xlu1 %v864_v3, %s7512_s22  ;;  %v604_v11 = vmax.f32 %v7762_v4, %v7771_v7  ;;  %v7785_v13 = vld [vmem:[#allocation14 + $0x18] sm:$0xff]  ;;  %416 = vmatmul.f32.vlgmr.msra.gmra.mxu2 %v7762_v4  ;;  %v7796_v16 = vld [vmem:[%s7738_s12 + $0x48] sm:$0xff]  ;;  %v949_v34 = vperm.slane %v945_v30, 2  ;;  %v947_v36 = vperm.slane %v945_v30, 0  ;;  %s7514_s2 = smov 57  }
  0x53   : > { %375 = vmatpush.xpose.msra.mxu0 %v7775_v9  ;;  %v7788_v14 = vld [vmem:[%s7738_s12 + $0x38] sm:$0xff]  ;;  %395 = vmatpush.xpose.msra.mxu1 %v7777_v10  ;;  %v7793_v15 = vld [vmem:[%s7738_s12 + $0x40] sm:$0xff]  ;;  %v7799_v17 = vld [vmem:[%s7738_s12 + $0x50] sm:$0xff]  ;;  %s6763_s26 = sld [smem:[#allocation5 + $0x1]]  ;;  %s7515_s18 = smov 127   ;;  %vm959_vm0 = vcmask 457728  }
  0x54   : > { %v605_v18 = vmax.f32 %v603_v8, %v604_v11  ;;  %436 = vmatmul.f32.vlgmr.msra.gmra.mxu3 %v7771_v7  ;;  %496 = vmatpush.xpose.msrb.mxu2 %v7783_v12  ;;  %v7803_v19 = vld [vmem:[#allocation14] sm:$0xff]  ;;  %v7805_v20 = vld [vmem:[#allocation14 + $0x8] sm:$0xff]  ;;  %v7809_v21 = vld [vmem:[#allocation15 + $0x10] sm:$0xff]  ;;  %v856_v24 = vmax.f32 %v7788_v14, %v7793_v15  ;;  %v857_v25 = vmax.f32 %v7796_v16, %v7799_v17  ;;  %s6764_s28 = sld [smem:[#allocation5 + $0x1c]]  ;;  %vm1138_vm4 = vcmask 465920  }
  0x55   : > { %516 = vmatpush.xpose.msrb.mxu3 %v7785_v13  ;;  %v7811_v22 = vld [vmem:[#allocation15 + $0x18] sm:$0xff]  ;;  %v7819_v26 = vld [vmem:[#allocation15] sm:$0xff]  ;;  %v7821_v27 = vld [vmem:[#allocation15 + $0x8] sm:$0xff]  ;;  %872 = vrot.lane.b32.xlu2 %v866_v28, %s7512_s22  ;;  %s6765_s29 = sld [smem:[#allocation5 + $0x37]]  ;;  %vm3593_vm6 = vcmask 64512  }
  0x56   : > { %376 = vmatmul.f32.vlgmr.msra.gmra.mxu0 %v7765_v5  ;;  %606 = vmax.xlane.f32.xlu0 %v605_v18  ;;  %v858_v29 = vmax.f32 %v856_v24, %v857_v25  ;;  %v1124_v35 = vld [vmem:[#allocation17 + $0x2] ss:$8 sm:$0xf]  ;;  %s6766_s13 = sld [smem:[#allocation5 + $0x52]] }
  0x57   : > { %396 = vmatmul.f32.vlgmr.msra.gmra.mxu1 %v7768_v6  ;;  %456 = vmatpush.xpose.msrb.mxu0 %v7803_v19  ;;  %v1128_v37 = vperm.slane %v1124_v35, 2  ;;  %v1126_v38 = vperm.slane %v1124_v35, 0  ;;  %v1127_v39 = vperm.slane %v1124_v35, 1  ;;  %v1129_v40 = vperm.slane %v1124_v35, 3  ;;  %s6767_s21 = sld [smem:[#allocation5 + $0x2]]  ;;  %v7918_v11 = vld [vmem:[%s7738_s12] sm:$0xff] }
  0x58   : > { %476 = vmatpush.xpose.msrb.mxu1 %v7805_v20  ;;  %577 = vmatpush.xpose.msra.mxu2 %v7809_v21  ;;  %v7925_v24 = vld [vmem:[%s7738_s12 + $0x30] sm:$0xff]  ;;  %s5433_s17 = sld [smem:[#allocation3]] }
  0x59   : > { %597 = vmatpush.xpose.msra.mxu3 %v7811_v22  ;;  %v7908_v60 = vstv %s6763_s26  ;;  %s6889_s16 = sld [smem:[#allocation3 + $0x2]] }
  0x5a   : > { %870 = vrot.lane.b32.xlu1 %v865_v23, %s7512_s22  ;;  %497 = vmatmul.f32.vlgmr.msrb.gmra.mxu2 %v7762_v4  ;;  %v7910_v61 = vstv %s6764_s28  ;;  %s6872_s1 = sld [smem:[#allocation3 + $0x1]]  ;;  %s7516_s28 = smov 126  }
  0x5b   : > { %537 = vmatpush.xpose.msra.mxu0 %v7819_v26  ;;  %v7931_v30 = vstv %s6765_s29  ;;  %s6890_s24 = sld [smem:[#allocation3 + $0x3]] }
  0x5c   : > { %557 = vmatpush.xpose.msra.mxu1 %v7821_v27  ;;  %517 = vmatmul.f32.vlgmr.msrb.gmra.mxu3 %v7771_v7  ;;  %v7937_v35 = vstv %s6766_s13  ;;  %s7949_s25 = sld [smem:[#allocation5 + $0x1d]] }
  0x5d   : > { %668 = vmatpush.xpose.msrb.mxu2 %v7752_v0  ;;  %688 = vmatpush.xpose.msrb.mxu3 %v7756_v2  ;;  %s7951_s30 = sld [smem:[#allocation4]] }
  0x5e   : > { %457 = vmatmul.f32.vlgmr.msrb.gmra.mxu0 %v7765_v5  ;;  %859 = vmax.xlane.f32.xlu0 %v858_v29  ;;  %s7953_s26 = sld [smem:[#allocation4 + $0x1]] }
  0x5f   : > { %477 = vmatmul.f32.vlgmr.msrb.gmra.mxu1 %v7768_v6  ;;  %628 = vmatpush.xpose.msrb.mxu0 %v7775_v9  ;;  %s7993_s29 = sld [smem:[#allocation5 + $0x38]] }
  0x60   : > { %648 = vmatpush.xpose.msrb.mxu1 %v7777_v10  ;;  %874 = vrot.lane.b32.xlu2 %v867_v32, %s7512_s22  ;;  %s6770_s13 = sld [smem:[#allocation5 + $0x53]] }
  0x62   : > { %953 = vrot.lane.b32.xlu1 %v948_v31, %s7513_s27  ;;  %578 = vmatmul.f32.vlgmr.msra.gmra.mxu2 %v7762_v4 }
  0x63   : > { %749 = vmatpush.xpose.msra.mxu2 %v7783_v12 }
  0x64   : > { %598 = vmatmul.f32.vlgmr.msra.gmra.mxu3 %v7771_v7 }
  0x65   : > { %769 = vmatpush.xpose.msra.mxu3 %v7785_v13 }
  0x66   : > { %538 = vmatmul.f32.vlgmr.msra.gmra.mxu0 %v7765_v5 }
  0x67   : > { %558 = vmatmul.f32.vlgmr.msra.gmra.mxu1 %v7768_v6  ;;  %709 = vmatpush.xpose.msra.mxu0 %v7803_v19 }
  0x68   : > { %729 = vmatpush.xpose.msra.mxu1 %v7805_v20  ;;  %955 = vrot.lane.b32.xlu2 %v949_v34, %s7513_s27 }
  0x6a   : > { %957 = vrot.lane.b32.xlu1 %v950_v33, %s7513_s27  ;;  %669 = vmatmul.f32.vlgmr.msrb.gmra.mxu2 %v7796_v16 }
  0x6b   : > { %830 = vmatpush.xpose.msrb.mxu2 %v7809_v21 }
  0x6c   : > { %689 = vmatmul.f32.vlgmr.msrb.gmra.mxu3 %v7799_v17 }
  0x6d   : > { %850 = vmatpush.xpose.msrb.mxu3 %v7811_v22 }
  0x6e   : > { %629 = vmatmul.f32.vlgmr.msrb.gmra.mxu0 %v7788_v14 }
  0x6f   : > { %649 = vmatmul.f32.vlgmr.msrb.gmra.mxu1 %v7793_v15  ;;  %790 = vmatpush.xpose.msrb.mxu0 %v7819_v26 }
  0x70   : > { %810 = vmatpush.xpose.msrb.mxu1 %v7821_v27  ;;  %1130 = vrot.lane.b32.xlu2 %v1126_v38, %s7514_s2 }
  0x72   : > { %951 = vrot.lane.b32.xlu0 %v947_v36, %s7513_s27  ;;  %1134 = vrot.lane.b32.xlu1 %v1128_v37, %s7514_s2 }
  0x73   : > { %750 = vmatmul.f32.vlgmr.msra.gmra.mxu2 %v7796_v16 }
  0x74   : > { %770 = vmatmul.f32.vlgmr.msra.gmra.mxu3 %v7799_v17  ;;  %5569 = vmatpush.msra.mxu2 %v7752_v0 }
  0x75   : > { %5589 = vmatpush.msra.mxu3 %v7756_v2 }
  0x76   : > { %710 = vmatmul.f32.vlgmr.msra.gmra.mxu0 %v7788_v14 }
  0x77   : > { %730 = vmatmul.f32.vlgmr.msra.gmra.mxu1 %v7793_v15  ;;  %5529 = vmatpush.msra.mxu0 %v7775_v9 }
  0x78   : > { %5549 = vmatpush.msra.mxu1 %v7777_v10  ;;  %1136 = vrot.lane.b32.xlu2 %v1129_v40, %s7514_s2 }
  0x7a   : > { %1132 = vrot.lane.b32.xlu0 %v1127_v39, %s7514_s2 }
  0x7b   : > { %831 = vmatmul.f32.vlgmr.msrb.gmra.mxu2 %v7796_v16 }
  0x7c   : > { %851 = vmatmul.f32.vlgmr.msrb.gmra.mxu3 %v7799_v17  ;;  %5652 = vmatpush.msrb.mxu2 %v7783_v12 }
  0x7d   : > { %5672 = vmatpush.msrb.mxu3 %v7785_v13 }
  0x7e   : > { %791 = vmatmul.f32.vlgmr.msrb.gmra.mxu0 %v7788_v14 }
  0x7f   : > { %811 = vmatmul.f32.vlgmr.msrb.gmra.mxu1 %v7793_v15  ;;  %5612 = vmatpush.msrb.mxu0 %v7803_v19 }
  0x80   : > { %5632 = vmatpush.msrb.mxu1 %v7805_v20 }
  0xaf   : > { %v7884_v42 = vpop.permute.xlu2 %872 }
  0xb0   : > { %12323 = vst [vmem:[#allocation25_spill] sm:$0xff] %v7884_v42 }
  0xba   : > { %v7888_v44 = vpop.permute.xlu2 %874 }
  0xbb   : > { %12325 = vst [vmem:[#allocation27_spill] sm:$0xff] %v7888_v44 }
  0xc2   : > { %v7894_v52 = vpop.permute.xlu2 %955 }
  0xc4   : > { %v7882_v41 = vpop.permute.xlu1 %868 }
  0xc5   : > { %12322 = vst [vmem:[#allocation24_spill] sm:$0xff] %v7882_v41 }
  0xc9   : > { %v7890_v45 = vpop.xlane.xlu0 %606 }
  0xca   : > { %12326 = vst [vmem:[#allocation28_spill] sm:$0xff] %v7890_v45  ;;  %v7922_v23 = vpop.permute.xlu2 %1130 }
  0xcb   : > { %v7945_v37 = vmul.f32 %v7922_v23, %v7918_v11 }
  0xcc   : > { %v7886_v43 = vpop.permute.xlu1 %870 }
  0xcd   : > { %12324 = vst [vmem:[#allocation26_spill] sm:$0xff] %v7886_v43 }
  0xd1   : > { %v7896_v54 = vpop.xlane.xlu0 %859 }
  0xd2   : > { %12327 = vst [vmem:[#allocation29_spill] sm:$0xff] %v7896_v54 }
  0xd3   : > { %v377_v46 = vpop.f32.mrf.mxu0 }
  0xd4   : > { %v397_v47 = vpop.f32.mrf.mxu1  ;;  %v7892_v48 = vpop.permute.xlu1 %953 }
  0xd5   : > { %v417_v49 = vpop.f32.mrf.mxu2  ;;  %v398_v3 = vadd.f32 %v397_v47, %v377_v46  ;;  %v7947_v47 = vstv %s6767_s21  ;;  %s7517_s21 = smov 63  }
  0xd7   : > { %v437_v50 = vpop.f32.mrf.mxu3  ;;  %v418_v31 = vadd.f32 %v417_v49, %v398_v3  ;;  %v7957_v3 = vpop.permute.xlu2 %1136 }
  0xd9   : > { %v438_v39 = vadd.f32 %v437_v50, %v418_v31  ;;  %v7960_v31 = vstv %s5433_s17  ;;  %s6771_s17 = sld [smem:[#allocation5 + $0x3]] }
  0xdb   : > { %v458_v51 = vpop.f32.mrf.mxu0 }
  0xdc   : > { %v478_v53 = vpop.f32.mrf.mxu1  ;;  %v7898_v55 = vpop.permute.xlu1 %957 }
  0xdd   : > { %v7902_v56 = vmul.f32 %v7898_v55, %v7771_v7  ;;  %v977_v57 = vmul.f32 %v7799_v17, %v7898_v55  ;;  %v498_v58 = vpop.f32.mrf.mxu2  ;;  %v479_v40 = vadd.f32 %v478_v53, %v458_v51  ;;  %v8005_v43 = vsel %vm959_vm0, %v7894_v52, %v7898_v55 }
  0xdf   : > { %v7906_v59 = vpop.f32.mrf.mxu3  ;;  %v984_v62 = vmul.f32 %v7908_v60, %v7902_v56  ;;  %v1021_v63 = vmul.f32 %v7910_v61, %v977_v57 }
  0xe1   : > { %998 = vrot.lane.b32.xlu1 %v984_v62, %s7515_s18  ;;  %1035 = vrot.lane.b32.xlu0 %v1021_v63, %s7515_s18  ;;  %v1159_v63 = vmul.f32 %v7947_v47, %v7945_v37 }
  0xe3   : > { %v539_v1 = vpop.f32.mrf.mxu0 }
  0xe4   : > { %v559_v8 = vpop.f32.mrf.mxu1  ;;  %v7920_v18 = vpop.permute.xlu0 %951 }
  0xe5   : > { %v968_v25 = vmul.f32 %v7920_v18, %v7918_v11  ;;  %v973_v28 = vmul.f32 %v7925_v24, %v7920_v18  ;;  %v579_v29 = vpop.f32.mrf.mxu2 }
  0xe7   : > { %v980_v32 = vmul.f32 %v7908_v60, %v968_v25  ;;  %v7934_v33 = vpop.f32.mrf.mxu3  ;;  %v1053_v34 = vmul.f32 %v7931_v30, %v968_v25  ;;  %v1089_v36 = vmul.f32 %v7937_v35, %v973_v28  ;;  %v440_v25 = vmul.f32 0.015625, %v438_v39 }
  0xe8   : > { %v1017_v51 = vmul.f32 %v7910_v61, %v973_v28  ;;  %v560_v39 = vadd.f32 %v559_v8, %v539_v1  ;;  %v7972_v28 = vstv %s6890_s24  ;;  %s6773_s24 = sld [smem:[#allocation5 + $0x39]] }
  0xe9   : > { %990 = vrot.lane.b32.xlu2 %v980_v32, %s7515_s18  ;;  %1063 = vrot.lane.b32.xlu1 %v1053_v34, %s7515_s18  ;;  %v499_v32 = vadd.f32 %v498_v58, %v479_v40  ;;  %v7962_v34 = vstv %s6889_s16  ;;  %v7970_v58 = vstv %s6872_s1  ;;  %s7518_s16 = smov 120   ;;  %s6772_s1 = sld [smem:[#allocation5 + $0x1e]] }
  0xea   : > { %1099 = vrot.lane.b32.xlu0 %v1089_v36, %s7515_s18  ;;  %v1093_v36 = vmul.f32 %v7937_v35, %v977_v57  ;;  %v7978_v57 = vmul.f32 %v7799_v17, %v7957_v3  ;;  %v5895_v1 = vmul.f32 %v7962_v34, %v440_v25  ;;  %v580_v54 = vadd.f32 %v579_v29, %v560_v39 }
  0xeb   : > { %v630_v38 = vpop.f32.mrf.mxu0  ;;  %v519_v8 = vadd.f32 %v7906_v59, %v499_v32  ;;  %v1057_v32 = vmul.f32 %v7931_v30, %v7902_v56 }
  0xec   : > { %v650_v46 = vpop.f32.mrf.mxu1  ;;  %v600_v42 = vadd.f32 %v7934_v33, %v580_v54  ;;  %v8021_v54 = vmul.f32 %v8005_v43, %v7762_v4 }
  0xed   : > { %v651_v49 = vadd.f32 %v650_v46, %v630_v38  ;;  %v670_v62 = vpop.f32.mrf.mxu2  ;;  %v7968_v46 = vmul.f32 %v7957_v3, %v7771_v7  ;;  %v5435_v7 = vmul.f32 %v7960_v31, %v440_v25  ;;  %v7996_v25 = vstv %s7953_s26  ;;  %s6775_s26 = sld [smem:[#allocation5 + $0x4]] }
  0xef   : > { %v671_v50 = vadd.f32 %v670_v62, %v651_v49  ;;  %v690_v53 = vpop.f32.mrf.mxu3  ;;  %v1163_v17 = vmul.f32 %v7947_v47, %v7968_v46 }
  0xf1   : > { %1027 = vrot.lane.b32.xlu2 %v1017_v51, %s7515_s18  ;;  %v691_v38 = vadd.f32 %v690_v53, %v671_v50  ;;  %1107 = vrot.lane.b32.xlu1 %v1093_v36, %s7515_s18  ;;  %v7984_v51 = vstv %s7949_s25  ;;  %s6774_s25 = sld [smem:[#allocation5 + $0x54]] }
  0xf2   : > { %1169 = vrot.lane.b32.xlu0 %v1159_v63, %s7516_s28  ;;  %v7988_v63 = vstv %s7951_s30  ;;  %s7519_s30 = smov 64  }
  0xf3   : > { %v711_v40 = vpop.f32.mrf.mxu0  ;;  %v693_v49 = vmul.f32 0.015625, %v691_v38  ;;  %v1200_v38 = vmul.f32 %v7984_v51, %v7978_v57 }
  0xf4   : > { %v731_v62 = vpop.f32.mrf.mxu1 }
  0xf5   : > { %v732_v50 = vadd.f32 %v731_v62, %v711_v40  ;;  %v5440_v53 = vmul.f32 %v7970_v58, %v693_v49  ;;  %v5900_v36 = vmul.f32 %v7972_v28, %v693_v49  ;;  %v521_v40 = vmul.f32 0.015625, %v519_v8 }
  0xf6   : > { %v751_v59 = vpop.f32.mrf.mxu2 }
  0xf7   : > { %v5441_v62 = vadd.f32 %v5440_v53, %v5435_v7  ;;  %v5901_v45 = vadd.f32 %v5900_v36, %v5895_v1  ;;  %v752_v41 = vadd.f32 %v751_v59, %v732_v50  ;;  %v771_v49 = vpop.f32.mrf.mxu3  ;;  %v8013_v7 = vmul.f32 %v7925_v24, %v7922_v23 }
  0xf8   : > { %v5436_v1 = vmul.f32 %v7960_v31, %v521_v40  ;;  %v5896_v8 = vmul.f32 %v7962_v34, %v521_v40 }
  0xf9   : > { %v5448_v29 = vadd.f32 %v7988_v63, %v5441_v62  ;;  %v5908_v39 = vadd.f32 %v7996_v25, %v5901_v45  ;;  %1071 = vrot.lane.b32.xlu2 %v1057_v32, %s7515_s18  ;;  %v772_v56 = vadd.f32 %v771_v49, %v752_v41  ;;  %1177 = vrot.lane.b32.xlu1 %v1163_v17, %s7516_s28  ;;  %v8026_v32 = vstv %s7993_s29  ;;  %s7520_s29 = smov 119  }
  0xfa   : > { %1214 = vrot.lane.b32.xlu0 %v1200_v38, %s7516_s28  ;;  %v602_v38 = vmul.f32 0.015625, %v600_v42  ;;  %v1196_v40 = vmul.f32 %v7984_v51, %v8013_v7  ;;  %v960_v42 = vsel %vm959_vm0, %v7920_v18, %v7892_v48 }
  0xfb   : > { %v792_v55 = vpop.f32.mrf.mxu0  ;;  %v5449_v45 = vmax.f32 %v5448_v29, 0.0  ;;  %v774_v50 = vmul.f32 0.015625, %v772_v56  ;;  %v5909_v41 = vmax.f32 %v5908_v39, 0.0  ;;  %v8045_v18 = vmul.f32 %v7788_v14, %v960_v42 }
  0xfc   : > { %v812_v53 = vpop.f32.mrf.mxu1 }
  0xfd   : > { %v813_v36 = vadd.f32 %v812_v53, %v792_v55  ;;  %v6873_v33 = vmul.f32 -1.442695, %v5449_v45  ;;  %v5442_v59 = vmul.f32 %v7970_v58, %v774_v50  ;;  %v5902_v17 = vmul.f32 %v7972_v28, %v774_v50 }
  0xfe   : > { %v832_v62 = vpop.f32.mrf.mxu2  ;;  %v6892_v55 = vmul.f32 -1.442695, %v5909_v41  ;;  %v1232_v45 = vmul.f32 %v8026_v32, %v7945_v37  ;;  %v983_v53 = vmul.f32 %v7908_v60, %v8021_v54  ;;  %v5437_v37 = vmul.f32 %v7960_v31, %v602_v38 }
  0xff   : > { %7057 = vpow2.f32 %v6873_v33  ;;  %v5443_v49 = vadd.f32 %v5442_v59, %v5436_v1  ;;  %v5903_v29 = vadd.f32 %v5902_v17, %v5896_v8  ;;  %v833_v39 = vadd.f32 %v832_v62, %v813_v36  ;;  %v852_v56 = vpop.f32.mrf.mxu3 }
 0x100   : > { %v5897_v8 = vmul.f32 %v7962_v34, %v602_v38  ;;  %7059 = vpow2.f32 %v6892_v55  ;;  %v8048_v33 = vmul.f32 %v960_v42, %v7765_v5  ;;  %v1236_v38 = vmul.f32 %v8026_v32, %v7968_v46 }
 0x101   : > { %v5469_v50 = vadd.f32 %v7988_v63, %v5443_v49  ;;  %v5929_v44 = vadd.f32 %v7996_v25, %v5903_v29  ;;  %1206 = vrot.lane.b32.xlu2 %v1196_v40, %s7516_s28  ;;  %v853_v1 = vadd.f32 %v852_v56, %v833_v39  ;;  %1242 = vrot.lane.b32.xlu1 %v1232_v45, %s7516_s28 }
 0x102   : > { %996 = vrot.lane.b32.xlu0 %v983_v53, %s7515_s18  ;;  %v961_v39 = vsel %vm959_vm0, %v7892_v48, %v7894_v52  ;;  %v1018_v56 = vmul.f32 %v7910_v61, %v8045_v18 }
 0x103   : > { %v5470_v41 = vmax.f32 %v5469_v50, 0.0  ;;  %v855_v36 = vmul.f32 0.015625, %v853_v1  ;;  %v5930_v62 = vmax.f32 %v5929_v44, 0.0  ;;  %v981_v44 = vmul.f32 %v7908_v60, %v8048_v33 }
 0x104   : > { %v970_v48 = vmul.f32 %v961_v39, %v7768_v6  ;;  %v8068_v46 = vmul.f32 %v7793_v15, %v961_v39 }
 0x105   : > { %v7058_v59 = vpop.eup %7057  ;;  %v6874_v17 = vmul.f32 -1.442695, %v5470_v41  ;;  %v5444_v40 = vmul.f32 %v7970_v58, %v855_v36  ;;  %v5904_v49 = vmul.f32 %v7972_v28, %v855_v36  ;;  %v6893_v58 = vmul.f32 -1.442695, %v5930_v62 }
 0x106   : > { %v5453_v29 = vadd.f32 1.0, %v7058_v59  ;;  %v7060_v45 = vpop.eup %7059  ;;  %v1019_v36 = vmul.f32 %v7910_v61, %v8068_v46 }
 0x107   : > { %7061 = vpow2.f32 %v6874_v17  ;;  %v5445_v31 = vadd.f32 %v5444_v40, %v5437_v37  ;;  %v5905_v34 = vadd.f32 %v5904_v49, %v5897_v8  ;;  %v8070_v1 = vadd.f32 1.0, %v7060_v45 }
 0x108   : > { %7063 = vrcp.f32 %v5453_v29  ;;  %v982_v37 = vmul.f32 %v7908_v60, %v970_v48  ;;  %v1055_v8 = vmul.f32 %v7931_v30, %v970_v48  ;;  %vm5459_vm1 = vweird.f32 %v5453_v29 }
 0x109   : > { %v5490_v28 = vadd.f32 %v7988_v63, %v5445_v31  ;;  %v5950_v55 = vadd.f32 %v7996_v25, %v5905_v34  ;;  %1250 = vrot.lane.b32.xlu2 %v1236_v38, %s7516_s28  ;;  %992 = vrot.lane.b32.xlu1 %v981_v44, %s7515_s18  ;;  %7065 = vpow2.f32 %v6893_v58  ;;  %v5465_v59 = vand.u32 2147483648, %v5453_v29  ;;  %v8085_v34 = vpop.permute.xlu1 %1134 }
 0x10a   : > { %1029 = vrot.lane.b32.xlu0 %v1018_v56, %s7515_s18  ;;  %v5463_v40 = vand.u32 2147483647, %v5453_v29  ;;  %v976_v60 = vmul.f32 %v7796_v16, %v8005_v43  ;;  %vm5919_vm15 = vweird.f32 %v8070_v1 }
 0x10b   : > { %v5491_v52 = vmax.f32 %v5490_v28, 0.0  ;;  %v5951_v50 = vmax.f32 %v5950_v55, 0.0  ;;  %v5466_v39 = vor.u32 1.1754944e-38, %v5465_v59  ;;  %v8099_v55 = vsel %vm1138_vm4, %v8085_v34, %v7957_v3 }
 0x10c   : > { %vm5464_vm5 = vcmp.eq.f32.partialorder %v5463_v40, 8.507059e+37  ;;  %v1020_v43 = vmul.f32 %v7910_v61, %v976_v60  ;;  %v1092_v45 = vmul.f32 %v7937_v35, %v976_v60  ;;  %v1056_v61 = vmul.f32 %v7931_v30, %v8021_v54 }
 0x10d   : > { %v7062_v53 = vpop.eup %7061  ;;  %v6875_v42 = vmul.f32 -1.442695, %v5491_v52  ;;  %v6894_v17 = vmul.f32 -1.442695, %v5951_v50  ;;  %v1054_v60 = vmul.f32 %v7931_v30, %v8048_v33 }
 0x10e   : > { %v7064_v63 = vpop.eup %7063  ;;  %v8072_v25 = vadd.f32 1.0, %v7062_v53 }
 0x10f   : > { %7067 = vpow2.f32 %v6875_v42  ;;  %v5455_v41 = vmul.f32 %v7064_v63, %v5453_v29  ;;  %vm5460_vm2 = vweird.f32 %v7064_v63  ;;  %v7066_v49 = vpop.eup %7065 }
 0x110   : > { %7069 = vrcp.f32 %v8072_v25  ;;  %vm8087_vm3 = vmor %vm5459_vm1, %vm5460_vm2  ;;  %v8091_v58 = vadd.f32 1.0, %v7066_v49  ;;  %v5486_v50 = vand.u32 2147483648, %v8072_v25  ;;  %vm5480_vm7 = vweird.f32 %v8072_v25 }
 0x111   : > { %994 = vrot.lane.b32.xlu2 %v982_v37, %s7515_s18  ;;  %v5456_v62 = vsub.f32 1.0, %v5455_v41  ;;  %7071 = vrcp.f32 %v8070_v1  ;;  %1031 = vrot.lane.b32.xlu1 %v1019_v36, %s7515_s18  ;;  %v8117_v37 = vmul.f32 %v8099_v55, %v7762_v4  ;;  %v1133_v36 = vpop.permute.xlu0 %1132 }
 0x112   : > { %1067 = vrot.lane.b32.xlu0 %v1055_v8, %s7515_s18  ;;  %7073 = vpow2.f32 %v6894_v17 }
 0x113   : > { %v5457_v31 = vmul.f32 %v7064_v63, %v5456_v62  ;;  %v1162_v40 = vmul.f32 %v7947_v47, %v8117_v37 }
 0x115   : > { %v7068_v56 = vpop.eup %7067  ;;  %v5458_v29 = vadd.f32 %v7064_v63, %v5457_v31 }
 0x116   : > { %v7070_v44 = vpop.eup %7069  ;;  %v8093_v28 = vadd.f32 1.0, %v7068_v56  ;;  %v1139_v56 = vsel %vm1138_vm4, %v7922_v23, %v1133_v36 }
 0x117   : > { %v5462_v48 = vsel %vm8087_vm3, %v7064_v63, %v5458_v29  ;;  %v5476_v52 = vmul.f32 %v7070_v44, %v8072_v25  ;;  %v8105_v53 = vpop.eup %7071  ;;  %vm5481_vm8 = vweird.f32 %v7070_v44  ;;  %v5484_v63 = vand.u32 2147483647, %v8072_v25 }
 0x118   : > { %7075 = vrcp.f32 %v8093_v28  ;;  %v5467_v42 = vsel %vm5464_vm5, %v5466_v39, %v5462_v48  ;;  %v7074_v54 = vpop.eup %7073  ;;  %v5915_v41 = vmul.f32 %v8105_v53, %v8070_v1  ;;  %vm8127_vm9 = vmor %vm5480_vm7, %vm5481_vm8  ;;  %v5487_v25 = vor.u32 1.1754944e-38, %v5486_v50 }
 0x119   : > { %1033 = vrot.lane.b32.xlu2 %v1020_v43, %s7515_s18  ;;  %6876 = vmatmul.msk.f32.vlgmr.msra.gmra.mxu0 %vm3593_vm6, %v5467_v42  ;;  %v5477_v3 = vsub.f32 1.0, %v5476_v52  ;;  %7077 = vrcp.f32 %v8091_v58  ;;  %vm5485_vm10 = vcmp.eq.f32.partialorder %v5484_v63, 8.507059e+37  ;;  %v8134_v62 = vadd.f32 1.0, %v7074_v54 }
 0x11a   : > { %1105 = vrot.lane.b32.xlu0 %v1092_v45, %s7515_s18  ;;  %1069 = vrot.lane.b32.xlu1 %v1056_v61, %s7515_s18  ;;  %v5916_v38 = vsub.f32 1.0, %v5915_v41  ;;  %v1090_v29 = vmul.f32 %v7937_v35, %v8045_v18  ;;  %v5507_v45 = vand.u32 2147483648, %v8093_v28  ;;  %vm5501_vm11 = vweird.f32 %v8093_v28 }
 0x11b   : > { %6877 = vmatmul.msk.f32.vlgmr.msra.gmra.mxu1 %vm3593_vm6, %v5467_v42  ;;  %6878 = vmatmul.msk.f32.vlgmr.msra.gmra.mxu2 %vm3593_vm6, %v5467_v42  ;;  %v5478_v8 = vmul.f32 %v7070_v44, %v5477_v3  ;;  %v5505_v33 = vand.u32 2147483647, %v8093_v28  ;;  %7079 = vrcp.f32 %v8134_v62  ;;  %v8164_v48 = vmul.f32 %v1139_v56, %v7765_v5 }
 0x11c   : > { %6879 = vmatmul.msk.f32.vlgmr.msra.gmra.mxu3 %vm3593_vm6, %v5467_v42  ;;  %5695 = vmatpush.msra.mxu0 %v7819_v26  ;;  %v5917_v18 = vmul.f32 %v8105_v53, %v5916_v38  ;;  %v5508_v61 = vor.u32 1.1754944e-38, %v5507_v45  ;;  %vm5920_vm1 = vweird.f32 %v8105_v53  ;;  %v1140_v5 = vsel %vm1138_vm4, %v1133_v36, %v8085_v34 }
 0x11d   : > { %v5479_v59 = vadd.f32 %v7070_v44, %v5478_v8  ;;  %5715 = vmatpush.msra.mxu1 %v7821_v27  ;;  %5735 = vmatpush.msra.mxu2 %v7809_v21  ;;  %vm8175_vm14 = vcmp.eq.f32.partialorder %v5505_v33, 8.507059e+37  ;;  %vm8201_vm2 = vmor %vm5919_vm15, %vm5920_vm1  ;;  %vm5940_vm5 = vweird.f32 %v8091_v58  ;;  %v5946_v36 = vand.u32 2147483648, %v8091_v58 }
 0x11e   : > { %v7076_v17 = vpop.eup %7075  ;;  %5755 = vmatpush.msra.mxu3 %v7811_v22  ;;  %vm1496_vm15 = vcmask 523264   ;;  %vm1675_vm1 = vcmask 531456  }
 0x11f   : > { %v5483_v49 = vsel %vm8127_vm9, %v7070_v44, %v5479_v59  ;;  %v5497_v31 = vmul.f32 %v7076_v17, %v8093_v28  ;;  %v8144_v39 = vpop.eup %7077  ;;  %vm5502_vm12 = vweird.f32 %v7076_v17  ;;  %v8167_v28 = vmul.f32 %v7788_v14, %v1139_v56 }
 0x120   : > { %v5488_v43 = vsel %vm5485_vm10, %v5487_v25, %v5483_v49  ;;  %v5936_v44 = vmul.f32 %v8144_v39, %v8091_v58  ;;  %vm8170_vm13 = vmor %vm5501_vm11, %vm5502_vm12  ;;  %v1091_v14 = vmul.f32 %v7937_v35, %v8068_v46  ;;  %v1160_v35 = vmul.f32 %v7947_v47, %v8164_v48 }
 0x121   : > { %1065 = vrot.lane.b32.xlu2 %v1054_v60, %s7515_s18  ;;  %6880 = vmatmul.msk.f32.vlgmr.msrb.gmra.mxu0 %vm3593_vm6, %v5488_v43  ;;  %v5498_v30 = vsub.f32 1.0, %v5497_v31  ;;  %v8193_v54 = vpop.eup %7079  ;;  %v1197_v34 = vmul.f32 %v7984_v51, %v8167_v28  ;;  %vm5941_vm7 = vweird.f32 %v8144_v39  ;;  %v1267_v49 = vstv %s6770_s13  ;;  %s6776_s13 = sld [smem:[#allocation5 + $0x1f]] }
 0x122   : > { %1175 = vrot.lane.b32.xlu0 %v1162_v40, %s7516_s28  ;;  %1101 = vrot.lane.b32.xlu1 %v1090_v29, %s7515_s18  ;;  %v5937_v63 = vsub.f32 1.0, %v5936_v44  ;;  %v5957_v25 = vmul.f32 %v8193_v54, %v8134_v62  ;;  %vm8235_vm8 = vmor %vm5940_vm5, %vm5941_vm7  ;;  %vm5961_vm10 = vweird.f32 %v8134_v62  ;;  %vm5962_vm11 = vweird.f32 %v8193_v54  ;;  %v1303_v29 = vld [vmem:[#allocation17 + $0x3] ss:$8 sm:$0xf] }
 0x123   : > { %6881 = vmatmul.msk.f32.vlgmr.msrb.gmra.mxu1 %vm3593_vm6, %v5488_v43  ;;  %6882 = vmatmul.msk.f32.vlgmr.msrb.gmra.mxu2 %vm3593_vm6, %v5488_v43  ;;  %v5499_v23 = vmul.f32 %v7076_v17, %v5498_v30  ;;  %vm5963_vm12 = vmor %vm5961_vm10, %vm5962_vm11  ;;  %v1272_v45 = vmul.f32 %v1267_v49, %v7978_v57  ;;  %v1305_v33 = vperm.slane %v1303_v29, 0  ;;  %v1337_v40 = vstv %s6771_s17  ;;  %s6777_s17 = sld [smem:[#allocation5 + $0x3a]] }
 0x124   : > { %6883 = vmatmul.msk.f32.vlgmr.msrb.gmra.mxu3 %vm3593_vm6, %v5488_v43  ;;  %5989 = vmatpush.msrb.mxu0 %v7775_v9  ;;  %v5925_v9 = vand.u32 2147483648, %v8070_v1  ;;  %v5938_v4 = vmul.f32 %v8144_v39, %v5937_v63  ;;  %vm2212_vm5 = vcmask 596992   ;;  %vm1537_vm7 = vcmask 973824  }
 0x125   : > { %v5500_v42 = vadd.f32 %v7076_v17, %v5499_v23  ;;  %6009 = vmatpush.msrb.mxu1 %v7777_v10  ;;  %6029 = vmatpush.msrb.mxu2 %v7752_v0  ;;  %v5918_v10 = vadd.f32 %v8105_v53, %v5917_v18  ;;  %v5923_v0 = vand.u32 2147483647, %v8070_v1  ;;  %v1149_v1 = vmul.f32 %v1140_v5, %v7768_v6 }
 0x126   : > { %6049 = vmatpush.msrb.mxu3 %v7756_v2  ;;  %v5926_v8 = vor.u32 1.1754944e-38, %v5925_v9  ;;  %v8219_v6 = vmul.f32 %v7793_v15, %v1140_v5  ;;  %v5939_v59 = vadd.f32 %v8144_v39, %v5938_v4  ;;  %v1307_v23 = vperm.slane %v1303_v29, 2 }
 0x127   : > { %v5504_v3 = vsel %vm8170_vm13, %v7076_v17, %v5500_v42  ;;  %v5922_v41 = vsel %vm8201_vm2, %v8105_v53, %v5918_v10  ;;  %vm5924_vm3 = vcmp.eq.f32.partialorder %v5923_v0, 8.507059e+37  ;;  %v1161_v15 = vmul.f32 %v7947_v47, %v1149_v1 }
 0x128   : > { %v5509_v2 = vsel %vm8175_vm14, %v5508_v61, %v5504_v3  ;;  %v5927_v53 = vsel %vm5924_vm3, %v5926_v8, %v5922_v41  ;;  %v5958_v17 = vsub.f32 1.0, %v5957_v25  ;;  %v1155_v47 = vmul.f32 %v7796_v16, %v8099_v55 }
 0x129   : > { %1103 = vrot.lane.b32.xlu2 %v1091_v14, %s7515_s18  ;;  %6884 = vmatmul.msk.f32.vlgmr.msra.gmra.mxu0 %vm3593_vm6, %v5509_v2  ;;  %v5967_v55 = vand.u32 2147483648, %v8134_v62  ;;  %v1270_v43 = vmul.f32 %v1267_v49, %v8219_v6  ;;  %vm1317_vm14 = vcmask 515072   ;;  %vm1854_vm2 = vcmask 580608  }
 0x12a   : > { %1208 = vrot.lane.b32.xlu0 %v1197_v34, %s7516_s28  ;;  %1171 = vrot.lane.b32.xlu1 %v1160_v35, %s7516_s28  ;;  %v5959_v60 = vmul.f32 %v8193_v54, %v5958_v17  ;;  %v1199_v31 = vmul.f32 %v7984_v51, %v1155_v47  ;;  %vm2033_vm3 = vcmask 588800   ;;  %vm1000_vm10 = vcmask 1039360  }
 0x12b   : > { %6885 = vmatmul.msk.f32.vlgmr.msra.gmra.mxu1 %vm3593_vm6, %v5509_v2  ;;  %6886 = vmatmul.msk.f32.vlgmr.msra.gmra.mxu2 %vm3593_vm6, %v5509_v2  ;;  %vm3230_vm11 = vcmask 7168  }
 0x12c   : > { %6887 = vmatmul.msk.f32.vlgmr.msra.gmra.mxu3 %vm3593_vm6, %v5509_v2  ;;  %6072 = vmatpush.msra.mxu0 %v7803_v19  ;;  %v5944_v19 = vand.u32 2147483647, %v8091_v58  ;;  %v5943_v58 = vsel %vm8235_vm8, %v8144_v39, %v5939_v59  ;;  %v5960_v38 = vadd.f32 %v8193_v54, %v5959_v60  ;;  %v1268_v39 = vmul.f32 %v1267_v49, %v8013_v7 }
 0x12d   : > { %6092 = vmatpush.msra.mxu1 %v7805_v20  ;;  %6112 = vmatpush.msra.mxu2 %v7783_v12  ;;  %v1234_v20 = vmul.f32 %v8026_v32, %v1149_v1  ;;  %v1198_v12 = vmul.f32 %v7984_v51, %v8219_v6  ;;  %v1233_v7 = vmul.f32 %v8026_v32, %v8164_v48  ;;  %v1308_v48 = vperm.slane %v1303_v29, 3 }
 0x12e   : > { %6132 = vmatpush.msra.mxu3 %v7785_v13  ;;  %v5947_v13 = vor.u32 1.1754944e-38, %v5946_v36  ;;  %vm5945_vm9 = vcmp.eq.f32.partialorder %v5944_v19, 8.507059e+37  ;;  %vm1358_vm8 = vcmask 982016  }
 0x130   : > { %v5948_v16 = vsel %vm5945_vm9, %v5947_v13, %v5943_v58  ;;  %vm2745_vm9 = vcmask 990208  }
 0x131   : > { %1173 = vrot.lane.b32.xlu2 %v1161_v15, %s7516_s28  ;;  %6895 = vmatmul.msk.f32.vlgmr.msrb.gmra.mxu0 %vm3593_vm6, %v5927_v53 }
 0x132   : > { %1246 = vrot.lane.b32.xlu0 %v1234_v20, %s7516_s28  ;;  %1210 = vrot.lane.b32.xlu1 %v1198_v12, %s7516_s28 }
 0x133   : > { %6896 = vmatmul.msk.f32.vlgmr.msrb.gmra.mxu1 %vm3593_vm6, %v5927_v53  ;;  %6897 = vmatmul.msk.f32.vlgmr.msrb.gmra.mxu2 %vm3593_vm6, %v5927_v53 }
 0x134   : > { %6898 = vmatmul.msk.f32.vlgmr.msrb.gmra.mxu3 %vm3593_vm6, %v5927_v53  ;;  %6155 = vmatpush.msrb.mxu0 %v7819_v26  ;;  %v5965_v26 = vand.u32 2147483647, %v8134_v62  ;;  %v1269_v62 = vmul.f32 %v1267_v49, %v8167_v28 }
 0x135   : > { %6175 = vmatpush.msrb.mxu1 %v7821_v27  ;;  %6195 = vmatpush.msrb.mxu2 %v7809_v21  ;;  %v1235_v21 = vmul.f32 %v8026_v32, %v8117_v37  ;;  %v5964_v27 = vsel %vm5963_vm12, %v8193_v54, %v5960_v38  ;;  %v1271_v37 = vmul.f32 %v1267_v49, %v1155_v47  ;;  %v1306_v32 = vperm.slane %v1303_v29, 1  ;;  %v8386_v29 = vld [vmem:[%s7738_s12 + $0x10] sm:$0xff] }
 0x136   : > { %6215 = vmatpush.msrb.mxu3 %v7811_v22  ;;  %v5968_v22 = vor.u32 1.1754944e-38, %v5967_v55  ;;  %vm5966_vm13 = vcmp.eq.f32.partialorder %v5965_v26, 8.507059e+37  ;;  %v8375_v26 = vld [vmem:[%s7738_s12 + $0x8] sm:$0xff]  ;;  %vm3414_vm12 = vcmask 56320  }
 0x138   : > { %v5969_v51 = vsel %vm5966_vm13, %v5968_v22, %v5964_v27  ;;  %v8380_v27 = vld [vmem:[%s7738_s12 + $0x20] sm:$0xff]  ;;  %vm1179_vm13 = vcmask 1031168  }
 0x139   : > { %1212 = vrot.lane.b32.xlu2 %v1199_v31, %s7516_s28  ;;  %6899 = vmatmul.msk.f32.vlgmr.msra.gmra.mxu0 %vm3593_vm6, %v5948_v16 }
 0x13a   : > { %1278 = vrot.lane.b32.xlu0 %v1268_v39, %s7516_s28  ;;  %1248 = vrot.lane.b32.xlu1 %v1235_v21, %s7516_s28 }
 0x13b   : > { %6900 = vmatmul.msk.f32.vlgmr.msra.gmra.mxu1 %vm3593_vm6, %v5948_v16  ;;  %6901 = vmatmul.msk.f32.vlgmr.msra.gmra.mxu2 %vm3593_vm6, %v5948_v16 }
 0x13c   : > { %6902 = vmatmul.msk.f32.vlgmr.msra.gmra.mxu3 %vm3593_vm6, %v5948_v16 }
 0x141   : > { %1244 = vrot.lane.b32.xlu2 %v1233_v7, %s7516_s28  ;;  %6903 = vmatmul.msk.f32.vlgmr.msrb.gmra.mxu0 %vm3593_vm6, %v5969_v51 }
 0x142   : > { %1284 = vrot.lane.b32.xlu0 %v1271_v37, %s7516_s28  ;;  %1280 = vrot.lane.b32.xlu1 %v1269_v62, %s7516_s28 }
 0x143   : > { %v8280_v56 = vpop.permute.xlu2 %990  ;;  %6904 = vmatmul.msk.f32.vlgmr.msrb.gmra.mxu1 %vm3593_vm6, %v5969_v51  ;;  %6905 = vmatmul.msk.f32.vlgmr.msrb.gmra.mxu2 %vm3593_vm6, %v5969_v51 }
 0x144   : > { %6906 = vmatmul.msk.f32.vlgmr.msrb.gmra.mxu3 %vm3593_vm6, %v5969_v51 }
 0x149   : > { %1282 = vrot.lane.b32.xlu2 %v1270_v43, %s7516_s28  ;;  %v8390_v43 = vld [vmem:[%s7738_s12 + $0x18] sm:$0xff] }
 0x14a   : > { %1311 = vrot.lane.b32.xlu0 %v1306_v32, %s7517_s21  ;;  %1286 = vrot.lane.b32.xlu1 %v1272_v45, %s7516_s28 }
 0x14b   : > { %v8290_v30 = vpop.permute.xlu2 %1027 }
 0x151   : > { %1309 = vrot.lane.b32.xlu2 %v1305_v33, %s7517_s21 }
 0x152   : > { %1313 = vrot.lane.b32.xlu1 %v1307_v23, %s7517_s21 }
 0x153   : > { %v8294_v18 = vpop.permute.xlu2 %1071  ;;  %v8296_v44 = vpop.permute.xlu1 %998 }
 0x154   : > { %12340 = vst [vmem:[#allocation30_spill] sm:$0xff] %v8296_v44  ;;  %v8298_v57 = vpop.permute.xlu0 %1035 }
 0x155   : > { %12341 = vst [vmem:[#allocation31_spill] sm:$0xff] %v8298_v57 }
 0x159   : > { %1315 = vrot.lane.b32.xlu2 %v1308_v48, %s7517_s21 }
 0x15b   : > { %v8301_v28 = vpop.permute.xlu2 %1206  ;;  %v8303_v52 = vpop.permute.xlu1 %1063 }
 0x15c   : > { %12342 = vst [vmem:[#allocation32_spill] sm:$0xff] %v8301_v28  ;;  %v8305_v61 = vpop.permute.xlu0 %1099 }
 0x163   : > { %v8307_v42 = vpop.permute.xlu2 %1250  ;;  %v8309_v50 = vpop.permute.xlu1 %1107 }
 0x164   : > { %v8311_v5 = vpop.permute.xlu0 %1169 }
 0x16b   : > { %v8313_v14 = vpop.permute.xlu2 %994  ;;  %v8315_v9 = vpop.permute.xlu1 %1177 }
 0x16c   : > { %12343 = vst [vmem:[#allocation33_spill] sm:$0xff] %v8315_v9  ;;  %v8317_v3 = vpop.permute.xlu0 %1214 }
 0x16d   : > { %12344 = vst [vmem:[#allocation34_spill] sm:$0xff] %v8317_v3 }
 0x173   : > { %v8319_v10 = vpop.permute.xlu2 %1033  ;;  %v8321_v0 = vpop.permute.xlu1 %1242 }
 0x174   : > { %v8323_v63 = vpop.permute.xlu0 %996 }
 0x17b   : > { %v8325_v54 = vpop.permute.xlu2 %1065  ;;  %v8327_v34 = vpop.permute.xlu1 %992 }
 0x17c   : > { %v8329_v35 = vpop.permute.xlu0 %1029 }
 0x183   : > { %v8331_v2 = vpop.permute.xlu2 %1103  ;;  %v8333_v46 = vpop.permute.xlu1 %1031 }
 0x184   : > { %v8335_v1 = vpop.permute.xlu0 %1067 }
 0x18b   : > { %v8337_v8 = vpop.permute.xlu2 %1173 }
 0x18c   : > { %v8339_v41 = vpop.permute.xlu1 %1069  ;;  %v8341_v4 = vpop.permute.xlu0 %1105 }
 0x193   : > { %v8343_v25 = vpop.permute.xlu2 %1212 }
 0x194   : > { %v8345_v6 = vpop.permute.xlu1 %1101  ;;  %v8347_v53 = vpop.permute.xlu0 %1175 }
 0x19b   : > { %v8349_v36 = vpop.permute.xlu2 %1244 }
 0x19c   : > { %v8351_v15 = vpop.permute.xlu1 %1171  ;;  %v8353_v59 = vpop.permute.xlu0 %1208 }
 0x1a3   : > { %v8355_v19 = vpop.permute.xlu2 %1282 }
 0x1a4   : > { %12345 = vst [vmem:[#allocation35_spill] sm:$0xff] %v8355_v19  ;;  %v8357_v17 = vpop.permute.xlu1 %1210  ;;  %v8359_v20 = vpop.permute.xlu0 %1246 }
 0x1a5   : > { %12346 = vst [vmem:[#allocation36_spill] sm:$0xff] %v8359_v20 }
 0x1ab   : > { %v1310_v12 = vpop.permute.xlu2 %1309 }
 0x1ac   : > { %v8361_v13 = vpop.permute.xlu1 %1248  ;;  %v8363_v47 = vpop.permute.xlu0 %1278  ;;  %v1326_v58 = vmul.f32 %v1310_v12, %v7918_v11 }
 0x1ad   : > { %12347 = vst [vmem:[#allocation37_spill] sm:$0xff] %v8361_v13 }
 0x1ae   : > { %12348 = vst [vmem:[#allocation38_spill] sm:$0xff] %v8363_v47  ;;  %v1338_v60 = vmul.f32 %v1337_v40, %v1326_v58 }
 0x1b0   : > { %1348 = vrot.lane.b32.xlu0 %v1338_v60, %s7518_s16  ;;  %v1331_v60 = vmul.f32 %v7925_v24, %v1310_v12  ;;  %v8409_v24 = vld [vmem:[%s7738_s12 + $0x50] sm:$0xff] }
 0x1b3   : > { %v1316_v22 = vpop.permute.xlu2 %1315 }
 0x1b4   : > { %v8367_v49 = vpop.permute.xlu1 %1280  ;;  %v8369_v16 = vpop.permute.xlu0 %1284  ;;  %v1330_v51 = vmul.f32 %v8380_v27, %v1316_v22 }
 0x1b5   : > { %12349 = vst [vmem:[#allocation39_spill] sm:$0xff] %v8367_v49 }
 0x1b6   : > { %12350 = vst [vmem:[#allocation40_spill] sm:$0xff] %v8369_v16  ;;  %v1342_v33 = vmul.f32 %v1337_v40, %v1330_v51  ;;  %v1374_v16 = vstv %s6772_s1  ;;  %s6778_s1 = sld [smem:[#allocation5 + $0x55]] }
 0x1bc   : > { %v8371_v55 = vpop.permute.xlu1 %1286  ;;  %v1312_v31 = vpop.permute.xlu0 %1311 }
 0x1bd   : > { %12351 = vst [vmem:[#allocation41_spill] sm:$0xff] %v8371_v55  ;;  %v1318_v38 = vsel %vm1317_vm14, %v1310_v12, %v1312_v31  ;;  %v1335_v12 = vmul.f32 %v8409_v24, %v1316_v22 }
 0x1be   : > { %v1327_v39 = vmul.f32 %v8375_v26, %v1318_v38 }
 0x1bf   : > { %v1379_v47 = vmul.f32 %v1374_v16, %v1335_v12 }
 0x1c0   : > { %v1339_v21 = vmul.f32 %v1337_v40, %v1327_v39 }
 0x1c2   : > { %1350 = vrot.lane.b32.xlu1 %v1339_v21, %s7518_s16 }
 0x1c4   : > { %v1314_v7 = vpop.permute.xlu1 %1313 }
 0x1c5   : > { %v1319_v37 = vsel %vm1317_vm14, %v1312_v31, %v1314_v7  ;;  %v1320_v62 = vsel %vm1317_vm14, %v1314_v7, %v1316_v22  ;;  %v8398_v31 = vld [vmem:[%s7738_s12 + $0x38] sm:$0xff]  ;;  %v8402_v7 = vld [vmem:[%s7738_s12 + $0x40] sm:$0xff]  ;;  %v1446_v22 = vstv %s6774_s25  ;;  %s6779_s25 = sld [smem:[#allocation5 + $0x5]] }
 0x1c6   : > { %v1328_v32 = vmul.f32 %v8386_v29, %v1319_v37  ;;  %v1329_v45 = vmul.f32 %v8390_v43, %v1320_v62  ;;  %v1332_v21 = vmul.f32 %v8398_v31, %v1318_v38  ;;  %v1333_v55 = vmul.f32 %v8402_v7, %v1319_v37  ;;  %v8413_v38 = vld [vmem:[%s7738_s12 + $0x48] sm:$0xff] }
 0x1c7   : > { %v1410_v37 = vstv %s6773_s24  ;;  %s7521_s24 = smov 65  }
 0x1c8   : > { %v1341_v23 = vmul.f32 %v1337_v40, %v1329_v45  ;;  %v1340_v48 = vmul.f32 %v1337_v40, %v1328_v32  ;;  %v1375_v40 = vmul.f32 %v1374_v16, %v1331_v60  ;;  %v1377_v19 = vmul.f32 %v1374_v16, %v1333_v55 }
 0x1c9   : > { %v1411_v49 = vmul.f32 %v1410_v37, %v1326_v58  ;;  %v1448_v58 = vmul.f32 %v1446_v22, %v1332_v21 }
 0x1ca   : > { %1354 = vrot.lane.b32.xlu0 %v1341_v23, %s7518_s16  ;;  %1352 = vrot.lane.b32.xlu2 %v1340_v48, %s7518_s16  ;;  %v1376_v23 = vmul.f32 %v1374_v16, %v1332_v21 }
 0x1cb   : > { %1356 = vrot.lane.b32.xlu1 %v1342_v33, %s7518_s16  ;;  %v1334_v33 = vmul.f32 %v8413_v38, %v1320_v62  ;;  %v1447_v62 = vmul.f32 %v1446_v22, %v1331_v60 }
 0x1cd   : > { %v1378_v48 = vmul.f32 %v1374_v16, %v1334_v33  ;;  %v1415_v16 = vmul.f32 %v1410_v37, %v1330_v51 }
 0x1d2   : > { %1385 = vrot.lane.b32.xlu2 %v1375_v40, %s7518_s16  ;;  %1387 = vrot.lane.b32.xlu0 %v1376_v23, %s7518_s16  ;;  %v1412_v40 = vmul.f32 %v1410_v37, %v1327_v39  ;;  %v1414_v23 = vmul.f32 %v1410_v37, %v1329_v45  ;;  %v1451_v39 = vmul.f32 %v1446_v22, %v1335_v12 }
 0x1d3   : > { %1389 = vrot.lane.b32.xlu1 %v1377_v19, %s7518_s16  ;;  %v1413_v19 = vmul.f32 %v1410_v37, %v1328_v32  ;;  %v1482_v32 = vld [vmem:[#allocation17 + $0x4] ss:$8 sm:$0xf] }
 0x1d4   : > { %v1485_v45 = vperm.slane %v1482_v32, 1  ;;  %v1484_v60 = vperm.slane %v1482_v32, 0  ;;  %v1486_v51 = vperm.slane %v1482_v32, 2  ;;  %v1487_v21 = vperm.slane %v1482_v32, 3 }
 0x1da   : > { %1391 = vrot.lane.b32.xlu2 %v1378_v48, %s7518_s16  ;;  %1393 = vrot.lane.b32.xlu0 %v1379_v47, %s7518_s16  ;;  %v1450_v47 = vmul.f32 %v1446_v22, %v1334_v33 }
 0x1db   : > { %1421 = vrot.lane.b32.xlu1 %v1411_v49, %s7518_s16  ;;  %v1449_v49 = vmul.f32 %v1446_v22, %v1333_v55 }
 0x1e2   : > { %1425 = vrot.lane.b32.xlu0 %v1413_v19, %s7518_s16  ;;  %1423 = vrot.lane.b32.xlu2 %v1412_v40, %s7518_s16 }
 0x1e3   : > { %1427 = vrot.lane.b32.xlu1 %v1414_v23, %s7518_s16 }
 0x1ea   : > { %1457 = vrot.lane.b32.xlu0 %v1447_v62, %s7518_s16  ;;  %1429 = vrot.lane.b32.xlu2 %v1415_v16, %s7518_s16 }
 0x1eb   : > { %1459 = vrot.lane.b32.xlu1 %v1448_v58, %s7518_s16 }
 0x1f2   : > { %1463 = vrot.lane.b32.xlu0 %v1450_v47, %s7518_s16  ;;  %1461 = vrot.lane.b32.xlu2 %v1449_v49, %s7518_s16 }
 0x1f3   : > { %1465 = vrot.lane.b32.xlu1 %v1451_v39, %s7518_s16 }
 0x1fa   : > { %1490 = vrot.lane.b32.xlu0 %v1485_v45, %s7519_s30  ;;  %1488 = vrot.lane.b32.xlu2 %v1484_v60, %s7519_s30  ;;  %v1516_v45 = vstv %s6775_s26  ;;  %s7522_s26 = smov 118  }
 0x1fb   : > { %1492 = vrot.lane.b32.xlu1 %v1486_v51, %s7519_s30 }
 0x202   : > { %1494 = vrot.lane.b32.xlu2 %v1487_v21, %s7519_s30 }
 0x222   : > { %v8436_v33 = vpop.permute.xlu0 %1348 }
 0x223   : > { %12354 = vst [vmem:[#allocation44_spill] sm:$0xff] %v8436_v33 }
 0x224   : > { %v8432_v55 = vpop.permute.xlu2 %1352 }
 0x225   : > { %12352 = vst [vmem:[#allocation42_spill] sm:$0xff] %v8432_v55 }
 0x22c   : > { %v8434_v12 = vpop.permute.xlu2 %1385 }
 0x22d   : > { %12353 = vst [vmem:[#allocation43_spill] sm:$0xff] %v8434_v12 }
 0x234   : > { %v8438_v37 = vpop.permute.xlu2 %1391  ;;  %v8440_v48 = vpop.permute.xlu1 %1350 }
 0x235   : > { %12355 = vst [vmem:[#allocation45_spill] sm:$0xff] %v8438_v37 }
 0x236   : > { %12356 = vst [vmem:[#allocation46_spill] sm:$0xff] %v8440_v48 }
 0x23c   : > { %v8442_v19 = vpop.permute.xlu2 %1423  ;;  %v8444_v40 = vpop.permute.xlu0 %1354 }
 0x23d   : > { %12357 = vst [vmem:[#allocation47_spill] sm:$0xff] %v8442_v19  ;;  %v8446_v23 = vpop.permute.xlu1 %1356 }
 0x23e   : > { %12358 = vst [vmem:[#allocation48_spill] sm:$0xff] %v8444_v40  ;;  %v1553_v40 = vstv %s6776_s13  ;;  %s6780_s13 = sld [smem:[#allocation5 + $0x20]] }
 0x23f   : > { %12359 = vst [vmem:[#allocation49_spill] sm:$0xff] %v8446_v23  ;;  %v8485_v23 = vld [vmem:[%s7738_s12 + $0x30] sm:$0xff] }
 0x244   : > { %v8448_v22 = vpop.permute.xlu2 %1429  ;;  %v8450_v62 = vpop.permute.xlu0 %1387 }
 0x245   : > { %12360 = vst [vmem:[#allocation50_spill] sm:$0xff] %v8448_v22  ;;  %v8452_v16 = vpop.permute.xlu1 %1389 }
 0x246   : > { %12361 = vst [vmem:[#allocation51_spill] sm:$0xff] %v8450_v62 }
 0x247   : > { %12362 = vst [vmem:[#allocation52_spill] sm:$0xff] %v8452_v16 }
 0x24c   : > { %v8454_v58 = vpop.permute.xlu2 %1461  ;;  %v8456_v47 = vpop.permute.xlu0 %1393 }
 0x24d   : > { %12363 = vst [vmem:[#allocation53_spill] sm:$0xff] %v8454_v58  ;;  %v8458_v49 = vpop.permute.xlu1 %1421 }
 0x24e   : > { %12364 = vst [vmem:[#allocation54_spill] sm:$0xff] %v8456_v47 }
 0x24f   : > { %12365 = vst [vmem:[#allocation55_spill] sm:$0xff] %v8458_v49 }
 0x254   : > { %v8460_v39 = vpop.permute.xlu0 %1425  ;;  %v1489_v32 = vpop.permute.xlu2 %1488 }
 0x255   : > { %12366 = vst [vmem:[#allocation56_spill] sm:$0xff] %v8460_v39  ;;  %v8462_v60 = vpop.permute.xlu1 %1427  ;;  %v1505_v51 = vmul.f32 %v1489_v32, %v7918_v11 }
 0x256   : > { %12367 = vst [vmem:[#allocation57_spill] sm:$0xff] %v8462_v60 }
 0x257   : > { %v1517_v21 = vmul.f32 %v1516_v45, %v1505_v51 }
 0x259   : > { %1527 = vrot.lane.b32.xlu0 %v1517_v21, %s7520_s29 }
 0x25c   : > { %v8466_v22 = vpop.permute.xlu0 %1457  ;;  %v1495_v39 = vpop.permute.xlu2 %1494 }
 0x25d   : > { %12368 = vst [vmem:[#allocation58_spill] sm:$0xff] %v8466_v22  ;;  %v8468_v58 = vpop.permute.xlu1 %1459  ;;  %v1509_v62 = vmul.f32 %v8380_v27, %v1495_v39 }
 0x25e   : > { %12369 = vst [vmem:[#allocation59_spill] sm:$0xff] %v8468_v58 }
 0x25f   : > { %v1521_v55 = vmul.f32 %v1516_v45, %v1509_v62 }
 0x264   : > { %v8470_v47 = vpop.permute.xlu0 %1463 }
 0x265   : > { %12370 = vst [vmem:[#allocation60_spill] sm:$0xff] %v8470_v47  ;;  %v8472_v19 = vpop.permute.xlu1 %1465 }
 0x266   : > { %12371 = vst [vmem:[#allocation61_spill] sm:$0xff] %v8472_v19 }
 0x26c   : > { %v1491_v49 = vpop.permute.xlu0 %1490 }
 0x26d   : > { %v1493_v16 = vpop.permute.xlu1 %1492  ;;  %v1497_v60 = vsel %vm1496_vm15, %v1489_v32, %v1491_v49 }
 0x26e   : > { %v1499_v11 = vsel %vm1496_vm15, %v1493_v16, %v1495_v39  ;;  %v1498_v37 = vsel %vm1496_vm15, %v1491_v49, %v1493_v16  ;;  %v1506_v21 = vmul.f32 %v8375_v26, %v1497_v60  ;;  %v1510_v16 = vmul.f32 %v8485_v23, %v1489_v32 }
 0x26f   : > { %v1508_v22 = vmul.f32 %v8390_v43, %v1499_v11  ;;  %v1507_v47 = vmul.f32 %v8386_v29, %v1498_v37  ;;  %v1511_v49 = vmul.f32 %v8398_v31, %v1497_v60 }
 0x270   : > { %v1518_v58 = vmul.f32 %v1516_v45, %v1506_v21  ;;  %v1554_v33 = vmul.f32 %v1553_v40, %v1510_v16 }
 0x271   : > { %v1520_v19 = vmul.f32 %v1516_v45, %v1508_v22  ;;  %v1519_v12 = vmul.f32 %v1516_v45, %v1507_v47  ;;  %v1555_v48 = vmul.f32 %v1553_v40, %v1511_v49 }
 0x272   : > { %1529 = vrot.lane.b32.xlu1 %v1518_v58, %s7520_s29  ;;  %v1513_v58 = vmul.f32 %v8413_v38, %v1499_v11 }
 0x273   : > { %1533 = vrot.lane.b32.xlu0 %v1520_v19, %s7520_s29  ;;  %1531 = vrot.lane.b32.xlu2 %v1519_v12, %s7520_s29  ;;  %v1512_v12 = vmul.f32 %v8402_v7, %v1498_v37  ;;  %v1514_v19 = vmul.f32 %v8409_v24, %v1495_v39  ;;  %v1625_v37 = vstv %s6778_s1  ;;  %s6782_s1 = sld [smem:[#allocation5 + $0x56]] }
 0x274   : > { %v1557_v28 = vmul.f32 %v1553_v40, %v1513_v58 }
 0x275   : > { %v1556_v32 = vmul.f32 %v1553_v40, %v1512_v12  ;;  %v1558_v60 = vmul.f32 %v1553_v40, %v1514_v19  ;;  %v1626_v40 = vmul.f32 %v1625_v37, %v1510_v16  ;;  %v1630_v16 = vmul.f32 %v1625_v37, %v1514_v19 }
 0x27a   : > { %1535 = vrot.lane.b32.xlu1 %v1521_v55, %s7520_s29  ;;  %v1589_v55 = vstv %s6777_s17  ;;  %s6781_s17 = sld [smem:[#allocation5 + $0x3b]] }
 0x27b   : > { %1564 = vrot.lane.b32.xlu2 %v1554_v33, %s7520_s29  ;;  %1566 = vrot.lane.b32.xlu0 %v1555_v48, %s7520_s29  ;;  %v1590_v33 = vmul.f32 %v1589_v55, %v1505_v51  ;;  %v1592_v48 = vmul.f32 %v1589_v55, %v1507_v47  ;;  %v1591_v45 = vmul.f32 %v1589_v55, %v1506_v21  ;;  %v1661_v21 = vld [vmem:[#allocation17 + $0x5] ss:$8 sm:$0xf] }
 0x27c   : > { %v1593_v39 = vmul.f32 %v1589_v55, %v1508_v22  ;;  %v1594_v11 = vmul.f32 %v1589_v55, %v1509_v62  ;;  %v1629_v51 = vmul.f32 %v1625_v37, %v1513_v58  ;;  %v1628_v47 = vmul.f32 %v1625_v37, %v1512_v12 }
 0x27d   : > { %v1663_v22 = vperm.slane %v1661_v21, 0  ;;  %v1665_v62 = vperm.slane %v1661_v21, 2 }
 0x282   : > { %1568 = vrot.lane.b32.xlu1 %v1556_v32, %s7520_s29  ;;  %v1664_v32 = vperm.slane %v1661_v21, 1 }
 0x283   : > { %1570 = vrot.lane.b32.xlu2 %v1557_v28, %s7520_s29  ;;  %1572 = vrot.lane.b32.xlu0 %v1558_v60, %s7520_s29  ;;  %v1627_v28 = vmul.f32 %v1625_v37, %v1511_v49  ;;  %v1666_v49 = vperm.slane %v1661_v21, 3 }
 0x28a   : > { %1600 = vrot.lane.b32.xlu1 %v1590_v33, %s7520_s29 }
 0x28b   : > { %1604 = vrot.lane.b32.xlu0 %v1592_v48, %s7520_s29  ;;  %1602 = vrot.lane.b32.xlu2 %v1591_v45, %s7520_s29 }
 0x292   : > { %1606 = vrot.lane.b32.xlu1 %v1593_v39, %s7520_s29 }
 0x293   : > { %1636 = vrot.lane.b32.xlu0 %v1626_v40, %s7520_s29  ;;  %1608 = vrot.lane.b32.xlu2 %v1594_v11, %s7520_s29 }
 0x29a   : > { %1638 = vrot.lane.b32.xlu1 %v1627_v28, %s7520_s29 }
 0x29b   : > { %1642 = vrot.lane.b32.xlu0 %v1629_v51, %s7520_s29  ;;  %1640 = vrot.lane.b32.xlu2 %v1628_v47, %s7520_s29 }
 0x2a2   : > { %1644 = vrot.lane.b32.xlu1 %v1630_v16, %s7520_s29 }
 0x2a3   : > { %1669 = vrot.lane.b32.xlu0 %v1664_v32, %s7521_s24  ;;  %1667 = vrot.lane.b32.xlu2 %v1663_v22, %s7521_s24  ;;  %v1695_v32 = vstv %s6779_s25  ;;  %v8543_v22 = vld [vmem:[%s7738_s12] sm:$0xff]  ;;  %s7523_s25 = smov 71  }
 0x2aa   : > { %1671 = vrot.lane.b32.xlu1 %v1665_v62, %s7521_s24 }
 0x2ab   : > { %1673 = vrot.lane.b32.xlu2 %v1666_v49, %s7521_s24 }
 0x2cb   : > { %v8516_v60 = vpop.permute.xlu0 %1527 }
 0x2cc   : > { %12374 = vst [vmem:[#allocation64_spill] sm:$0xff] %v8516_v60 }
 0x2cd   : > { %v8512_v12 = vpop.permute.xlu2 %1531 }
 0x2ce   : > { %12372 = vst [vmem:[#allocation62_spill] sm:$0xff] %v8512_v12  ;;  %v1732_v12 = vstv %s6780_s13  ;;  %s6783_s13 = sld [smem:[#allocation5 + $0x6]] }
 0x2d5   : > { %v8514_v58 = vpop.permute.xlu2 %1564 }
 0x2d6   : > { %12373 = vst [vmem:[#allocation63_spill] sm:$0xff] %v8514_v58 }
 0x2dd   : > { %v8518_v19 = vpop.permute.xlu2 %1570 }
 0x2de   : > { %12375 = vst [vmem:[#allocation65_spill] sm:$0xff] %v8518_v19 }
 0x2e4   : > { %v8520_v55 = vpop.permute.xlu1 %1529 }
 0x2e5   : > { %12376 = vst [vmem:[#allocation66_spill] sm:$0xff] %v8520_v55  ;;  %v8522_v33 = vpop.permute.xlu2 %1602  ;;  %v8524_v48 = vpop.permute.xlu0 %1533 }
 0x2e6   : > { %12377 = vst [vmem:[#allocation67_spill] sm:$0xff] %v8522_v33 }
 0x2e7   : > { %12378 = vst [vmem:[#allocation68_spill] sm:$0xff] %v8524_v48 }
 0x2ec   : > { %v8526_v45 = vpop.permute.xlu1 %1535 }
 0x2ed   : > { %12379 = vst [vmem:[#allocation69_spill] sm:$0xff] %v8526_v45  ;;  %v8528_v37 = vpop.permute.xlu2 %1608  ;;  %v8530_v39 = vpop.permute.xlu0 %1566 }
 0x2ee   : > { %12380 = vst [vmem:[#allocation70_spill] sm:$0xff] %v8528_v37 }
 0x2ef   : > { %12381 = vst [vmem:[#allocation71_spill] sm:$0xff] %v8530_v39 }
 0x2f4   : > { %v8532_v40 = vpop.permute.xlu1 %1568 }
 0x2f5   : > { %12382 = vst [vmem:[#allocation72_spill] sm:$0xff] %v8532_v40  ;;  %v8534_v11 = vpop.permute.xlu2 %1640  ;;  %v8536_v28 = vpop.permute.xlu0 %1572 }
 0x2f6   : > { %12383 = vst [vmem:[#allocation73_spill] sm:$0xff] %v8534_v11 }
 0x2f7   : > { %12384 = vst [vmem:[#allocation74_spill] sm:$0xff] %v8536_v28 }
 0x2fc   : > { %v8538_v51 = vpop.permute.xlu1 %1600 }
 0x2fd   : > { %12385 = vst [vmem:[#allocation75_spill] sm:$0xff] %v8538_v51  ;;  %v8540_v47 = vpop.permute.xlu0 %1604  ;;  %v1668_v21 = vpop.permute.xlu2 %1667 }
 0x2fe   : > { %12386 = vst [vmem:[#allocation76_spill] sm:$0xff] %v8540_v47  ;;  %v1684_v16 = vmul.f32 %v8543_v22, %v1668_v21 }
 0x300   : > { %v1696_v62 = vmul.f32 %v1695_v32, %v1684_v16 }
 0x302   : > { %1706 = vrot.lane.b32.xlu0 %v1696_v62, %s7522_s26 }
 0x304   : > { %v8547_v49 = vpop.permute.xlu1 %1606 }
 0x305   : > { %12387 = vst [vmem:[#allocation77_spill] sm:$0xff] %v8547_v49  ;;  %v8549_v11 = vpop.permute.xlu0 %1636  ;;  %v1674_v40 = vpop.permute.xlu2 %1673 }
 0x306   : > { %12388 = vst [vmem:[#allocation78_spill] sm:$0xff] %v8549_v11  ;;  %v1688_v62 = vmul.f32 %v8380_v27, %v1674_v40 }
 0x308   : > { %v1700_v39 = vmul.f32 %v1695_v32, %v1688_v62 }
 0x30c   : > { %v8551_v28 = vpop.permute.xlu1 %1638 }
 0x30d   : > { %12389 = vst [vmem:[#allocation79_spill] sm:$0xff] %v8551_v28  ;;  %v8553_v37 = vpop.permute.xlu0 %1642 }
 0x30e   : > { %12390 = vst [vmem:[#allocation80_spill] sm:$0xff] %v8553_v37 }
 0x314   : > { %v8555_v47 = vpop.permute.xlu1 %1644 }
 0x315   : > { %12391 = vst [vmem:[#allocation81_spill] sm:$0xff] %v8555_v47  ;;  %v1670_v51 = vpop.permute.xlu0 %1669 }
 0x316   : > { %v1676_v33 = vsel %vm1675_vm1, %v1668_v21, %v1670_v51 }
 0x317   : > { %v1685_v19 = vmul.f32 %v8375_v26, %v1676_v33 }
 0x319   : > { %v1697_v58 = vmul.f32 %v1695_v32, %v1685_v19 }
 0x31b   : > { %1708 = vrot.lane.b32.xlu1 %v1697_v58, %s7522_s26  ;;  %v1689_v58 = vmul.f32 %v8485_v23, %v1668_v21 }
 0x31c   : > { %v1672_v49 = vpop.permute.xlu1 %1671 }
 0x31d   : > { %v1677_v11 = vsel %vm1675_vm1, %v1670_v51, %v1672_v49  ;;  %v1678_v28 = vsel %vm1675_vm1, %v1672_v49, %v1674_v40  ;;  %v1690_v51 = vmul.f32 %v8398_v31, %v1676_v33  ;;  %v1733_v60 = vmul.f32 %v1732_v12, %v1689_v58 }
 0x31e   : > { %v1686_v37 = vmul.f32 %v8386_v29, %v1677_v11  ;;  %v1687_v47 = vmul.f32 %v8390_v43, %v1678_v28  ;;  %v1691_v49 = vmul.f32 %v8402_v7, %v1677_v11 }
 0x31f   : > { %v1734_v55 = vmul.f32 %v1732_v12, %v1690_v51 }
 0x320   : > { %v1699_v45 = vmul.f32 %v1695_v32, %v1687_v47  ;;  %v1698_v48 = vmul.f32 %v1695_v32, %v1686_v37  ;;  %v1735_v13 = vmul.f32 %v1732_v12, %v1691_v49 }
 0x322   : > { %1712 = vrot.lane.b32.xlu0 %v1699_v45, %s7522_s26  ;;  %1710 = vrot.lane.b32.xlu2 %v1698_v48, %s7522_s26  ;;  %v1693_v48 = vmul.f32 %v8409_v24, %v1674_v40  ;;  %v1692_v45 = vmul.f32 %v8413_v38, %v1678_v28 }
 0x323   : > { %1714 = vrot.lane.b32.xlu1 %v1700_v39, %s7522_s26  ;;  %v1768_v39 = vstv %s6781_s17  ;;  %s12035_s17 = smov 112  }
 0x324   : > { %v1736_v21 = vmul.f32 %v1732_v12, %v1692_v45  ;;  %v1737_v33 = vmul.f32 %v1732_v12, %v1693_v48  ;;  %v1769_v32 = vmul.f32 %v1768_v39, %v1684_v16  ;;  %v1770_v11 = vmul.f32 %v1768_v39, %v1685_v19 }
 0x325   : > { %v1773_v12 = vmul.f32 %v1768_v39, %v1688_v62 }
 0x32a   : > { %1743 = vrot.lane.b32.xlu2 %v1733_v60, %s7522_s26  ;;  %1745 = vrot.lane.b32.xlu0 %v1734_v55, %s7522_s26  ;;  %v1771_v60 = vmul.f32 %v1768_v39, %v1686_v37  ;;  %v1772_v55 = vmul.f32 %v1768_v39, %v1687_v47  ;;  %v1840_v47 = vld [vmem:[#allocation17 + $0x6] ss:$8 sm:$0xf] }
 0x32b   : > { %1747 = vrot.lane.b32.xlu1 %v1735_v13, %s7522_s26  ;;  %v1804_v13 = vstv %s6782_s1  ;;  %v1844_v62 = vperm.slane %v1840_v47, 2  ;;  %s6784_s1 = sld [smem:[#allocation5 + $0x21]] }
 0x32c   : > { %v1805_v40 = vmul.f32 %v1804_v13, %v1689_v58  ;;  %v1806_v28 = vmul.f32 %v1804_v13, %v1690_v51  ;;  %v1808_v16 = vmul.f32 %v1804_v13, %v1692_v45  ;;  %v1807_v37 = vmul.f32 %v1804_v13, %v1691_v49 }
 0x32d   : > { %v1809_v19 = vmul.f32 %v1804_v13, %v1693_v48  ;;  %v1842_v58 = vperm.slane %v1840_v47, 0  ;;  %v1845_v51 = vperm.slane %v1840_v47, 3 }
 0x332   : > { %1749 = vrot.lane.b32.xlu2 %v1736_v21, %s7522_s26  ;;  %1751 = vrot.lane.b32.xlu0 %v1737_v33, %s7522_s26  ;;  %v1843_v21 = vperm.slane %v1840_v47, 1  ;;  %v1874_v47 = vstv %s6783_s13  ;;  %s6785_s13 = sld [smem:[#allocation5 + $0x3c]] }
 0x333   : > { %1779 = vrot.lane.b32.xlu1 %v1769_v32, %s7522_s26 }
 0x33a   : > { %1783 = vrot.lane.b32.xlu0 %v1771_v60, %s7522_s26  ;;  %1781 = vrot.lane.b32.xlu2 %v1770_v11, %s7522_s26 }
 0x33b   : > { %1785 = vrot.lane.b32.xlu1 %v1772_v55, %s7522_s26 }
 0x342   : > { %1815 = vrot.lane.b32.xlu0 %v1805_v40, %s7522_s26  ;;  %1787 = vrot.lane.b32.xlu2 %v1773_v12, %s7522_s26 }
 0x343   : > { %1817 = vrot.lane.b32.xlu1 %v1806_v28, %s7522_s26 }
 0x34a   : > { %1821 = vrot.lane.b32.xlu0 %v1808_v16, %s7522_s26  ;;  %1819 = vrot.lane.b32.xlu2 %v1807_v37, %s7522_s26 }
 0x34b   : > { %1823 = vrot.lane.b32.xlu1 %v1809_v19, %s7522_s26 }
 0x352   : > { %1848 = vrot.lane.b32.xlu0 %v1843_v21, %s7523_s25  ;;  %1846 = vrot.lane.b32.xlu2 %v1842_v58, %s7523_s25 }
 0x353   : > { %1850 = vrot.lane.b32.xlu1 %v1844_v62, %s7523_s25 }
 0x35a   : > { %1852 = vrot.lane.b32.xlu2 %v1845_v51, %s7523_s25 }
 0x374   : > { %v8596_v45 = vpop.permute.xlu0 %1706 }
 0x375   : > { %12394 = vst [vmem:[#allocation84_spill] sm:$0xff] %v8596_v45 }
 0x37c   : > { %v8592_v49 = vpop.permute.xlu2 %1710 }
 0x37d   : > { %12392 = vst [vmem:[#allocation82_spill] sm:$0xff] %v8592_v49 }
 0x384   : > { %v8594_v48 = vpop.permute.xlu2 %1743 }
 0x385   : > { %12393 = vst [vmem:[#allocation83_spill] sm:$0xff] %v8594_v48 }
 0x38c   : > { %v8598_v39 = vpop.permute.xlu2 %1749 }
 0x38d   : > { %12395 = vst [vmem:[#allocation85_spill] sm:$0xff] %v8598_v39  ;;  %v8600_v33 = vpop.permute.xlu1 %1708 }
 0x38e   : > { %12396 = vst [vmem:[#allocation86_spill] sm:$0xff] %v8600_v33 }
 0x394   : > { %v8602_v32 = vpop.permute.xlu2 %1781  ;;  %v8604_v60 = vpop.permute.xlu0 %1712 }
 0x395   : > { %12397 = vst [vmem:[#allocation87_spill] sm:$0xff] %v8602_v32  ;;  %v8606_v11 = vpop.permute.xlu1 %1714 }
 0x396   : > { %12398 = vst [vmem:[#allocation88_spill] sm:$0xff] %v8604_v60 }
 0x397   : > { %12399 = vst [vmem:[#allocation89_spill] sm:$0xff] %v8606_v11  ;;  %v1911_v11 = vstv %s6784_s1  ;;  %s6786_s1 = sld [smem:[#allocation5 + $0x57]] }
 0x39c   : > { %v8608_v55 = vpop.permute.xlu2 %1787  ;;  %v8610_v13 = vpop.permute.xlu0 %1745 }
 0x39d   : > { %12400 = vst [vmem:[#allocation90_spill] sm:$0xff] %v8608_v55  ;;  %v8612_v40 = vpop.permute.xlu1 %1747 }
 0x39e   : > { %12401 = vst [vmem:[#allocation91_spill] sm:$0xff] %v8610_v13 }
 0x39f   : > { %12402 = vst [vmem:[#allocation92_spill] sm:$0xff] %v8612_v40 }
 0x3a4   : > { %v8614_v12 = vpop.permute.xlu2 %1819  ;;  %v8616_v28 = vpop.permute.xlu0 %1751 }
 0x3a5   : > { %12403 = vst [vmem:[#allocation93_spill] sm:$0xff] %v8614_v12  ;;  %v8618_v16 = vpop.permute.xlu1 %1779 }
 0x3a6   : > { %12404 = vst [vmem:[#allocation94_spill] sm:$0xff] %v8616_v28 }
 0x3a7   : > { %12405 = vst [vmem:[#allocation95_spill] sm:$0xff] %v8618_v16 }
 0x3ac   : > { %v8620_v37 = vpop.permute.xlu0 %1783  ;;  %v1847_v19 = vpop.permute.xlu2 %1846 }
 0x3ad   : > { %12406 = vst [vmem:[#allocation96_spill] sm:$0xff] %v8620_v37  ;;  %v8622_v21 = vpop.permute.xlu1 %1785  ;;  %v1863_v58 = vmul.f32 %v8543_v22, %v1847_v19 }
 0x3ae   : > { %12407 = vst [vmem:[#allocation97_spill] sm:$0xff] %v8622_v21 }
 0x3af   : > { %v1875_v62 = vmul.f32 %v1874_v47, %v1863_v58 }
 0x3b1   : > { %1885 = vrot.lane.b32.xlu0 %v1875_v62, %s12035_s17 }
 0x3b4   : > { %v8626_v51 = vpop.permute.xlu0 %1815  ;;  %v1853_v16 = vpop.permute.xlu2 %1852 }
 0x3b5   : > { %12408 = vst [vmem:[#allocation98_spill] sm:$0xff] %v8626_v51  ;;  %v8628_v12 = vpop.permute.xlu1 %1817  ;;  %v1867_v13 = vmul.f32 %v8380_v27, %v1853_v16 }
 0x3b6   : > { %12409 = vst [vmem:[#allocation99_spill] sm:$0xff] %v8628_v12 }
 0x3b7   : > { %v1879_v60 = vmul.f32 %v1874_v47, %v1867_v13 }
 0x3bc   : > { %v8630_v28 = vpop.permute.xlu0 %1821 }
 0x3bd   : > { %12410 = vst [vmem:[#allocation100_spill] sm:$0xff] %v8630_v28  ;;  %v8632_v55 = vpop.permute.xlu1 %1823 }
 0x3be   : > { %12411 = vst [vmem:[#allocation101_spill] sm:$0xff] %v8632_v55 }
 0x3c4   : > { %v1849_v32 = vpop.permute.xlu0 %1848 }
 0x3c5   : > { %v1851_v37 = vpop.permute.xlu1 %1850  ;;  %v1855_v21 = vsel %vm1854_vm2, %v1847_v19, %v1849_v32 }
 0x3c6   : > { %v1857_v40 = vsel %vm1854_vm2, %v1851_v37, %v1853_v16  ;;  %v1856_v39 = vsel %vm1854_vm2, %v1849_v32, %v1851_v37  ;;  %v1864_v62 = vmul.f32 %v8375_v26, %v1855_v21  ;;  %v1868_v32 = vmul.f32 %v8485_v23, %v1847_v19 }
 0x3c7   : > { %v1866_v51 = vmul.f32 %v8390_v43, %v1857_v40  ;;  %v1865_v12 = vmul.f32 %v8386_v29, %v1856_v39  ;;  %v1869_v37 = vmul.f32 %v8398_v31, %v1855_v21 }
 0x3c8   : > { %v1876_v28 = vmul.f32 %v1874_v47, %v1864_v62  ;;  %v1912_v49 = vmul.f32 %v1911_v11, %v1868_v32 }
 0x3c9   : > { %v1878_v48 = vmul.f32 %v1874_v47, %v1866_v51  ;;  %v1877_v55 = vmul.f32 %v1874_v47, %v1865_v12  ;;  %v1913_v45 = vmul.f32 %v1911_v11, %v1869_v37 }
 0x3ca   : > { %1887 = vrot.lane.b32.xlu1 %v1876_v28, %s12035_s17  ;;  %v1871_v28 = vmul.f32 %v8413_v38, %v1857_v40 }
 0x3cb   : > { %1891 = vrot.lane.b32.xlu0 %v1878_v48, %s12035_s17  ;;  %1889 = vrot.lane.b32.xlu2 %v1877_v55, %s12035_s17  ;;  %v1870_v48 = vmul.f32 %v8402_v7, %v1856_v39  ;;  %v1872_v55 = vmul.f32 %v8409_v24, %v1853_v16  ;;  %v1983_v39 = vstv %s6786_s1  ;;  %s6787_s1 = sld [smem:[#allocation5 + $0x7]] }
 0x3cc   : > { %v1915_v33 = vmul.f32 %v1911_v11, %v1871_v28 }
 0x3cd   : > { %v1914_v19 = vmul.f32 %v1911_v11, %v1870_v48  ;;  %v1916_v21 = vmul.f32 %v1911_v11, %v1872_v55  ;;  %v1984_v11 = vmul.f32 %v1983_v39, %v1868_v32  ;;  %v1988_v32 = vmul.f32 %v1983_v39, %v1872_v55 }
 0x3d2   : > { %1893 = vrot.lane.b32.xlu1 %v1879_v60, %s12035_s17  ;;  %v1947_v60 = vstv %s6785_s13  ;;  %s12051_s13 = smov 72  }
 0x3d3   : > { %1922 = vrot.lane.b32.xlu2 %v1912_v49, %s12035_s17  ;;  %1924 = vrot.lane.b32.xlu0 %v1913_v45, %s12035_s17  ;;  %v1948_v49 = vmul.f32 %v1947_v60, %v1863_v58  ;;  %v1950_v45 = vmul.f32 %v1947_v60, %v1865_v12  ;;  %v1949_v47 = vmul.f32 %v1947_v60, %v1864_v62  ;;  %v2019_v62 = vld [vmem:[#allocation17 + $0x7] ss:$8 sm:$0xf] }
 0x3d4   : > { %v1951_v40 = vmul.f32 %v1947_v60, %v1866_v51  ;;  %v1952_v16 = vmul.f32 %v1947_v60, %v1867_v13  ;;  %v1986_v58 = vmul.f32 %v1983_v39, %v1870_v48  ;;  %v1987_v12 = vmul.f32 %v1983_v39, %v1871_v28 }
 0x3d5   : > { %v2021_v51 = vperm.slane %v2019_v62, 0  ;;  %v2023_v13 = vperm.slane %v2019_v62, 2 }
 0x3da   : > { %1926 = vrot.lane.b32.xlu1 %v1914_v19, %s12035_s17  ;;  %v2022_v19 = vperm.slane %v2019_v62, 1 }
 0x3db   : > { %1928 = vrot.lane.b32.xlu2 %v1915_v33, %s12035_s17  ;;  %1930 = vrot.lane.b32.xlu0 %v1916_v21, %s12035_s17  ;;  %v1985_v33 = vmul.f32 %v1983_v39, %v1869_v37  ;;  %v2024_v37 = vperm.slane %v2019_v62, 3 }
 0x3e2   : > { %1958 = vrot.lane.b32.xlu1 %v1948_v49, %s12035_s17 }
 0x3e3   : > { %1962 = vrot.lane.b32.xlu0 %v1950_v45, %s12035_s17  ;;  %1960 = vrot.lane.b32.xlu2 %v1949_v47, %s12035_s17 }
 0x3ea   : > { %1964 = vrot.lane.b32.xlu1 %v1951_v40, %s12035_s17 }
 0x3eb   : > { %1994 = vrot.lane.b32.xlu0 %v1984_v11, %s12035_s17  ;;  %1966 = vrot.lane.b32.xlu2 %v1952_v16, %s12035_s17 }
 0x3f2   : > { %1996 = vrot.lane.b32.xlu1 %v1985_v33, %s12035_s17 }
 0x3f3   : > { %2000 = vrot.lane.b32.xlu0 %v1987_v12, %s12035_s17  ;;  %1998 = vrot.lane.b32.xlu2 %v1986_v58, %s12035_s17 }
 0x3fa   : > { %2002 = vrot.lane.b32.xlu1 %v1988_v32, %s12035_s17  ;;  %s12055_s17 = smov 111  }
 0x3fb   : > { %2027 = vrot.lane.b32.xlu0 %v2022_v19, %s12051_s13  ;;  %2025 = vrot.lane.b32.xlu2 %v2021_v51, %s12051_s13  ;;  %v2053_v19 = vstv %s6787_s1  ;;  %s6788_s1 = sld [smem:[#allocation5 + $0x22]] }
 0x402   : > { %2029 = vrot.lane.b32.xlu1 %v2023_v13, %s12051_s13 }
 0x403   : > { %2031 = vrot.lane.b32.xlu2 %v2024_v37, %s12051_s13  ;;  %s6789_s13 = sld [smem:[#allocation5 + $0x3d]] }
 0x423   : > { %v8673_v21 = vpop.permute.xlu0 %1885 }
 0x424   : > { %12414 = vst [vmem:[#allocation104_spill] sm:$0xff] %v8673_v21 }
 0x425   : > { %v8669_v48 = vpop.permute.xlu2 %1889 }
 0x426   : > { %12412 = vst [vmem:[#allocation102_spill] sm:$0xff] %v8669_v48 }
 0x42d   : > { %v8671_v28 = vpop.permute.xlu2 %1922 }
 0x42e   : > { %12413 = vst [vmem:[#allocation103_spill] sm:$0xff] %v8671_v28 }
 0x435   : > { %v8675_v55 = vpop.permute.xlu2 %1928 }
 0x436   : > { %12415 = vst [vmem:[#allocation105_spill] sm:$0xff] %v8675_v55 }
 0x43c   : > { %v8677_v60 = vpop.permute.xlu1 %1887 }
 0x43d   : > { %12416 = vst [vmem:[#allocation106_spill] sm:$0xff] %v8677_v60  ;;  %v8679_v49 = vpop.permute.xlu2 %1960  ;;  %v8681_v45 = vpop.permute.xlu0 %1891 }
 0x43e   : > { %12417 = vst [vmem:[#allocation107_spill] sm:$0xff] %v8679_v49 }
 0x43f   : > { %12418 = vst [vmem:[#allocation108_spill] sm:$0xff] %v8681_v45 }
 0x444   : > { %v8683_v47 = vpop.permute.xlu1 %1893 }
 0x445   : > { %12419 = vst [vmem:[#allocation109_spill] sm:$0xff] %v8683_v47  ;;  %v8685_v39 = vpop.permute.xlu2 %1966  ;;  %v8687_v40 = vpop.permute.xlu0 %1924 }
 0x446   : > { %12420 = vst [vmem:[#allocation110_spill] sm:$0xff] %v8685_v39 }
 0x447   : > { %12421 = vst [vmem:[#allocation111_spill] sm:$0xff] %v8687_v40 }
 0x44c   : > { %v8689_v11 = vpop.permute.xlu1 %1926 }
 0x44d   : > { %12422 = vst [vmem:[#allocation112_spill] sm:$0xff] %v8689_v11  ;;  %v8691_v16 = vpop.permute.xlu2 %1998  ;;  %v8693_v33 = vpop.permute.xlu0 %1930 }
 0x44e   : > { %12423 = vst [vmem:[#allocation113_spill] sm:$0xff] %v8691_v16 }
 0x44f   : > { %12424 = vst [vmem:[#allocation114_spill] sm:$0xff] %v8693_v33 }
 0x454   : > { %v8695_v58 = vpop.permute.xlu1 %1958 }
 0x455   : > { %12425 = vst [vmem:[#allocation115_spill] sm:$0xff] %v8695_v58  ;;  %v8697_v12 = vpop.permute.xlu0 %1962  ;;  %v2026_v62 = vpop.permute.xlu2 %2025 }
 0x456   : > { %12426 = vst [vmem:[#allocation116_spill] sm:$0xff] %v8697_v12  ;;  %v2042_v51 = vmul.f32 %v8543_v22, %v2026_v62 }
 0x458   : > { %v2054_v32 = vmul.f32 %v2053_v19, %v2042_v51 }
 0x45a   : > { %2064 = vrot.lane.b32.xlu0 %v2054_v32, %s12055_s17 }
 0x45c   : > { %v8701_v13 = vpop.permute.xlu1 %1964 }
 0x45d   : > { %12427 = vst [vmem:[#allocation117_spill] sm:$0xff] %v8701_v13  ;;  %v8703_v37 = vpop.permute.xlu0 %1994  ;;  %v2032_v55 = vpop.permute.xlu2 %2031 }
 0x45e   : > { %12428 = vst [vmem:[#allocation118_spill] sm:$0xff] %v8703_v37  ;;  %v2046_v32 = vmul.f32 %v8380_v27, %v2032_v55 }
 0x460   : > { %v2058_v28 = vmul.f32 %v2053_v19, %v2046_v32 }
 0x464   : > { %v8705_v16 = vpop.permute.xlu1 %1996 }
 0x465   : > { %12429 = vst [vmem:[#allocation119_spill] sm:$0xff] %v8705_v16  ;;  %v8707_v39 = vpop.permute.xlu0 %2000 }
 0x466   : > { %12430 = vst [vmem:[#allocation120_spill] sm:$0xff] %v8707_v39 }
 0x46c   : > { %v8709_v58 = vpop.permute.xlu1 %2002 }
 0x46d   : > { %12431 = vst [vmem:[#allocation121_spill] sm:$0xff] %v8709_v58  ;;  %v2028_v12 = vpop.permute.xlu0 %2027 }
 0x46e   : > { %v2034_v49 = vsel %vm2033_vm3, %v2026_v62, %v2028_v12 }
 0x46f   : > { %v2043_v33 = vmul.f32 %v8375_v26, %v2034_v49  ;;  %v2048_v45 = vmul.f32 %v8398_v31, %v2034_v49 }
 0x471   : > { %v2055_v11 = vmul.f32 %v2053_v19, %v2043_v33 }
 0x473   : > { %2066 = vrot.lane.b32.xlu1 %v2055_v11, %s12055_s17  ;;  %v2047_v11 = vmul.f32 %v8485_v23, %v2026_v62 }
 0x474   : > { %v2030_v13 = vpop.permute.xlu1 %2029 }
 0x475   : > { %v2035_v37 = vsel %vm2033_vm3, %v2028_v12, %v2030_v13  ;;  %v2036_v39 = vsel %vm2033_vm3, %v2030_v13, %v2032_v55  ;;  %v2090_v12 = vstv %s6788_s1  ;;  %s6790_s1 = sld [smem:[#allocation5 + $0x58]] }
 0x476   : > { %v2044_v16 = vmul.f32 %v8386_v29, %v2035_v37  ;;  %v2045_v58 = vmul.f32 %v8390_v43, %v2036_v39  ;;  %v2049_v13 = vmul.f32 %v8402_v7, %v2035_v37  ;;  %v2092_v48 = vmul.f32 %v2090_v12, %v2048_v45 }
 0x477   : > { %v2091_v21 = vmul.f32 %v2090_v12, %v2047_v11 }
 0x478   : > { %v2056_v40 = vmul.f32 %v2053_v19, %v2044_v16  ;;  %v2057_v47 = vmul.f32 %v2053_v19, %v2045_v58  ;;  %v2093_v60 = vmul.f32 %v2090_v12, %v2049_v13 }
 0x47a   : > { %2070 = vrot.lane.b32.xlu0 %v2057_v47, %s12055_s17  ;;  %2068 = vrot.lane.b32.xlu2 %v2056_v40, %s12055_s17  ;;  %v2051_v47 = vmul.f32 %v8409_v24, %v2032_v55  ;;  %v2126_v40 = vstv %s6789_s13  ;;  %s12071_s13 = smov 73  }
 0x47b   : > { %2072 = vrot.lane.b32.xlu1 %v2058_v28, %s12055_s17  ;;  %v2050_v28 = vmul.f32 %v8413_v38, %v2036_v39  ;;  %v2127_v19 = vmul.f32 %v2126_v40, %v2042_v51  ;;  %v2129_v37 = vmul.f32 %v2126_v40, %v2044_v16  ;;  %v2162_v55 = vstv %s6790_s1  ;;  %s6791_s1 = sld [smem:[#allocation5 + $0x8]] }
 0x47c   : > { %v2095_v49 = vmul.f32 %v2090_v12, %v2051_v47  ;;  %v2131_v39 = vmul.f32 %v2126_v40, %v2046_v32  ;;  %v2164_v51 = vmul.f32 %v2162_v55, %v2048_v45  ;;  %v2167_v16 = vmul.f32 %v2162_v55, %v2051_v47 }
 0x47d   : > { %v2094_v62 = vmul.f32 %v2090_v12, %v2050_v28  ;;  %v2165_v12 = vmul.f32 %v2162_v55, %v2049_v13 }
 0x482   : > { %2101 = vrot.lane.b32.xlu2 %v2091_v21, %s12055_s17  ;;  %2103 = vrot.lane.b32.xlu0 %v2092_v48, %s12055_s17  ;;  %v2128_v21 = vmul.f32 %v2126_v40, %v2043_v33  ;;  %v2130_v48 = vmul.f32 %v2126_v40, %v2045_v58  ;;  %v2166_v33 = vmul.f32 %v2162_v55, %v2050_v28  ;;  %v2198_v58 = vld [vmem:[#allocation17 + $0x20] ss:$8 sm:$0xf] }
 0x483   : > { %2105 = vrot.lane.b32.xlu1 %v2093_v60, %s12055_s17  ;;  %v2163_v60 = vmul.f32 %v2162_v55, %v2047_v11  ;;  %v2200_v11 = vperm.slane %v2198_v58, 0  ;;  %v2202_v32 = vperm.slane %v2198_v58, 2  ;;  %v2203_v45 = vperm.slane %v2198_v58, 3 }
 0x48a   : > { %2107 = vrot.lane.b32.xlu2 %v2094_v62, %s12055_s17  ;;  %2109 = vrot.lane.b32.xlu0 %v2095_v49, %s12055_s17  ;;  %v2201_v62 = vperm.slane %v2198_v58, 1  ;;  %v2232_v58 = vstv %s6791_s1  ;;  %s6792_s1 = sld [smem:[#allocation5 + $0x23]] }
 0x48b   : > { %2137 = vrot.lane.b32.xlu1 %v2127_v19, %s12055_s17 }
 0x492   : > { %2141 = vrot.lane.b32.xlu0 %v2129_v37, %s12055_s17  ;;  %2139 = vrot.lane.b32.xlu2 %v2128_v21, %s12055_s17 }
 0x493   : > { %2143 = vrot.lane.b32.xlu1 %v2130_v48, %s12055_s17 }
 0x49a   : > { %2173 = vrot.lane.b32.xlu0 %v2163_v60, %s12055_s17  ;;  %2145 = vrot.lane.b32.xlu2 %v2131_v39, %s12055_s17 }
 0x49b   : > { %2175 = vrot.lane.b32.xlu1 %v2164_v51, %s12055_s17 }
 0x4a2   : > { %2179 = vrot.lane.b32.xlu0 %v2166_v33, %s12055_s17  ;;  %2177 = vrot.lane.b32.xlu2 %v2165_v12, %s12055_s17 }
 0x4a3   : > { %2181 = vrot.lane.b32.xlu1 %v2167_v16, %s12055_s17  ;;  %s12121_s17 = smov 110  }
 0x4aa   : > { %2206 = vrot.lane.b32.xlu0 %v2201_v62, %s12071_s13  ;;  %2204 = vrot.lane.b32.xlu2 %v2200_v11, %s12071_s13 }
 0x4ab   : > { %2208 = vrot.lane.b32.xlu1 %v2202_v32, %s12071_s13 }
 0x4b2   : > { %2210 = vrot.lane.b32.xlu2 %v2203_v45, %s12071_s13  ;;  %s6793_s13 = sld [smem:[#allocation5 + $0x3e]] }
 0x4cc   : > { %v8750_v28 = vpop.permute.xlu0 %2064 }
 0x4cd   : > { %12434 = vst [vmem:[#allocation124_spill] sm:$0xff] %v8750_v28 }
 0x4d4   : > { %v8746_v13 = vpop.permute.xlu2 %2068 }
 0x4d5   : > { %12432 = vst [vmem:[#allocation122_spill] sm:$0xff] %v8746_v13 }
 0x4dc   : > { %v8748_v47 = vpop.permute.xlu2 %2101 }
 0x4dd   : > { %12433 = vst [vmem:[#allocation123_spill] sm:$0xff] %v8748_v47 }
 0x4e4   : > { %v8752_v40 = vpop.permute.xlu2 %2107 }
 0x4e5   : > { %12435 = vst [vmem:[#allocation125_spill] sm:$0xff] %v8752_v40  ;;  %v8754_v49 = vpop.permute.xlu1 %2066 }
 0x4e6   : > { %12436 = vst [vmem:[#allocation126_spill] sm:$0xff] %v8754_v49 }
 0x4ec   : > { %v8756_v19 = vpop.permute.xlu2 %2139  ;;  %v8758_v21 = vpop.permute.xlu0 %2070 }
 0x4ed   : > { %12437 = vst [vmem:[#allocation127_spill] sm:$0xff] %v8756_v19  ;;  %v8760_v37 = vpop.permute.xlu1 %2072 }
 0x4ee   : > { %12438 = vst [vmem:[#allocation128_spill] sm:$0xff] %v8758_v21 }
 0x4ef   : > { %12439 = vst [vmem:[#allocation129_spill] sm:$0xff] %v8760_v37 }
 0x4f4   : > { %v8762_v48 = vpop.permute.xlu2 %2145  ;;  %v8764_v55 = vpop.permute.xlu0 %2103 }
 0x4f5   : > { %12440 = vst [vmem:[#allocation130_spill] sm:$0xff] %v8762_v48  ;;  %v8766_v60 = vpop.permute.xlu1 %2105 }
 0x4f6   : > { %12441 = vst [vmem:[#allocation131_spill] sm:$0xff] %v8764_v55 }
 0x4f7   : > { %12442 = vst [vmem:[#allocation132_spill] sm:$0xff] %v8766_v60 }
 0x4fc   : > { %v8768_v39 = vpop.permute.xlu2 %2177  ;;  %v8770_v51 = vpop.permute.xlu0 %2109 }
 0x4fd   : > { %12443 = vst [vmem:[#allocation133_spill] sm:$0xff] %v8768_v39  ;;  %v8772_v12 = vpop.permute.xlu1 %2137 }
 0x4fe   : > { %12444 = vst [vmem:[#allocation134_spill] sm:$0xff] %v8770_v51 }
 0x4ff   : > { %12445 = vst [vmem:[#allocation135_spill] sm:$0xff] %v8772_v12 }
 0x504   : > { %v8774_v33 = vpop.permute.xlu0 %2141  ;;  %v2205_v16 = vpop.permute.xlu2 %2204 }
 0x505   : > { %12446 = vst [vmem:[#allocation136_spill] sm:$0xff] %v8774_v33  ;;  %v8776_v62 = vpop.permute.xlu1 %2143  ;;  %v2221_v11 = vmul.f32 %v8543_v22, %v2205_v16 }
 0x506   : > { %12447 = vst [vmem:[#allocation137_spill] sm:$0xff] %v8776_v62 }
 0x507   : > { %v2233_v32 = vmul.f32 %v2232_v58, %v2221_v11 }
 0x509   : > { %2243 = vrot.lane.b32.xlu0 %v2233_v32, %s12121_s17 }
 0x50c   : > { %v8780_v45 = vpop.permute.xlu0 %2173  ;;  %v2211_v33 = vpop.permute.xlu2 %2210 }
 0x50d   : > { %12448 = vst [vmem:[#allocation138_spill] sm:$0xff] %v8780_v45  ;;  %v8782_v39 = vpop.permute.xlu1 %2175  ;;  %v2225_v55 = vmul.f32 %v8380_v27, %v2211_v33  ;;  %v2230_v27 = vmul.f32 %v8409_v24, %v2211_v33 }
 0x50e   : > { %12449 = vst [vmem:[#allocation139_spill] sm:$0xff] %v8782_v39 }
 0x50f   : > { %v2237_v37 = vmul.f32 %v2232_v58, %v2225_v55 }
 0x514   : > { %v8784_v51 = vpop.permute.xlu0 %2179 }
 0x515   : > { %12450 = vst [vmem:[#allocation140_spill] sm:$0xff] %v8784_v51  ;;  %v8786_v19 = vpop.permute.xlu1 %2181 }
 0x516   : > { %12451 = vst [vmem:[#allocation141_spill] sm:$0xff] %v8786_v19 }
 0x51c   : > { %v2207_v12 = vpop.permute.xlu0 %2206 }
 0x51d   : > { %v2209_v48 = vpop.permute.xlu1 %2208  ;;  %v2213_v62 = vsel %vm2212_vm5, %v2205_v16, %v2207_v12 }
 0x51e   : > { %v2215_v60 = vsel %vm2212_vm5, %v2209_v48, %v2211_v33  ;;  %v2214_v40 = vsel %vm2212_vm5, %v2207_v12, %v2209_v48  ;;  %v2222_v32 = vmul.f32 %v8375_v26, %v2213_v62  ;;  %v2227_v48 = vmul.f32 %v8398_v31, %v2213_v62  ;;  %v2377_v62 = vld [vmem:[#allocation17 + $0x21] ss:$8 sm:$0xf] }
 0x51f   : > { %v2224_v45 = vmul.f32 %v8390_v43, %v2215_v60  ;;  %v2223_v39 = vmul.f32 %v8386_v29, %v2214_v40  ;;  %v2226_v26 = vmul.f32 %v8485_v23, %v2205_v16  ;;  %v2269_v12 = vstv %s6792_s1  ;;  %s6794_s1 = sld [smem:[#allocation5 + $0x59]] }
 0x520   : > { %v2234_v51 = vmul.f32 %v2232_v58, %v2222_v32  ;;  %v2271_v43 = vmul.f32 %v2269_v12, %v2227_v48  ;;  %v2228_v29 = vmul.f32 %v8402_v7, %v2214_v40 }
 0x521   : > { %v2236_v47 = vmul.f32 %v2232_v58, %v2224_v45  ;;  %v2235_v19 = vmul.f32 %v2232_v58, %v2223_v39  ;;  %v2270_v21 = vmul.f32 %v2269_v12, %v2226_v26 }
 0x522   : > { %2245 = vrot.lane.b32.xlu1 %v2234_v51, %s12121_s17  ;;  %v2272_v31 = vmul.f32 %v2269_v12, %v2228_v29 }
 0x523   : > { %2249 = vrot.lane.b32.xlu0 %v2236_v47, %s12121_s17  ;;  %2247 = vrot.lane.b32.xlu2 %v2235_v19, %s12121_s17  ;;  %v2229_v47 = vmul.f32 %v8413_v38, %v2215_v60  ;;  %v2274_v19 = vmul.f32 %v2269_v12, %v2230_v27 }
 0x525   : > { %v2273_v51 = vmul.f32 %v2269_v12, %v2229_v47  ;;  %v2341_v24 = vstv %s6794_s1  ;;  %s6796_s1 = sld [smem:[#allocation5 + $0x24]] }
 0x526   : > { %v2343_v33 = vmul.f32 %v2341_v24, %v2227_v48  ;;  %v2345_v58 = vmul.f32 %v2341_v24, %v2229_v47  ;;  %v2382_v48 = vperm.slane %v2377_v62, 3 }
 0x52a   : > { %2251 = vrot.lane.b32.xlu1 %v2237_v37, %s12121_s17  ;;  %v2305_v37 = vstv %s6793_s13  ;;  %s6795_s13 = sld [smem:[#allocation5 + $0x9]] }
 0x52b   : > { %2282 = vrot.lane.b32.xlu0 %v2271_v43, %s12121_s17  ;;  %2280 = vrot.lane.b32.xlu2 %v2270_v21, %s12121_s17  ;;  %v2306_v16 = vmul.f32 %v2305_v37, %v2221_v11  ;;  %v2308_v7 = vmul.f32 %v2305_v37, %v2223_v39  ;;  %v2307_v40 = vmul.f32 %v2305_v37, %v2222_v32  ;;  %v2380_v11 = vperm.slane %v2377_v62, 1 }
 0x52c   : > { %v2309_v38 = vmul.f32 %v2305_v37, %v2224_v45  ;;  %v2342_v21 = vmul.f32 %v2341_v24, %v2226_v26  ;;  %v2310_v60 = vmul.f32 %v2305_v37, %v2225_v55  ;;  %v2344_v39 = vmul.f32 %v2341_v24, %v2228_v29 }
 0x52d   : > { %v2346_v45 = vmul.f32 %v2341_v24, %v2230_v27  ;;  %v2379_v32 = vperm.slane %v2377_v62, 0  ;;  %v2381_v55 = vperm.slane %v2377_v62, 2 }
 0x532   : > { %2284 = vrot.lane.b32.xlu1 %v2272_v31, %s12121_s17 }
 0x533   : > { %2288 = vrot.lane.b32.xlu0 %v2274_v19, %s12121_s17  ;;  %2286 = vrot.lane.b32.xlu2 %v2273_v51, %s12121_s17 }
 0x53a   : > { %2316 = vrot.lane.b32.xlu1 %v2306_v16, %s12121_s17 }
 0x53b   : > { %2320 = vrot.lane.b32.xlu0 %v2308_v7, %s12121_s17  ;;  %2318 = vrot.lane.b32.xlu2 %v2307_v40, %s12121_s17 }
 0x542   : > { %2322 = vrot.lane.b32.xlu1 %v2309_v38, %s12121_s17 }
 0x543   : > { %2352 = vrot.lane.b32.xlu0 %v2342_v21, %s12121_s17  ;;  %2324 = vrot.lane.b32.xlu2 %v2310_v60, %s12121_s17  ;;  %v2410_v60 = vstv %s6795_s13  ;;  %s6797_s13 = sld [smem:[#allocation5 + $0x3f]] }
 0x54a   : > { %2354 = vrot.lane.b32.xlu1 %v2343_v33, %s12121_s17 }
 0x54b   : > { %2358 = vrot.lane.b32.xlu0 %v2345_v58, %s12121_s17  ;;  %2356 = vrot.lane.b32.xlu2 %v2344_v39, %s12121_s17 }
 0x552   : > { %2360 = vrot.lane.b32.xlu1 %v2346_v45, %s12121_s17  ;;  %s6805_s17 = sld [smem:[#allocation5 + $0x41]] }
 0x553   : > { %2385 = vrot.lane.b32.xlu0 %v2380_v11, %s7520_s29  ;;  %2383 = vrot.lane.b32.xlu2 %v2379_v32, %s7520_s29 }
 0x55a   : > { %2387 = vrot.lane.b32.xlu1 %v2381_v55, %s7520_s29 }
 0x55b   : > { %2389 = vrot.lane.b32.xlu2 %v2382_v48, %s7520_s29 }
 0x57b   : > { %v8827_v43 = vpop.permute.xlu0 %2243 }
 0x57c   : > { %12454 = vst [vmem:[#allocation144_spill] sm:$0xff] %v8827_v43 }
 0x57d   : > { %v8823_v26 = vpop.permute.xlu2 %2247 }
 0x57e   : > { %12452 = vst [vmem:[#allocation142_spill] sm:$0xff] %v8823_v26 }
 0x585   : > { %v8825_v12 = vpop.permute.xlu2 %2280 }
 0x586   : > { %12453 = vst [vmem:[#allocation143_spill] sm:$0xff] %v8825_v12 }
 0x58d   : > { %v8829_v29 = vpop.permute.xlu2 %2286 }
 0x58e   : > { %12455 = vst [vmem:[#allocation145_spill] sm:$0xff] %v8829_v29 }
 0x594   : > { %v8831_v27 = vpop.permute.xlu1 %2245 }
 0x595   : > { %12456 = vst [vmem:[#allocation146_spill] sm:$0xff] %v8831_v27  ;;  %v8833_v47 = vpop.permute.xlu0 %2249  ;;  %v8835_v31 = vpop.permute.xlu2 %2318 }
 0x596   : > { %12457 = vst [vmem:[#allocation147_spill] sm:$0xff] %v8833_v47  ;;  %v8894_v47 = vld [vmem:[%s7738_s12 + $0x40] sm:$0xff] }
 0x597   : > { %12458 = vst [vmem:[#allocation148_spill] sm:$0xff] %v8835_v31  ;;  %v8882_v31 = vld [vmem:[%s7738_s12 + $0x18] sm:$0xff] }
 0x59c   : > { %v8837_v19 = vpop.permute.xlu1 %2251 }
 0x59d   : > { %12459 = vst [vmem:[#allocation149_spill] sm:$0xff] %v8837_v19  ;;  %v8839_v51 = vpop.permute.xlu0 %2282  ;;  %v8841_v37 = vpop.permute.xlu2 %2324  ;;  %v2446_v19 = vstv %s6796_s1  ;;  %s6798_s1 = sld [smem:[#allocation5 + $0x5a]] }
 0x59e   : > { %12460 = vst [vmem:[#allocation150_spill] sm:$0xff] %v8839_v51 }
 0x59f   : > { %12461 = vst [vmem:[#allocation151_spill] sm:$0xff] %v8841_v37 }
 0x5a4   : > { %v8843_v16 = vpop.permute.xlu1 %2284 }
 0x5a5   : > { %12462 = vst [vmem:[#allocation152_spill] sm:$0xff] %v8843_v16  ;;  %v8845_v7 = vpop.permute.xlu0 %2288  ;;  %v8847_v40 = vpop.permute.xlu2 %2356 }
 0x5a6   : > { %12463 = vst [vmem:[#allocation153_spill] sm:$0xff] %v8845_v7 }
 0x5a7   : > { %12464 = vst [vmem:[#allocation154_spill] sm:$0xff] %v8847_v40  ;;  %v8867_v40 = vld [vmem:[%s7738_s12 + $0x8] sm:$0xff] }
 0x5ac   : > { %v8849_v24 = vpop.permute.xlu1 %2316 }
 0x5ad   : > { %12465 = vst [vmem:[#allocation155_spill] sm:$0xff] %v8849_v24  ;;  %v8851_v38 = vpop.permute.xlu0 %2320  ;;  %v2384_v21 = vpop.permute.xlu2 %2383 }
 0x5ae   : > { %12466 = vst [vmem:[#allocation156_spill] sm:$0xff] %v8851_v38  ;;  %v2399_v33 = vmul.f32 %v8543_v22, %v2384_v21  ;;  %v8878_v38 = vld [vmem:[%s7738_s12 + $0x10] sm:$0xff] }
 0x5b0   : > { %v2411_v58 = vmul.f32 %v2410_v60, %v2399_v33 }
 0x5b2   : > { %2421 = vrot.lane.b32.xlu0 %v2411_v58, %s7519_s30 }
 0x5b4   : > { %v8855_v39 = vpop.permute.xlu1 %2322 }
 0x5b5   : > { %12467 = vst [vmem:[#allocation157_spill] sm:$0xff] %v8855_v39  ;;  %v8857_v62 = vpop.permute.xlu0 %2352  ;;  %v2390_v7 = vpop.permute.xlu2 %2389 }
 0x5b6   : > { %12468 = vst [vmem:[#allocation158_spill] sm:$0xff] %v8857_v62  ;;  %v8872_v62 = vld [vmem:[%s7738_s12 + $0x20] sm:$0xff] }
 0x5bc   : > { %v8859_v11 = vpop.permute.xlu1 %2354 }
 0x5bd   : > { %12469 = vst [vmem:[#allocation159_spill] sm:$0xff] %v8859_v11  ;;  %v8861_v45 = vpop.permute.xlu0 %2358 }
 0x5be   : > { %12470 = vst [vmem:[#allocation160_spill] sm:$0xff] %v8861_v45  ;;  %v2403_v45 = vmul.f32 %v8872_v62, %v2390_v7 }
 0x5c0   : > { %v2415_v29 = vmul.f32 %v2410_v60, %v2403_v45 }
 0x5c4   : > { %v8863_v32 = vpop.permute.xlu1 %2360 }
 0x5c5   : > { %12471 = vst [vmem:[#allocation161_spill] sm:$0xff] %v8863_v32  ;;  %v2386_v55 = vpop.permute.xlu0 %2385 }
 0x5c6   : > { %v2391_v48 = vsel %vm1537_vm7, %v2384_v21, %v2386_v55 }
 0x5c7   : > { %v2400_v58 = vmul.f32 %v8867_v40, %v2391_v48 }
 0x5c9   : > { %v2412_v39 = vmul.f32 %v2410_v60, %v2400_v58 }
 0x5cb   : > { %2423 = vrot.lane.b32.xlu1 %v2412_v39, %s7519_s30 }
 0x5cc   : > { %v2388_v11 = vpop.permute.xlu1 %2387 }
 0x5cd   : > { %v2392_v32 = vsel %vm1537_vm7, %v2386_v55, %v2388_v11  ;;  %v2393_v37 = vsel %vm1537_vm7, %v2388_v11, %v2390_v7  ;;  %v2404_v11 = vmul.f32 %v8485_v23, %v2384_v21  ;;  %v8890_v55 = vld [vmem:[%s7738_s12 + $0x38] sm:$0xff]  ;;  %v8901_v23 = vld [vmem:[%s7738_s12 + $0x50] sm:$0xff] }
 0x5ce   : > { %v2401_v24 = vmul.f32 %v8878_v38, %v2392_v32  ;;  %v2402_v39 = vmul.f32 %v8882_v31, %v2393_v37  ;;  %v2405_v51 = vmul.f32 %v8890_v55, %v2391_v48  ;;  %v2406_v26 = vmul.f32 %v8894_v47, %v2392_v32 }
 0x5cf   : > { %v2482_v48 = vstv %s6797_s13  ;;  %s6799_s13 = sld [smem:[#allocation5 + $0xa]] }
 0x5d0   : > { %v2413_v16 = vmul.f32 %v2410_v60, %v2401_v24  ;;  %v2414_v12 = vmul.f32 %v2410_v60, %v2402_v39  ;;  %v2448_v60 = vmul.f32 %v2446_v19, %v2405_v51  ;;  %v2449_v43 = vmul.f32 %v2446_v19, %v2406_v26 }
 0x5d1   : > { %v2483_v13 = vmul.f32 %v2482_v48, %v2399_v33 }
 0x5d2   : > { %2427 = vrot.lane.b32.xlu0 %v2414_v12, %s7519_s30  ;;  %2425 = vrot.lane.b32.xlu2 %v2413_v16, %s7519_s30  ;;  %v2447_v12 = vmul.f32 %v2446_v19, %v2404_v11  ;;  %v8905_v16 = vld [vmem:[%s7738_s12 + $0x48] sm:$0xff] }
 0x5d3   : > { %2429 = vrot.lane.b32.xlu1 %v2415_v29, %s7519_s30  ;;  %v2408_v29 = vmul.f32 %v8901_v23, %v2390_v7  ;;  %v2407_v21 = vmul.f32 %v8905_v16, %v2393_v37  ;;  %v2518_v37 = vstv %s6798_s1  ;;  %s6800_s1 = sld [smem:[#allocation5 + $0x25]] }
 0x5d4   : > { %v2519_v7 = vmul.f32 %v2518_v37, %v2404_v11  ;;  %v2520_v33 = vmul.f32 %v2518_v37, %v2405_v51 }
 0x5d5   : > { %v2450_v32 = vmul.f32 %v2446_v19, %v2407_v21  ;;  %v2451_v27 = vmul.f32 %v2446_v19, %v2408_v29  ;;  %v2487_v19 = vmul.f32 %v2482_v48, %v2403_v45 }
 0x5da   : > { %2457 = vrot.lane.b32.xlu2 %v2447_v12, %s7519_s30  ;;  %2459 = vrot.lane.b32.xlu0 %v2448_v60, %s7519_s30  ;;  %v2485_v60 = vmul.f32 %v2482_v48, %v2401_v24  ;;  %v2486_v12 = vmul.f32 %v2482_v48, %v2402_v39  ;;  %v2523_v24 = vmul.f32 %v2518_v37, %v2408_v29 }
 0x5db   : > { %2461 = vrot.lane.b32.xlu1 %v2449_v43, %s7519_s30  ;;  %v2484_v43 = vmul.f32 %v2482_v48, %v2400_v58  ;;  %v2554_v58 = vld [vmem:[#allocation17 + $0x22] ss:$8 sm:$0xf] }
 0x5dc   : > { %v2557_v39 = vperm.slane %v2554_v58, 1  ;;  %v2556_v11 = vperm.slane %v2554_v58, 0  ;;  %v2558_v45 = vperm.slane %v2554_v58, 2  ;;  %v2559_v51 = vperm.slane %v2554_v58, 3 }
 0x5e2   : > { %2463 = vrot.lane.b32.xlu2 %v2450_v32, %s7519_s30  ;;  %2465 = vrot.lane.b32.xlu0 %v2451_v27, %s7519_s30  ;;  %v2522_v27 = vmul.f32 %v2518_v37, %v2407_v21 }
 0x5e3   : > { %2493 = vrot.lane.b32.xlu1 %v2483_v13, %s7519_s30  ;;  %v2521_v13 = vmul.f32 %v2518_v37, %v2406_v26 }
 0x5ea   : > { %2497 = vrot.lane.b32.xlu0 %v2485_v60, %s7519_s30  ;;  %2495 = vrot.lane.b32.xlu2 %v2484_v43, %s7519_s30 }
 0x5eb   : > { %2499 = vrot.lane.b32.xlu1 %v2486_v12, %s7519_s30 }
 0x5f2   : > { %2529 = vrot.lane.b32.xlu0 %v2519_v7, %s7519_s30  ;;  %2501 = vrot.lane.b32.xlu2 %v2487_v19, %s7519_s30 }
 0x5f3   : > { %2531 = vrot.lane.b32.xlu1 %v2520_v33, %s7519_s30 }
 0x5fa   : > { %2535 = vrot.lane.b32.xlu0 %v2522_v27, %s7519_s30  ;;  %2533 = vrot.lane.b32.xlu2 %v2521_v13, %s7519_s30 }
 0x5fb   : > { %2537 = vrot.lane.b32.xlu1 %v2523_v24, %s7519_s30 }
 0x602   : > { %2562 = vrot.lane.b32.xlu0 %v2557_v39, %s7518_s16  ;;  %2560 = vrot.lane.b32.xlu2 %v2556_v11, %s7518_s16  ;;  %v2587_v39 = vstv %s6799_s13  ;;  %s6801_s13 = sld [smem:[#allocation5 + $0x40]] }
 0x603   : > { %2564 = vrot.lane.b32.xlu1 %v2558_v45, %s7518_s16 }
 0x60a   : > { %2566 = vrot.lane.b32.xlu2 %v2559_v51, %s7518_s16 }
 0x624   : > { %v8928_v21 = vpop.permute.xlu0 %2421 }
 0x625   : > { %12474 = vst [vmem:[#allocation164_spill] sm:$0xff] %v8928_v21 }
 0x62c   : > { %v8924_v26 = vpop.permute.xlu2 %2425 }
 0x62d   : > { %12472 = vst [vmem:[#allocation162_spill] sm:$0xff] %v8924_v26 }
 0x634   : > { %v8926_v29 = vpop.permute.xlu2 %2457 }
 0x635   : > { %12473 = vst [vmem:[#allocation163_spill] sm:$0xff] %v8926_v29 }
 0x63c   : > { %v8930_v48 = vpop.permute.xlu2 %2463 }
 0x63d   : > { %12475 = vst [vmem:[#allocation165_spill] sm:$0xff] %v8930_v48  ;;  %v8932_v32 = vpop.permute.xlu1 %2423 }
 0x63e   : > { %12476 = vst [vmem:[#allocation166_spill] sm:$0xff] %v8932_v32 }
 0x644   : > { %v8934_v43 = vpop.permute.xlu2 %2495  ;;  %v8936_v60 = vpop.permute.xlu0 %2427 }
 0x645   : > { %12477 = vst [vmem:[#allocation167_spill] sm:$0xff] %v8934_v43  ;;  %v8938_v12 = vpop.permute.xlu1 %2429 }
 0x646   : > { %12478 = vst [vmem:[#allocation168_spill] sm:$0xff] %v8936_v60  ;;  %v2623_v60 = vstv %s6800_s1  ;;  %s6802_s1 = sld [smem:[#allocation5 + $0x5b]] }
 0x647   : > { %12479 = vst [vmem:[#allocation169_spill] sm:$0xff] %v8938_v12 }
 0x64c   : > { %v8940_v37 = vpop.permute.xlu2 %2501  ;;  %v8942_v7 = vpop.permute.xlu0 %2459 }
 0x64d   : > { %12480 = vst [vmem:[#allocation170_spill] sm:$0xff] %v8940_v37  ;;  %v8944_v19 = vpop.permute.xlu1 %2461 }
 0x64e   : > { %12481 = vst [vmem:[#allocation171_spill] sm:$0xff] %v8942_v7 }
 0x64f   : > { %12482 = vst [vmem:[#allocation172_spill] sm:$0xff] %v8944_v19 }
 0x654   : > { %v8946_v33 = vpop.permute.xlu2 %2533  ;;  %v8948_v13 = vpop.permute.xlu0 %2465 }
 0x655   : > { %12483 = vst [vmem:[#allocation173_spill] sm:$0xff] %v8946_v33  ;;  %v8950_v27 = vpop.permute.xlu1 %2493 }
 0x656   : > { %12484 = vst [vmem:[#allocation174_spill] sm:$0xff] %v8948_v13 }
 0x657   : > { %12485 = vst [vmem:[#allocation175_spill] sm:$0xff] %v8950_v27 }
 0x65c   : > { %v8952_v24 = vpop.permute.xlu0 %2497  ;;  %v2561_v58 = vpop.permute.xlu2 %2560 }
 0x65d   : > { %12486 = vst [vmem:[#allocation176_spill] sm:$0xff] %v8952_v24  ;;  %v8954_v11 = vpop.permute.xlu1 %2499  ;;  %v2576_v45 = vmul.f32 %v8543_v22, %v2561_v58 }
 0x65e   : > { %12487 = vst [vmem:[#allocation177_spill] sm:$0xff] %v8954_v11 }
 0x65f   : > { %v2588_v51 = vmul.f32 %v2587_v39, %v2576_v45 }
 0x661   : > { %2598 = vrot.lane.b32.xlu0 %v2588_v51, %s7517_s21 }
 0x664   : > { %v8958_v43 = vpop.permute.xlu0 %2529  ;;  %v2567_v27 = vpop.permute.xlu2 %2566 }
 0x665   : > { %12488 = vst [vmem:[#allocation178_spill] sm:$0xff] %v8958_v43  ;;  %v8960_v37 = vpop.permute.xlu1 %2531  ;;  %v2580_v48 = vmul.f32 %v8872_v62, %v2567_v27 }
 0x666   : > { %12489 = vst [vmem:[#allocation179_spill] sm:$0xff] %v8960_v37 }
 0x667   : > { %v2592_v26 = vmul.f32 %v2587_v39, %v2580_v48 }
 0x66c   : > { %v8962_v33 = vpop.permute.xlu0 %2535 }
 0x66d   : > { %12490 = vst [vmem:[#allocation180_spill] sm:$0xff] %v8962_v33  ;;  %v8964_v13 = vpop.permute.xlu1 %2537 }
 0x66e   : > { %12491 = vst [vmem:[#allocation181_spill] sm:$0xff] %v8964_v13 }
 0x674   : > { %v2563_v24 = vpop.permute.xlu0 %2562 }
 0x675   : > { %v2565_v29 = vpop.permute.xlu1 %2564  ;;  %v2568_v11 = vsel %vm1358_vm8, %v2561_v58, %v2563_v24 }
 0x676   : > { %v2570_v22 = vsel %vm1358_vm8, %v2565_v29, %v2567_v27  ;;  %v2569_v7 = vsel %vm1358_vm8, %v2563_v24, %v2565_v29  ;;  %v2577_v51 = vmul.f32 %v8867_v40, %v2568_v11  ;;  %v2582_v29 = vmul.f32 %v8890_v55, %v2568_v11  ;;  %v8978_v24 = vld [vmem:[%s7738_s12 + $0x30] sm:$0xff] }
 0x677   : > { %v2579_v43 = vmul.f32 %v8882_v31, %v2570_v22  ;;  %v2578_v33 = vmul.f32 %v8878_v38, %v2569_v7  ;;  %v2581_v12 = vmul.f32 %v8978_v24, %v2561_v58 }
 0x678   : > { %v2589_v37 = vmul.f32 %v2587_v39, %v2577_v51  ;;  %v2625_v21 = vmul.f32 %v2623_v60, %v2582_v29 }
 0x679   : > { %v2591_v13 = vmul.f32 %v2587_v39, %v2579_v43  ;;  %v2590_v19 = vmul.f32 %v2587_v39, %v2578_v33  ;;  %v2624_v32 = vmul.f32 %v2623_v60, %v2581_v12 }
 0x67a   : > { %2600 = vrot.lane.b32.xlu1 %v2589_v37, %s7517_s21  ;;  %v2583_v37 = vmul.f32 %v8894_v47, %v2569_v7 }
 0x67b   : > { %2604 = vrot.lane.b32.xlu0 %v2591_v13, %s7517_s21  ;;  %2602 = vrot.lane.b32.xlu2 %v2590_v19, %s7517_s21  ;;  %v2585_v19 = vmul.f32 %v8901_v23, %v2567_v27  ;;  %v2584_v13 = vmul.f32 %v8905_v16, %v2570_v22 }
 0x67c   : > { %v2626_v11 = vmul.f32 %v2623_v60, %v2583_v37 }
 0x67d   : > { %v2628_v28 = vmul.f32 %v2623_v60, %v2585_v19  ;;  %v2627_v58 = vmul.f32 %v2623_v60, %v2584_v13 }
 0x682   : > { %2606 = vrot.lane.b32.xlu1 %v2592_v26, %s7517_s21  ;;  %v2659_v26 = vstv %s6801_s13  ;;  %s7529_s13 = smov 121  }
 0x683   : > { %2636 = vrot.lane.b32.xlu0 %v2625_v21, %s7517_s21  ;;  %2634 = vrot.lane.b32.xlu2 %v2624_v32, %s7517_s21  ;;  %v2660_v21 = vmul.f32 %v2659_v26, %v2576_v45  ;;  %v2662_v7 = vmul.f32 %v2659_v26, %v2578_v33  ;;  %v2661_v39 = vmul.f32 %v2659_v26, %v2577_v51  ;;  %v2695_v32 = vstv %s6802_s1  ;;  %v2731_v51 = vld [vmem:[#allocation17 + $0x23] ss:$8 sm:$0xf]  ;;  %s6803_s1 = sld [smem:[#allocation5 + $0xb]] }
 0x684   : > { %v2663_v27 = vmul.f32 %v2659_v26, %v2579_v43  ;;  %v2696_v60 = vmul.f32 %v2695_v32, %v2581_v12  ;;  %v2664_v22 = vmul.f32 %v2659_v26, %v2580_v48  ;;  %v2699_v45 = vmul.f32 %v2695_v32, %v2584_v13 }
 0x685   : > { %v2698_v33 = vmul.f32 %v2695_v32, %v2583_v37  ;;  %v2700_v43 = vmul.f32 %v2695_v32, %v2585_v19  ;;  %v2733_v12 = vperm.slane %v2731_v51, 0  ;;  %v2735_v48 = vperm.slane %v2731_v51, 2 }
 0x68a   : > { %2638 = vrot.lane.b32.xlu1 %v2626_v11, %s7517_s21  ;;  %v2734_v11 = vperm.slane %v2731_v51, 1 }
 0x68b   : > { %2642 = vrot.lane.b32.xlu0 %v2628_v28, %s7517_s21  ;;  %2640 = vrot.lane.b32.xlu2 %v2627_v58, %s7517_s21  ;;  %v2697_v28 = vmul.f32 %v2695_v32, %v2582_v29  ;;  %v2736_v58 = vperm.slane %v2731_v51, 3 }
 0x692   : > { %2670 = vrot.lane.b32.xlu1 %v2660_v21, %s7517_s21 }
 0x693   : > { %2674 = vrot.lane.b32.xlu0 %v2662_v7, %s7517_s21  ;;  %2672 = vrot.lane.b32.xlu2 %v2661_v39, %s7517_s21 }
 0x69a   : > { %2676 = vrot.lane.b32.xlu1 %v2663_v27, %s7517_s21 }
 0x69b   : > { %2706 = vrot.lane.b32.xlu0 %v2696_v60, %s7517_s21  ;;  %2678 = vrot.lane.b32.xlu2 %v2664_v22, %s7517_s21 }
 0x6a2   : > { %2708 = vrot.lane.b32.xlu1 %v2697_v28, %s7517_s21 }
 0x6a3   : > { %2712 = vrot.lane.b32.xlu0 %v2699_v45, %s7517_s21  ;;  %2710 = vrot.lane.b32.xlu2 %v2698_v33, %s7517_s21 }
 0x6aa   : > { %2714 = vrot.lane.b32.xlu1 %v2700_v43, %s7517_s21  ;;  %v9031_v43 = vld [vmem:[%s7738_s12] sm:$0xff] }
 0x6ab   : > { %2739 = vrot.lane.b32.xlu0 %v2734_v11, %s7529_s13  ;;  %2737 = vrot.lane.b32.xlu2 %v2733_v12, %s7529_s13  ;;  %v2765_v11 = vstv %s6803_s1  ;;  %s6804_s1 = sld [smem:[#allocation5 + $0x26]] }
 0x6b2   : > { %2741 = vrot.lane.b32.xlu1 %v2735_v48, %s7529_s13 }
 0x6b3   : > { %2743 = vrot.lane.b32.xlu2 %v2736_v58, %s7529_s13  ;;  %s7530_s13 = smov 62  }
 0x6d3   : > { %v9004_v13 = vpop.permute.xlu0 %2598 }
 0x6d4   : > { %12494 = vst [vmem:[#allocation184_spill] sm:$0xff] %v9004_v13  ;;  %v2802_v13 = vstv %s6804_s1  ;;  %s6806_s1 = sld [smem:[#allocation5 + $0x5c]] }
 0x6d5   : > { %v9000_v29 = vpop.permute.xlu2 %2602 }
 0x6d6   : > { %12492 = vst [vmem:[#allocation182_spill] sm:$0xff] %v9000_v29 }
 0x6dd   : > { %v9002_v37 = vpop.permute.xlu2 %2634 }
 0x6de   : > { %12493 = vst [vmem:[#allocation183_spill] sm:$0xff] %v9002_v37 }
 0x6e5   : > { %v9006_v26 = vpop.permute.xlu2 %2640 }
 0x6e6   : > { %12495 = vst [vmem:[#allocation185_spill] sm:$0xff] %v9006_v26 }
 0x6ec   : > { %v9008_v19 = vpop.permute.xlu1 %2600 }
 0x6ed   : > { %12496 = vst [vmem:[#allocation186_spill] sm:$0xff] %v9008_v19  ;;  %v9010_v21 = vpop.permute.xlu0 %2604  ;;  %v9012_v7 = vpop.permute.xlu2 %2672 }
 0x6ee   : > { %12497 = vst [vmem:[#allocation187_spill] sm:$0xff] %v9010_v21 }
 0x6ef   : > { %12498 = vst [vmem:[#allocation188_spill] sm:$0xff] %v9012_v7 }
 0x6f4   : > { %v9014_v39 = vpop.permute.xlu1 %2606 }
 0x6f5   : > { %12499 = vst [vmem:[#allocation189_spill] sm:$0xff] %v9014_v39  ;;  %v9016_v32 = vpop.permute.xlu0 %2636  ;;  %v9018_v27 = vpop.permute.xlu2 %2678 }
 0x6f6   : > { %12500 = vst [vmem:[#allocation190_spill] sm:$0xff] %v9016_v32 }
 0x6f7   : > { %12501 = vst [vmem:[#allocation191_spill] sm:$0xff] %v9018_v27 }
 0x6fc   : > { %v9020_v60 = vpop.permute.xlu1 %2638 }
 0x6fd   : > { %12502 = vst [vmem:[#allocation192_spill] sm:$0xff] %v9020_v60  ;;  %v9022_v22 = vpop.permute.xlu0 %2642  ;;  %v9024_v28 = vpop.permute.xlu2 %2710 }
 0x6fe   : > { %12503 = vst [vmem:[#allocation193_spill] sm:$0xff] %v9022_v22 }
 0x6ff   : > { %12504 = vst [vmem:[#allocation194_spill] sm:$0xff] %v9024_v28 }
 0x704   : > { %v9026_v45 = vpop.permute.xlu1 %2670 }
 0x705   : > { %12505 = vst [vmem:[#allocation195_spill] sm:$0xff] %v9026_v45  ;;  %v9028_v33 = vpop.permute.xlu0 %2674  ;;  %v2738_v51 = vpop.permute.xlu2 %2737 }
 0x706   : > { %12506 = vst [vmem:[#allocation196_spill] sm:$0xff] %v9028_v33  ;;  %v2754_v12 = vmul.f32 %v9031_v43, %v2738_v51 }
 0x708   : > { %v2766_v48 = vmul.f32 %v2765_v11, %v2754_v12 }
 0x70a   : > { %2776 = vrot.lane.b32.xlu0 %v2766_v48, %s7530_s13 }
 0x70c   : > { %v9035_v58 = vpop.permute.xlu1 %2676 }
 0x70d   : > { %12507 = vst [vmem:[#allocation197_spill] sm:$0xff] %v9035_v58  ;;  %v9037_v27 = vpop.permute.xlu0 %2706  ;;  %v2744_v60 = vpop.permute.xlu2 %2743 }
 0x70e   : > { %12508 = vst [vmem:[#allocation198_spill] sm:$0xff] %v9037_v27  ;;  %v2758_v48 = vmul.f32 %v8872_v62, %v2744_v60 }
 0x710   : > { %v2770_v39 = vmul.f32 %v2765_v11, %v2758_v48 }
 0x714   : > { %v9039_v28 = vpop.permute.xlu1 %2708 }
 0x715   : > { %12509 = vst [vmem:[#allocation199_spill] sm:$0xff] %v9039_v28  ;;  %v9041_v7 = vpop.permute.xlu0 %2712 }
 0x716   : > { %12510 = vst [vmem:[#allocation200_spill] sm:$0xff] %v9041_v7 }
 0x71c   : > { %v9043_v33 = vpop.permute.xlu1 %2714 }
 0x71d   : > { %12511 = vst [vmem:[#allocation201_spill] sm:$0xff] %v9043_v33  ;;  %v2740_v45 = vpop.permute.xlu0 %2739 }
 0x71e   : > { %v2746_v22 = vsel %vm2745_vm9, %v2738_v51, %v2740_v45 }
 0x71f   : > { %v2755_v26 = vmul.f32 %v8867_v40, %v2746_v22  ;;  %v2760_v29 = vmul.f32 %v8890_v55, %v2746_v22 }
 0x721   : > { %v2767_v37 = vmul.f32 %v2765_v11, %v2755_v26 }
 0x723   : > { %2778 = vrot.lane.b32.xlu1 %v2767_v37, %s7530_s13  ;;  %v2759_v37 = vmul.f32 %v8978_v24, %v2738_v51 }
 0x724   : > { %v2742_v58 = vpop.permute.xlu1 %2741 }
 0x725   : > { %v2747_v27 = vsel %vm2745_vm9, %v2740_v45, %v2742_v58  ;;  %v2748_v32 = vsel %vm2745_vm9, %v2742_v58, %v2744_v60  ;;  %v2804_v58 = vmul.f32 %v2802_v13, %v2760_v29  ;;  %v2803_v19 = vmul.f32 %v2802_v13, %v2759_v37 }
 0x726   : > { %v2756_v28 = vmul.f32 %v8878_v38, %v2747_v27  ;;  %v2757_v7 = vmul.f32 %v8882_v31, %v2748_v32  ;;  %v2761_v45 = vmul.f32 %v8894_v47, %v2747_v27  ;;  %vm1716_vm9 = vcmask 965632  }
 0x728   : > { %v2768_v33 = vmul.f32 %v2765_v11, %v2756_v28  ;;  %v2769_v21 = vmul.f32 %v2765_v11, %v2757_v7  ;;  %v2805_v49 = vmul.f32 %v2802_v13, %v2761_v45 }
 0x72a   : > { %2782 = vrot.lane.b32.xlu0 %v2769_v21, %s7530_s13  ;;  %2780 = vrot.lane.b32.xlu2 %v2768_v33, %s7530_s13  ;;  %v2763_v21 = vmul.f32 %v8901_v23, %v2744_v60  ;;  %v2838_v33 = vstv %s6805_s17  ;;  %s6807_s17 = sld [smem:[#allocation5 + $0xc]] }
 0x72b   : > { %2784 = vrot.lane.b32.xlu1 %v2770_v39, %s7530_s13  ;;  %v2762_v39 = vmul.f32 %v8905_v16, %v2748_v32  ;;  %v2839_v11 = vmul.f32 %v2838_v33, %v2754_v12  ;;  %v2841_v27 = vmul.f32 %v2838_v33, %v2756_v28 }
 0x72c   : > { %v2807_v22 = vmul.f32 %v2802_v13, %v2763_v21 }
 0x72d   : > { %v2806_v51 = vmul.f32 %v2802_v13, %v2762_v39  ;;  %v2843_v13 = vmul.f32 %v2838_v33, %v2758_v48 }
 0x732   : > { %2813 = vrot.lane.b32.xlu2 %v2803_v19, %s7530_s13  ;;  %2815 = vrot.lane.b32.xlu0 %v2804_v58, %s7530_s13  ;;  %v2840_v19 = vmul.f32 %v2838_v33, %v2755_v26  ;;  %v2842_v58 = vmul.f32 %v2838_v33, %v2757_v7  ;;  %v2910_v7 = vld [vmem:[#allocation17 + $0x24] ss:$8 sm:$0xf] }
 0x733   : > { %2817 = vrot.lane.b32.xlu1 %v2805_v49, %s7530_s13  ;;  %v2874_v49 = vstv %s6806_s1  ;;  %v2914_v48 = vperm.slane %v2910_v7, 2  ;;  %s6809_s1 = sld [smem:[#allocation5 + $0x42]] }
 0x734   : > { %v2875_v32 = vmul.f32 %v2874_v49, %v2759_v37  ;;  %v2876_v60 = vmul.f32 %v2874_v49, %v2760_v29  ;;  %v2877_v12 = vmul.f32 %v2874_v49, %v2761_v45  ;;  %v2878_v26 = vmul.f32 %v2874_v49, %v2762_v39 }
 0x735   : > { %v2879_v28 = vmul.f32 %v2874_v49, %v2763_v21  ;;  %v2912_v37 = vperm.slane %v2910_v7, 0  ;;  %v2915_v29 = vperm.slane %v2910_v7, 3 }
 0x73a   : > { %2819 = vrot.lane.b32.xlu2 %v2806_v51, %s7530_s13  ;;  %2821 = vrot.lane.b32.xlu0 %v2807_v22, %s7530_s13  ;;  %v2913_v51 = vperm.slane %v2910_v7, 1  ;;  %v2943_v7 = vstv %s6807_s17  ;;  %s6810_s17 = sld [smem:[#allocation5 + $0x5d]] }
 0x73b   : > { %2849 = vrot.lane.b32.xlu1 %v2839_v11, %s7530_s13 }
 0x742   : > { %2853 = vrot.lane.b32.xlu0 %v2841_v27, %s7530_s13  ;;  %2851 = vrot.lane.b32.xlu2 %v2840_v19, %s7530_s13 }
 0x743   : > { %2855 = vrot.lane.b32.xlu1 %v2842_v58, %s7530_s13 }
 0x74a   : > { %2885 = vrot.lane.b32.xlu0 %v2875_v32, %s7530_s13  ;;  %2857 = vrot.lane.b32.xlu2 %v2843_v13, %s7530_s13 }
 0x74b   : > { %2887 = vrot.lane.b32.xlu1 %v2876_v60, %s7530_s13 }
 0x752   : > { %2891 = vrot.lane.b32.xlu0 %v2878_v26, %s7530_s13  ;;  %2889 = vrot.lane.b32.xlu2 %v2877_v12, %s7530_s13 }
 0x753   : > { %2893 = vrot.lane.b32.xlu1 %v2879_v28, %s7530_s13  ;;  %s6808_s13 = sld [smem:[#allocation5 + $0x27]] }
 0x75a   : > { %2918 = vrot.lane.b32.xlu0 %v2913_v51, %s7515_s18  ;;  %2916 = vrot.lane.b32.xlu2 %v2912_v37, %s7515_s18 }
 0x75b   : > { %2920 = vrot.lane.b32.xlu1 %v2914_v48, %s7515_s18 }
 0x762   : > { %2922 = vrot.lane.b32.xlu2 %v2915_v29, %s7515_s18 }
 0x77c   : > { %v9081_v39 = vpop.permute.xlu0 %2776 }
 0x77d   : > { %12514 = vst [vmem:[#allocation204_spill] sm:$0xff] %v9081_v39 }
 0x784   : > { %v9077_v45 = vpop.permute.xlu2 %2780 }
 0x785   : > { %12512 = vst [vmem:[#allocation202_spill] sm:$0xff] %v9077_v45 }
 0x78c   : > { %v9079_v21 = vpop.permute.xlu2 %2813 }
 0x78d   : > { %12513 = vst [vmem:[#allocation203_spill] sm:$0xff] %v9079_v21 }
 0x794   : > { %v9083_v33 = vpop.permute.xlu2 %2819 }
 0x795   : > { %12515 = vst [vmem:[#allocation205_spill] sm:$0xff] %v9083_v33  ;;  %v9085_v22 = vpop.permute.xlu1 %2778 }
 0x796   : > { %12516 = vst [vmem:[#allocation206_spill] sm:$0xff] %v9085_v22 }
 0x79c   : > { %v9087_v11 = vpop.permute.xlu2 %2851  ;;  %v9089_v19 = vpop.permute.xlu0 %2782 }
 0x79d   : > { %12517 = vst [vmem:[#allocation207_spill] sm:$0xff] %v9087_v11  ;;  %v9091_v27 = vpop.permute.xlu1 %2784 }
 0x79e   : > { %12518 = vst [vmem:[#allocation208_spill] sm:$0xff] %v9089_v19 }
 0x79f   : > { %12519 = vst [vmem:[#allocation209_spill] sm:$0xff] %v9091_v27 }
 0x7a4   : > { %v9093_v58 = vpop.permute.xlu2 %2857  ;;  %v9095_v49 = vpop.permute.xlu0 %2815 }
 0x7a5   : > { %12520 = vst [vmem:[#allocation210_spill] sm:$0xff] %v9093_v58  ;;  %v9097_v32 = vpop.permute.xlu1 %2817 }
 0x7a6   : > { %12521 = vst [vmem:[#allocation211_spill] sm:$0xff] %v9095_v49  ;;  %v2979_v49 = vstv %s6808_s13  ;;  %s6811_s13 = sld [smem:[#allocation5 + $0xd]] }
 0x7a7   : > { %12522 = vst [vmem:[#allocation212_spill] sm:$0xff] %v9097_v32 }
 0x7ac   : > { %v9099_v13 = vpop.permute.xlu2 %2889  ;;  %v9101_v60 = vpop.permute.xlu0 %2821 }
 0x7ad   : > { %12523 = vst [vmem:[#allocation213_spill] sm:$0xff] %v9099_v13  ;;  %v9103_v12 = vpop.permute.xlu1 %2849 }
 0x7ae   : > { %12524 = vst [vmem:[#allocation214_spill] sm:$0xff] %v9101_v60 }
 0x7af   : > { %12525 = vst [vmem:[#allocation215_spill] sm:$0xff] %v9103_v12 }
 0x7b4   : > { %v9105_v26 = vpop.permute.xlu0 %2853  ;;  %v2917_v28 = vpop.permute.xlu2 %2916 }
 0x7b5   : > { %12526 = vst [vmem:[#allocation216_spill] sm:$0xff] %v9105_v26  ;;  %v9107_v51 = vpop.permute.xlu1 %2855  ;;  %v2932_v37 = vmul.f32 %v9031_v43, %v2917_v28 }
 0x7b6   : > { %12527 = vst [vmem:[#allocation217_spill] sm:$0xff] %v9107_v51 }
 0x7b7   : > { %v2944_v48 = vmul.f32 %v2943_v7, %v2932_v37 }
 0x7b9   : > { %2954 = vrot.lane.b32.xlu0 %v2944_v48, %s7513_s27 }
 0x7bc   : > { %v9111_v29 = vpop.permute.xlu0 %2885  ;;  %v2923_v12 = vpop.permute.xlu2 %2922 }
 0x7bd   : > { %12528 = vst [vmem:[#allocation218_spill] sm:$0xff] %v9111_v29  ;;  %v9113_v58 = vpop.permute.xlu1 %2887  ;;  %v2936_v21 = vmul.f32 %v8872_v62, %v2923_v12 }
 0x7be   : > { %12529 = vst [vmem:[#allocation219_spill] sm:$0xff] %v9113_v58 }
 0x7bf   : > { %v2948_v27 = vmul.f32 %v2943_v7, %v2936_v21 }
 0x7c4   : > { %v9115_v13 = vpop.permute.xlu0 %2891 }
 0x7c5   : > { %12530 = vst [vmem:[#allocation220_spill] sm:$0xff] %v9115_v13  ;;  %v9117_v60 = vpop.permute.xlu1 %2893 }
 0x7c6   : > { %12531 = vst [vmem:[#allocation221_spill] sm:$0xff] %v9117_v60 }
 0x7cc   : > { %v2919_v26 = vpop.permute.xlu0 %2918 }
 0x7cd   : > { %v2921_v11 = vpop.permute.xlu1 %2920  ;;  %v2924_v32 = vsel %vm1000_vm10, %v2917_v28, %v2919_v26 }
 0x7ce   : > { %v2926_v51 = vsel %vm1000_vm10, %v2921_v11, %v2923_v12  ;;  %v2925_v43 = vsel %vm1000_vm10, %v2919_v26, %v2921_v11  ;;  %v2933_v48 = vmul.f32 %v8867_v40, %v2924_v32  ;;  %v2938_v11 = vmul.f32 %v8890_v55, %v2924_v32 }
 0x7cf   : > { %v2935_v29 = vmul.f32 %v8882_v31, %v2926_v51  ;;  %v2934_v58 = vmul.f32 %v8878_v38, %v2925_v43  ;;  %v2937_v26 = vmul.f32 %v8978_v24, %v2917_v28 }
 0x7d0   : > { %v2945_v13 = vmul.f32 %v2943_v7, %v2933_v48  ;;  %v2981_v19 = vmul.f32 %v2979_v49, %v2938_v11 }
 0x7d1   : > { %v2947_v33 = vmul.f32 %v2943_v7, %v2935_v29  ;;  %v2946_v60 = vmul.f32 %v2943_v7, %v2934_v58  ;;  %v2980_v45 = vmul.f32 %v2979_v49, %v2937_v26 }
 0x7d2   : > { %2956 = vrot.lane.b32.xlu1 %v2945_v13, %s7513_s27  ;;  %v2939_v13 = vmul.f32 %v8894_v47, %v2925_v43  ;;  %v3087_v43 = vstv %s6811_s13  ;;  %s6814_s13 = sld [smem:[#allocation5 + $0x5e]] }
 0x7d3   : > { %2960 = vrot.lane.b32.xlu0 %v2947_v33, %s7513_s27  ;;  %2958 = vrot.lane.b32.xlu2 %v2946_v60, %s7513_s27  ;;  %v2941_v33 = vmul.f32 %v8901_v23, %v2923_v12  ;;  %v2940_v60 = vmul.f32 %v8905_v16, %v2926_v51 }
 0x7d4   : > { %v2982_v32 = vmul.f32 %v2979_v49, %v2939_v13 }
 0x7d5   : > { %v2984_v39 = vmul.f32 %v2979_v49, %v2941_v33  ;;  %v2983_v24 = vmul.f32 %v2979_v49, %v2940_v60 }
 0x7da   : > { %2962 = vrot.lane.b32.xlu1 %v2948_v27, %s7513_s27  ;;  %v3015_v27 = vstv %s6809_s1  ;;  %s6812_s1 = sld [smem:[#allocation5 + $0x28]] }
 0x7db   : > { %2992 = vrot.lane.b32.xlu0 %v2981_v19, %s7513_s27  ;;  %2990 = vrot.lane.b32.xlu2 %v2980_v45, %s7513_s27  ;;  %v3016_v19 = vmul.f32 %v3015_v27, %v2932_v37  ;;  %v3018_v28 = vmul.f32 %v3015_v27, %v2934_v58  ;;  %v3017_v7 = vmul.f32 %v3015_v27, %v2933_v48  ;;  %v3051_v45 = vstv %s6810_s17  ;;  %s6813_s17 = sld [smem:[#allocation5 + $0x43]] }
 0x7dc   : > { %v3019_v12 = vmul.f32 %v3015_v27, %v2935_v29  ;;  %v3052_v49 = vmul.f32 %v3051_v45, %v2937_v26  ;;  %v3020_v51 = vmul.f32 %v3015_v27, %v2936_v21  ;;  %v3055_v58 = vmul.f32 %v3051_v45, %v2940_v60 }
 0x7dd   : > { %v3054_v37 = vmul.f32 %v3051_v45, %v2939_v13  ;;  %v3089_v21 = vmul.f32 %v8878_v38, %v3087_v43  ;;  %v3088_v29 = vmul.f32 %v8867_v40, %v3087_v43  ;;  %v3056_v48 = vmul.f32 %v3051_v45, %v2941_v33 }
 0x7de   : > { %v3090_v26 = vmul.f32 %v8882_v31, %v3087_v43  ;;  %v3091_v60 = vmul.f32 %v8872_v62, %v3087_v43 }
 0x7e1   : > { %v3149_v27 = vstv %s6813_s17  ;;  %s6820_s17 = sld [smem:[#allocation5 + $0xe]] }
 0x7e2   : > { %2994 = vrot.lane.b32.xlu1 %v2982_v32, %s7513_s27 }
 0x7e3   : > { %2998 = vrot.lane.b32.xlu0 %v2984_v39, %s7513_s27  ;;  %2996 = vrot.lane.b32.xlu2 %v2983_v24, %s7513_s27  ;;  %v3053_v39 = vmul.f32 %v3051_v45, %v2938_v11  ;;  %v3118_v11 = vstv %s6812_s1  ;;  %v3180_v45 = vstv %s6814_s13  ;;  %s7531_s1 = smov 1   ;;  %s7532_s13 = smov 54  }
 0x7e4   : > { %v3119_v13 = vmul.f32 %v8890_v55, %v3118_v11  ;;  %v3120_v33 = vmul.f32 %v8894_v47, %v3118_v11  ;;  %v3122_v32 = vmul.f32 %v8901_v23, %v3118_v11  ;;  %v3121_v24 = vmul.f32 %v8905_v16, %v3118_v11 }
 0x7ea   : > { %3026 = vrot.lane.b32.xlu1 %v3016_v19, %s7513_s27  ;;  %v3150_v19 = vmul.f32 %v8867_v40, %v3149_v27  ;;  %v3183_v40 = vmul.f32 %v8905_v16, %v3180_v45 }
 0x7eb   : > { %3030 = vrot.lane.b32.xlu0 %v3018_v28, %s7513_s27  ;;  %3028 = vrot.lane.b32.xlu2 %v3017_v7, %s7513_s27  ;;  %v3152_v28 = vmul.f32 %v8882_v31, %v3149_v27  ;;  %v3151_v7 = vmul.f32 %v8878_v38, %v3149_v27  ;;  %v3211_v31 = vld [vmem:[#allocation17 + $0x26] ss:$8 sm:$0xf] }
 0x7ec   : > { %v3218_v38 = vperm.slane %v3211_v31, 0 }
 0x7f2   : > { %3032 = vrot.lane.b32.xlu1 %v3019_v12, %s7513_s27  ;;  %v3153_v12 = vmul.f32 %v8872_v62, %v3149_v27  ;;  %v3219_v62 = vperm.slane %v3211_v31, 1 }
 0x7f3   : > { %3062 = vrot.lane.b32.xlu0 %v3052_v49, %s7513_s27  ;;  %3034 = vrot.lane.b32.xlu2 %v3020_v51, %s7513_s27  ;;  %v3182_v49 = vmul.f32 %v8894_v47, %v3180_v45  ;;  %v3181_v51 = vmul.f32 %v8890_v55, %v3180_v45  ;;  %v3221_v55 = vperm.slane %v3211_v31, 3 }
 0x7fa   : > { %3064 = vrot.lane.b32.xlu1 %v3053_v39, %s7513_s27  ;;  %v3184_v39 = vmul.f32 %v8901_v23, %v3180_v45 }
 0x7fb   : > { %3068 = vrot.lane.b32.xlu0 %v3055_v58, %s7513_s27  ;;  %3066 = vrot.lane.b32.xlu2 %v3054_v37, %s7513_s27  ;;  %v3220_v58 = vperm.slane %v3211_v31, 2 }
 0x802   : > { %3070 = vrot.lane.b32.xlu1 %v3056_v48, %s7513_s27 }
 0x803   : > { %3098 = vrot.lane.b32.xlu0 %v3089_v21, %s7512_s22  ;;  %3096 = vrot.lane.b32.xlu2 %v3088_v29, %s7512_s22 }
 0x80a   : > { %3100 = vrot.lane.b32.xlu1 %v3090_v26, %s7512_s22 }
 0x80b   : > { %3127 = vrot.lane.b32.xlu0 %v3119_v13, %s7512_s22  ;;  %3102 = vrot.lane.b32.xlu2 %v3091_v60, %s7512_s22 }
 0x812   : > { %3129 = vrot.lane.b32.xlu1 %v3120_v33, %s7512_s22 }
 0x813   : > { %3133 = vrot.lane.b32.xlu0 %v3122_v32, %s7512_s22  ;;  %3131 = vrot.lane.b32.xlu2 %v3121_v24, %s7512_s22 }
 0x81a   : > { %3158 = vrot.lane.b32.xlu1 %v3150_v19, %s7512_s22 }
 0x81b   : > { %3162 = vrot.lane.b32.xlu0 %v3152_v28, %s7512_s22  ;;  %3160 = vrot.lane.b32.xlu2 %v3151_v7, %s7512_s22 }
 0x822   : > { %3164 = vrot.lane.b32.xlu1 %v3153_v12, %s7512_s22 }
 0x823   : > { %3191 = vrot.lane.b32.xlu0 %v3182_v49, %s7512_s22  ;;  %3189 = vrot.lane.b32.xlu2 %v3181_v51, %s7512_s22 }
 0x82a   : > { %3193 = vrot.lane.b32.xlu1 %v3183_v40, %s7512_s22 }
 0x82b   : > { %3222 = vrot.lane.b32.xlu0 %v3218_v38, %s7531_s1  ;;  %3195 = vrot.lane.b32.xlu2 %v3184_v39, %s7512_s22  ;;  %v9186_v16 = vpop.permute.xlu0 %2954 }
 0x82c   : > { %12534 = vst [vmem:[#allocation224_spill] sm:$0xff] %v9186_v16  ;;  %v9297_v16 = vld [vmem:[%s7738_s12 + $0x58] sm:$0xff] }
 0x82d   : > { %v9182_v47 = vpop.permute.xlu2 %2958 }
 0x82e   : > { %12532 = vst [vmem:[#allocation222_spill] sm:$0xff] %v9182_v47 }
 0x832   : > { %3224 = vrot.lane.b32.xlu1 %v3219_v62, %s7531_s1 }
 0x833   : > { %3228 = vrot.lane.b32.xlu0 %v3221_v55, %s7531_s1  ;;  %3226 = vrot.lane.b32.xlu2 %v3220_v58, %s7531_s1  ;;  %s6821_s1 = sld [smem:[#allocation5 + $0x29]] }
 0x835   : > { %v9184_v37 = vpop.permute.xlu2 %2990 }
 0x836   : > { %12533 = vst [vmem:[#allocation223_spill] sm:$0xff] %v9184_v37 }
 0x83d   : > { %v9188_v43 = vpop.permute.xlu2 %2996 }
 0x83e   : > { %12535 = vst [vmem:[#allocation225_spill] sm:$0xff] %v9188_v43  ;;  %v9282_v43 = vld [vmem:[%s7738_s12 + $0x40] sm:$0xff] }
 0x844   : > { %v9190_v23 = vpop.permute.xlu1 %2956 }
 0x845   : > { %12536 = vst [vmem:[#allocation226_spill] sm:$0xff] %v9190_v23  ;;  %v9192_v21 = vpop.permute.xlu0 %2960  ;;  %v9194_v29 = vpop.permute.xlu2 %3028 }
 0x846   : > { %12537 = vst [vmem:[#allocation227_spill] sm:$0xff] %v9192_v21  ;;  %v9287_v21 = vld [vmem:[%s7738_s12 + $0x48] sm:$0xff] }
 0x847   : > { %12538 = vst [vmem:[#allocation228_spill] sm:$0xff] %v9194_v29 }
 0x84c   : > { %v9196_v48 = vpop.permute.xlu1 %2962 }
 0x84d   : > { %12539 = vst [vmem:[#allocation229_spill] sm:$0xff] %v9196_v48  ;;  %v9198_v11 = vpop.permute.xlu0 %2992  ;;  %v9204_v60 = vpop.permute.xlu2 %3034 }
 0x84e   : > { %12540 = vst [vmem:[#allocation230_spill] sm:$0xff] %v9198_v11 }
 0x84f   : > { %12543 = vst [vmem:[#allocation233_spill] sm:$0xff] %v9204_v60  ;;  %v9274_v60 = vld [vmem:[%s7738_s12 + $0x28] sm:$0xff] }
 0x854   : > { %v9200_v26 = vpop.permute.xlu1 %2994 }
 0x855   : > { %12541 = vst [vmem:[#allocation231_spill] sm:$0xff] %v9200_v26  ;;  %v9202_v13 = vpop.permute.xlu0 %2998  ;;  %v9210_v24 = vpop.permute.xlu2 %3066  ;;  %v3292_v26 = vstv %s6821_s1  ;;  %s6823_s1 = sld [smem:[#allocation5 + $0x5f]] }
 0x856   : > { %12542 = vst [vmem:[#allocation232_spill] sm:$0xff] %v9202_v13 }
 0x857   : > { %12546 = vst [vmem:[#allocation236_spill] sm:$0xff] %v9210_v24 }
 0x85b   : > { %v3364_v22 = vstv %s6823_s1  ;;  %s6825_s1 = sld [smem:[#allocation5 + $0x2a]] }
 0x85c   : > { %v9206_v33 = vpop.permute.xlu1 %3026 }
 0x85d   : > { %12544 = vst [vmem:[#allocation234_spill] sm:$0xff] %v9206_v33  ;;  %v9208_v32 = vpop.permute.xlu0 %3030  ;;  %v9216_v28 = vpop.permute.xlu2 %3096 }
 0x85e   : > { %12545 = vst [vmem:[#allocation235_spill] sm:$0xff] %v9208_v32  ;;  %v9271_v32 = vld [vmem:[%s7738_s12 + $0x38] sm:$0xff] }
 0x85f   : > { %12549 = vst [vmem:[#allocation239_spill] sm:$0xff] %v9216_v28 }
 0x864   : > { %v9212_v27 = vpop.permute.xlu1 %3032 }
 0x865   : > { %12547 = vst [vmem:[#allocation237_spill] sm:$0xff] %v9212_v27  ;;  %v9214_v19 = vpop.permute.xlu0 %3062  ;;  %v9222_v12 = vpop.permute.xlu2 %3102 }
 0x866   : > { %12548 = vst [vmem:[#allocation238_spill] sm:$0xff] %v9214_v19 }
 0x867   : > { %12552 = vst [vmem:[#allocation242_spill] sm:$0xff] %v9222_v12 }
 0x86c   : > { %v9218_v7 = vpop.permute.xlu1 %3064 }
 0x86d   : > { %12550 = vst [vmem:[#allocation240_spill] sm:$0xff] %v9218_v7  ;;  %v9220_v45 = vpop.permute.xlu0 %3068  ;;  %v9230_v40 = vpop.permute.xlu2 %3131  ;;  %v9268_v7 = vld [vmem:[%s7738_s12 + $0x20] sm:$0xff] }
 0x86e   : > { %12551 = vst [vmem:[#allocation241_spill] sm:$0xff] %v9220_v45 }
 0x86f   : > { %12556 = vst [vmem:[#allocation246_spill] sm:$0xff] %v9230_v40 }
 0x874   : > { %v9224_v49 = vpop.permute.xlu1 %3070 }
 0x875   : > { %12553 = vst [vmem:[#allocation243_spill] sm:$0xff] %v9224_v49  ;;  %v9226_v51 = vpop.permute.xlu0 %3098  ;;  %v9238_v55 = vpop.permute.xlu2 %3160 }
 0x876   : > { %12554 = vst [vmem:[#allocation244_spill] sm:$0xff] %v9226_v51 }
 0x877   : > { %12560 = vst [vmem:[#allocation250_spill] sm:$0xff] %v9238_v55 }
 0x87c   : > { %v9228_v31 = vpop.permute.xlu1 %3100 }
 0x87d   : > { %12555 = vst [vmem:[#allocation245_spill] sm:$0xff] %v9228_v31  ;;  %v9232_v38 = vpop.permute.xlu0 %3127  ;;  %v9244_v28 = vpop.permute.xlu2 %3189 }
 0x87e   : > { %12557 = vst [vmem:[#allocation247_spill] sm:$0xff] %v9232_v38  ;;  %v9253_v38 = vld [vmem:[%s7738_s12 + $0x8] sm:$0xff] }
 0x87f   : > { %12563 = vst [vmem:[#allocation253_spill] sm:$0xff] %v9244_v28 }
 0x884   : > { %v9234_v39 = vpop.permute.xlu1 %3129 }
 0x885   : > { %12558 = vst [vmem:[#allocation248_spill] sm:$0xff] %v9234_v39  ;;  %v9236_v62 = vpop.permute.xlu0 %3133  ;;  %v9250_v40 = vpop.permute.xlu2 %3195  ;;  %v3255_v39 = vstv %s6820_s17  ;;  %s6822_s17 = sld [smem:[#allocation5 + $0x44]] }
 0x886   : > { %12559 = vst [vmem:[#allocation249_spill] sm:$0xff] %v9236_v62 }
 0x887   : > { %12566 = vst [vmem:[#allocation256_spill] sm:$0xff] %v9250_v40  ;;  %v9263_v40 = vld [vmem:[%s7738_s12 + $0x18] sm:$0xff] }
 0x88c   : > { %v9240_v58 = vpop.permute.xlu1 %3158 }
 0x88d   : > { %12561 = vst [vmem:[#allocation251_spill] sm:$0xff] %v9240_v58  ;;  %v9242_v12 = vpop.permute.xlu0 %3162  ;;  %v3227_v28 = vpop.permute.xlu2 %3226 }
 0x88e   : > { %12562 = vst [vmem:[#allocation252_spill] sm:$0xff] %v9242_v12 }
 0x894   : > { %v9246_v51 = vpop.permute.xlu1 %3164 }
 0x895   : > { %12564 = vst [vmem:[#allocation254_spill] sm:$0xff] %v9246_v51  ;;  %v9248_v31 = vpop.permute.xlu0 %3191 }
 0x896   : > { %12565 = vst [vmem:[#allocation255_spill] sm:$0xff] %v9248_v31  ;;  %v9260_v31 = vld [vmem:[%s7738_s12 + $0x10] sm:$0xff] }
 0x89c   : > { %v9255_v62 = vpop.permute.xlu1 %3193 }
 0x89d   : > { %12567 = vst [vmem:[#allocation257_spill] sm:$0xff] %v9255_v62  ;;  %v3223_v55 = vpop.permute.xlu0 %3222 }
 0x89e   : > { %v3239_v12 = vmul.f32 %v3223_v55, %v9253_v38 }
 0x8a0   : > { %v3256_v58 = vmul.f32 %v3255_v39, %v3239_v12 }
 0x8a2   : > { %3266 = vrot.lane.b32.xlu1 %v3256_v58, %s7532_s13 }
 0x8a4   : > { %v3225_v51 = vpop.permute.xlu1 %3224 }
 0x8a5   : > { %v3231_v62 = vsel %vm3230_vm11, %v3223_v55, %v3225_v51  ;;  %v3232_v49 = vsel %vm3230_vm11, %v3225_v51, %v3227_v28  ;;  %v3229_v45 = vpop.permute.xlu0 %3228  ;;  %v3249_v51 = vmul.f32 %v9271_v32, %v3223_v55 }
 0x8a6   : > { %v3240_v24 = vmul.f32 %v3231_v62, %v9260_v31  ;;  %v3241_v19 = vmul.f32 %v3232_v49, %v9263_v40  ;;  %v3233_v58 = vsel %vm3230_vm11, %v3227_v28, %v3229_v45  ;;  %v3243_v29 = vmul.f32 %v3229_v45, %v9274_v60 }
 0x8a7   : > { %v3242_v33 = vmul.f32 %v3233_v58, %v9268_v7  ;;  %v3250_v37 = vmul.f32 %v9282_v43, %v3231_v62  ;;  %v3293_v11 = vmul.f32 %v3292_v26, %v3249_v51  ;;  %vm1895_vm11 = vcmask 916480  }
 0x8a8   : > { %v3257_v13 = vmul.f32 %v3255_v39, %v3240_v24  ;;  %v3258_v27 = vmul.f32 %v3255_v39, %v3241_v19  ;;  %v3260_v48 = vmul.f32 %v3255_v39, %v3243_v29 }
 0x8a9   : > { %v3259_v28 = vmul.f32 %v3255_v39, %v3242_v33  ;;  %v3294_v55 = vmul.f32 %v3292_v26, %v3250_v37  ;;  %v3253_v39 = vmul.f32 %v9297_v16, %v3229_v45 }
 0x8aa   : > { %3270 = vrot.lane.b32.xlu0 %v3258_v27, %s7532_s13  ;;  %3268 = vrot.lane.b32.xlu2 %v3257_v13, %s7532_s13  ;;  %v9290_v27 = vld [vmem:[%s7738_s12 + $0x50] sm:$0xff]  ;;  %v3251_v13 = vmul.f32 %v9287_v21, %v3232_v49 }
 0x8ab   : > { %3272 = vrot.lane.b32.xlu1 %v3259_v28, %s7532_s13  ;;  %v3252_v47 = vmul.f32 %v9290_v27, %v3233_v58 }
 0x8ac   : > { %v3295_v62 = vmul.f32 %v3292_v26, %v3251_v13 }
 0x8ad   : > { %v3296_v28 = vmul.f32 %v3292_v26, %v3252_v47 }
 0x8b2   : > { %3303 = vrot.lane.b32.xlu0 %v3293_v11, %s7532_s13  ;;  %3274 = vrot.lane.b32.xlu2 %v3260_v48, %s7532_s13  ;;  %v3297_v11 = vmul.f32 %v3292_v26, %v3253_v39  ;;  %v3328_v48 = vstv %s6822_s17  ;;  %v3365_v26 = vmul.f32 %v3364_v22, %v3249_v51  ;;  %s7533_s17 = smov 7  }
 0x8b3   : > { %3305 = vrot.lane.b32.xlu1 %v3294_v55, %s7532_s13  ;;  %v3330_v49 = vmul.f32 %v3328_v48, %v3240_v24  ;;  %v3329_v23 = vmul.f32 %v3328_v48, %v3239_v12  ;;  %v3331_v58 = vmul.f32 %v3328_v48, %v3241_v19  ;;  %v3333_v45 = vmul.f32 %v3328_v48, %v3243_v29 }
 0x8b4   : > { %v3332_v55 = vmul.f32 %v3328_v48, %v3242_v33  ;;  %v3366_v24 = vmul.f32 %v3364_v22, %v3250_v37  ;;  %v3367_v12 = vmul.f32 %v3364_v22, %v3251_v13  ;;  %v3368_v19 = vmul.f32 %v3364_v22, %v3252_v47 }
 0x8b5   : > { %v3369_v33 = vmul.f32 %v3364_v22, %v3253_v39 }
 0x8ba   : > { %3307 = vrot.lane.b32.xlu2 %v3295_v62, %s7532_s13  ;;  %3309 = vrot.lane.b32.xlu0 %v3296_v28, %s7532_s13 }
 0x8bb   : > { %3311 = vrot.lane.b32.xlu1 %v3297_v11, %s7532_s13 }
 0x8c2   : > { %3339 = vrot.lane.b32.xlu2 %v3329_v23, %s7532_s13  ;;  %3341 = vrot.lane.b32.xlu0 %v3330_v49, %s7532_s13  ;;  %v3400_v23 = vld [vmem:[#allocation17 + $0x27] ss:$8 sm:$0xf] }
 0x8c3   : > { %3343 = vrot.lane.b32.xlu1 %v3331_v58, %s7532_s13  ;;  %v3402_v29 = vperm.slane %v3400_v23, 0  ;;  %v3403_v62 = vperm.slane %v3400_v23, 1  ;;  %v3405_v51 = vperm.slane %v3400_v23, 3  ;;  %v3404_v28 = vperm.slane %v3400_v23, 2 }
 0x8ca   : > { %3347 = vrot.lane.b32.xlu0 %v3333_v45, %s7532_s13  ;;  %3345 = vrot.lane.b32.xlu2 %v3332_v55, %s7532_s13 }
 0x8cb   : > { %3375 = vrot.lane.b32.xlu1 %v3365_v26, %s7532_s13 }
 0x8d2   : > { %3379 = vrot.lane.b32.xlu0 %v3367_v12, %s7532_s13  ;;  %3377 = vrot.lane.b32.xlu2 %v3366_v24, %s7532_s13 }
 0x8d3   : > { %3381 = vrot.lane.b32.xlu1 %v3368_v19, %s7532_s13 }
 0x8da   : > { %3406 = vrot.lane.b32.xlu0 %v3402_v29, %s7533_s17  ;;  %3383 = vrot.lane.b32.xlu2 %v3369_v33, %s7532_s13  ;;  %s6824_s13 = sld [smem:[#allocation5 + $0xf]] }
 0x8db   : > { %3408 = vrot.lane.b32.xlu1 %v3403_v62, %s7533_s17 }
 0x8e2   : > { %3412 = vrot.lane.b32.xlu0 %v3405_v51, %s7533_s17  ;;  %3410 = vrot.lane.b32.xlu2 %v3404_v28, %s7533_s17  ;;  %v3434_v28 = vstv %s6824_s13  ;;  %s7534_s17 = smov 48   ;;  %s6826_s13 = sld [smem:[#allocation5 + $0x45]] }
 0x904   : > { %v9314_v37 = vpop.permute.xlu2 %3268 }
 0x905   : > { %12568 = vst [vmem:[#allocation258_spill] sm:$0xff] %v9314_v37 }
 0x90c   : > { %v9316_v13 = vpop.permute.xlu2 %3274 }
 0x90d   : > { %12569 = vst [vmem:[#allocation259_spill] sm:$0xff] %v9316_v13 }
 0x914   : > { %v9318_v11 = vpop.permute.xlu1 %3266  ;;  %v9322_v48 = vpop.permute.xlu2 %3307 }
 0x915   : > { %12570 = vst [vmem:[#allocation260_spill] sm:$0xff] %v9318_v11 }
 0x916   : > { %12572 = vst [vmem:[#allocation262_spill] sm:$0xff] %v9322_v48 }
 0x91c   : > { %v9320_v47 = vpop.permute.xlu0 %3270  ;;  %v9328_v49 = vpop.permute.xlu2 %3339 }
 0x91d   : > { %12571 = vst [vmem:[#allocation261_spill] sm:$0xff] %v9320_v47  ;;  %v9324_v22 = vpop.permute.xlu1 %3272 }
 0x91e   : > { %12573 = vst [vmem:[#allocation263_spill] sm:$0xff] %v9324_v22 }
 0x91f   : > { %12575 = vst [vmem:[#allocation265_spill] sm:$0xff] %v9328_v49 }
 0x924   : > { %v9326_v39 = vpop.permute.xlu0 %3303  ;;  %v9336_v26 = vpop.permute.xlu2 %3345 }
 0x925   : > { %12574 = vst [vmem:[#allocation264_spill] sm:$0xff] %v9326_v39  ;;  %v9330_v58 = vpop.permute.xlu1 %3305 }
 0x926   : > { %12576 = vst [vmem:[#allocation266_spill] sm:$0xff] %v9330_v58 }
 0x927   : > { %12579 = vst [vmem:[#allocation269_spill] sm:$0xff] %v9336_v26 }
 0x92c   : > { %v9332_v45 = vpop.permute.xlu0 %3309  ;;  %v9342_v23 = vpop.permute.xlu2 %3377 }
 0x92d   : > { %12577 = vst [vmem:[#allocation267_spill] sm:$0xff] %v9332_v45  ;;  %v9334_v55 = vpop.permute.xlu1 %3311 }
 0x92e   : > { %12578 = vst [vmem:[#allocation268_spill] sm:$0xff] %v9334_v55 }
 0x92f   : > { %12582 = vst [vmem:[#allocation272_spill] sm:$0xff] %v9342_v23 }
 0x934   : > { %v9338_v24 = vpop.permute.xlu0 %3341  ;;  %v9350_v62 = vpop.permute.xlu2 %3383 }
 0x935   : > { %12580 = vst [vmem:[#allocation270_spill] sm:$0xff] %v9338_v24  ;;  %v9340_v12 = vpop.permute.xlu1 %3343 }
 0x936   : > { %12581 = vst [vmem:[#allocation271_spill] sm:$0xff] %v9340_v12 }
 0x937   : > { %12586 = vst [vmem:[#allocation276_spill] sm:$0xff] %v9350_v62 }
 0x93c   : > { %v9344_v19 = vpop.permute.xlu0 %3347  ;;  %v3411_v26 = vpop.permute.xlu2 %3410 }
 0x93d   : > { %12583 = vst [vmem:[#allocation273_spill] sm:$0xff] %v9344_v19  ;;  %v9346_v29 = vpop.permute.xlu1 %3375 }
 0x93e   : > { %12584 = vst [vmem:[#allocation274_spill] sm:$0xff] %v9346_v29 }
 0x944   : > { %v9348_v33 = vpop.permute.xlu0 %3379 }
 0x945   : > { %12585 = vst [vmem:[#allocation275_spill] sm:$0xff] %v9348_v33  ;;  %v9352_v51 = vpop.permute.xlu1 %3381 }
 0x946   : > { %12587 = vst [vmem:[#allocation277_spill] sm:$0xff] %v9352_v51 }
 0x94c   : > { %v3407_v55 = vpop.permute.xlu0 %3406 }
 0x94d   : > { %v3423_v13 = vmul.f32 %v3407_v55, %v9253_v38  ;;  %v3409_v12 = vpop.permute.xlu1 %3408  ;;  %v3428_v49 = vmul.f32 %v9271_v32, %v3407_v55 }
 0x94e   : > { %v3416_v23 = vsel %vm3414_vm12, %v3409_v12, %v3411_v26  ;;  %v3415_v19 = vsel %vm3414_vm12, %v3407_v55, %v3409_v12 }
 0x94f   : > { %v3435_v45 = vmul.f32 %v3434_v28, %v3423_v13  ;;  %v3425_v33 = vmul.f32 %v3416_v23, %v9263_v40  ;;  %v3424_v62 = vmul.f32 %v3415_v19, %v9260_v31  ;;  %v3429_v11 = vmul.f32 %v9282_v43, %v3415_v19 }
 0x951   : > { %3445 = vrot.lane.b32.xlu1 %v3435_v45, %s7534_s17  ;;  %v3437_v29 = vmul.f32 %v3434_v28, %v3425_v33  ;;  %v3436_v24 = vmul.f32 %v3434_v28, %v3424_v62  ;;  %v3471_v45 = vstv %s6825_s1  ;;  %s6827_s1 = sld [smem:[#allocation5 + $0x60]] }
 0x952   : > { %v3472_v22 = vmul.f32 %v3471_v45, %v3428_v49 }
 0x953   : > { %3449 = vrot.lane.b32.xlu0 %v3437_v29, %s7534_s17  ;;  %3447 = vrot.lane.b32.xlu2 %v3436_v24, %s7534_s17  ;;  %v3430_v24 = vmul.f32 %v9287_v21, %v3416_v23 }
 0x954   : > { %v3413_v51 = vpop.permute.xlu0 %3412 }
 0x955   : > { %v3417_v39 = vsel %vm3414_vm12, %v3411_v26, %v3413_v51  ;;  %v3427_v12 = vmul.f32 %v3413_v51, %v9274_v60  ;;  %v3473_v26 = vmul.f32 %v3471_v45, %v3429_v11  ;;  %v3432_v29 = vmul.f32 %v9297_v16, %v3413_v51 }
 0x956   : > { %v3426_v58 = vmul.f32 %v3417_v39, %v9268_v7  ;;  %v3431_v55 = vmul.f32 %v9290_v27, %v3417_v39  ;;  %v3474_v20 = vmul.f32 %v3471_v45, %v3430_v24  ;;  %vm2074_vm12 = vcmask 908288  }
 0x957   : > { %v3439_v47 = vmul.f32 %v3434_v28, %v3427_v12 }
 0x958   : > { %v3438_v48 = vmul.f32 %v3434_v28, %v3426_v58  ;;  %v3475_v37 = vmul.f32 %v3471_v45, %v3431_v55  ;;  %v3579_v28 = vld [vmem:[#allocation17 + $0x40] ss:$8 sm:$0xf] }
 0x95a   : > { %3451 = vrot.lane.b32.xlu1 %v3438_v48, %s7534_s17  ;;  %v3476_v48 = vmul.f32 %v3471_v45, %v3432_v29  ;;  %v3581_v45 = vperm.slane %v3579_v28, 0 }
 0x95b   : > { %3482 = vrot.lane.b32.xlu0 %v3472_v22, %s7534_s17  ;;  %3453 = vrot.lane.b32.xlu2 %v3439_v47, %s7534_s17  ;;  %v3507_v22 = vstv %s6826_s13  ;;  %s7535_s13 = smov 8  }
 0x95c   : > { %v3509_v47 = vmul.f32 %v3507_v22, %v3424_v62  ;;  %v3508_v39 = vmul.f32 %v3507_v22, %v3423_v13  ;;  %v3510_v23 = vmul.f32 %v3507_v22, %v3425_v33  ;;  %v3512_v19 = vmul.f32 %v3507_v22, %v3427_v12 }
 0x95d   : > { %v3511_v51 = vmul.f32 %v3507_v22, %v3426_v58  ;;  %v3582_v12 = vperm.slane %v3579_v28, 1 }
 0x962   : > { %3484 = vrot.lane.b32.xlu1 %v3473_v26, %s7534_s17  ;;  %v3583_v26 = vperm.slane %v3579_v28, 2 }
 0x963   : > { %3488 = vrot.lane.b32.xlu0 %v3475_v37, %s7534_s17  ;;  %3486 = vrot.lane.b32.xlu2 %v3474_v20, %s7534_s17  ;;  %v3543_v37 = vstv %s6827_s1  ;;  %s7536_s1 = smov 47  }
 0x964   : > { %v3544_v20 = vmul.f32 %v3543_v37, %v3428_v49  ;;  %v3546_v62 = vmul.f32 %v3543_v37, %v3430_v24  ;;  %v3545_v13 = vmul.f32 %v3543_v37, %v3429_v11  ;;  %v3547_v33 = vmul.f32 %v3543_v37, %v3431_v55 }
 0x965   : > { %v3548_v58 = vmul.f32 %v3543_v37, %v3432_v29  ;;  %v3584_v49 = vperm.slane %v3579_v28, 3 }
 0x96a   : > { %3490 = vrot.lane.b32.xlu1 %v3476_v48, %s7534_s17 }
 0x96b   : > { %3520 = vrot.lane.b32.xlu0 %v3509_v47, %s7534_s17  ;;  %3518 = vrot.lane.b32.xlu2 %v3508_v39, %s7534_s17 }
 0x972   : > { %3522 = vrot.lane.b32.xlu1 %v3510_v23, %s7534_s17 }
 0x973   : > { %3526 = vrot.lane.b32.xlu0 %v3512_v19, %s7534_s17  ;;  %3524 = vrot.lane.b32.xlu2 %v3511_v51, %s7534_s17 }
 0x97a   : > { %3554 = vrot.lane.b32.xlu1 %v3544_v20, %s7534_s17 }
 0x97b   : > { %3558 = vrot.lane.b32.xlu0 %v3546_v62, %s7534_s17  ;;  %3556 = vrot.lane.b32.xlu2 %v3545_v13, %s7534_s17 }
 0x982   : > { %3560 = vrot.lane.b32.xlu1 %v3547_v33, %s7534_s17 }
 0x983   : > { %3585 = vrot.lane.b32.xlu0 %v3581_v45, %s7535_s13  ;;  %3562 = vrot.lane.b32.xlu2 %v3548_v58, %s7534_s17  ;;  %s6828_s17 = sld [smem:[#allocation5 + $0x10]] }
 0x98a   : > { %3587 = vrot.lane.b32.xlu1 %v3582_v12, %s7535_s13 }
 0x98b   : > { %3591 = vrot.lane.b32.xlu0 %v3584_v49, %s7535_s13  ;;  %3589 = vrot.lane.b32.xlu2 %v3583_v26, %s7535_s13  ;;  %v3613_v26 = vstv %s6828_s17  ;;  %s6829_s13 = sld [smem:[#allocation5 + $0x2b]] }
 0x98c   : > { %s6830_s17 = sld [smem:[#allocation5 + $0x46]] }
 0x9ad   : > { %v9384_v11 = vpop.permute.xlu2 %3447 }
 0x9ae   : > { %12588 = vst [vmem:[#allocation278_spill] sm:$0xff] %v9384_v11 }
 0x9b5   : > { %v9386_v24 = vpop.permute.xlu2 %3453 }
 0x9b6   : > { %12589 = vst [vmem:[#allocation279_spill] sm:$0xff] %v9386_v24 }
 0x9bd   : > { %v9392_v22 = vpop.permute.xlu2 %3486 }
 0x9be   : > { %12592 = vst [vmem:[#allocation282_spill] sm:$0xff] %v9392_v22 }
 0x9c3   : > { %v9388_v48 = vpop.permute.xlu1 %3445 }
 0x9c4   : > { %12590 = vst [vmem:[#allocation280_spill] sm:$0xff] %v9388_v48 }
 0x9c5   : > { %v9390_v55 = vpop.permute.xlu0 %3449  ;;  %v9398_v39 = vpop.permute.xlu2 %3518 }
 0x9c6   : > { %12591 = vst [vmem:[#allocation281_spill] sm:$0xff] %v9390_v55 }
 0x9c7   : > { %12595 = vst [vmem:[#allocation285_spill] sm:$0xff] %v9398_v39 }
 0x9cc   : > { %v9394_v29 = vpop.permute.xlu1 %3451 }
 0x9cd   : > { %12593 = vst [vmem:[#allocation283_spill] sm:$0xff] %v9394_v29  ;;  %v9396_v47 = vpop.permute.xlu0 %3482  ;;  %v9406_v37 = vpop.permute.xlu2 %3524 }
 0x9ce   : > { %12594 = vst [vmem:[#allocation284_spill] sm:$0xff] %v9396_v47 }
 0x9cf   : > { %12599 = vst [vmem:[#allocation289_spill] sm:$0xff] %v9406_v37 }
 0x9d4   : > { %v9400_v23 = vpop.permute.xlu1 %3484 }
 0x9d5   : > { %12596 = vst [vmem:[#allocation286_spill] sm:$0xff] %v9400_v23  ;;  %v9402_v19 = vpop.permute.xlu0 %3488  ;;  %v9412_v13 = vpop.permute.xlu2 %3556 }
 0x9d6   : > { %12597 = vst [vmem:[#allocation287_spill] sm:$0xff] %v9402_v19 }
 0x9d7   : > { %12602 = vst [vmem:[#allocation292_spill] sm:$0xff] %v9412_v13 }
 0x9dc   : > { %v9404_v51 = vpop.permute.xlu1 %3490 }
 0x9dd   : > { %12598 = vst [vmem:[#allocation288_spill] sm:$0xff] %v9404_v51  ;;  %v9408_v20 = vpop.permute.xlu0 %3520  ;;  %v9420_v58 = vpop.permute.xlu2 %3562 }
 0x9de   : > { %12600 = vst [vmem:[#allocation290_spill] sm:$0xff] %v9408_v20 }
 0x9df   : > { %12606 = vst [vmem:[#allocation296_spill] sm:$0xff] %v9420_v58 }
 0x9e4   : > { %v9410_v62 = vpop.permute.xlu1 %3522 }
 0x9e5   : > { %12601 = vst [vmem:[#allocation291_spill] sm:$0xff] %v9410_v62  ;;  %v9414_v28 = vpop.permute.xlu0 %3526  ;;  %v3590_v24 = vpop.permute.xlu2 %3589 }
 0x9e6   : > { %12603 = vst [vmem:[#allocation293_spill] sm:$0xff] %v9414_v28 }
 0x9ec   : > { %v9416_v33 = vpop.permute.xlu1 %3554 }
 0x9ed   : > { %12604 = vst [vmem:[#allocation294_spill] sm:$0xff] %v9416_v33  ;;  %v9418_v45 = vpop.permute.xlu0 %3558 }
 0x9ee   : > { %12605 = vst [vmem:[#allocation295_spill] sm:$0xff] %v9418_v45 }
 0x9f4   : > { %v9422_v12 = vpop.permute.xlu1 %3560 }
 0x9f5   : > { %12607 = vst [vmem:[#allocation297_spill] sm:$0xff] %v9422_v12  ;;  %v3586_v49 = vpop.permute.xlu0 %3585 }
 0x9f6   : > { %v3602_v51 = vmul.f32 %v3586_v49, %v9253_v38  ;;  %v3607_v22 = vmul.f32 %v9271_v32, %v3586_v49 }
 0x9f8   : > { %v3614_v37 = vmul.f32 %v3613_v26, %v3602_v51 }
 0x9fa   : > { %3624 = vrot.lane.b32.xlu1 %v3614_v37, %s7536_s1 }
 0x9fc   : > { %v3588_v62 = vpop.permute.xlu1 %3587 }
 0x9fd   : > { %v3594_v33 = vsel %vm3593_vm6, %v3586_v49, %v3588_v62  ;;  %v3595_v45 = vsel %vm3593_vm6, %v3588_v62, %v3590_v24  ;;  %v3592_v20 = vpop.permute.xlu0 %3591  ;;  %v3650_v62 = vstv %s6829_s13  ;;  %s6831_s13 = sld [smem:[#allocation5 + $0x61]] }
 0x9fe   : > { %v3603_v13 = vmul.f32 %v3594_v33, %v9260_v31  ;;  %v3604_v58 = vmul.f32 %v3595_v45, %v9263_v40  ;;  %v3596_v19 = vsel %vm3593_vm6, %v3590_v24, %v3592_v20  ;;  %v3606_v47 = vmul.f32 %v3592_v20, %v9274_v60 }
 0x9ff   : > { %v3605_v37 = vmul.f32 %v3596_v19, %v9268_v7  ;;  %v3651_v39 = vmul.f32 %v3650_v62, %v3607_v22  ;;  %v3608_v55 = vmul.f32 %v9282_v43, %v3594_v33  ;;  %v3609_v24 = vmul.f32 %v9287_v21, %v3595_v45 }
 0xa00   : > { %v3615_v12 = vmul.f32 %v3613_v26, %v3603_v13  ;;  %v3616_v28 = vmul.f32 %v3613_v26, %v3604_v58  ;;  %v3618_v29 = vmul.f32 %v3613_v26, %v3606_v47  ;;  %v3686_v33 = vstv %s6830_s17  ;;  %s7537_s17 = smov 9  }
 0xa01   : > { %v3617_v23 = vmul.f32 %v3613_v26, %v3605_v37  ;;  %v3653_v49 = vmul.f32 %v3650_v62, %v3609_v24  ;;  %v3687_v45 = vmul.f32 %v3686_v33, %v3602_v51  ;;  %v3691_v26 = vmul.f32 %v3686_v33, %v3606_v47 }
 0xa02   : > { %3628 = vrot.lane.b32.xlu0 %v3616_v28, %s7536_s1  ;;  %3626 = vrot.lane.b32.xlu2 %v3615_v12, %s7536_s1  ;;  %v3610_v28 = vmul.f32 %v9290_v27, %v3596_v19  ;;  %v3652_v12 = vmul.f32 %v3650_v62, %v3608_v55  ;;  %v3689_v19 = vmul.f32 %v3686_v33, %v3604_v58  ;;  %vm3772_vm6 = vcmask 72704  }
 0xa03   : > { %3630 = vrot.lane.b32.xlu1 %v3617_v23, %s7536_s1  ;;  %v3611_v23 = vmul.f32 %v9297_v16, %v3592_v20  ;;  %v3690_v20 = vmul.f32 %v3686_v33, %v3605_v37 }
 0xa04   : > { %v3654_v48 = vmul.f32 %v3650_v62, %v3610_v28 }
 0xa0a   : > { %3661 = vrot.lane.b32.xlu0 %v3651_v39, %s7536_s1  ;;  %3632 = vrot.lane.b32.xlu2 %v3618_v29, %s7536_s1  ;;  %v3655_v39 = vmul.f32 %v3650_v62, %v3611_v23  ;;  %v3688_v29 = vmul.f32 %v3686_v33, %v3603_v13  ;;  %v3758_v62 = vld [vmem:[#allocation17 + $0x41] ss:$8 sm:$0xf] }
 0xa0b   : > { %3663 = vrot.lane.b32.xlu1 %v3652_v12, %s7536_s1  ;;  %v3722_v12 = vstv %s6831_s13  ;;  %v3761_v37 = vperm.slane %v3758_v62, 1  ;;  %v3762_v33 = vperm.slane %v3758_v62, 2  ;;  %s7538_s13 = smov 46  }
 0xa0c   : > { %v3724_v13 = vmul.f32 %v3722_v12, %v3608_v55  ;;  %v3725_v51 = vmul.f32 %v3722_v12, %v3609_v24  ;;  %v3726_v58 = vmul.f32 %v3722_v12, %v3610_v28  ;;  %v3727_v47 = vmul.f32 %v3722_v12, %v3611_v23 }
 0xa12   : > { %3665 = vrot.lane.b32.xlu2 %v3653_v49, %s7536_s1  ;;  %3667 = vrot.lane.b32.xlu0 %v3654_v48, %s7536_s1  ;;  %v3723_v48 = vmul.f32 %v3722_v12, %v3607_v22  ;;  %v3760_v49 = vperm.slane %v3758_v62, 0  ;;  %v3763_v22 = vperm.slane %v3758_v62, 3 }
 0xa13   : > { %3669 = vrot.lane.b32.xlu1 %v3655_v39, %s7536_s1 }
 0xa1a   : > { %3697 = vrot.lane.b32.xlu2 %v3687_v45, %s7536_s1  ;;  %3699 = vrot.lane.b32.xlu0 %v3688_v29, %s7536_s1 }
 0xa1b   : > { %3701 = vrot.lane.b32.xlu1 %v3689_v19, %s7536_s1 }
 0xa22   : > { %3705 = vrot.lane.b32.xlu0 %v3691_v26, %s7536_s1  ;;  %3703 = vrot.lane.b32.xlu2 %v3690_v20, %s7536_s1 }
 0xa23   : > { %3733 = vrot.lane.b32.xlu1 %v3723_v48, %s7536_s1 }
 0xa2a   : > { %3737 = vrot.lane.b32.xlu0 %v3725_v51, %s7536_s1  ;;  %3735 = vrot.lane.b32.xlu2 %v3724_v13, %s7536_s1 }
 0xa2b   : > { %3739 = vrot.lane.b32.xlu1 %v3726_v58, %s7536_s1 }
 0xa32   : > { %3764 = vrot.lane.b32.xlu0 %v3760_v49, %s7537_s17  ;;  %3741 = vrot.lane.b32.xlu2 %v3727_v47, %s7536_s1  ;;  %s6832_s1 = sld [smem:[#allocation5 + $0x11]] }
 0xa33   : > { %3766 = vrot.lane.b32.xlu1 %v3761_v37, %s7537_s17 }
 0xa3a   : > { %3770 = vrot.lane.b32.xlu0 %v3763_v22, %s7537_s17  ;;  %3768 = vrot.lane.b32.xlu2 %v3762_v33, %s7537_s17  ;;  %v3792_v33 = vstv %s6832_s1  ;;  %s6833_s17 = sld [smem:[#allocation5 + $0x2c]] }
 0xa3b   : > { %s6834_s1 = sld [smem:[#allocation5 + $0x47]] }
 0xa5c   : > { %v9457_v55 = vpop.permute.xlu2 %3626 }
 0xa5d   : > { %12608 = vst [vmem:[#allocation298_spill] sm:$0xff] %v9457_v55 }
 0xa64   : > { %v9459_v24 = vpop.permute.xlu2 %3632 }
 0xa65   : > { %12609 = vst [vmem:[#allocation299_spill] sm:$0xff] %v9459_v24 }
 0xa6c   : > { %v9461_v39 = vpop.permute.xlu1 %3624  ;;  %v9465_v29 = vpop.permute.xlu2 %3665 }
 0xa6d   : > { %12610 = vst [vmem:[#allocation300_spill] sm:$0xff] %v9461_v39 }
 0xa6e   : > { %12612 = vst [vmem:[#allocation302_spill] sm:$0xff] %v9465_v29 }
 0xa74   : > { %v9463_v28 = vpop.permute.xlu0 %3628  ;;  %v9471_v19 = vpop.permute.xlu2 %3697 }
 0xa75   : > { %12611 = vst [vmem:[#allocation301_spill] sm:$0xff] %v9463_v28  ;;  %v9467_v23 = vpop.permute.xlu1 %3630 }
 0xa76   : > { %12613 = vst [vmem:[#allocation303_spill] sm:$0xff] %v9467_v23 }
 0xa77   : > { %12615 = vst [vmem:[#allocation305_spill] sm:$0xff] %v9471_v19 }
 0xa7c   : > { %v9469_v45 = vpop.permute.xlu0 %3661  ;;  %v9479_v48 = vpop.permute.xlu2 %3703 }
 0xa7d   : > { %12614 = vst [vmem:[#allocation304_spill] sm:$0xff] %v9469_v45  ;;  %v9473_v26 = vpop.permute.xlu1 %3663 }
 0xa7e   : > { %12616 = vst [vmem:[#allocation306_spill] sm:$0xff] %v9473_v26 }
 0xa7f   : > { %12619 = vst [vmem:[#allocation309_spill] sm:$0xff] %v9479_v48 }
 0xa84   : > { %v9475_v20 = vpop.permute.xlu0 %3667  ;;  %v9487_v58 = vpop.permute.xlu2 %3735 }
 0xa85   : > { %12617 = vst [vmem:[#allocation307_spill] sm:$0xff] %v9475_v20  ;;  %v9477_v12 = vpop.permute.xlu1 %3669 }
 0xa86   : > { %12618 = vst [vmem:[#allocation308_spill] sm:$0xff] %v9477_v12 }
 0xa87   : > { %12623 = vst [vmem:[#allocation313_spill] sm:$0xff] %v9487_v58 }
 0xa8c   : > { %v9481_v13 = vpop.permute.xlu0 %3699  ;;  %v9493_v37 = vpop.permute.xlu2 %3741 }
 0xa8d   : > { %12620 = vst [vmem:[#allocation310_spill] sm:$0xff] %v9481_v13  ;;  %v9483_v51 = vpop.permute.xlu1 %3701 }
 0xa8e   : > { %12621 = vst [vmem:[#allocation311_spill] sm:$0xff] %v9483_v51 }
 0xa8f   : > { %12626 = vst [vmem:[#allocation316_spill] sm:$0xff] %v9493_v37 }
 0xa94   : > { %v9485_v62 = vpop.permute.xlu0 %3705  ;;  %v3769_v48 = vpop.permute.xlu2 %3768 }
 0xa95   : > { %12622 = vst [vmem:[#allocation312_spill] sm:$0xff] %v9485_v62  ;;  %v9489_v49 = vpop.permute.xlu1 %3733 }
 0xa96   : > { %12624 = vst [vmem:[#allocation314_spill] sm:$0xff] %v9489_v49 }
 0xa9c   : > { %v9491_v47 = vpop.permute.xlu0 %3737 }
 0xa9d   : > { %12625 = vst [vmem:[#allocation315_spill] sm:$0xff] %v9491_v47  ;;  %v9495_v22 = vpop.permute.xlu1 %3739 }
 0xa9e   : > { %12627 = vst [vmem:[#allocation317_spill] sm:$0xff] %v9495_v22 }
 0xaa4   : > { %v3765_v12 = vpop.permute.xlu0 %3764 }
 0xaa5   : > { %v3781_v24 = vmul.f32 %v3765_v12, %v9253_v38  ;;  %v3767_v20 = vpop.permute.xlu1 %3766  ;;  %v3786_v26 = vmul.f32 %v9271_v32, %v3765_v12 }
 0xaa6   : > { %v3774_v49 = vsel %vm3772_vm6, %v3767_v20, %v3769_v48  ;;  %v3773_v58 = vsel %vm3772_vm6, %v3765_v12, %v3767_v20  ;;  %v3829_v20 = vstv %s6833_s17  ;;  %s6835_s17 = sld [smem:[#allocation5 + $0x62]] }
 0xaa7   : > { %v3793_v51 = vmul.f32 %v3792_v33, %v3781_v24  ;;  %v3783_v47 = vmul.f32 %v3774_v49, %v9263_v40  ;;  %v3782_v37 = vmul.f32 %v3773_v58, %v9260_v31  ;;  %v3830_v23 = vmul.f32 %v3829_v20, %v3786_v26 }
 0xaa8   : > { %v3787_v39 = vmul.f32 %v9282_v43, %v3773_v58 }
 0xaa9   : > { %3803 = vrot.lane.b32.xlu1 %v3793_v51, %s7538_s13  ;;  %v3795_v22 = vmul.f32 %v3792_v33, %v3783_v47  ;;  %v3794_v13 = vmul.f32 %v3792_v33, %v3782_v37 }
 0xaab   : > { %3807 = vrot.lane.b32.xlu0 %v3795_v22, %s7538_s13  ;;  %3805 = vrot.lane.b32.xlu2 %v3794_v13, %s7538_s13  ;;  %v3788_v13 = vmul.f32 %v9287_v21, %v3774_v49 }
 0xaac   : > { %v3771_v62 = vpop.permute.xlu0 %3770 }
 0xaad   : > { %v3775_v45 = vsel %vm3772_vm6, %v3769_v48, %v3771_v62  ;;  %v3785_v51 = vmul.f32 %v3771_v62, %v9274_v60  ;;  %v3831_v48 = vmul.f32 %v3829_v20, %v3787_v39  ;;  %v3790_v22 = vmul.f32 %v9297_v16, %v3771_v62 }
 0xaae   : > { %v3784_v29 = vmul.f32 %v3775_v45, %v9268_v7  ;;  %v3789_v12 = vmul.f32 %v9290_v27, %v3775_v45  ;;  %v3832_v11 = vmul.f32 %v3829_v20, %v3788_v13  ;;  %vm12291_vm6 = vcmask 900096  }
 0xaaf   : > { %v3797_v28 = vmul.f32 %v3792_v33, %v3785_v51 }
 0xab0   : > { %v3796_v19 = vmul.f32 %v3792_v33, %v3784_v29  ;;  %v3833_v55 = vmul.f32 %v3829_v20, %v3789_v12  ;;  %v3937_v33 = vld [vmem:[#allocation17 + $0x42] ss:$8 sm:$0xf] }
 0xab2   : > { %3809 = vrot.lane.b32.xlu1 %v3796_v19, %s7538_s13  ;;  %v3834_v19 = vmul.f32 %v3829_v20, %v3790_v22  ;;  %v3939_v20 = vperm.slane %v3937_v33, 0 }
 0xab3   : > { %3840 = vrot.lane.b32.xlu0 %v3830_v23, %s7538_s13  ;;  %3811 = vrot.lane.b32.xlu2 %v3797_v28, %s7538_s13  ;;  %v3865_v23 = vstv %s6834_s1  ;;  %s6842_s1 = sld [smem:[#allocation5 + $0x49]] }
 0xab4   : > { %v3867_v28 = vmul.f32 %v3865_v23, %v3782_v37  ;;  %v3866_v45 = vmul.f32 %v3865_v23, %v3781_v24  ;;  %v3868_v58 = vmul.f32 %v3865_v23, %v3783_v47  ;;  %v3870_v62 = vmul.f32 %v3865_v23, %v3785_v51 }
 0xab5   : > { %v3869_v49 = vmul.f32 %v3865_v23, %v3784_v29  ;;  %v3940_v51 = vperm.slane %v3937_v33, 1 }
 0xaba   : > { %3842 = vrot.lane.b32.xlu1 %v3831_v48, %s7538_s13  ;;  %v4018_v48 = vld [vmem:[#allocation17 + $0x43] ss:$8 sm:$0xf] }
 0xabb   : > { %3846 = vrot.lane.b32.xlu0 %v3833_v55, %s7538_s13  ;;  %3844 = vrot.lane.b32.xlu2 %v3832_v11, %s7538_s13  ;;  %v3901_v55 = vstv %s6835_s17  ;;  %s6843_s17 = sld [smem:[#allocation5 + $0x64]] }
 0xabc   : > { %v3902_v11 = vmul.f32 %v3901_v55, %v3786_v26  ;;  %v3904_v37 = vmul.f32 %v3901_v55, %v3788_v13  ;;  %v3903_v24 = vmul.f32 %v3901_v55, %v3787_v39  ;;  %v3905_v47 = vmul.f32 %v3901_v55, %v3789_v12 }
 0xabd   : > { %v3906_v29 = vmul.f32 %v3901_v55, %v3790_v22  ;;  %v3942_v26 = vperm.slane %v3937_v33, 3  ;;  %v3941_v39 = vperm.slane %v3937_v33, 2  ;;  %v4020_v13 = vperm.slane %v4018_v48, 0 }
 0xabe   : > { %v4022_v12 = vperm.slane %v4018_v48, 2  ;;  %v4023_v22 = vperm.slane %v4018_v48, 3 }
 0xac2   : > { %3848 = vrot.lane.b32.xlu1 %v3834_v19, %s7538_s13  ;;  %v4021_v19 = vperm.slane %v4018_v48, 1 }
 0xac3   : > { %3878 = vrot.lane.b32.xlu0 %v3867_v28, %s7538_s13  ;;  %3876 = vrot.lane.b32.xlu2 %v3866_v45, %s7538_s13 }
 0xaca   : > { %3880 = vrot.lane.b32.xlu1 %v3868_v58, %s7538_s13 }
 0xacb   : > { %3884 = vrot.lane.b32.xlu0 %v3870_v62, %s7538_s13  ;;  %3882 = vrot.lane.b32.xlu2 %v3869_v49, %s7538_s13 }
 0xad2   : > { %3912 = vrot.lane.b32.xlu1 %v3902_v11, %s7538_s13 }
 0xad3   : > { %3916 = vrot.lane.b32.xlu0 %v3904_v37, %s7538_s13  ;;  %3914 = vrot.lane.b32.xlu2 %v3903_v24, %s7538_s13 }
 0xada   : > { %3918 = vrot.lane.b32.xlu1 %v3905_v47, %s7538_s13 }
 0xadb   : > { %3943 = vrot.lane.b32.xlu0 %v3939_v20, %s7512_s22  ;;  %3920 = vrot.lane.b32.xlu2 %v3906_v29, %s7538_s13  ;;  %s6841_s13 = sld [smem:[#allocation5 + $0x2e]] }
 0xae2   : > { %3945 = vrot.lane.b32.xlu1 %v3940_v51, %s7512_s22 }
 0xae3   : > { %3949 = vrot.lane.b32.xlu0 %v3942_v26, %s7512_s22  ;;  %3947 = vrot.lane.b32.xlu2 %v3941_v39, %s7512_s22 }
 0xaea   : > { %4024 = vrot.lane.b32.xlu1 %v4020_v13, %s7513_s27 }
 0xaeb   : > { %4028 = vrot.lane.b32.xlu0 %v4022_v12, %s7513_s27  ;;  %4026 = vrot.lane.b32.xlu2 %v4021_v19, %s7513_s27 }
 0xaf2   : > { %4030 = vrot.lane.b32.xlu1 %v4023_v22, %s7513_s27  ;;  %s6840_s27 = sld [smem:[#allocation5 + $0x13]] }
 0xb05   : > { %v9535_v23 = vpop.permute.xlu2 %3805 }
 0xb06   : > { %12628 = vst [vmem:[#allocation318_spill] sm:$0xff] %v9535_v23 }
 0xb0d   : > { %v9537_v28 = vpop.permute.xlu2 %3811 }
 0xb0e   : > { %12629 = vst [vmem:[#allocation319_spill] sm:$0xff] %v9537_v28 }
 0xb15   : > { %v9541_v58 = vpop.permute.xlu2 %3844 }
 0xb16   : > { %12631 = vst [vmem:[#allocation321_spill] sm:$0xff] %v9541_v58 }
 0xb1b   : > { %v9539_v45 = vpop.permute.xlu1 %3803 }
 0xb1c   : > { %12630 = vst [vmem:[#allocation320_spill] sm:$0xff] %v9539_v45 }
 0xb1d   : > { %v9543_v62 = vpop.permute.xlu0 %3807  ;;  %v9549_v11 = vpop.permute.xlu2 %3876 }
 0xb1e   : > { %12632 = vst [vmem:[#allocation322_spill] sm:$0xff] %v9543_v62 }
 0xb1f   : > { %12635 = vst [vmem:[#allocation325_spill] sm:$0xff] %v9549_v11 }
 0xb24   : > { %v9545_v49 = vpop.permute.xlu1 %3809 }
 0xb25   : > { %12633 = vst [vmem:[#allocation323_spill] sm:$0xff] %v9545_v49  ;;  %v9547_v55 = vpop.permute.xlu0 %3840  ;;  %v9555_v33 = vpop.permute.xlu2 %3882  ;;  %v4087_v49 = vstv %s6841_s13  ;;  %s6847_s13 = sld [smem:[#allocation5 + $0x65]] }
 0xb26   : > { %12634 = vst [vmem:[#allocation324_spill] sm:$0xff] %v9547_v55 }
 0xb27   : > { %12638 = vst [vmem:[#allocation328_spill] sm:$0xff] %v9555_v33 }
 0xb2c   : > { %v9551_v37 = vpop.permute.xlu1 %3842 }
 0xb2d   : > { %12636 = vst [vmem:[#allocation326_spill] sm:$0xff] %v9551_v37  ;;  %v9553_v24 = vpop.permute.xlu0 %3846  ;;  %v9563_v51 = vpop.permute.xlu2 %3914 }
 0xb2e   : > { %12637 = vst [vmem:[#allocation327_spill] sm:$0xff] %v9553_v24 }
 0xb2f   : > { %12642 = vst [vmem:[#allocation332_spill] sm:$0xff] %v9563_v51 }
 0xb34   : > { %v9557_v47 = vpop.permute.xlu1 %3848 }
 0xb35   : > { %12639 = vst [vmem:[#allocation329_spill] sm:$0xff] %v9557_v47  ;;  %v9559_v20 = vpop.permute.xlu0 %3878  ;;  %v9569_v39 = vpop.permute.xlu2 %3920 }
 0xb36   : > { %12640 = vst [vmem:[#allocation330_spill] sm:$0xff] %v9559_v20 }
 0xb37   : > { %12645 = vst [vmem:[#allocation335_spill] sm:$0xff] %v9569_v39 }
 0xb3c   : > { %v9561_v29 = vpop.permute.xlu1 %3880 }
 0xb3d   : > { %12641 = vst [vmem:[#allocation331_spill] sm:$0xff] %v9561_v29  ;;  %v9565_v26 = vpop.permute.xlu0 %3884  ;;  %v9577_v22 = vpop.permute.xlu2 %3947 }
 0xb3e   : > { %12643 = vst [vmem:[#allocation333_spill] sm:$0xff] %v9565_v26  ;;  %v4051_v26 = vstv %s6840_s27  ;;  %s6846_s27 = sld [smem:[#allocation5 + $0x4a]] }
 0xb3f   : > { %12649 = vst [vmem:[#allocation339_spill] sm:$0xff] %v9577_v22 }
 0xb44   : > { %v9567_v48 = vpop.permute.xlu1 %3912 }
 0xb45   : > { %12644 = vst [vmem:[#allocation334_spill] sm:$0xff] %v9567_v48  ;;  %v9571_v13 = vpop.permute.xlu0 %3916  ;;  %v4027_v51 = vpop.permute.xlu2 %4026 }
 0xb46   : > { %12646 = vst [vmem:[#allocation336_spill] sm:$0xff] %v9571_v13 }
 0xb4c   : > { %v9573_v12 = vpop.permute.xlu1 %3918 }
 0xb4d   : > { %12647 = vst [vmem:[#allocation337_spill] sm:$0xff] %v9573_v12  ;;  %v9575_v19 = vpop.permute.xlu0 %3943 }
 0xb4e   : > { %12648 = vst [vmem:[#allocation338_spill] sm:$0xff] %v9575_v19 }
 0xb54   : > { %v9579_v47 = vpop.permute.xlu1 %3945 }
 0xb55   : > { %12650 = vst [vmem:[#allocation340_spill] sm:$0xff] %v9579_v47  ;;  %v9581_v28 = vpop.permute.xlu0 %3949 }
 0xb56   : > { %12651 = vst [vmem:[#allocation341_spill] sm:$0xff] %v9581_v28 }
 0xb5c   : > { %v4025_v33 = vpop.permute.xlu1 %4024 }
 0xb5d   : > { %v4032_v48 = vsel %vm959_vm0, %v4025_v33, %v4027_v51  ;;  %v4040_v39 = vmul.f32 %v4025_v33, %v9253_v38  ;;  %v4029_v12 = vpop.permute.xlu0 %4028  ;;  %v4045_v58 = vmul.f32 %v9271_v32, %v4025_v33 }
 0xb5e   : > { %v4041_v13 = vmul.f32 %v4032_v48, %v9260_v31  ;;  %v4033_v22 = vsel %vm959_vm0, %v4027_v51, %v4029_v12 }
 0xb5f   : > { %v4052_v29 = vmul.f32 %v4051_v26, %v4040_v39  ;;  %v4042_v24 = vmul.f32 %v4033_v22, %v9263_v40 }
 0xb60   : > { %v4053_v20 = vmul.f32 %v4051_v26, %v4041_v13 }
 0xb61   : > { %4062 = vrot.lane.b32.xlu2 %v4052_v29, %s7515_s18  ;;  %v4054_v28 = vmul.f32 %v4051_v26, %v4042_v24  ;;  %v4046_v29 = vmul.f32 %v9282_v43, %v4032_v48 }
 0xb62   : > { %4064 = vrot.lane.b32.xlu0 %v4053_v20, %s7515_s18  ;;  %v4088_v20 = vmul.f32 %v4087_v49, %v4045_v58 }
 0xb63   : > { %4066 = vrot.lane.b32.xlu1 %v4054_v28, %s7515_s18  ;;  %v4089_v62 = vmul.f32 %v4087_v49, %v4046_v29 }
 0xb64   : > { %v4031_v11 = vpop.permute.xlu1 %4030 }
 0xb65   : > { %v4034_v47 = vsel %vm959_vm0, %v4029_v12, %v4031_v11  ;;  %v4044_v19 = vmul.f32 %v4031_v11, %v9274_v60  ;;  %v4047_v12 = vmul.f32 %v9287_v21, %v4033_v22 }
 0xb66   : > { %v4043_v55 = vmul.f32 %v4034_v47, %v9268_v7  ;;  %v4048_v28 = vmul.f32 %v9290_v27, %v4034_v47 }
 0xb67   : > { %v4056_v37 = vmul.f32 %v4051_v26, %v4044_v19  ;;  %v4090_v33 = vmul.f32 %v4087_v49, %v4047_v12 }
 0xb68   : > { %v4055_v51 = vmul.f32 %v4051_v26, %v4043_v55  ;;  %v4091_v26 = vmul.f32 %v4087_v49, %v4048_v28 }
 0xb6a   : > { %4070 = vrot.lane.b32.xlu0 %v4056_v37, %s7515_s18  ;;  %4068 = vrot.lane.b32.xlu2 %v4055_v51, %s7515_s18  ;;  %v4049_v37 = vmul.f32 %v9297_v16, %v4031_v11  ;;  %v4123_v51 = vstv %s6842_s1  ;;  %s6850_s1 = sld [smem:[#allocation5 + $0x4b]] }
 0xb6b   : > { %4098 = vrot.lane.b32.xlu1 %v4088_v20, %s7515_s18  ;;  %v4124_v45 = vmul.f32 %v4123_v51, %v4040_v39  ;;  %v4125_v22 = vmul.f32 %v4123_v51, %v4041_v13  ;;  %v4126_v47 = vmul.f32 %v4123_v51, %v4042_v24  ;;  %v4128_v11 = vmul.f32 %v4123_v51, %v4044_v19  ;;  %v4195_v13 = vld [vmem:[#allocation17 + $0x44] ss:$8 sm:$0xf] }
 0xb6c   : > { %v4092_v48 = vmul.f32 %v4087_v49, %v4049_v37  ;;  %v4159_v20 = vstv %s6843_s17  ;;  %v4197_v19 = vperm.slane %v4195_v13, 0  ;;  %s6851_s17 = sld [smem:[#allocation5 + $0x66]] }
 0xb6d   : > { %v4161_v49 = vmul.f32 %v4159_v20, %v4046_v29  ;;  %v4160_v39 = vmul.f32 %v4159_v20, %v4045_v58  ;;  %v4164_v24 = vmul.f32 %v4159_v20, %v4049_v37  ;;  %v4198_v29 = vperm.slane %v4195_v13, 1 }
 0xb6e   : > { %v4200_v58 = vperm.slane %v4195_v13, 3 }
 0xb72   : > { %4100 = vrot.lane.b32.xlu2 %v4089_v62, %s7515_s18  ;;  %4102 = vrot.lane.b32.xlu0 %v4090_v33, %s7515_s18  ;;  %v4127_v62 = vmul.f32 %v4123_v51, %v4043_v55  ;;  %v4163_v55 = vmul.f32 %v4159_v20, %v4048_v28  ;;  %v4199_v33 = vperm.slane %v4195_v13, 2 }
 0xb73   : > { %4104 = vrot.lane.b32.xlu1 %v4091_v26, %s7515_s18 }
 0xb7a   : > { %4106 = vrot.lane.b32.xlu2 %v4092_v48, %s7515_s18  ;;  %4134 = vrot.lane.b32.xlu0 %v4124_v45, %s7515_s18  ;;  %v4162_v45 = vmul.f32 %v4159_v20, %v4047_v12 }
 0xb7b   : > { %4136 = vrot.lane.b32.xlu1 %v4125_v22, %s7515_s18 }
 0xb82   : > { %4140 = vrot.lane.b32.xlu0 %v4127_v62, %s7515_s18  ;;  %4138 = vrot.lane.b32.xlu2 %v4126_v47, %s7515_s18 }
 0xb83   : > { %4142 = vrot.lane.b32.xlu1 %v4128_v11, %s7515_s18 }
 0xb8a   : > { %4172 = vrot.lane.b32.xlu0 %v4161_v49, %s7515_s18  ;;  %4170 = vrot.lane.b32.xlu2 %v4160_v39, %s7515_s18 }
 0xb8b   : > { %4174 = vrot.lane.b32.xlu1 %v4162_v45, %s7515_s18 }
 0xb92   : > { %4178 = vrot.lane.b32.xlu0 %v4164_v24, %s7515_s18  ;;  %4176 = vrot.lane.b32.xlu2 %v4163_v55, %s7515_s18  ;;  %s6845_s18 = sld [smem:[#allocation5 + $0x2f]] }
 0xb93   : > { %4201 = vrot.lane.b32.xlu1 %v4197_v19, %s7514_s2 }
 0xb9a   : > { %4205 = vrot.lane.b32.xlu0 %v4199_v33, %s7514_s2  ;;  %4203 = vrot.lane.b32.xlu2 %v4198_v29, %s7514_s2 }
 0xb9b   : > { %4207 = vrot.lane.b32.xlu1 %v4200_v58, %s7514_s2  ;;  %s6844_s2 = sld [smem:[#allocation5 + $0x14]] }
 0xbbb   : > { %v9620_v12 = vpop.permute.xlu2 %4062 }
 0xbbc   : > { %12652 = vst [vmem:[#allocation342_spill] sm:$0xff] %v9620_v12  ;;  %v4513_v12 = vstv %s6851_s17  ;;  %s10798_s17 = sld [smem:[#allocation5 + $0x63]] }
 0xbc4   : > { %v9622_v37 = vpop.permute.xlu2 %4068 }
 0xbc5   : > { %12653 = vst [vmem:[#allocation343_spill] sm:$0xff] %v9622_v37 }
 0xbcc   : > { %v9626_v26 = vpop.permute.xlu2 %4100 }
 0xbcd   : > { %12655 = vst [vmem:[#allocation345_spill] sm:$0xff] %v9626_v26 }
 0xbd4   : > { %v9624_v28 = vpop.permute.xlu0 %4064  ;;  %v9632_v22 = vpop.permute.xlu2 %4106 }
 0xbd5   : > { %12654 = vst [vmem:[#allocation344_spill] sm:$0xff] %v9624_v28  ;;  %v9628_v51 = vpop.permute.xlu1 %4066  ;;  %v7161_v28 = vld [vmem:[%s7738_s12 + $0x8] sm:$0xff] }
 0xbd6   : > { %12656 = vst [vmem:[#allocation346_spill] sm:$0xff] %v9628_v51  ;;  %v4264_v51 = vstv %s6845_s18  ;;  %s896_s18 = sld [smem:[#allocation5]] }
 0xbd7   : > { %12658 = vst [vmem:[#allocation348_spill] sm:$0xff] %v9632_v22 }
 0xbdc   : > { %v9630_v48 = vpop.permute.xlu0 %4070  ;;  %v9640_v20 = vpop.permute.xlu2 %4138 }
 0xbdd   : > { %12657 = vst [vmem:[#allocation347_spill] sm:$0xff] %v9630_v48  ;;  %v9634_v47 = vpop.permute.xlu1 %4098 }
 0xbde   : > { %12659 = vst [vmem:[#allocation349_spill] sm:$0xff] %v9634_v47 }
 0xbdf   : > { %12662 = vst [vmem:[#allocation352_spill] sm:$0xff] %v9640_v20 }
 0xbe4   : > { %v9636_v62 = vpop.permute.xlu0 %4102  ;;  %v9646_v45 = vpop.permute.xlu2 %4170 }
 0xbe5   : > { %12660 = vst [vmem:[#allocation350_spill] sm:$0xff] %v9636_v62  ;;  %v9638_v11 = vpop.permute.xlu1 %4104 }
 0xbe6   : > { %12661 = vst [vmem:[#allocation351_spill] sm:$0xff] %v9638_v11 }
 0xbe7   : > { %12665 = vst [vmem:[#allocation355_spill] sm:$0xff] %v9646_v45 }
 0xbec   : > { %v9642_v49 = vpop.permute.xlu0 %4134  ;;  %v9654_v19 = vpop.permute.xlu2 %4176 }
 0xbed   : > { %12663 = vst [vmem:[#allocation353_spill] sm:$0xff] %v9642_v49  ;;  %v9644_v39 = vpop.permute.xlu1 %4136  ;;  %v4228_v49 = vstv %s6844_s2  ;;  %s6761_s2 = sld [smem:[#allocation5 + $0x36]] }
 0xbee   : > { %12664 = vst [vmem:[#allocation354_spill] sm:$0xff] %v9644_v39 }
 0xbef   : > { %12669 = vst [vmem:[#allocation359_spill] sm:$0xff] %v9654_v19 }
 0xbf4   : > { %v9648_v13 = vpop.permute.xlu0 %4140  ;;  %v4204_v58 = vpop.permute.xlu2 %4203 }
 0xbf5   : > { %12666 = vst [vmem:[#allocation356_spill] sm:$0xff] %v9648_v13  ;;  %v9650_v24 = vpop.permute.xlu1 %4142 }
 0xbf6   : > { %12667 = vst [vmem:[#allocation357_spill] sm:$0xff] %v9650_v24 }
 0xbfc   : > { %v9652_v55 = vpop.permute.xlu0 %4172 }
 0xbfd   : > { %12668 = vst [vmem:[#allocation358_spill] sm:$0xff] %v9652_v55  ;;  %v9656_v33 = vpop.permute.xlu1 %4174 }
 0xbfe   : > { %12670 = vst [vmem:[#allocation360_spill] sm:$0xff] %v9656_v33 }
 0xc04   : > { %v9658_v29 = vpop.permute.xlu0 %4178 }
 0xc05   : > { %12671 = vst [vmem:[#allocation361_spill] sm:$0xff] %v9658_v29  ;;  %v4202_v20 = vpop.permute.xlu1 %4201 }
 0xc06   : > { %v4209_v39 = vsel %vm1138_vm4, %v4202_v20, %v4204_v58  ;;  %v4217_v45 = vmul.f32 %v4202_v20, %v9253_v38 }
 0xc07   : > { %v4218_v13 = vmul.f32 %v4209_v39, %v9260_v31 }
 0xc08   : > { %v4229_v11 = vmul.f32 %v4228_v49, %v4217_v45 }
 0xc09   : > { %v4230_v24 = vmul.f32 %v4228_v49, %v4218_v13 }
 0xc0a   : > { %4239 = vrot.lane.b32.xlu2 %v4229_v11, %s7516_s28  ;;  %v4222_v11 = vmul.f32 %v9271_v32, %v4202_v20 }
 0xc0b   : > { %4241 = vrot.lane.b32.xlu0 %v4230_v24, %s7516_s28 }
 0xc0c   : > { %v4206_v22 = vpop.permute.xlu0 %4205 }
 0xc0d   : > { %v4210_v19 = vsel %vm1138_vm4, %v4204_v58, %v4206_v22  ;;  %v4208_v55 = vpop.permute.xlu1 %4207 }
 0xc0e   : > { %v4219_v29 = vmul.f32 %v4210_v19, %v9263_v40  ;;  %v4221_v48 = vmul.f32 %v4208_v55, %v9274_v60  ;;  %v4211_v38 = vsel %vm1138_vm4, %v4206_v22, %v4208_v55  ;;  %v4223_v40 = vmul.f32 %v9282_v43, %v4209_v39 }
 0xc0f   : > { %v4220_v31 = vmul.f32 %v4211_v38, %v9268_v7  ;;  %v4224_v24 = vmul.f32 %v9287_v21, %v4210_v19  ;;  %v4265_v60 = vmul.f32 %v4264_v51, %v4222_v11  ;;  %v4225_v7 = vmul.f32 %v9290_v27, %v4211_v38 }
 0xc10   : > { %v4231_v33 = vmul.f32 %v4228_v49, %v4219_v29  ;;  %v4233_v37 = vmul.f32 %v4228_v49, %v4221_v48  ;;  %v4226_v32 = vmul.f32 %v9297_v16, %v4208_v55  ;;  %v4336_v39 = vstv %s6847_s13  ;;  %v4372_v55 = vld [vmem:[#allocation17 + $0x45] ss:$8 sm:$0xf]  ;;  %s10185_s13 = sld [smem:[#allocation5 + $0x31]] }
 0xc11   : > { %v4232_v62 = vmul.f32 %v4228_v49, %v4220_v31  ;;  %v4267_v22 = vmul.f32 %v4264_v51, %v4224_v24  ;;  %v4340_v19 = vmul.f32 %v4336_v39, %v4225_v7  ;;  %v4376_v58 = vperm.slane %v4372_v55, 2 }
 0xc12   : > { %4243 = vrot.lane.b32.xlu1 %v4231_v33, %s7516_s28  ;;  %v4266_v33 = vmul.f32 %v4264_v51, %v4223_v40  ;;  %v4269_v43 = vmul.f32 %v4264_v51, %v4226_v32  ;;  %v4375_v38 = vperm.slane %v4372_v55, 1  ;;  %vm876_vm4 = vcmask 449536  }
 0xc13   : > { %4247 = vrot.lane.b32.xlu0 %v4233_v37, %s7516_s28  ;;  %4245 = vrot.lane.b32.xlu2 %v4232_v62, %s7516_s28  ;;  %v4268_v37 = vmul.f32 %v4264_v51, %v4225_v7  ;;  %v4300_v62 = vstv %s6846_s27  ;;  %v4338_v51 = vmul.f32 %v4336_v39, %v4223_v40  ;;  %s6760_s27 = sld [smem:[#allocation5 + $0x1b]] }
 0xc14   : > { %v4301_v21 = vmul.f32 %v4300_v62, %v4217_v45  ;;  %v4302_v20 = vmul.f32 %v4300_v62, %v4218_v13  ;;  %v4303_v27 = vmul.f32 %v4300_v62, %v4219_v29  ;;  %v4304_v49 = vmul.f32 %v4300_v62, %v4220_v31 }
 0xc15   : > { %v4305_v16 = vmul.f32 %v4300_v62, %v4221_v48  ;;  %v4337_v45 = vmul.f32 %v4336_v39, %v4222_v11  ;;  %v4339_v13 = vmul.f32 %v4336_v39, %v4224_v24  ;;  %v4341_v29 = vmul.f32 %v4336_v39, %v4226_v32 }
 0xc16   : > { %v4374_v48 = vperm.slane %v4372_v55, 0  ;;  %v4377_v31 = vperm.slane %v4372_v55, 3 }
 0xc1a   : > { %4275 = vrot.lane.b32.xlu1 %v4265_v60, %s7516_s28 }
 0xc1b   : > { %4277 = vrot.lane.b32.xlu2 %v4266_v33, %s7516_s28  ;;  %4279 = vrot.lane.b32.xlu0 %v4267_v22, %s7516_s28 }
 0xc22   : > { %4281 = vrot.lane.b32.xlu1 %v4268_v37, %s7516_s28 }
 0xc23   : > { %4283 = vrot.lane.b32.xlu2 %v4269_v43, %s7516_s28  ;;  %4311 = vrot.lane.b32.xlu0 %v4301_v21, %s7516_s28 }
 0xc2a   : > { %4313 = vrot.lane.b32.xlu1 %v4302_v20, %s7516_s28 }
 0xc2b   : > { %4317 = vrot.lane.b32.xlu0 %v4304_v49, %s7516_s28  ;;  %4315 = vrot.lane.b32.xlu2 %v4303_v27, %s7516_s28 }
 0xc32   : > { %4319 = vrot.lane.b32.xlu1 %v4305_v16, %s7516_s28 }
 0xc33   : > { %4349 = vrot.lane.b32.xlu0 %v4338_v51, %s7516_s28  ;;  %4347 = vrot.lane.b32.xlu2 %v4337_v45, %s7516_s28 }
 0xc3a   : > { %4351 = vrot.lane.b32.xlu1 %v4339_v13, %s7516_s28 }
 0xc3b   : > { %4355 = vrot.lane.b32.xlu0 %v4341_v29, %s7516_s28  ;;  %4353 = vrot.lane.b32.xlu2 %v4340_v19, %s7516_s28  ;;  %s6848_s28 = sld [smem:[#allocation5 + $0x15]] }
 0xc41   : > { %v4405_v29 = vstv %s6848_s28  ;;  %s10270_s28 = sld [smem:[#allocation5 + $0x4c]] }
 0xc42   : > { %4378 = vrot.lane.b32.xlu1 %v4374_v48, %s7517_s21 }
 0xc43   : > { %4382 = vrot.lane.b32.xlu0 %v4376_v58, %s7517_s21  ;;  %4380 = vrot.lane.b32.xlu2 %v4375_v38, %s7517_s21  ;;  %v9739_v58 = vld [vmem:[%s7738_s12 + $0x8] sm:$0xff] }
 0xc4a   : > { %4384 = vrot.lane.b32.xlu1 %v4377_v31, %s7517_s21  ;;  %v9743_v31 = vld [vmem:[%s7738_s12 + $0x10] sm:$0xff]  ;;  %s6849_s21 = sld [smem:[#allocation5 + $0x30]] }
 0xc4b   : > { %12692 = vst [vmem:[#allocation382_spill] sm:$0xff] %v9743_v31 }
 0xc64   : > { %v9697_v11 = vpop.permute.xlu2 %4239 }
 0xc65   : > { %12672 = vst [vmem:[#allocation362_spill] sm:$0xff] %v9697_v11 }
 0xc6d   : > { %v9699_v40 = vpop.permute.xlu2 %4245 }
 0xc6e   : > { %12673 = vst [vmem:[#allocation363_spill] sm:$0xff] %v9699_v40 }
 0xc75   : > { %v9703_v60 = vpop.permute.xlu2 %4277 }
 0xc76   : > { %12675 = vst [vmem:[#allocation365_spill] sm:$0xff] %v9703_v60  ;;  %v9774_v60 = vld [vmem:[%s7738_s12 + $0x48] sm:$0xff] }
 0xc77   : > { %12698 = vst [vmem:[#allocation388_spill] sm:$0xff] %v9774_v60 }
 0xc7d   : > { %v9701_v24 = vpop.permute.xlu0 %4241  ;;  %v9709_v33 = vpop.permute.xlu2 %4283 }
 0xc7e   : > { %12674 = vst [vmem:[#allocation364_spill] sm:$0xff] %v9701_v24 }
 0xc7f   : > { %12678 = vst [vmem:[#allocation368_spill] sm:$0xff] %v9709_v33  ;;  %v9755_v33 = vld [vmem:[%s7738_s12 + $0x28] sm:$0xff] }
 0xc80   : > { %12694 = vst [vmem:[#allocation384_spill] sm:$0xff] %v9755_v33 }
 0xc84   : > { %v9705_v7 = vpop.permute.xlu1 %4243 }
 0xc85   : > { %12676 = vst [vmem:[#allocation366_spill] sm:$0xff] %v9705_v7  ;;  %v9707_v22 = vpop.permute.xlu0 %4247  ;;  %v9717_v43 = vpop.permute.xlu2 %4315  ;;  %v4441_v7 = vstv %s6849_s21  ;;  %s10380_s21 = sld [smem:[#allocation5 + $0x67]] }
 0xc86   : > { %12677 = vst [vmem:[#allocation367_spill] sm:$0xff] %v9707_v22  ;;  %v9759_v22 = vld [vmem:[%s7738_s12 + $0x38] sm:$0xff] }
 0xc87   : > { %12682 = vst [vmem:[#allocation372_spill] sm:$0xff] %v9717_v43 }
 0xc88   : > { %12695 = vst [vmem:[#allocation385_spill] sm:$0xff] %v9759_v22 }
 0xc8c   : > { %v9711_v32 = vpop.permute.xlu1 %4275 }
 0xc8d   : > { %12679 = vst [vmem:[#allocation369_spill] sm:$0xff] %v9711_v32  ;;  %v9713_v37 = vpop.permute.xlu0 %4279  ;;  %v9723_v27 = vpop.permute.xlu2 %4347  ;;  %v9770_v32 = vld [vmem:[%s7738_s12 + $0x40] sm:$0xff] }
 0xc8e   : > { %12680 = vst [vmem:[#allocation370_spill] sm:$0xff] %v9713_v37 }
 0xc8f   : > { %12685 = vst [vmem:[#allocation375_spill] sm:$0xff] %v9723_v27 }
 0xc90   : > { %12697 = vst [vmem:[#allocation387_spill] sm:$0xff] %v9770_v32 }
 0xc94   : > { %v9715_v62 = vpop.permute.xlu1 %4281 }
 0xc95   : > { %12681 = vst [vmem:[#allocation371_spill] sm:$0xff] %v9715_v62  ;;  %v9719_v21 = vpop.permute.xlu0 %4311  ;;  %v9731_v51 = vpop.permute.xlu2 %4353 }
 0xc96   : > { %12683 = vst [vmem:[#allocation373_spill] sm:$0xff] %v9719_v21 }
 0xc97   : > { %12689 = vst [vmem:[#allocation379_spill] sm:$0xff] %v9731_v51 }
 0xc9c   : > { %v9721_v20 = vpop.permute.xlu1 %4313 }
 0xc9d   : > { %12684 = vst [vmem:[#allocation374_spill] sm:$0xff] %v9721_v20  ;;  %v9725_v49 = vpop.permute.xlu0 %4317  ;;  %v4381_v55 = vpop.permute.xlu2 %4380 }
 0xc9e   : > { %12686 = vst [vmem:[#allocation376_spill] sm:$0xff] %v9725_v49  ;;  %v9749_v49 = vld [vmem:[%s7738_s12 + $0x18] sm:$0xff] }
 0xc9f   : > { %12693 = vst [vmem:[#allocation383_spill] sm:$0xff] %v9749_v49 }
 0xca4   : > { %v9727_v16 = vpop.permute.xlu1 %4319 }
 0xca5   : > { %12687 = vst [vmem:[#allocation377_spill] sm:$0xff] %v9727_v16  ;;  %v9729_v39 = vpop.permute.xlu0 %4349 }
 0xca6   : > { %12688 = vst [vmem:[#allocation378_spill] sm:$0xff] %v9729_v39 }
 0xcac   : > { %v9733_v45 = vpop.permute.xlu1 %4351 }
 0xcad   : > { %12690 = vst [vmem:[#allocation380_spill] sm:$0xff] %v9733_v45  ;;  %v9735_v13 = vpop.permute.xlu0 %4355 }
 0xcae   : > { %12691 = vst [vmem:[#allocation381_spill] sm:$0xff] %v9735_v13 }
 0xcb4   : > { %v4379_v19 = vpop.permute.xlu1 %4378 }
 0xcb5   : > { %v4386_v48 = vsel %vm1317_vm14, %v4379_v19, %v4381_v55  ;;  %v4394_v38 = vmul.f32 %v9739_v58, %v4379_v19  ;;  %v4383_v16 = vpop.permute.xlu0 %4382 }
 0xcb6   : > { %v4395_v27 = vmul.f32 %v9743_v31, %v4386_v48  ;;  %v4387_v13 = vsel %vm1317_vm14, %v4381_v55, %v4383_v16  ;;  %v9764_v55 = vld [vmem:[%s7738_s12 + $0x20] sm:$0xff] }
 0xcb7   : > { %v4406_v21 = vmul.f32 %v4405_v29, %v4394_v38  ;;  %v4396_v39 = vmul.f32 %v9749_v49, %v4387_v13  ;;  %12696 = vst [vmem:[#allocation386_spill] sm:$0xff] %v9764_v55 }
 0xcb8   : > { %v4407_v51 = vmul.f32 %v4405_v29, %v4395_v27 }
 0xcb9   : > { %4416 = vrot.lane.b32.xlu2 %v4406_v21, %s7518_s16  ;;  %v4408_v45 = vmul.f32 %v4405_v29, %v4396_v39  ;;  %v4399_v21 = vmul.f32 %v9759_v22, %v4379_v19  ;;  %v4400_v19 = vmul.f32 %v9770_v32, %v4386_v48 }
 0xcba   : > { %4418 = vrot.lane.b32.xlu0 %v4407_v51, %s7518_s16 }
 0xcbb   : > { %4420 = vrot.lane.b32.xlu1 %v4408_v45, %s7518_s16  ;;  %v4401_v45 = vmul.f32 %v9774_v60, %v4387_v13  ;;  %v4477_v13 = vstv %s6850_s1  ;;  %s10794_s1 = sld [smem:[#allocation5 + $0x48]] }
 0xcbc   : > { %v4385_v20 = vpop.permute.xlu1 %4384  ;;  %v4478_v26 = vmul.f32 %v4477_v13, %v4394_v38 }
 0xcbd   : > { %v4388_v43 = vsel %vm1317_vm14, %v4383_v16, %v4385_v20  ;;  %v4398_v62 = vmul.f32 %v9755_v33, %v4385_v20  ;;  %v4442_v16 = vmul.f32 %v4441_v7, %v4399_v21  ;;  %v4444_v11 = vmul.f32 %v4441_v7, %v4401_v45 }
 0xcbe   : > { %v4397_v51 = vmul.f32 %v9764_v55, %v4388_v43 }
 0xcbf   : > { %v4410_v40 = vmul.f32 %v4405_v29, %v4398_v62 }
 0xcc0   : > { %v4409_v37 = vmul.f32 %v4405_v29, %v4397_v51  ;;  %v9779_v29 = vld [vmem:[%s7738_s12 + $0x50] sm:$0xff] }
 0xcc1   : > { %12699 = vst [vmem:[#allocation389_spill] sm:$0xff] %v9779_v29  ;;  %v4402_v24 = vmul.f32 %v9779_v29, %v4388_v43  ;;  %v4479_v43 = vmul.f32 %v4477_v13, %v4395_v27  ;;  %v4549_v27 = vld [vmem:[#allocation17 + $0x46] ss:$8 sm:$0xf] }
 0xcc2   : > { %4424 = vrot.lane.b32.xlu0 %v4410_v40, %s7518_s16  ;;  %4422 = vrot.lane.b32.xlu2 %v4409_v37, %s7518_s16  ;;  %v4443_v40 = vmul.f32 %v4441_v7, %v4400_v19  ;;  %v9785_v37 = vld [vmem:[%s7738_s12 + $0x58] sm:$0xff] }
 0xcc3   : > { %4452 = vrot.lane.b32.xlu1 %v4442_v16, %s7518_s16  ;;  %12700 = vst [vmem:[#allocation390_spill] sm:$0xff] %v9785_v37  ;;  %v4403_v48 = vmul.f32 %v9785_v37, %v4385_v20  ;;  %v4445_v47 = vmul.f32 %v4441_v7, %v4402_v24  ;;  %v4482_v20 = vmul.f32 %v4477_v13, %v4398_v62  ;;  %v4551_v62 = vperm.slane %v4549_v27, 0  ;;  %v7163_v37 = vld [vmem:[%s7738_s12 + $0x38] sm:$0xff] }
 0xcc4   : > { %v4517_v38 = vmul.f32 %v4513_v12, %v4402_v24 }
 0xcc5   : > { %v4446_v16 = vmul.f32 %v4441_v7, %v4403_v48  ;;  %v4514_v7 = vmul.f32 %v4513_v12, %v4399_v21  ;;  %v4552_v21 = vperm.slane %v4549_v27, 1 }
 0xcca   : > { %4454 = vrot.lane.b32.xlu2 %v4443_v40, %s7518_s16  ;;  %4456 = vrot.lane.b32.xlu0 %v4444_v11, %s7518_s16  ;;  %v4480_v40 = vmul.f32 %v4477_v13, %v4396_v39  ;;  %v4481_v11 = vmul.f32 %v4477_v13, %v4397_v51  ;;  %v4518_v39 = vmul.f32 %v4513_v12, %v4403_v48  ;;  %v4553_v51 = vperm.slane %v4549_v27, 2  ;;  %v12704_v48 = vld [vmem:[#allocation25_spill] sm:$0xff] }
 0xccb   : > { %4458 = vrot.lane.b32.xlu1 %v4445_v47, %s7518_s16  ;;  %v4515_v47 = vmul.f32 %v4513_v12, %v4400_v19  ;;  %v4554_v19 = vperm.slane %v4549_v27, 3 }
 0xcd2   : > { %4460 = vrot.lane.b32.xlu2 %v4446_v16, %s7518_s16  ;;  %4488 = vrot.lane.b32.xlu0 %v4478_v26, %s7518_s16  ;;  %v4516_v26 = vmul.f32 %v4513_v12, %v4401_v45  ;;  %v12703_v45 = vld [vmem:[#allocation27_spill] sm:$0xff]  ;;  %v7155_v16 = vld [vmem:[%s7738_s12 + $0x20] sm:$0xff] }
 0xcd3   : > { %4490 = vrot.lane.b32.xlu1 %v4479_v43, %s7518_s16  ;;  %v879_v13 = vsel %vm876_vm4, %v12704_v48, %v12703_v45  ;;  %v9813_v43 = vmul.f32 %v7155_v16, %v12703_v45 }
 0xcd5   : > { %12705 = vst [vmem:[#allocation27_spill] sm:$0xff] %v9813_v43 }
 0xcda   : > { %4494 = vrot.lane.b32.xlu0 %v4481_v11, %s7518_s16  ;;  %4492 = vrot.lane.b32.xlu2 %v4480_v40, %s7518_s16  ;;  %v7156_v40 = vld [vmem:[%s7738_s12 + $0x50] sm:$0xff] }
 0xcdb   : > { %4496 = vrot.lane.b32.xlu1 %v4482_v20, %s7518_s16  ;;  %v9817_v11 = vmul.f32 %v7156_v40, %v12703_v45  ;;  %v921_v20 = vstv %s6761_s2  ;;  %s6856_s2 = sld [smem:[#allocation5 + $0x17]] }
 0xcdc   : > { %v926_v16 = vmul.f32 %v921_v20, %v9813_v43 }
 0xcdd   : > { %12706 = vst [vmem:[#allocation25_spill] sm:$0xff] %v9817_v11 }
 0xce2   : > { %4526 = vrot.lane.b32.xlu0 %v4515_v47, %s7518_s16  ;;  %4524 = vrot.lane.b32.xlu2 %v4514_v7, %s7518_s16  ;;  %v12707_v47 = vld [vmem:[#allocation26_spill] sm:$0xff]  ;;  %v12708_v7 = vld [vmem:[#allocation24_spill] sm:$0xff] }
 0xce3   : > { %4528 = vrot.lane.b32.xlu1 %v4516_v26, %s7518_s16  ;;  %v877_v26 = vsel %vm876_vm4, %v12708_v7, %v12707_v47 }
 0xce4   : > { %v886_v23 = vmul.f32 %v7161_v28, %v877_v26  ;;  %v892_v29 = vmul.f32 %v7163_v37, %v877_v26 }
 0xce6   : > { %v923_v49 = vmul.f32 %v921_v20, %v886_v23 }
 0xcea   : > { %4532 = vrot.lane.b32.xlu0 %v4518_v39, %s7518_s16  ;;  %4530 = vrot.lane.b32.xlu2 %v4517_v38, %s7518_s16  ;;  %s6762_s16 = sld [smem:[#allocation5 + $0x51]]  ;;  %v7157_v39 = vld [vmem:[%s7738_s12 + $0x18] sm:$0xff] }
 0xceb   : > { %4555 = vrot.lane.b32.xlu1 %v4551_v62, %s7519_s30  ;;  %v888_v38 = vmul.f32 %v7157_v39, %v879_v13  ;;  %v7158_v62 = vld [vmem:[%s7738_s12 + $0x48] sm:$0xff] }
 0xcf0   : > { %v933_v27 = vstv %s6762_s16  ;;  %s6857_s16 = sld [smem:[#allocation5 + $0x32]] }
 0xcf1   : > { %v938_v40 = vmul.f32 %v933_v27, %v9817_v11 }
 0xcf2   : > { %4559 = vrot.lane.b32.xlu0 %v4553_v51, %s7519_s30  ;;  %4557 = vrot.lane.b32.xlu2 %v4552_v21, %s7519_s30  ;;  %v894_v51 = vmul.f32 %v7158_v62, %v879_v13  ;;  %v878_v21 = vsel %vm876_vm4, %v12707_v47, %v12704_v48  ;;  %v9838_v62 = vstv %s6760_s27  ;;  %v7162_v48 = vld [vmem:[%s7738_s12 + $0x10] sm:$0xff]  ;;  %s6859_s27 = sld [smem:[#allocation5 + $0x68]] }
 0xcf3   : > { %4561 = vrot.lane.b32.xlu1 %v4554_v19, %s7519_s30  ;;  %v7159_v19 = vld [vmem:[%s7738_s12] sm:$0xff]  ;;  %12711 = vst [vmem:[#allocation393_spill] sm:$0xff] %v9838_v62  ;;  %v887_v47 = vmul.f32 %v7162_v48, %v878_v21  ;;  %v943_v22 = vadd.f32 %v938_v40, %v926_v16  ;;  %s10098_s30 = sld [smem:[#allocation5 + $0x16]] }
 0xcf4   : > { %v885_v45 = vmul.f32 %v7159_v19, %v12708_v7  ;;  %v7164_v19 = vld [vmem:[%s7738_s12 + $0x40] sm:$0xff]  ;;  %v913_v11 = vmul.f32 %v9838_v62, %v894_v51  ;;  %v937_v28 = vmul.f32 %v933_v27, %v894_v51 }
 0xcf5   : > { %v893_v60 = vmul.f32 %v7164_v19, %v878_v21  ;;  %v911_v21 = vmul.f32 %v9838_v62, %v892_v29  ;;  %v924_v51 = vmul.f32 %v921_v20, %v887_v47 }
 0xcf6   : > { %v922_v55 = vmul.f32 %v921_v20, %v885_v45 }
 0xcf7   : > { %v912_v19 = vmul.f32 %v9838_v62, %v893_v60  ;;  %v936_v16 = vmul.f32 %v933_v27, %v893_v60  ;;  %v1003_v60 = vsel %vm1000_vm10, %v8313_v14, %v8323_v63 }
 0xd13   : > { %v9804_v12 = vpop.permute.xlu2 %4416 }
 0xd14   : > { %12701 = vst [vmem:[#allocation391_spill] sm:$0xff] %v9804_v12  ;;  %v7160_v12 = vld [vmem:[%s7738_s12 + $0x30] sm:$0xff] }
 0xd15   : > { %v891_v39 = vmul.f32 %v7160_v12, %v12708_v7  ;;  %v925_v7 = vmul.f32 %v921_v20, %v888_v38 }
 0xd17   : > { %v934_v33 = vmul.f32 %v933_v27, %v891_v39 }
 0xd1c   : > { %v9806_v24 = vpop.permute.xlu2 %4422 }
 0xd1d   : > { %12702 = vst [vmem:[#allocation392_spill] sm:$0xff] %v9806_v24  ;;  %v9831_v24 = vstv %s896_s18  ;;  %s6858_s18 = sld [smem:[#allocation5 + $0x4d]] }
 0xd1e   : > { %12709 = vst [vmem:[#allocation26_spill] sm:$0xff] %v9831_v24  ;;  %v901_v43 = vmul.f32 %v9831_v24, %v888_v38  ;;  %v898_v12 = vmul.f32 %v9831_v24, %v885_v45  ;;  %v899_v48 = vmul.f32 %v9831_v24, %v886_v23  ;;  %v900_v26 = vmul.f32 %v9831_v24, %v887_v47 }
 0xd1f   : > { %v935_v38 = vmul.f32 %v933_v27, %v892_v29  ;;  %v1004_v45 = vsel %vm1000_vm10, %v8323_v63, %v8296_v44  ;;  %v1001_v24 = vsel %vm1000_vm10, %v8280_v56, %v8327_v34  ;;  %v1073_v63 = vsel %vm1000_vm10, %v8303_v52, %v8325_v54 }
 0xd20   : > { %v916_v23 = vadd.f32 %v911_v21, %v899_v48  ;;  %v917_v29 = vadd.f32 %v912_v19, %v900_v26  ;;  %v1183_v47 = vsel %vm1179_vm13, %v8347_v53, %v8315_v9  ;;  %v1109_v19 = vsel %vm1000_vm10, %v8305_v61, %v8345_v6 }
 0xd21   : > { %v940_v20 = vadd.f32 %v935_v38, %v923_v49  ;;  %v1040_v49 = vsel %vm1000_vm10, %v8319_v10, %v8298_v57  ;;  %v1182_v61 = vsel %vm1179_vm13, %v8337_v8, %v8347_v53  ;;  %v10902_v57 = vld [vmem:[%s7738_s12 + $0x40] sm:$0xff] }
 0xd24   : > { %v9845_v32 = vpop.permute.xlu2 %4454 }
 0xd25   : > { %12712 = vst [vmem:[#allocation394_spill] sm:$0xff] %v9845_v32  ;;  %v1086_v32 = vadd.f32 %v8294_v18, %v943_v22  ;;  %v939_v22 = vadd.f32 %v934_v33, %v922_v55  ;;  %v1075_v33 = vsel %vm1000_vm10, %v8335_v1, %v8339_v41 }
 0xd27   : > { %v1122_v40 = vadd.f32 %v8309_v50, %v1086_v32  ;;  %v1082_v48 = vadd.f32 %v1073_v63, %v939_v22 }
 0xd29   : > { %v9872_v27 = vadd.f32 %v8307_v42, %v1122_v40  ;;  %v1118_v40 = vadd.f32 %v1109_v19, %v1082_v48  ;;  %v12723_v48 = vld [vmem:[#allocation44_spill] sm:$0xff] }
 0xd2c   : > { %v9836_v13 = vpop.permute.xlu0 %4418 }
 0xd2d   : > { %12710 = vst [vmem:[#allocation24_spill] sm:$0xff] %v9836_v13  ;;  %v910_v13 = vmul.f32 %v9838_v62, %v891_v39  ;;  %v9850_v37 = vpop.permute.xlu1 %4420  ;;  %v918_v39 = vadd.f32 %v913_v11, %v901_v43  ;;  %v1002_v43 = vsel %vm1000_vm10, %v8327_v34, %v8313_v14  ;;  %v941_v11 = vadd.f32 %v936_v16, %v924_v51  ;;  %v9886_v34 = vpop.permute.xlu2 %4460 }
 0xd2e   : > { %12713 = vst [vmem:[#allocation395_spill] sm:$0xff] %v9850_v37  ;;  %v942_v37 = vadd.f32 %v937_v28, %v925_v7  ;;  %v1038_v14 = vsel %vm1000_vm10, %v8329_v35, %v8333_v46  ;;  %v1039_v7 = vsel %vm1000_vm10, %v8333_v46, %v8319_v10  ;;  %v1111_v46 = vsel %vm1000_vm10, %v8331_v2, %v8341_v4 }
 0xd2f   : > { %v915_v62 = vadd.f32 %v910_v13, %v898_v12  ;;  %v1013_v32 = vadd.f32 %v1004_v45, %v918_v39  ;;  %v1011_v13 = vadd.f32 %v1002_v43, %v916_v23  ;;  %v1037_v12 = vsel %vm1000_vm10, %v8290_v30, %v8329_v35  ;;  %v12714_v23 = vld [vmem:[#allocation36_spill] sm:$0xff] }
 0xd30   : > { %v1084_v28 = vadd.f32 %v1075_v33, %v941_v11  ;;  %v1180_v30 = vsel %vm1179_vm13, %v8311_v5, %v8351_v15  ;;  %v1112_v5 = vsel %vm1000_vm10, %v8341_v4, %v8309_v50  ;;  %v1252_v51 = vsel %vm1179_vm13, %v8321_v0, %v8349_v36  ;;  %v12717_v33 = vld [vmem:[#allocation39_spill] sm:$0xff] }
 0xd31   : > { %v1010_v56 = vadd.f32 %v1001_v24, %v915_v62  ;;  %v1012_v24 = vadd.f32 %v1003_v60, %v917_v29  ;;  %v1076_v62 = vsel %vm1000_vm10, %v8339_v41, %v8294_v18  ;;  %v1049_v52 = vadd.f32 %v1040_v49, %v1013_v32  ;;  %v12716_v60 = vld [vmem:[#allocation32_spill] sm:$0xff]  ;;  %v12718_v49 = vld [vmem:[#allocation38_spill] sm:$0xff] }
 0xd32   : > { %v1047_v21 = vadd.f32 %v1038_v14, %v1011_v13  ;;  %v1074_v18 = vsel %vm1000_vm10, %v8325_v54, %v8335_v1  ;;  %v1085_v41 = vadd.f32 %v1076_v62, %v942_v37  ;;  %v1110_v54 = vsel %vm1000_vm10, %v8345_v6, %v8331_v2  ;;  %v12719_v14 = vld [vmem:[#allocation35_spill] sm:$0xff] }
 0xd33   : > { %v1046_v26 = vadd.f32 %v1037_v12, %v1010_v56  ;;  %v1192_v38 = vadd.f32 %v1183_v47, %v1049_v52  ;;  %v1048_v10 = vadd.f32 %v1039_v7, %v1012_v24  ;;  %v1083_v1 = vadd.f32 %v1074_v18, %v940_v20  ;;  %v12715_v20 = vld [vmem:[#allocation37_spill] sm:$0xff] }
 0xd34   : > { %v9863_v31 = vpop.permute.xlu0 %4424  ;;  %v1120_v37 = vadd.f32 %v1111_v46, %v1084_v28  ;;  %v1219_v16 = vsel %vm1179_vm13, %v8343_v25, %v8317_v3  ;;  %v1181_v2 = vsel %vm1179_vm13, %v8351_v15, %v8337_v8  ;;  %v1121_v53 = vadd.f32 %v1112_v5, %v1085_v41  ;;  %v12721_v47 = vld [vmem:[#allocation41_spill] sm:$0xff]  ;;  %v12722_v28 = vld [vmem:[#allocation46_spill] sm:$0xff]  ;;  %v12727_v5 = vld [vmem:[#allocation51_spill] sm:$0xff] }
 0xd35   : > { %v9888_v55 = vpop.permute.xlu1 %4452  ;;  %v1189_v6 = vadd.f32 %v1180_v30, %v1046_v26  ;;  %v1119_v45 = vadd.f32 %v1110_v54, %v1083_v1  ;;  %v1191_v39 = vadd.f32 %v1182_v61, %v1048_v10  ;;  %v1228_v22 = vadd.f32 %v1219_v16, %v1192_v38  ;;  %v9954_v56 = vpop.permute.xlu2 %4492  ;;  %v12725_v30 = vld [vmem:[#allocation48_spill] sm:$0xff]  ;;  %v12726_v61 = vld [vmem:[#allocation49_spill] sm:$0xff]  ;;  %v13029_v3 = vld [vmem:[#allocation335_spill] sm:$0xff]  ;;  %13030 = vst [vmem:[#allocation41_spill] sm:$0xff] %v10902_v57 }
 0xd36   : > { %v1261_v4 = vadd.f32 %v1252_v51, %v1118_v40  ;;  %v1217_v0 = vsel %vm1179_vm13, %v8353_v59, %v8357_v17  ;;  %v1253_v29 = vsel %vm1179_vm13, %v8349_v36, %v12714_v23  ;;  %v1254_v8 = vsel %vm1179_vm13, %v12714_v23, %v12715_v20 }
 0xd37   : > { %v1190_v15 = vadd.f32 %v1181_v2, %v1047_v21  ;;  %v1216_v32 = vsel %vm1179_vm13, %v12716_v60, %v8353_v59  ;;  %v1218_v43 = vsel %vm1179_vm13, %v8357_v17, %v8343_v25  ;;  %v1255_v11 = vsel %vm1179_vm13, %v12715_v20, %v8307_v42  ;;  %v12720_v59 = vld [vmem:[#allocation40_spill] sm:$0xff]  ;;  %v12724_v21 = vld [vmem:[#allocation42_spill] sm:$0xff]  ;;  %v12729_v2 = vld [vmem:[#allocation45_spill] sm:$0xff] }
 0xd38   : > { %v1225_v36 = vadd.f32 %v1216_v32, %v1189_v6  ;;  %v1288_v63 = vsel %vm1179_vm13, %v12718_v49, %v12717_v33  ;;  %v1289_v24 = vsel %vm1179_vm13, %v12717_v33, %v12719_v14  ;;  %v1290_v13 = vsel %vm1179_vm13, %v12719_v14, %v12720_v59  ;;  %v12730_v6 = vld [vmem:[#allocation52_spill] sm:$0xff]  ;;  %v12735_v32 = vld [vmem:[#allocation50_spill] sm:$0xff] }
 0xd39   : > { %v1226_v25 = vadd.f32 %v1217_v0, %v1190_v15  ;;  %v1262_v17 = vadd.f32 %v1253_v29, %v1119_v45  ;;  %v1263_v62 = vadd.f32 %v1254_v8, %v1120_v37  ;;  %v1291_v42 = vsel %vm1179_vm13, %v12720_v59, %v12721_v47  ;;  %v12728_v37 = vld [vmem:[#allocation43_spill] sm:$0xff]  ;;  %v12733_v29 = vld [vmem:[#allocation54_spill] sm:$0xff]  ;;  %v12734_v8 = vld [vmem:[#allocation56_spill] sm:$0xff] }
 0xd3a   : > { %v1227_v12 = vadd.f32 %v1218_v43, %v1191_v39  ;;  %v1264_v7 = vadd.f32 %v1255_v11, %v1121_v53  ;;  %v1359_v26 = vsel %vm1358_vm8, %v12723_v48, %v12722_v28  ;;  %v1360_v18 = vsel %vm1358_vm8, %v12722_v28, %v12724_v21  ;;  %v12732_v0 = vld [vmem:[#allocation55_spill] sm:$0xff]  ;;  %v12740_v28 = vld [vmem:[#allocation60_spill] sm:$0xff] }
 0xd3b   : > { %v1297_v41 = vadd.f32 %v1288_v63, %v1261_v4  ;;  %v1298_v19 = vadd.f32 %v1289_v24, %v1262_v17  ;;  %v1299_v38 = vadd.f32 %v1290_v13, %v1263_v62  ;;  %v1361_v10 = vsel %vm1358_vm8, %v12724_v21, %v12725_v30  ;;  %v12731_v4 = vld [vmem:[#allocation47_spill] sm:$0xff]  ;;  %v12737_v24 = vld [vmem:[#allocation53_spill] sm:$0xff]  ;;  %v12739_v62 = vld [vmem:[#allocation58_spill] sm:$0xff] }
 0xd3c   : > { %v9911_v35 = vpop.permute.xlu0 %4456  ;;  %v1300_v46 = vadd.f32 %v1291_v42, %v1264_v7  ;;  %v1301_v54 = vadd.f32 %v12721_v47, %v9872_v27  ;;  %v1362_v1 = vsel %vm1358_vm8, %v12725_v30, %v12726_v61  ;;  %v1395_v51 = vsel %vm1358_vm8, %v12728_v37, %v12727_v5  ;;  %v12738_v59 = vld [vmem:[#allocation59_spill] sm:$0xff] }
 0xd3d   : > { %v9934_v50 = vpop.permute.xlu1 %4458  ;;  %v1368_v16 = vadd.f32 %v1359_v26, %v1225_v36  ;;  %v1369_v40 = vadd.f32 %v1360_v18, %v1226_v25  ;;  %v1397_v53 = vsel %vm1358_vm8, %v12730_v6, %v12729_v2  ;;  %v1396_v45 = vsel %vm1358_vm8, %v12727_v5, %v12730_v6  ;;  %v12736_v36 = vld [vmem:[#allocation57_spill] sm:$0xff]  ;;  %v10017_v42 = vpop.permute.xlu2 %4524  ;;  %v12742_v18 = vld [vmem:[#allocation66_spill] sm:$0xff]  ;;  %v12745_v5 = vld [vmem:[#allocation68_spill] sm:$0xff] }
 0xd3e   : > { %v1370_v27 = vadd.f32 %v1361_v10, %v1227_v12  ;;  %v1431_v23 = vsel %vm1358_vm8, %v12732_v0, %v12731_v4  ;;  %v1398_v20 = vsel %vm1358_vm8, %v12729_v2, %v12733_v29  ;;  %v1432_v15 = vsel %vm1358_vm8, %v12731_v4, %v12734_v8  ;;  %v12741_v26 = vld [vmem:[#allocation61_spill] sm:$0xff]  ;;  %v12747_v2 = vld [vmem:[#allocation71_spill] sm:$0xff]  ;;  %v12749_v4 = vld [vmem:[#allocation72_spill] sm:$0xff] }
 0xd3f   : > { %v1371_v60 = vadd.f32 %v1362_v1, %v1228_v22  ;;  %v1444_v43 = vadd.f32 %v12735_v32, %v1301_v54  ;;  %v1404_v11 = vadd.f32 %v1395_v51, %v1368_v16  ;;  %v1434_v33 = vsel %vm1358_vm8, %v12736_v36, %v12735_v32  ;;  %v12744_v54 = vld [vmem:[#allocation62_spill] sm:$0xff]  ;;  %v12746_v16 = vld [vmem:[#allocation69_spill] sm:$0xff]  ;;  %v12748_v6 = vld [vmem:[#allocation63_spill] sm:$0xff] }
 0xd40   : > { %v1406_v49 = vadd.f32 %v1397_v53, %v1370_v27  ;;  %v1405_v63 = vadd.f32 %v1396_v45, %v1369_v40  ;;  %v1433_v14 = vsel %vm1358_vm8, %v12734_v8, %v12736_v36  ;;  %v1468_v13 = vsel %vm1358_vm8, %v12738_v59, %v12737_v24  ;;  %v12751_v32 = vld [vmem:[#allocation67_spill] sm:$0xff] }
 0xd41   : > { %v1440_v25 = vadd.f32 %v1431_v23, %v1297_v41  ;;  %v1407_v17 = vadd.f32 %v1398_v20, %v1371_v60  ;;  %v1441_v22 = vadd.f32 %v1432_v15, %v1298_v19  ;;  %v1467_v47 = vsel %vm1358_vm8, %v12739_v62, %v12738_v59  ;;  %v12743_v41 = vld [vmem:[#allocation64_spill] sm:$0xff]  ;;  %v12750_v15 = vld [vmem:[#allocation65_spill] sm:$0xff] }
 0xd42   : > { %v1443_v7 = vadd.f32 %v1434_v33, %v1300_v46  ;;  %v1469_v48 = vsel %vm1358_vm8, %v12737_v24, %v12740_v28  ;;  %v1470_v21 = vsel %vm1358_vm8, %v12740_v28, %v12741_v26  ;;  %v1538_v19 = vsel %vm1537_vm7, %v12743_v41, %v12742_v18  ;;  %v12753_v33 = vld [vmem:[#allocation70_spill] sm:$0xff]  ;;  %v12754_v59 = vld [vmem:[#allocation76_spill] sm:$0xff]  ;;  %v12757_v28 = vld [vmem:[#allocation79_spill] sm:$0xff] }
 0xd43   : > { %v1442_v30 = vadd.f32 %v1433_v14, %v1299_v38  ;;  %v1477_v10 = vadd.f32 %v1468_v13, %v1441_v22  ;;  %v1539_v1 = vsel %vm1537_vm7, %v12742_v18, %v12744_v54  ;;  %v1540_v46 = vsel %vm1537_vm7, %v12744_v54, %v12745_v5  ;;  %v12755_v22 = vld [vmem:[#allocation77_spill] sm:$0xff] }
 0xd44   : > { %v9968_v52 = vpop.permute.xlu0 %4488  ;;  %v1476_v37 = vadd.f32 %v1467_v47, %v1440_v25  ;;  %v1480_v51 = vadd.f32 %v12741_v26, %v1444_v43  ;;  %v1541_v40 = vsel %vm1537_vm7, %v12745_v5, %v12746_v16  ;;  %v1574_v38 = vsel %vm1537_vm7, %v12748_v6, %v12747_v2  ;;  %v12752_v43 = vld [vmem:[#allocation75_spill] sm:$0xff]  ;;  %v12756_v47 = vld [vmem:[#allocation74_spill] sm:$0xff]  ;;  %v12759_v41 = vld [vmem:[#allocation73_spill] sm:$0xff] }
 0xd45   : > { %v9993_v39 = vpop.permute.xlu1 %4490  ;;  %v1478_v53 = vadd.f32 %v1469_v48, %v1442_v30  ;;  %v1479_v45 = vadd.f32 %v1470_v21, %v1443_v7  ;;  %v1547_v27 = vadd.f32 %v1538_v19, %v1404_v11  ;;  %v1575_v0 = vsel %vm1537_vm7, %v12747_v2, %v12749_v4  ;;  %v12758_v48 = vld [vmem:[#allocation78_spill] sm:$0xff]  ;;  %v12760_v30 = vld [vmem:[#allocation80_spill] sm:$0xff] }
 0xd46   : > { %v1548_v20 = vadd.f32 %v1539_v1, %v1405_v63  ;;  %v1549_v8 = vadd.f32 %v1540_v46, %v1406_v49  ;;  %v1576_v60 = vsel %vm1537_vm7, %v12749_v4, %v12750_v15  ;;  %v1610_v36 = vsel %vm1537_vm7, %v12752_v43, %v12751_v32  ;;  %v12761_v1 = vld [vmem:[#allocation81_spill] sm:$0xff]  ;;  %v12764_v6 = vld [vmem:[#allocation82_spill] sm:$0xff] }
 0xd47   : > { %v1623_v14 = vadd.f32 %v12753_v33, %v1480_v51  ;;  %v1550_v24 = vadd.f32 %v1541_v40, %v1407_v17  ;;  %v1583_v11 = vadd.f32 %v1574_v38, %v1547_v27  ;;  %v1611_v13 = vsel %vm1537_vm7, %v12751_v32, %v12754_v59  ;;  %v12762_v51 = vld [vmem:[#allocation86_spill] sm:$0xff]  ;;  %v12763_v40 = vld [vmem:[#allocation84_spill] sm:$0xff]  ;;  %v10087_v38 = vpop.permute.xlu2 %4530 }
 0xd48   : > { %v1584_v25 = vadd.f32 %v1575_v0, %v1548_v20  ;;  %v1612_v49 = vsel %vm1537_vm7, %v12754_v59, %v12755_v22  ;;  %v1613_v63 = vsel %vm1537_vm7, %v12755_v22, %v12753_v33  ;;  %v1585_v62 = vadd.f32 %v1576_v60, %v1549_v8  ;;  %v12765_v0 = vld [vmem:[#allocation88_spill] sm:$0xff]  ;;  %v12766_v8 = vld [vmem:[#allocation89_spill] sm:$0xff]  ;;  %v12768_v59 = vld [vmem:[#allocation83_spill] sm:$0xff] }
 0xd49   : > { %v1577_v17 = vsel %vm1537_vm7, %v12750_v15, %v12756_v47  ;;  %v1619_v7 = vadd.f32 %v1610_v36, %v1476_v37  ;;  %v1646_v26 = vsel %vm1537_vm7, %v12758_v48, %v12757_v28  ;;  %v1620_v18 = vadd.f32 %v1611_v13, %v1477_v10  ;;  %v12772_v48 = vld [vmem:[#allocation87_spill] sm:$0xff] }
 0xd4a   : > { %v1647_v19 = vsel %vm1537_vm7, %v12757_v28, %v12759_v41  ;;  %v1648_v54 = vsel %vm1537_vm7, %v12759_v41, %v12760_v30  ;;  %v1649_v5 = vsel %vm1537_vm7, %v12760_v30, %v12761_v1  ;;  %v1621_v46 = vadd.f32 %v1612_v49, %v1478_v53  ;;  %v12771_v28 = vld [vmem:[#allocation96_spill] sm:$0xff]  ;;  %v12774_v41 = vld [vmem:[#allocation95_spill] sm:$0xff] }
 0xd4b   : > { %v1622_v37 = vadd.f32 %v1613_v63, %v1479_v45  ;;  %v1717_v2 = vsel %vm1716_vm9, %v12763_v40, %v12762_v51  ;;  %v1718_v10 = vsel %vm1716_vm9, %v12762_v51, %v12764_v6  ;;  %v1586_v27 = vadd.f32 %v1577_v17, %v1550_v24  ;;  %v12767_v24 = vld [vmem:[#allocation91_spill] sm:$0xff]  ;;  %v12769_v17 = vld [vmem:[#allocation85_spill] sm:$0xff] }
 0xd4c   : > { %v10019_v12 = vpop.permute.xlu0 %4494  ;;  %v1655_v4 = vadd.f32 %v1646_v26, %v1619_v7  ;;  %v1719_v20 = vsel %vm1716_vm9, %v12764_v6, %v12765_v0  ;;  %v1720_v53 = vsel %vm1716_vm9, %v12765_v0, %v12766_v8  ;;  %v1656_v45 = vadd.f32 %v1647_v19, %v1620_v18  ;;  %v12770_v7 = vld [vmem:[#allocation92_spill] sm:$0xff]  ;;  %v12778_v51 = vld [vmem:[#allocation99_spill] sm:$0xff] }
 0xd4d   : > { %v10046_v23 = vpop.permute.xlu1 %4496  ;;  %v1657_v15 = vadd.f32 %v1648_v54, %v1621_v46  ;;  %v1658_v60 = vadd.f32 %v1649_v5, %v1622_v37  ;;  %v1659_v32 = vadd.f32 %v12761_v1, %v1623_v14  ;;  %v1726_v36 = vadd.f32 %v1717_v2, %v1583_v11  ;;  %v12776_v1 = vld [vmem:[#allocation97_spill] sm:$0xff]  ;;  %v12813_v47 = vld [vmem:[#allocation123_spill] sm:$0xff] }
 0xd4e   : > { %v1727_v33 = vadd.f32 %v1718_v10, %v1584_v25  ;;  %v1753_v13 = vsel %vm1716_vm9, %v12768_v59, %v12767_v24  ;;  %v1728_v49 = vadd.f32 %v1719_v20, %v1585_v62  ;;  %v1729_v63 = vadd.f32 %v1720_v53, %v1586_v27  ;;  %v12773_v25 = vld [vmem:[#allocation90_spill] sm:$0xff]  ;;  %v12777_v37 = vld [vmem:[#allocation93_spill] sm:$0xff] }
 0xd4f   : > { %v1755_v14 = vsel %vm1716_vm9, %v12770_v7, %v12769_v17  ;;  %v1790_v11 = vsel %vm1716_vm9, %v12772_v48, %v12771_v28  ;;  %v1802_v26 = vadd.f32 %v12773_v25, %v1659_v32  ;;  %v1754_v18 = vsel %vm1716_vm9, %v12767_v24, %v12770_v7  ;;  %v12775_v62 = vld [vmem:[#allocation94_spill] sm:$0xff]  ;;  %v4558_v59 = vpop.permute.xlu2 %4557 }
 0xd50   : > { %v1789_v19 = vsel %vm1716_vm9, %v12774_v41, %v12772_v48  ;;  %v1756_v30 = vsel %vm1716_vm9, %v12769_v17, %v12775_v62  ;;  %v1762_v54 = vadd.f32 %v1753_v13, %v1726_v36  ;;  %v1792_v5 = vsel %vm1716_vm9, %v12776_v1, %v12773_v25  ;;  %v12779_v27 = vld [vmem:[#allocation98_spill] sm:$0xff]  ;;  %v12780_v36 = vld [vmem:[#allocation100_spill] sm:$0xff] }
 0xd51   : > { %v1791_v46 = vsel %vm1716_vm9, %v12771_v28, %v12776_v1  ;;  %v1826_v40 = vsel %vm1716_vm9, %v12778_v51, %v12777_v37  ;;  %v1764_v6 = vadd.f32 %v1755_v14, %v1728_v49  ;;  %v1799_v10 = vadd.f32 %v1790_v11, %v1656_v45  ;;  %v12781_v28 = vld [vmem:[#allocation101_spill] sm:$0xff]  ;;  %v12782_v14 = vld [vmem:[#allocation106_spill] sm:$0xff]  ;;  %v12783_v48 = vld [vmem:[#allocation104_spill] sm:$0xff] }
 0xd52   : > { %v1825_v0 = vsel %vm1716_vm9, %v12779_v27, %v12778_v51  ;;  %v1763_v20 = vadd.f32 %v1754_v18, %v1727_v33  ;;  %v1798_v53 = vadd.f32 %v1789_v19, %v1655_v4  ;;  %v1765_v32 = vadd.f32 %v1756_v30, %v1729_v63  ;;  %v12784_v33 = vld [vmem:[#allocation102_spill] sm:$0xff]  ;;  %v12785_v30 = vld [vmem:[#allocation108_spill] sm:$0xff]  ;;  %v12789_v27 = vld [vmem:[#allocation103_spill] sm:$0xff] }
 0xd53   : > { %v1827_v24 = vsel %vm1716_vm9, %v12777_v37, %v12780_v36  ;;  %v1801_v13 = vadd.f32 %v1792_v5, %v1658_v60  ;;  %v1800_v17 = vadd.f32 %v1791_v46, %v1657_v15  ;;  %v1835_v7 = vadd.f32 %v1826_v40, %v1799_v10  ;;  %v12786_v5 = vld [vmem:[#allocation109_spill] sm:$0xff]  ;;  %v12787_v37 = vld [vmem:[#allocation382_spill] sm:$0xff]  ;;  %v12788_v10 = vld [vmem:[#allocation111_spill] sm:$0xff] }
 0xd54   : > { %v10070_v21 = vpop.permute.xlu0 %4526  ;;  %v1828_v45 = vsel %vm1716_vm9, %v12780_v36, %v12781_v28  ;;  %v1834_v49 = vadd.f32 %v1825_v0, %v1798_v53  ;;  %v1896_v11 = vsel %vm1895_vm11, %v12783_v48, %v12782_v14  ;;  %v1897_v4 = vsel %vm1895_vm11, %v12782_v14, %v12784_v33  ;;  %v12790_v53 = vld [vmem:[#allocation112_spill] sm:$0xff]  ;;  %v12793_v48 = vld [vmem:[#allocation107_spill] sm:$0xff] }
 0xd55   : > { %v10096_v43 = vpop.permute.xlu1 %4528  ;;  %v4582_v63 = vstv %s10098_s30  ;;  %v1838_v18 = vadd.f32 %v12781_v28, %v1802_v26  ;;  %v1836_v60 = vadd.f32 %v1827_v24, %v1800_v17  ;;  %v1837_v19 = vadd.f32 %v1828_v45, %v1801_v13  ;;  %v12791_v24 = vld [vmem:[#allocation105_spill] sm:$0xff]  ;;  %v12792_v17 = vld [vmem:[#allocation114_spill] sm:$0xff]  ;;  %s6860_s30 = sld [smem:[#allocation5 + $0x18]] }
 0xd56   : > { %v10106_v22 = vsel %vm1358_vm8, %v10096_v43, %v10087_v38  ;;  %v1898_v1 = vsel %vm1895_vm11, %v12784_v33, %v12785_v30  ;;  %v1899_v46 = vsel %vm1895_vm11, %v12785_v30, %v12786_v5  ;;  %v1905_v26 = vadd.f32 %v1896_v11, %v1762_v54  ;;  %v12794_v11 = vld [vmem:[#allocation115_spill] sm:$0xff]  ;;  %v12795_v30 = vld [vmem:[#allocation110_spill] sm:$0xff] }
 0xd57   : > { %v1906_v40 = vadd.f32 %v1897_v4, %v1763_v20  ;;  %v1933_v36 = vsel %vm1895_vm11, %v12788_v10, %v12790_v53  ;;  %v1934_v13 = vsel %vm1895_vm11, %v12790_v53, %v12791_v24  ;;  %v1935_v28 = vsel %vm1895_vm11, %v12791_v24, %v12792_v17  ;;  %v12808_v17 = vld [vmem:[#allocation122_spill] sm:$0xff] }
 0xd58   : > { %v1907_v45 = vadd.f32 %v1898_v1, %v1764_v6  ;;  %v1908_v14 = vadd.f32 %v1899_v46, %v1765_v32  ;;  %v1968_v33 = vsel %vm1895_vm11, %v12794_v11, %v12793_v48  ;;  %v12797_v6 = vld [vmem:[#allocation383_spill] sm:$0xff]  ;;  %v12798_v11 = vld [vmem:[#allocation117_spill] sm:$0xff] }
 0xd59   : > { %v1942_v1 = vadd.f32 %v1933_v36, %v1906_v40  ;;  %v12801_v36 = vld [vmem:[#allocation384_spill] sm:$0xff] }
 0xd5a   : > { %v1943_v46 = vadd.f32 %v1934_v13, %v1907_v45  ;;  %v1944_v24 = vadd.f32 %v1935_v28, %v1908_v14  ;;  %v12802_v45 = vld [vmem:[#allocation113_spill] sm:$0xff] }
 0xd5c   : > { %v10133_v2 = vpop.permute.xlu0 %4532 }
 0xd5d   : > { %v4556_v25 = vpop.permute.xlu1 %4555 }
 0xd5e   : > { %v10153_v15 = vsel %vm1496_vm15, %v4556_v25, %v4558_v59  ;;  %v10156_v41 = vmul.f32 %v9739_v58, %v4556_v25  ;;  %v1932_v58 = vsel %vm1895_vm11, %v12789_v27, %v12788_v10  ;;  %v12796_v27 = vld [vmem:[#allocation116_spill] sm:$0xff] }
 0xd5f   : > { %v10166_v51 = vmul.f32 %v12787_v37, %v10153_v15  ;;  %v1981_v37 = vadd.f32 %v12795_v30, %v1838_v18  ;;  %v1941_v10 = vadd.f32 %v1932_v58, %v1905_v26  ;;  %v1969_v53 = vsel %vm1895_vm11, %v12793_v48, %v12796_v27  ;;  %v12799_v26 = vld [vmem:[#allocation119_spill] sm:$0xff]  ;;  %v12800_v58 = vld [vmem:[#allocation118_spill] sm:$0xff] }
 0xd60   : > { %v4583_v0 = vmul.f32 %v4582_v63, %v10156_v41  ;;  %v1971_v18 = vsel %vm1895_vm11, %v12798_v11, %v12795_v30  ;;  %v2004_v48 = vsel %vm1895_vm11, %v12800_v58, %v12799_v26  ;;  %v1978_v40 = vadd.f32 %v1969_v53, %v1835_v7  ;;  %v12805_v58 = vld [vmem:[#allocation121_spill] sm:$0xff] }
 0xd61   : > { %v4584_v54 = vmul.f32 %v4582_v63, %v10166_v51  ;;  %v2005_v14 = vsel %vm1895_vm11, %v12799_v26, %v12802_v45  ;;  %v1980_v53 = vadd.f32 %v1971_v18, %v1837_v19 }
 0xd62   : > { %4593 = vrot.lane.b32.xlu2 %v4583_v0, %s7520_s29  ;;  %v1970_v0 = vsel %vm1895_vm11, %v12796_v27, %v12798_v11  ;;  %v12804_v27 = vld [vmem:[#allocation386_spill] sm:$0xff] }
 0xd63   : > { %4595 = vrot.lane.b32.xlu0 %v4584_v54, %s7520_s29  ;;  %v1979_v28 = vadd.f32 %v1970_v0, %v1836_v60  ;;  %v12806_v0 = vld [vmem:[#allocation126_spill] sm:$0xff] }
 0xd64   : > { %v4560_v20 = vpop.permute.xlu0 %4559 }
 0xd65   : > { %v4564_v4 = vsel %vm1496_vm15, %v4558_v59, %v4560_v20  ;;  %v1977_v59 = vadd.f32 %v1968_v33, %v1834_v49  ;;  %v10206_v54 = vpop.permute.xlu1 %4561  ;;  %v12803_v33 = vld [vmem:[#allocation120_spill] sm:$0xff] }
 0xd66   : > { %v10195_v32 = vmul.f32 %v12797_v6, %v4564_v4  ;;  %v10211_v13 = vmul.f32 %v12801_v36, %v10206_v54  ;;  %v4565_v49 = vsel %vm1496_vm15, %v4560_v20, %v10206_v54  ;;  %v2006_v30 = vsel %vm1895_vm11, %v12802_v45, %v12803_v33  ;;  %v12807_v36 = vld [vmem:[#allocation124_spill] sm:$0xff] }
 0xd67   : > { %v10222_v7 = vmul.f32 %v12804_v27, %v4565_v49  ;;  %v2013_v11 = vadd.f32 %v2004_v48, %v1977_v59  ;;  %v2007_v60 = vsel %vm1895_vm11, %v12803_v33, %v12805_v58  ;;  %v2075_v26 = vsel %vm2074_vm12, %v12807_v36, %v12806_v0  ;;  %v12809_v27 = vld [vmem:[#allocation385_spill] sm:$0xff]  ;;  %v12810_v33 = vld [vmem:[#allocation128_spill] sm:$0xff] }
 0xd68   : > { %v4585_v6 = vmul.f32 %v4582_v63, %v10195_v32  ;;  %v4587_v20 = vmul.f32 %v4582_v63, %v10211_v13  ;;  %v2076_v45 = vsel %vm2074_vm12, %v12806_v0, %v12808_v17  ;;  %v10236_v5 = vmul.f32 %v12809_v27, %v4556_v25  ;;  %v12811_v36 = vld [vmem:[#allocation129_spill] sm:$0xff]  ;;  %v12812_v0 = vld [vmem:[#allocation131_spill] sm:$0xff] }
 0xd69   : > { %v4586_v19 = vmul.f32 %v4582_v63, %v10222_v7  ;;  %v2014_v59 = vadd.f32 %v2005_v14, %v1978_v40  ;;  %v2015_v18 = vadd.f32 %v2006_v30, %v1979_v28  ;;  %v2017_v48 = vadd.f32 %v12805_v58, %v1981_v37  ;;  %v12814_v28 = vld [vmem:[#allocation125_spill] sm:$0xff]  ;;  %v12815_v14 = vld [vmem:[#allocation132_spill] sm:$0xff]  ;;  %v12816_v58 = vld [vmem:[#allocation387_spill] sm:$0xff] }
 0xd6a   : > { %4597 = vrot.lane.b32.xlu1 %v4585_v6, %s7520_s29  ;;  %v10241_v6 = vstv %s10185_s13  ;;  %v2077_v62 = vsel %vm2074_vm12, %v12808_v17, %v12810_v33  ;;  %v2078_v8 = vsel %vm2074_vm12, %v12810_v33, %v12811_v36  ;;  %v2111_v25 = vsel %vm2074_vm12, %v12813_v47, %v12812_v0  ;;  %v12820_v33 = vld [vmem:[#allocation135_spill] sm:$0xff]  ;;  %s13137_s13 = smov 112  }
 0xd6b   : > { %4601 = vrot.lane.b32.xlu0 %v4587_v20, %s7520_s29  ;;  %4599 = vrot.lane.b32.xlu2 %v4586_v19, %s7520_s29  ;;  %v2016_v63 = vadd.f32 %v2007_v60, %v1980_v53  ;;  %v2084_v37 = vadd.f32 %v2075_v26, %v1941_v10  ;;  %v2085_v40 = vadd.f32 %v2076_v45, %v1942_v1  ;;  %v12817_v20 = vld [vmem:[#allocation388_spill] sm:$0xff]  ;;  %v12818_v53 = vld [vmem:[#allocation130_spill] sm:$0xff]  ;;  %v12819_v45 = vld [vmem:[#allocation127_spill] sm:$0xff] }
 0xd6c   : > { %v2113_v30 = vsel %vm2074_vm12, %v12815_v14, %v12814_v28  ;;  %v2112_v17 = vsel %vm2074_vm12, %v12812_v0, %v12815_v14  ;;  %v10262_v27 = vmul.f32 %v12816_v58, %v10153_v15  ;;  %v4619_v47 = vmul.f32 %v10241_v6, %v10236_v5  ;;  %v12821_v14 = vld [vmem:[#allocation134_spill] sm:$0xff]  ;;  %v12822_v58 = vld [vmem:[#allocation137_spill] sm:$0xff] }
 0xd6d   : > { %v10267_v19 = vmul.f32 %v12817_v20, %v4564_v4  ;;  %v2086_v10 = vadd.f32 %v2077_v62, %v1943_v46  ;;  %v2087_v1 = vadd.f32 %v2078_v8, %v1944_v24  ;;  %v2160_v60 = vadd.f32 %v12818_v53, %v2017_v48  ;;  %v12823_v20 = vld [vmem:[#allocation136_spill] sm:$0xff]  ;;  %v12824_v48 = vld [vmem:[#allocation133_spill] sm:$0xff] }
 0xd6e   : > { %v2120_v26 = vadd.f32 %v2111_v25, %v2084_v37  ;;  %v2147_v0 = vsel %vm2074_vm12, %v12820_v33, %v12819_v45  ;;  %v2114_v15 = vsel %vm2074_vm12, %v12814_v28, %v12821_v14  ;;  %v2150_v4 = vsel %vm2074_vm12, %v12822_v58, %v12818_v53  ;;  %v12825_v25 = vld [vmem:[#allocation139_spill] sm:$0xff]  ;;  %v12826_v53 = vld [vmem:[#allocation389_spill] sm:$0xff]  ;;  %v12828_v14 = vld [vmem:[#allocation140_spill] sm:$0xff] }
 0xd6f   : > { %v2148_v8 = vsel %vm2074_vm12, %v12819_v45, %v12823_v20  ;;  %v2122_v62 = vadd.f32 %v2113_v30, %v2086_v10  ;;  %v2121_v46 = vadd.f32 %v2112_v17, %v2085_v40  ;;  %v2149_v24 = vsel %vm2074_vm12, %v12823_v20, %v12822_v58  ;;  %v12827_v58 = vld [vmem:[#allocation138_spill] sm:$0xff] }
 0xd70   : > { %v2184_v37 = vsel %vm2074_vm12, %v12825_v25, %v12824_v48  ;;  %v4620_v28 = vmul.f32 %v10241_v6, %v10262_v27  ;;  %v10294_v33 = vmul.f32 %v12826_v53, %v4565_v49  ;;  %v2156_v30 = vadd.f32 %v2147_v0, %v2013_v11  ;;  %v12829_v53 = vld [vmem:[#allocation141_spill] sm:$0xff] }
 0xd71   : > { %v2123_v40 = vadd.f32 %v2114_v15, %v2087_v1  ;;  %v2159_v17 = vadd.f32 %v2150_v4, %v2016_v63  ;;  %v2157_v10 = vadd.f32 %v2148_v8, %v2014_v59  ;;  %v2158_v45 = vadd.f32 %v2149_v24, %v2015_v18  ;;  %v12830_v59 = vld [vmem:[#allocation146_spill] sm:$0xff]  ;;  %v12831_v18 = vld [vmem:[#allocation144_spill] sm:$0xff]  ;;  %v12833_v15 = vld [vmem:[#allocation147_spill] sm:$0xff] }
 0xd72   : > { %4629 = vrot.lane.b32.xlu1 %v4619_v47, %s7520_s29  ;;  %v4621_v47 = vmul.f32 %v10241_v6, %v10267_v19  ;;  %v2183_v20 = vsel %vm2074_vm12, %v12827_v58, %v12825_v25  ;;  %v2185_v36 = vsel %vm2074_vm12, %v12824_v48, %v12828_v14  ;;  %v2186_v11 = vsel %vm2074_vm12, %v12828_v14, %v12829_v53  ;;  %v12832_v1 = vld [vmem:[#allocation142_spill] sm:$0xff]  ;;  %v12834_v8 = vld [vmem:[#allocation149_spill] sm:$0xff] }
 0xd73   : > { %4631 = vrot.lane.b32.xlu2 %v4620_v28, %s7520_s29  ;;  %v2193_v49 = vadd.f32 %v2184_v37, %v2157_v10  ;;  %v2254_v63 = vsel %vm12291_vm6, %v12831_v18, %v12830_v59  ;;  %v2255_v0 = vsel %vm12291_vm6, %v12830_v59, %v12832_v1  ;;  %v2256_v4 = vsel %vm12291_vm6, %v12832_v1, %v12833_v15  ;;  %v12835_v48 = vld [vmem:[#allocation390_spill] sm:$0xff]  ;;  %v12837_v1 = vld [vmem:[#allocation143_spill] sm:$0xff] }
 0xd74   : > { %4633 = vrot.lane.b32.xlu0 %v4621_v47, %s7520_s29  ;;  %v2257_v24 = vsel %vm12291_vm6, %v12833_v15, %v12834_v8  ;;  %v10323_v25 = vmul.f32 %v12835_v48, %v10206_v54  ;;  %v4622_v14 = vmul.f32 %v10241_v6, %v10294_v33  ;;  %v2192_v37 = vadd.f32 %v2183_v20, %v2156_v30  ;;  %v12836_v18 = vld [vmem:[#allocation150_spill] sm:$0xff]  ;;  %v12838_v15 = vld [vmem:[#allocation152_spill] sm:$0xff]  ;;  %v12839_v20 = vld [vmem:[#allocation145_spill] sm:$0xff] }
 0xd75   : > { %v2196_v28 = vadd.f32 %v12829_v53, %v2160_v60  ;;  %v2194_v47 = vadd.f32 %v2185_v36, %v2158_v45  ;;  %v10329_v10 = vstv %s10270_s28  ;;  %v2195_v58 = vadd.f32 %v2186_v11, %v2159_v17  ;;  %v12840_v60 = vld [vmem:[#allocation148_spill] sm:$0xff]  ;;  %v12841_v17 = vld [vmem:[#allocation155_spill] sm:$0xff]  ;;  %s6861_s28 = sld [smem:[#allocation5 + $0x33]] }
 0xd76   : > { %v2263_v59 = vadd.f32 %v2254_v63, %v2120_v26  ;;  %v2290_v16 = vsel %vm12291_vm6, %v12837_v1, %v12836_v18  ;;  %v2291_v54 = vsel %vm12291_vm6, %v12836_v18, %v12838_v15  ;;  %v2264_v48 = vadd.f32 %v2255_v0, %v2121_v46  ;;  %v12842_v45 = vld [vmem:[#allocation156_spill] sm:$0xff] }
 0xd77   : > { %v2265_v8 = vadd.f32 %v2256_v4, %v2122_v62  ;;  %v2266_v30 = vadd.f32 %v2257_v24, %v2123_v40  ;;  %v2292_v36 = vsel %vm12291_vm6, %v12838_v15, %v12839_v20  ;;  %v2326_v26 = vsel %vm12291_vm6, %v12841_v17, %v12840_v60  ;;  %v12843_v62 = vld [vmem:[#allocation151_spill] sm:$0xff]  ;;  %v12844_v4 = vld [vmem:[#allocation153_spill] sm:$0xff]  ;;  %v12847_v15 = vld [vmem:[#allocation158_spill] sm:$0xff] }
 0xd78   : > { %v2327_v53 = vsel %vm12291_vm6, %v12840_v60, %v12842_v45  ;;  %v4655_v11 = vmul.f32 %v10329_v10, %v10156_v41  ;;  %v4623_v46 = vmul.f32 %v10241_v6, %v10323_v25  ;;  %v2339_v40 = vadd.f32 %v12843_v62, %v2196_v28  ;;  %v12846_v41 = vld [vmem:[#allocation159_spill] sm:$0xff]  ;;  %v12850_v17 = vld [vmem:[#allocation161_spill] sm:$0xff] }
 0xd79   : > { %v2299_v63 = vadd.f32 %v2290_v16, %v2263_v59  ;;  %v2300_v0 = vadd.f32 %v2291_v54, %v2264_v48  ;;  %v2293_v24 = vsel %vm12291_vm6, %v12839_v20, %v12844_v4  ;;  %v2362_v6 = vsel %vm12291_vm6, %v12847_v15, %v12846_v41  ;;  %v12848_v54 = vld [vmem:[#allocation154_spill] sm:$0xff]  ;;  %v12849_v20 = vld [vmem:[#allocation160_spill] sm:$0xff] }
 0xd7a   : > { %4635 = vrot.lane.b32.xlu1 %v4622_v14, %s7520_s29  ;;  %v12845_v14 = vld [vmem:[#allocation157_spill] sm:$0xff]  ;;  %v2301_v16 = vadd.f32 %v2292_v36, %v2265_v8  ;;  %v2335_v28 = vadd.f32 %v2326_v26, %v2192_v37  ;;  %v2336_v59 = vadd.f32 %v2327_v53, %v2193_v49  ;;  %v2363_v48 = vsel %vm12291_vm6, %v12846_v41, %v12848_v54  ;;  %v12854_v15 = vld [vmem:[#allocation168_spill] sm:$0xff] }
 0xd7b   : > { %v2328_v18 = vsel %vm12291_vm6, %v12842_v45, %v12845_v14  ;;  %v2329_v1 = vsel %vm12291_vm6, %v12845_v14, %v12843_v62  ;;  %4637 = vrot.lane.b32.xlu2 %v4623_v46, %s7520_s29  ;;  %v2364_v60 = vsel %vm12291_vm6, %v12848_v54, %v12849_v20  ;;  %v2365_v45 = vsel %vm12291_vm6, %v12849_v20, %v12850_v17  ;;  %v12851_v62 = vld [vmem:[#allocation166_spill] sm:$0xff]  ;;  %v12852_v14 = vld [vmem:[#allocation164_spill] sm:$0xff]  ;;  %v12855_v20 = vld [vmem:[#allocation169_spill] sm:$0xff] }
 0xd7c   : > { %4665 = vrot.lane.b32.xlu0 %v4655_v11, %s7520_s29  ;;  %v2431_v46 = vsel %vm1496_vm15, %v12852_v14, %v12851_v62  ;;  %v4656_v8 = vmul.f32 %v10329_v10, %v10166_v51  ;;  %v2302_v49 = vadd.f32 %v2293_v24, %v2266_v30  ;;  %v2337_v37 = vadd.f32 %v2328_v18, %v2194_v47  ;;  %v12853_v11 = vld [vmem:[#allocation162_spill] sm:$0xff]  ;;  %v12856_v24 = vld [vmem:[#allocation165_spill] sm:$0xff]  ;;  %v12857_v18 = vld [vmem:[#allocation172_spill] sm:$0xff] }
 0xd7d   : > { %v2338_v36 = vadd.f32 %v2329_v1, %v2195_v58  ;;  %v2371_v26 = vadd.f32 %v2362_v6, %v2335_v28  ;;  %v2372_v53 = vadd.f32 %v2363_v48, %v2336_v59  ;;  %v2432_v41 = vsel %vm1496_vm15, %v12851_v62, %v12853_v11  ;;  %v12858_v6 = vld [vmem:[#allocation171_spill] sm:$0xff] }
 0xd7e   : > { %v2433_v54 = vsel %vm1496_vm15, %v12853_v11, %v12854_v15  ;;  %v2434_v14 = vsel %vm1496_vm15, %v12854_v15, %v12855_v20  ;;  %v2373_v51 = vadd.f32 %v2364_v60, %v2337_v37  ;;  %v2375_v58 = vadd.f32 %v12850_v17, %v2339_v40  ;;  %v12859_v28 = vld [vmem:[#allocation163_spill] sm:$0xff]  ;;  %v12860_v37 = vld [vmem:[#allocation170_spill] sm:$0xff]  ;;  %v12863_v11 = vld [vmem:[#allocation176_spill] sm:$0xff] }
 0xd7f   : > { %v2374_v47 = vadd.f32 %v2365_v45, %v2338_v36  ;;  %v2440_v30 = vadd.f32 %v2431_v46, %v2299_v63  ;;  %v2469_v1 = vsel %vm1496_vm15, %v12857_v18, %v12856_v24  ;;  %v2467_v59 = vsel %vm1496_vm15, %v12859_v28, %v12858_v6  ;;  %v12861_v17 = vld [vmem:[#allocation167_spill] sm:$0xff] }
 0xd80   : > { %v4657_v48 = vmul.f32 %v10329_v10, %v10195_v32  ;;  %v4658_v62 = vmul.f32 %v10329_v10, %v10222_v7  ;;  %v2442_v60 = vadd.f32 %v2433_v54, %v2301_v16  ;;  %v2443_v45 = vadd.f32 %v2434_v14, %v2302_v49  ;;  %v12862_v46 = vld [vmem:[#allocation175_spill] sm:$0xff]  ;;  %v12864_v16 = vld [vmem:[#allocation174_spill] sm:$0xff]  ;;  %v12866_v14 = vld [vmem:[#allocation173_spill] sm:$0xff] }
 0xd81   : > { %v2516_v40 = vadd.f32 %v12860_v37, %v2375_v58  ;;  %v2468_v63 = vsel %vm1496_vm15, %v12858_v6, %v12857_v18  ;;  %v2503_v36 = vsel %vm1496_vm15, %v12862_v46, %v12861_v17  ;;  %v2504_v32 = vsel %vm1496_vm15, %v12861_v17, %v12863_v11  ;;  %v12867_v58 = vld [vmem:[#allocation179_spill] sm:$0xff]  ;;  %v12868_v6 = vld [vmem:[#allocation178_spill] sm:$0xff]  ;;  %v12870_v46 = vld [vmem:[#allocation181_spill] sm:$0xff] }
 0xd82   : > { %4667 = vrot.lane.b32.xlu1 %v4656_v8, %s7520_s29  ;;  %v2441_v8 = vadd.f32 %v2432_v41, %v2300_v0  ;;  %v2478_v7 = vadd.f32 %v2469_v1, %v2442_v60  ;;  %v2476_v0 = vadd.f32 %v2467_v59, %v2440_v30  ;;  %v2470_v49 = vsel %vm1496_vm15, %v12856_v24, %v12864_v16  ;;  %v12865_v41 = vld [vmem:[#allocation177_spill] sm:$0xff] }
 0xd83   : > { %4669 = vrot.lane.b32.xlu2 %v4657_v48, %s7520_s29  ;;  %v2506_v15 = vsel %vm1496_vm15, %v12865_v41, %v12860_v37  ;;  %v2505_v54 = vsel %vm1496_vm15, %v12863_v11, %v12865_v41  ;;  %v2540_v18 = vsel %vm1496_vm15, %v12867_v58, %v12866_v14  ;;  %v2539_v30 = vsel %vm1496_vm15, %v12868_v6, %v12867_v58  ;;  %v12869_v37 = vld [vmem:[#allocation180_spill] sm:$0xff] }
 0xd84   : > { %4671 = vrot.lane.b32.xlu0 %v4658_v62, %s7520_s29  ;;  %v4659_v1 = vmul.f32 %v10329_v10, %v10211_v13  ;;  %v2477_v24 = vadd.f32 %v2468_v63, %v2441_v8  ;;  %v2512_v28 = vadd.f32 %v2503_v36, %v2371_v26  ;;  %v2513_v59 = vadd.f32 %v2504_v32, %v2372_v53  ;;  %v12871_v13 = vld [vmem:[#allocation186_spill] sm:$0xff]  ;;  %v12872_v10 = vld [vmem:[#allocation184_spill] sm:$0xff] }
 0xd85   : > { %v4690_v48 = vstv %s10380_s21  ;;  %v2479_v62 = vadd.f32 %v2470_v49, %v2443_v45  ;;  %v2515_v60 = vadd.f32 %v2506_v15, %v2374_v47  ;;  %v2541_v17 = vsel %vm1496_vm15, %v12866_v14, %v12869_v37  ;;  %v12873_v47 = vld [vmem:[#allocation182_spill] sm:$0xff]  ;;  %v12874_v49 = vld [vmem:[#allocation187_spill] sm:$0xff]  ;;  %v12875_v15 = vld [vmem:[#allocation189_spill] sm:$0xff]  ;;  %s6862_s21 = sld [smem:[#allocation5 + $0x4e]] }
 0xd86   : > { %v2542_v11 = vsel %vm1496_vm15, %v12869_v37, %v12870_v46  ;;  %v2514_v41 = vadd.f32 %v2505_v54, %v2373_v51  ;;  %v2549_v58 = vadd.f32 %v2540_v18, %v2513_v59  ;;  %v2548_v6 = vadd.f32 %v2539_v30, %v2512_v28  ;;  %v12877_v18 = vld [vmem:[#allocation183_spill] sm:$0xff]  ;;  %v12879_v28 = vld [vmem:[#allocation185_spill] sm:$0xff]  ;;  %v12881_v37 = vld [vmem:[#allocation188_spill] sm:$0xff] }
 0xd87   : > { %v2608_v26 = vsel %vm1317_vm14, %v12872_v10, %v12871_v13  ;;  %v2552_v53 = vadd.f32 %v12870_v46, %v2516_v40  ;;  %v2609_v8 = vsel %vm1317_vm14, %v12871_v13, %v12873_v47  ;;  %v4691_v45 = vmul.f32 %v4690_v48, %v10236_v5  ;;  %v12876_v40 = vld [vmem:[#allocation190_spill] sm:$0xff]  ;;  %v12883_v13 = vld [vmem:[#allocation196_spill] sm:$0xff] }
 0xd88   : > { %v4692_v63 = vmul.f32 %v4690_v48, %v10262_v27  ;;  %v2550_v36 = vadd.f32 %v2541_v17, %v2514_v41  ;;  %v2551_v32 = vadd.f32 %v2542_v11, %v2515_v60  ;;  %v2610_v51 = vsel %vm1317_vm14, %v12873_v47, %v12874_v49  ;;  %v12880_v60 = vld [vmem:[#allocation193_spill] sm:$0xff]  ;;  %v12882_v17 = vld [vmem:[#allocation195_spill] sm:$0xff] }
 0xd89   : > { %v2611_v54 = vsel %vm1317_vm14, %v12874_v49, %v12875_v15  ;;  %v2617_v14 = vadd.f32 %v2608_v26, %v2476_v0  ;;  %v2644_v30 = vsel %vm1317_vm14, %v12877_v18, %v12876_v40  ;;  %v2618_v27 = vadd.f32 %v2609_v8, %v2477_v24  ;;  %v12884_v26 = vld [vmem:[#allocation191_spill] sm:$0xff]  ;;  %v12885_v18 = vld [vmem:[#allocation197_spill] sm:$0xff] }
 0xd8a   : > { %4673 = vrot.lane.b32.xlu1 %v4659_v1, %s7520_s29  ;;  %v12878_v1 = vld [vmem:[#allocation192_spill] sm:$0xff]  ;;  %v2647_v0 = vsel %vm1317_vm14, %v12879_v28, %v12880_v60  ;;  %v2680_v46 = vsel %vm1317_vm14, %v12882_v17, %v12881_v37  ;;  %v2619_v11 = vadd.f32 %v2610_v51, %v2478_v7  ;;  %v2620_v41 = vadd.f32 %v2611_v54, %v2479_v62  ;;  %v12887_v51 = vld [vmem:[#allocation198_spill] sm:$0xff]  ;;  %v13026_v15 = vld [vmem:[#allocation337_spill] sm:$0xff] }
 0xd8b   : > { %v2645_v5 = vsel %vm1317_vm14, %v12876_v40, %v12878_v1  ;;  %4701 = vrot.lane.b32.xlu2 %v4691_v45, %s7520_s29  ;;  %v2646_v59 = vsel %vm1317_vm14, %v12878_v1, %v12879_v28  ;;  %v2681_v10 = vsel %vm1317_vm14, %v12881_v37, %v12883_v13  ;;  %v4693_v24 = vmul.f32 %v4690_v48, %v10267_v19  ;;  %v12886_v19 = vld [vmem:[#allocation199_spill] sm:$0xff]  ;;  %v12888_v54 = vld [vmem:[#allocation194_spill] sm:$0xff]  ;;  %v13023_v60 = vld [vmem:[#allocation332_spill] sm:$0xff] }
 0xd8c   : > { %4703 = vrot.lane.b32.xlu0 %v4692_v63, %s7520_s29  ;;  %v2693_v47 = vadd.f32 %v12884_v26, %v2552_v53  ;;  %v2653_v8 = vadd.f32 %v2644_v30, %v2617_v14  ;;  %v2654_v45 = vadd.f32 %v2645_v5, %v2618_v27  ;;  %vm2786_vm15 = vcmask 506880   ;;  %v12889_v30 = vld [vmem:[#allocation200_spill] sm:$0xff]  ;;  %v12890_v27 = vld [vmem:[#allocation206_spill] sm:$0xff] }
 0xd8d   : > { %v2655_v63 = vadd.f32 %v2646_v59, %v2619_v11  ;;  %v2656_v49 = vadd.f32 %v2647_v0, %v2620_v41  ;;  %v2689_v40 = vadd.f32 %v2680_v46, %v2548_v6  ;;  %v2682_v1 = vsel %vm1317_vm14, %v12883_v13, %v12885_v18  ;;  %v10490_v6 = vld [vmem:[#allocation17 + $0x47] ss:$8 sm:$0xf] }
 0xd8e   : > { %v2690_v7 = vadd.f32 %v2681_v10, %v2549_v58  ;;  %v2683_v62 = vsel %vm1317_vm14, %v12885_v18, %v12884_v26  ;;  %v2716_v53 = vsel %vm1317_vm14, %v12887_v51, %v12886_v19  ;;  %v2717_v14 = vsel %vm1317_vm14, %v12886_v19, %v12888_v54  ;;  %v12891_v58 = vld [vmem:[#allocation204_spill] sm:$0xff]  ;;  %v12892_v17 = vld [vmem:[#allocation202_spill] sm:$0xff]  ;;  %v12894_v13 = vld [vmem:[#allocation209_spill] sm:$0xff] }
 0xd8f   : > { %v2718_v5 = vsel %vm1317_vm14, %v12888_v54, %v12889_v30  ;;  %v2787_v28 = vsel %vm2786_vm15, %v12891_v58, %v12890_v27  ;;  %v4695_v59 = vmul.f32 %v4690_v48, %v10323_v25  ;;  %v4694_v0 = vmul.f32 %v4690_v48, %v10294_v33  ;;  %v12893_v11 = vld [vmem:[#allocation208_spill] sm:$0xff]  ;;  %v12895_v48 = vld [vmem:[#allocation201_spill] sm:$0xff]  ;;  %v12900_v58 = vld [vmem:[#allocation207_spill] sm:$0xff] }
 0xd90   : > { %v2691_v37 = vadd.f32 %v2682_v1, %v2550_v36  ;;  %v2788_v46 = vsel %vm2786_vm15, %v12890_v27, %v12892_v17  ;;  %v2789_v41 = vsel %vm2786_vm15, %v12892_v17, %v12893_v11  ;;  %v2790_v10 = vsel %vm2786_vm15, %v12893_v11, %v12894_v13  ;;  %v12908_v13 = vld [vmem:[#allocation218_spill] sm:$0xff] }
 0xd91   : > { %v2725_v26 = vadd.f32 %v2716_v53, %v2689_v40  ;;  %v2726_v18 = vadd.f32 %v2717_v14, %v2690_v7  ;;  %v4728_v33 = vperm.slane %v10490_v6, 0  ;;  %v2719_v36 = vsel %vm1317_vm14, %v12889_v30, %v12895_v48  ;;  %v12897_v40 = vld [vmem:[#allocation203_spill] sm:$0xff]  ;;  %v12899_v53 = vld [vmem:[#allocation212_spill] sm:$0xff] }
 0xd92   : > { %4705 = vrot.lane.b32.xlu1 %v4693_v24, %s7520_s29  ;;  %v2692_v24 = vadd.f32 %v2683_v62, %v2551_v32  ;;  %v2727_v25 = vadd.f32 %v2718_v5, %v2691_v37  ;;  %v2729_v1 = vadd.f32 %v12895_v48, %v2693_v47  ;;  %v2796_v19 = vadd.f32 %v2787_v28, %v2653_v8  ;;  %v12896_v32 = vld [vmem:[#allocation211_spill] sm:$0xff]  ;;  %v12898_v62 = vld [vmem:[#allocation205_spill] sm:$0xff]  ;;  %v12902_v8 = vld [vmem:[#allocation214_spill] sm:$0xff] }
 0xd93   : > { %4707 = vrot.lane.b32.xlu2 %v4694_v0, %s7520_s29  ;;  %v2797_v51 = vadd.f32 %v2788_v46, %v2654_v45  ;;  %v2798_v54 = vadd.f32 %v2789_v41, %v2655_v63  ;;  %v2799_v27 = vadd.f32 %v2790_v10, %v2656_v49  ;;  %v2823_v7 = vsel %vm2786_vm15, %v12897_v40, %v12896_v32  ;;  %v12901_v30 = vld [vmem:[#allocation215_spill] sm:$0xff]  ;;  %v12903_v63 = vld [vmem:[#allocation210_spill] sm:$0xff]  ;;  %v12904_v49 = vld [vmem:[#allocation217_spill] sm:$0xff] }
 0xd94   : > { %4709 = vrot.lane.b32.xlu0 %v4695_v59, %s7520_s29  ;;  %v2825_v14 = vsel %vm2786_vm15, %v12899_v53, %v12898_v62  ;;  %v2824_v5 = vsel %vm2786_vm15, %v12896_v32, %v12899_v53  ;;  %v2859_v47 = vsel %vm2786_vm15, %v12901_v30, %v12900_v58  ;;  %v2826_v45 = vsel %vm2786_vm15, %v12898_v62, %v12902_v8  ;;  %v12905_v59 = vld [vmem:[#allocation216_spill] sm:$0xff]  ;;  %v12906_v62 = vld [vmem:[#allocation213_spill] sm:$0xff]  ;;  %v12907_v53 = vld [vmem:[#allocation219_spill] sm:$0xff]  ;;  %s10766_s29 = sld [smem:[#allocation5 + $0x12]] }
 0xd95   : > { %v2862_v28 = vsel %vm2786_vm15, %v12904_v49, %v12903_v63  ;;  %v2860_v0 = vsel %vm2786_vm15, %v12900_v58, %v12905_v59  ;;  %v4730_v37 = vperm.slane %v10490_v6, 2  ;;  %v4729_v17 = vperm.slane %v10490_v6, 1 }
 0xd96   : > { %v2728_v46 = vadd.f32 %v2719_v36, %v2692_v24  ;;  %v2872_v11 = vadd.f32 %v12903_v63, %v2729_v1  ;;  %v2832_v41 = vadd.f32 %v2823_v7, %v2796_v19  ;;  %v2861_v10 = vsel %vm2786_vm15, %v12905_v59, %v12904_v49  ;;  %v12909_v1 = vld [vmem:[#allocation220_spill] sm:$0xff]  ;;  %v12910_v7 = vld [vmem:[#allocation226_spill] sm:$0xff]  ;;  %v12915_v49 = vld [vmem:[#allocation229_spill] sm:$0xff] }
 0xd97   : > { %v2834_v48 = vadd.f32 %v2825_v14, %v2798_v54  ;;  %v2833_v32 = vadd.f32 %v2824_v5, %v2797_v51  ;;  %v2835_v40 = vadd.f32 %v2826_v45, %v2799_v27  ;;  %v2896_v58 = vsel %vm2786_vm15, %v12907_v53, %v12906_v62  ;;  %v12911_v54 = vld [vmem:[#allocation224_spill] sm:$0xff]  ;;  %v12914_v5 = vld [vmem:[#allocation227_spill] sm:$0xff] }
 0xd98   : > { %v2868_v30 = vadd.f32 %v2859_v47, %v2725_v26  ;;  %v2871_v8 = vadd.f32 %v2862_v28, %v2728_v46  ;;  %v2895_v24 = vsel %vm2786_vm15, %v12908_v13, %v12907_v53  ;;  %v2870_v36 = vadd.f32 %v2861_v10, %v2727_v25  ;;  %v12913_v25 = vld [vmem:[#allocation222_spill] sm:$0xff]  ;;  %v12917_v59 = vld [vmem:[#allocation223_spill] sm:$0xff] }
 0xd99   : > { %v2897_v19 = vsel %vm2786_vm15, %v12906_v62, %v12909_v1  ;;  %v2964_v51 = vsel %vm959_vm0, %v12911_v54, %v12910_v7  ;;  %v4731_v27 = vperm.slane %v10490_v6, 3  ;;  %v2965_v14 = vsel %vm959_vm0, %v12910_v7, %v12913_v25  ;;  %v12916_v28 = vld [vmem:[#allocation230_spill] sm:$0xff]  ;;  %v12918_v46 = vld [vmem:[#allocation231_spill] sm:$0xff]  ;;  %v12919_v62 = vld [vmem:[#allocation225_spill] sm:$0xff] }
 0xd9a   : > { %4732 = vrot.lane.b32.xlu1 %v4728_v33, %s7521_s24  ;;  %v2869_v33 = vadd.f32 %v2860_v0, %v2726_v18  ;;  %v12912_v18 = vld [vmem:[#allocation221_spill] sm:$0xff]  ;;  %v2966_v47 = vsel %vm959_vm0, %v12913_v25, %v12914_v5  ;;  %v2904_v45 = vadd.f32 %v2895_v24, %v2868_v30  ;;  %v2967_v6 = vsel %vm959_vm0, %v12914_v5, %v12915_v49  ;;  %v12921_v24 = vld [vmem:[#allocation234_spill] sm:$0xff]  ;;  %v12923_v54 = vld [vmem:[#allocation235_spill] sm:$0xff] }
 0xd9b   : > { %4734 = vrot.lane.b32.xlu2 %v4729_v17, %s7521_s24  ;;  %v2898_v13 = vsel %vm2786_vm15, %v12909_v1, %v12912_v18  ;;  %v2908_v63 = vadd.f32 %v12912_v18, %v2872_v11  ;;  %v3000_v0 = vsel %vm959_vm0, %v12917_v59, %v12916_v28  ;;  %v2973_v17 = vadd.f32 %v2964_v51, %v2832_v41  ;;  %v12922_v7 = vld [vmem:[#allocation233_spill] sm:$0xff] }
 0xd9c   : > { %4736 = vrot.lane.b32.xlu0 %v4730_v37, %s7521_s24  ;;  %v2905_v26 = vadd.f32 %v2896_v58, %v2869_v33  ;;  %v2906_v37 = vadd.f32 %v2897_v19, %v2870_v36  ;;  %v3001_v10 = vsel %vm959_vm0, %v12916_v28, %v12918_v46  ;;  %v3002_v53 = vsel %vm959_vm0, %v12918_v46, %v12919_v62  ;;  %v12920_v33 = vld [vmem:[#allocation228_spill] sm:$0xff]  ;;  %v12924_v5 = vld [vmem:[#allocation237_spill] sm:$0xff] }
 0xd9d   : > { %v2907_v58 = vadd.f32 %v2898_v13, %v2871_v8  ;;  %v2974_v11 = vadd.f32 %v2965_v14, %v2833_v32  ;;  %v2975_v30 = vadd.f32 %v2966_v47, %v2834_v48  ;;  %v3036_v1 = vsel %vm959_vm0, %v12921_v24, %v12920_v33  ;;  %v12925_v32 = vld [vmem:[#allocation232_spill] sm:$0xff]  ;;  %v12927_v14 = vld [vmem:[#allocation238_spill] sm:$0xff]  ;;  %v12929_v59 = vld [vmem:[#allocation241_spill] sm:$0xff] }
 0xd9e   : > { %v3049_v36 = vadd.f32 %v12922_v7, %v2908_v63  ;;  %v2976_v41 = vadd.f32 %v2967_v6, %v2835_v40  ;;  %v3009_v19 = vadd.f32 %v3000_v0, %v2973_v17  ;;  %v3037_v51 = vsel %vm959_vm0, %v12920_v33, %v12923_v54  ;;  %v12926_v13 = vld [vmem:[#allocation240_spill] sm:$0xff]  ;;  %v12930_v17 = vld [vmem:[#allocation243_spill] sm:$0xff]  ;;  %v12934_v24 = vld [vmem:[#allocation242_spill] sm:$0xff] }
 0xd9f   : > { %v3010_v18 = vadd.f32 %v3001_v10, %v2974_v11  ;;  %v3011_v25 = vadd.f32 %v3002_v53, %v2975_v30  ;;  %v3038_v8 = vsel %vm959_vm0, %v12923_v54, %v12924_v5  ;;  %v3039_v48 = vsel %vm959_vm0, %v12924_v5, %v12922_v7  ;;  %v12928_v63 = vld [vmem:[#allocation236_spill] sm:$0xff]  ;;  %v12933_v30 = vld [vmem:[#allocation245_spill] sm:$0xff] }
 0xda0   : > { %v3045_v40 = vadd.f32 %v3036_v1, %v2904_v45  ;;  %v3072_v47 = vsel %vm959_vm0, %v12927_v14, %v12926_v13  ;;  %v3073_v6 = vsel %vm959_vm0, %v12926_v13, %v12928_v63  ;;  %v3046_v28 = vadd.f32 %v3037_v51, %v2905_v26  ;;  %v12931_v10 = vld [vmem:[#allocation244_spill] sm:$0xff] }
 0xda1   : > { %v3074_v0 = vsel %vm959_vm0, %v12928_v63, %v12929_v59  ;;  %v3075_v46 = vsel %vm959_vm0, %v12929_v59, %v12930_v17  ;;  %v3047_v53 = vadd.f32 %v3038_v8, %v2906_v37  ;;  %v3048_v11 = vadd.f32 %v3039_v48, %v2907_v58  ;;  %v12935_v8 = vld [vmem:[#allocation248_spill] sm:$0xff]  ;;  %v12936_v48 = vld [vmem:[#allocation247_spill] sm:$0xff] }
 0xda2   : > { %4738 = vrot.lane.b32.xlu1 %v4731_v27, %s7521_s24  ;;  %v3003_v27 = vsel %vm959_vm0, %v12919_v62, %v12925_v32  ;;  %v12932_v62 = vld [vmem:[#allocation239_spill] sm:$0xff]  ;;  %v3105_v33 = vsel %vm876_vm4, %v12931_v10, %v12933_v30  ;;  %v3106_v26 = vsel %vm876_vm4, %v12933_v30, %v12934_v24  ;;  %v3081_v54 = vadd.f32 %v3072_v47, %v3045_v40  ;;  %v12940_v47 = vld [vmem:[#allocation252_spill] sm:$0xff]  ;;  %s10783_s24 = sld [smem:[#allocation5 + $0x2d]]  ;;  %v13021_v24 = vld [vmem:[#allocation333_spill] sm:$0xff] }
 0xda3   : > { %v3104_v45 = vsel %vm876_vm4, %v12932_v62, %v12931_v10  ;;  %v3012_v1 = vadd.f32 %v3003_v27, %v2976_v41  ;;  %v3112_v7 = vadd.f32 %v12932_v62, %v3009_v19  ;;  %v3082_v51 = vadd.f32 %v3073_v6, %v3046_v28  ;;  %v12937_v10 = vld [vmem:[#allocation246_spill] sm:$0xff]  ;;  %v12939_v27 = vld [vmem:[#allocation251_spill] sm:$0xff] }
 0xda4   : > { %v3083_v5 = vadd.f32 %v3074_v0, %v3047_v53  ;;  %v3084_v13 = vadd.f32 %v3075_v46, %v3048_v11  ;;  %v3085_v14 = vadd.f32 %v12930_v17, %v3049_v36  ;;  %v3113_v63 = vadd.f32 %v3104_v45, %v3010_v18  ;;  %v12938_v41 = vld [vmem:[#allocation250_spill] sm:$0xff]  ;;  %v12943_v45 = vld [vmem:[#allocation255_spill] sm:$0xff]  ;;  %v12944_v53 = vld [vmem:[#allocation253_spill] sm:$0xff] }
 0xda5   : > { %v3114_v37 = vadd.f32 %v3105_v33, %v3011_v25  ;;  %v3115_v58 = vadd.f32 %v3106_v26, %v3012_v1  ;;  %v3135_v59 = vsel %vm876_vm4, %v12936_v48, %v12935_v8  ;;  %v3136_v30 = vsel %vm876_vm4, %v12935_v8, %v12937_v10  ;;  %v12941_v25 = vld [vmem:[#allocation249_spill] sm:$0xff]  ;;  %v12942_v28 = vld [vmem:[#allocation254_spill] sm:$0xff] }
 0xda6   : > { %v3166_v19 = vsel %vm876_vm4, %v12939_v27, %v12938_v41  ;;  %v3174_v40 = vadd.f32 %v12939_v27, %v3081_v54  ;;  %v3167_v36 = vsel %vm876_vm4, %v12938_v41, %v12940_v47  ;;  %vm3276_vm0 = vcmask 441344   ;;  %v12945_v33 = vld [vmem:[#allocation257_spill] sm:$0xff]  ;;  %v12946_v54 = vld [vmem:[#allocation256_spill] sm:$0xff] }
 0xda7   : > { %v3143_v18 = vadd.f32 %v12936_v48, %v3112_v7  ;;  %v3137_v6 = vsel %vm876_vm4, %v12937_v10, %v12941_v25  ;;  %v3168_v0 = vsel %vm876_vm4, %v12940_v47, %v12942_v28  ;;  %v3178_v17 = vadd.f32 %v12942_v28, %v3085_v14  ;;  %v12947_v48 = vld [vmem:[#allocation258_spill] sm:$0xff]  ;;  %v12948_v10 = vld [vmem:[#allocation260_spill] sm:$0xff] }
 0xda8   : > { %v3144_v46 = vadd.f32 %v3135_v59, %v3113_v63  ;;  %v3145_v62 = vadd.f32 %v3136_v30, %v3114_v37  ;;  %v3197_v11 = vsel %vm876_vm4, %v12944_v53, %v12943_v45  ;;  %v3198_v26 = vsel %vm876_vm4, %v12943_v45, %v12945_v33  ;;  %v12949_v30 = vld [vmem:[#allocation261_spill] sm:$0xff] }
 0xda9   : > { %v3175_v1 = vadd.f32 %v3166_v19, %v3082_v51  ;;  %v3176_v7 = vadd.f32 %v3167_v36, %v3083_v5  ;;  %v3199_v8 = vsel %vm876_vm4, %v12945_v33, %v12946_v54  ;;  %v3277_v14 = vsel %vm3276_vm0, %v12948_v10, %v12947_v48  ;;  %v12950_v19 = vld [vmem:[#allocation263_spill] sm:$0xff]  ;;  %v12955_v33 = vld [vmem:[#allocation270_spill] sm:$0xff] }
 0xdaa   : > { %v3146_v63 = vadd.f32 %v3137_v6, %v3115_v58  ;;  %v3205_v37 = vadd.f32 %v12944_v53, %v3174_v40  ;;  %v3177_v59 = vadd.f32 %v3168_v0, %v3084_v13  ;;  %v3278_v41 = vsel %vm3276_vm0, %v12947_v48, %v12949_v30  ;;  %v12951_v58 = vld [vmem:[#allocation262_spill] sm:$0xff]  ;;  %v12953_v40 = vld [vmem:[#allocation265_spill] sm:$0xff] }
 0xdab   : > { %v3206_v27 = vadd.f32 %v3197_v11, %v3175_v1  ;;  %v3209_v51 = vadd.f32 %v12946_v54, %v3178_v17  ;;  %v3207_v5 = vadd.f32 %v3198_v26, %v3176_v7  ;;  %v3279_v47 = vsel %vm3276_vm0, %v12949_v30, %v12950_v19  ;;  %v12952_v6 = vld [vmem:[#allocation266_spill] sm:$0xff]  ;;  %v12954_v11 = vld [vmem:[#allocation264_spill] sm:$0xff]  ;;  %v12958_v48 = vld [vmem:[#allocation269_spill] sm:$0xff] }
 0xdac   : > { %v3208_v36 = vadd.f32 %v3199_v8, %v3177_v59  ;;  %v3286_v28 = vadd.f32 %v12948_v10, %v3143_v18  ;;  %v3287_v45 = vadd.f32 %v3277_v14, %v3144_v46  ;;  %v3314_v13 = vsel %vm3276_vm0, %v12952_v6, %v12951_v58  ;;  %v12956_v18 = vld [vmem:[#allocation271_spill] sm:$0xff]  ;;  %v12959_v14 = vld [vmem:[#allocation273_spill] sm:$0xff]  ;;  %v12960_v30 = vld [vmem:[#allocation272_spill] sm:$0xff] }
 0xdad   : > { %v3358_v0 = vadd.f32 %v12953_v40, %v3205_v37  ;;  %v3288_v53 = vadd.f32 %v3278_v41, %v3145_v62  ;;  %v3313_v17 = vsel %vm3276_vm0, %v12954_v11, %v12952_v6  ;;  %v3349_v26 = vsel %vm3276_vm0, %v12953_v40, %v12955_v33  ;;  %v12957_v8 = vld [vmem:[#allocation267_spill] sm:$0xff]  ;;  %v12961_v41 = vld [vmem:[#allocation274_spill] sm:$0xff]  ;;  %v12964_v40 = vld [vmem:[#allocation277_spill] sm:$0xff] }
 0xdae   : > { %v3289_v1 = vadd.f32 %v3279_v47, %v3146_v63  ;;  %v3322_v7 = vadd.f32 %v12954_v11, %v3286_v28  ;;  %v3350_v46 = vsel %vm3276_vm0, %v12955_v33, %v12956_v18  ;;  %vm3455_vm14 = vcmask 392192   ;;  %v12962_v28 = vld [vmem:[#allocation275_spill] sm:$0xff]  ;;  %v12965_v33 = vld [vmem:[#allocation278_spill] sm:$0xff] }
 0xdaf   : > { %v3324_v54 = vadd.f32 %v3314_v13, %v3288_v53  ;;  %v3315_v62 = vsel %vm3276_vm0, %v12951_v58, %v12957_v8  ;;  %v3351_v10 = vsel %vm3276_vm0, %v12956_v18, %v12958_v48  ;;  %v3352_v63 = vsel %vm3276_vm0, %v12958_v48, %v12959_v14  ;;  %v12963_v58 = vld [vmem:[#allocation276_spill] sm:$0xff] }
 0xdb0   : > { %v3323_v37 = vadd.f32 %v3313_v17, %v3287_v45  ;;  %v3359_v59 = vadd.f32 %v3349_v26, %v3206_v27  ;;  %v3385_v47 = vsel %vm3276_vm0, %v12961_v41, %v12960_v30  ;;  %v3386_v6 = vsel %vm3276_vm0, %v12960_v30, %v12962_v28  ;;  %v12966_v45 = vld [vmem:[#allocation280_spill] sm:$0xff] }
 0xdb1   : > { %v3360_v13 = vadd.f32 %v3350_v46, %v3207_v5  ;;  %v3388_v53 = vsel %vm3276_vm0, %v12964_v40, %v12963_v58  ;;  %v3387_v11 = vsel %vm3276_vm0, %v12962_v28, %v12964_v40  ;;  %v3456_v27 = vsel %vm3455_vm14, %v12966_v45, %v12965_v33  ;;  %v12967_v5 = vld [vmem:[#allocation281_spill] sm:$0xff]  ;;  %v12968_v58 = vld [vmem:[#allocation283_spill] sm:$0xff] }
 0xdb2   : > { %v3325_v17 = vadd.f32 %v3315_v62, %v3289_v1  ;;  %v3361_v26 = vadd.f32 %v3351_v10, %v3208_v36  ;;  %v3394_v18 = vadd.f32 %v12961_v41, %v3358_v0  ;;  %v3362_v48 = vadd.f32 %v3352_v63, %v3209_v51  ;;  %v12969_v1 = vld [vmem:[#allocation285_spill] sm:$0xff]  ;;  %v12970_v62 = vld [vmem:[#allocation286_spill] sm:$0xff]  ;;  %v12971_v0 = vld [vmem:[#allocation284_spill] sm:$0xff] }
 0xdb3   : > { %v3395_v14 = vadd.f32 %v3385_v47, %v3359_v59  ;;  %v3396_v30 = vadd.f32 %v3386_v6, %v3360_v13  ;;  %v3457_v46 = vsel %vm3455_vm14, %v12965_v33, %v12967_v5  ;;  %v3458_v8 = vsel %vm3455_vm14, %v12967_v5, %v12968_v58  ;;  %v12972_v10 = vld [vmem:[#allocation282_spill] sm:$0xff]  ;;  %v12973_v59 = vld [vmem:[#allocation287_spill] sm:$0xff]  ;;  %v12976_v33 = vld [vmem:[#allocation289_spill] sm:$0xff] }
 0xdb4   : > { %v3398_v28 = vadd.f32 %v3388_v53, %v3362_v48  ;;  %v3397_v40 = vadd.f32 %v3387_v11, %v3361_v26  ;;  %v3465_v25 = vadd.f32 %v12966_v45, %v3322_v7  ;;  %v3466_v19 = vadd.f32 %v3456_v27, %v3323_v37  ;;  %v12974_v7 = vld [vmem:[#allocation290_spill] sm:$0xff]  ;;  %v12975_v53 = vld [vmem:[#allocation291_spill] sm:$0xff]  ;;  %v12977_v27 = vld [vmem:[#allocation293_spill] sm:$0xff] }
 0xdb5   : > { %v3537_v36 = vadd.f32 %v12969_v1, %v3394_v18  ;;  %v3492_v51 = vsel %vm3455_vm14, %v12971_v0, %v12970_v62  ;;  %v3493_v63 = vsel %vm3455_vm14, %v12970_v62, %v12972_v10  ;;  %v3494_v41 = vsel %vm3455_vm14, %v12972_v10, %v12973_v59  ;;  %v12979_v18 = vld [vmem:[#allocation294_spill] sm:$0xff]  ;;  %v12981_v62 = vld [vmem:[#allocation297_spill] sm:$0xff]  ;;  %v12982_v10 = vld [vmem:[#allocation296_spill] sm:$0xff] }
 0xdb6   : > { %v3467_v47 = vadd.f32 %v3457_v46, %v3324_v54  ;;  %v3468_v6 = vadd.f32 %v3458_v8, %v3325_v17  ;;  %v3501_v13 = vadd.f32 %v12971_v0, %v3465_v25  ;;  %v3528_v37 = vsel %vm3455_vm14, %v12969_v1, %v12974_v7  ;;  %v12978_v17 = vld [vmem:[#allocation292_spill] sm:$0xff]  ;;  %v12980_v46 = vld [vmem:[#allocation295_spill] sm:$0xff] }
 0xdb7   : > { %v3529_v11 = vsel %vm3455_vm14, %v12974_v7, %v12975_v53  ;;  %v3530_v45 = vsel %vm3455_vm14, %v12975_v53, %v12976_v33  ;;  %v3531_v26 = vsel %vm3455_vm14, %v12976_v33, %v12977_v27  ;;  %vm3634_vm15 = vcmask 384000   ;;  %v12985_v53 = vld [vmem:[#allocation301_spill] sm:$0xff]  ;;  %v12986_v27 = vld [vmem:[#allocation303_spill] sm:$0xff] }
 0xdb8   : > { %v3502_v54 = vadd.f32 %v3492_v51, %v3466_v19  ;;  %v3503_v8 = vadd.f32 %v3493_v63, %v3467_v47  ;;  %v3504_v25 = vadd.f32 %v3494_v41, %v3468_v6  ;;  %v3564_v48 = vsel %vm3455_vm14, %v12979_v18, %v12978_v17  ;;  %v12983_v41 = vld [vmem:[#allocation298_spill] sm:$0xff]  ;;  %v12984_v47 = vld [vmem:[#allocation300_spill] sm:$0xff]  ;;  %v13016_v59 = vld [vmem:[#allocation331_spill] sm:$0xff] }
 0xdb9   : > { %v3538_v5 = vadd.f32 %v3528_v37, %v3395_v14  ;;  %v3565_v1 = vsel %vm3455_vm14, %v12978_v17, %v12980_v46  ;;  %v3566_v0 = vsel %vm3455_vm14, %v12980_v46, %v12981_v62  ;;  %v3567_v7 = vsel %vm3455_vm14, %v12981_v62, %v12982_v10  ;;  %v12989_v10 = vld [vmem:[#allocation306_spill] sm:$0xff] }
 0xdba   : > { %v3539_v19 = vadd.f32 %v3529_v11, %v3396_v30  ;;  %v3540_v51 = vadd.f32 %v3530_v45, %v3397_v40  ;;  %v3541_v63 = vadd.f32 %v3531_v26, %v3398_v28  ;;  %v3635_v6 = vsel %vm3634_vm15, %v12984_v47, %v12983_v41  ;;  %v12987_v11 = vld [vmem:[#allocation305_spill] sm:$0xff]  ;;  %v12988_v26 = vld [vmem:[#allocation302_spill] sm:$0xff] }
 0xdbb   : > { %v3573_v14 = vadd.f32 %v12979_v18, %v3537_v36  ;;  %v3574_v37 = vadd.f32 %v3564_v48, %v3538_v5  ;;  %v3636_v33 = vsel %vm3634_vm15, %v12983_v41, %v12985_v53  ;;  %v3637_v17 = vsel %vm3634_vm15, %v12985_v53, %v12986_v27  ;;  %v12990_v18 = vld [vmem:[#allocation304_spill] sm:$0xff] }
 0xdbc   : > { %v3575_v46 = vadd.f32 %v3565_v1, %v3539_v19  ;;  %v3576_v62 = vadd.f32 %v3566_v0, %v3540_v51  ;;  %v3577_v30 = vadd.f32 %v3567_v7, %v3541_v63  ;;  %v3644_v28 = vadd.f32 %v12984_v47, %v3501_v13  ;;  %v12991_v1 = vld [vmem:[#allocation310_spill] sm:$0xff]  ;;  %v12992_v13 = vld [vmem:[#allocation307_spill] sm:$0xff]  ;;  %v12993_v7 = vld [vmem:[#allocation309_spill] sm:$0xff] }
 0xdbd   : > { %v3645_v40 = vadd.f32 %v3635_v6, %v3502_v54  ;;  %v3716_v45 = vadd.f32 %v12987_v11, %v3573_v14  ;;  %v3672_v36 = vsel %vm3634_vm15, %v12989_v10, %v12988_v26  ;;  %v3671_v48 = vsel %vm3634_vm15, %v12990_v18, %v12989_v10  ;;  %v12994_v19 = vld [vmem:[#allocation311_spill] sm:$0xff]  ;;  %v12996_v14 = vld [vmem:[#allocation313_spill] sm:$0xff] }
 0xdbe   : > { %v3646_v5 = vadd.f32 %v3636_v33, %v3503_v8  ;;  %v3647_v41 = vadd.f32 %v3637_v17, %v3504_v25  ;;  %v3680_v53 = vadd.f32 %v12990_v18, %v3644_v28  ;;  %v3707_v0 = vsel %vm3634_vm15, %v12987_v11, %v12991_v1  ;;  %v12995_v25 = vld [vmem:[#allocation312_spill] sm:$0xff]  ;;  %v12997_v33 = vld [vmem:[#allocation314_spill] sm:$0xff]  ;;  %v13000_v18 = vld [vmem:[#allocation315_spill] sm:$0xff] }
 0xdbf   : > { %v3673_v54 = vsel %vm3634_vm15, %v12988_v26, %v12992_v13  ;;  %v3709_v51 = vsel %vm3634_vm15, %v12994_v19, %v12993_v7  ;;  %v3708_v8 = vsel %vm3634_vm15, %v12991_v1, %v12994_v19  ;;  %v3710_v63 = vsel %vm3634_vm15, %v12993_v7, %v12995_v25  ;;  %v12998_v11 = vld [vmem:[#allocation316_spill] sm:$0xff]  ;;  %v12999_v26 = vld [vmem:[#allocation317_spill] sm:$0xff]  ;;  %v13001_v25 = vld [vmem:[#allocation318_spill] sm:$0xff] }
 0xdc0   : > { %v3682_v47 = vadd.f32 %v3672_v36, %v3646_v5  ;;  %v3681_v6 = vadd.f32 %v3671_v48, %v3645_v40  ;;  %v3743_v17 = vsel %vm3634_vm15, %v12997_v33, %v12996_v14  ;;  %vm3813_vm6 = vcmask 375808   ;;  %v10796_v36 = vpop.permute.xlu2 %4593 }
 0xdc1   : > { %v3717_v28 = vadd.f32 %v3707_v0, %v3574_v37  ;;  %v3746_v10 = vsel %vm3634_vm15, %v12999_v26, %v12998_v11  ;;  %v3744_v1 = vsel %vm3634_vm15, %v12996_v14, %v13000_v18  ;;  %v3745_v40 = vsel %vm3634_vm15, %v13000_v18, %v12999_v26  ;;  %v13002_v14 = vld [vmem:[#allocation320_spill] sm:$0xff]  ;;  %v13003_v26 = vld [vmem:[#allocation322_spill] sm:$0xff] }
 0xdc2   : > { %v3683_v48 = vadd.f32 %v3673_v54, %v3647_v41  ;;  %v3719_v5 = vadd.f32 %v3709_v51, %v3576_v62  ;;  %v3718_v37 = vadd.f32 %v3708_v8, %v3575_v46  ;;  %v3720_v0 = vadd.f32 %v3710_v63, %v3577_v30  ;;  %v13004_v62 = vld [vmem:[#allocation323_spill] sm:$0xff]  ;;  %v13005_v51 = vld [vmem:[#allocation326_spill] sm:$0xff]  ;;  %v13007_v63 = vld [vmem:[#allocation321_spill] sm:$0xff] }
 0xdc3   : > { %v3752_v7 = vadd.f32 %v12997_v33, %v3716_v45  ;;  %v3753_v19 = vadd.f32 %v3743_v17, %v3717_v28  ;;  %v3814_v11 = vsel %vm3813_vm6, %v13002_v14, %v13001_v25  ;;  %v3815_v18 = vsel %vm3813_vm6, %v13001_v25, %v13003_v26  ;;  %v13006_v45 = vld [vmem:[#allocation324_spill] sm:$0xff]  ;;  %v10818_v17 = vld [vmem:[%s7738_s12 + $0x8] sm:$0xff]  ;;  %v13009_v28 = vld [vmem:[#allocation338_spill] sm:$0xff] }
 0xdc4   : > { %v3756_v13 = vadd.f32 %v3746_v10, %v3720_v0  ;;  %v3754_v41 = vadd.f32 %v3744_v1, %v3718_v37  ;;  %v3755_v54 = vadd.f32 %v3745_v40, %v3719_v5  ;;  %v3816_v46 = vsel %vm3813_vm6, %v13003_v26, %v13004_v62  ;;  %13008 = vst [vmem:[#allocation36_spill] sm:$0xff] %v10818_v17  ;;  %v13012_v0 = vld [vmem:[#allocation325_spill] sm:$0xff] }
 0xdc5   : > { %v3823_v30 = vadd.f32 %v13002_v14, %v3680_v53  ;;  %v3850_v8 = vsel %vm3813_vm6, %v13006_v45, %v13005_v51  ;;  %v3851_v33 = vsel %vm3813_vm6, %v13005_v51, %v13007_v63  ;;  %v3959_v10 = vmul.f32 %v10818_v17, %v13009_v28  ;;  %v13011_v53 = vld [vmem:[#allocation340_spill] sm:$0xff]  ;;  %v13013_v51 = vld [vmem:[#allocation327_spill] sm:$0xff] }
 0xdc6   : > { %v3824_v1 = vadd.f32 %v3814_v11, %v3681_v6  ;;  %v3825_v40 = vadd.f32 %v3815_v18, %v3682_v47  ;;  %v10823_v5 = vstv %s10766_s29  ;;  %v3951_v37 = vsel %vm876_vm4, %v13009_v28, %v13011_v53  ;;  %v13014_v47 = vld [vmem:[#allocation330_spill] sm:$0xff]  ;;  %s6863_s29 = sld [smem:[#allocation5 + $0x69]] }
 0xdc7   : > { %13010 = vst [vmem:[#allocation37_spill] sm:$0xff] %v10823_v5  ;;  %v3895_v25 = vadd.f32 %v13012_v0, %v3752_v7  ;;  %v3826_v14 = vadd.f32 %v3816_v46, %v3683_v48  ;;  %v3859_v26 = vadd.f32 %v13006_v45, %v3823_v30  ;;  %v3852_v62 = vsel %vm3813_vm6, %v13007_v63, %v13013_v51  ;;  %v10847_v30 = vld [vmem:[%s7738_s12 + $0x10] sm:$0xff]  ;;  %v13020_v51 = vld [vmem:[#allocation328_spill] sm:$0xff] }
 0xdc8   : > { %v3860_v27 = vadd.f32 %v3850_v8, %v3824_v1  ;;  %v3861_v6 = vadd.f32 %v3851_v33, %v3825_v40  ;;  %v3886_v11 = vsel %vm3813_vm6, %v13012_v0, %v13014_v47  ;;  %v10837_v18 = vstv %s10783_s24  ;;  %13017 = vst [vmem:[#allocation39_spill] sm:$0xff] %v10847_v30  ;;  %v13018_v33 = vld [vmem:[#allocation339_spill] sm:$0xff]  ;;  %v13019_v40 = vld [vmem:[#allocation341_spill] sm:$0xff]  ;;  %s6864_s24 = sld [smem:[#allocation5 + $0x19]] }
 0xdc9   : > { %13015 = vst [vmem:[#allocation32_spill] sm:$0xff] %v10837_v18  ;;  %v3887_v7 = vsel %vm3813_vm6, %v13014_v47, %v13016_v59  ;;  %v10843_v48 = vstv %s10794_s1  ;;  %v3971_v46 = vmul.f32 %v10823_v5, %v3959_v10  ;;  %v3960_v45 = vmul.f32 %v10847_v30, %v3951_v37  ;;  %v13043_v30 = vld [vmem:[#allocation343_spill] sm:$0xff]  ;;  %s13138_s1 = smov 111  }
 0xdca   : > { %v3862_v8 = vadd.f32 %v3852_v62, %v3826_v14  ;;  %v10851_v63 = vstv %s10798_s17  ;;  %v3952_v1 = vsel %vm876_vm4, %v13011_v53, %v13018_v33  ;;  %v3953_v0 = vsel %vm876_vm4, %v13018_v33, %v13019_v40  ;;  %v10866_v14 = vld [vmem:[%s7738_s12 + $0x38] sm:$0xff]  ;;  %v10872_v53 = vpop.permute.xlu2 %4599  ;;  %v13024_v33 = vld [vmem:[#allocation334_spill] sm:$0xff]  ;;  %s6866_s17 = sld [smem:[#allocation5 + $0x4f]] }
 0xdcb   : > { %v3896_v47 = vadd.f32 %v3886_v11, %v3753_v19  ;;  %v3888_v58 = vsel %vm3813_vm6, %v13016_v59, %v13020_v51  ;;  %v3889_v62 = vsel %vm3813_vm6, %v13020_v51, %v13021_v24  ;;  %13022 = vst [vmem:[#allocation38_spill] sm:$0xff] %v10866_v14  ;;  %v10870_v32 = vmul.f32 %v10866_v14, %v13009_v28  ;;  %v13025_v11 = vld [vmem:[#allocation336_spill] sm:$0xff]  ;;  %v10884_v51 = vld [vmem:[%s7738_s12 + $0x18] sm:$0xff]  ;;  %v13041_v14 = vld [vmem:[#allocation365_spill] sm:$0xff] }
 0xdcc   : > { %v3897_v49 = vadd.f32 %v3887_v7, %v3754_v41  ;;  %v3922_v19 = vsel %vm3813_vm6, %v13024_v33, %v13023_v60  ;;  %v3923_v59 = vsel %vm3813_vm6, %v13023_v60, %v13025_v11  ;;  %v3924_v24 = vsel %vm3813_vm6, %v13025_v11, %v13026_v15  ;;  %13027 = vst [vmem:[#allocation35_spill] sm:$0xff] %v10884_v51  ;;  %v10889_v7 = vld [vmem:[%s7738_s12 + $0x20] sm:$0xff] }
 0xdcd   : > { %v3961_v28 = vmul.f32 %v10884_v51, %v3952_v1  ;;  %v3972_v41 = vmul.f32 %v10823_v5, %v3960_v45  ;;  %13028 = vst [vmem:[#allocation40_spill] sm:$0xff] %v10889_v7  ;;  %v10892_v16 = vmul.f32 %v10889_v7, %v3953_v0  ;;  %v3976_v20 = vadd.f32 %v3971_v46, %v3859_v26  ;;  %v10906_v7 = vld [vmem:[%s7738_s12 + $0x48] sm:$0xff]  ;;  %v13033_v26 = vld [vmem:[#allocation342_spill] sm:$0xff] }
 0xdce   : > { %v3898_v4 = vadd.f32 %v3888_v58, %v3755_v54  ;;  %v3899_v29 = vadd.f32 %v3889_v62, %v3756_v13  ;;  %v3931_v60 = vadd.f32 %v13024_v33, %v3895_v25  ;;  %v3995_v61 = vmul.f32 %v10843_v48, %v3959_v10  ;;  %13031 = vst [vmem:[#allocation46_spill] sm:$0xff] %v10906_v7  ;;  %v13032_v25 = vld [vmem:[#allocation344_spill] sm:$0xff] }
 0xdcf   : > { %v3925_v11 = vsel %vm3813_vm6, %v13026_v15, %v13029_v3  ;;  %v3983_v9 = vmul.f32 %v10837_v18, %v10870_v32  ;;  %v3965_v44 = vmul.f32 %v10902_v57, %v3951_v37  ;;  %v3966_v58 = vmul.f32 %v10906_v7, %v3952_v1 }
 0xdd0   : > { %v3932_v13 = vadd.f32 %v3922_v19, %v3896_v47  ;;  %v10909_v54 = vadd.f32 %v3923_v59, %v3897_v49  ;;  %v10911_v10 = vadd.f32 %v3924_v24, %v3898_v4  ;;  %v4072_v3 = vsel %vm1000_vm10, %v13033_v26, %v13032_v25  ;;  %v13034_v47 = vld [vmem:[#allocation345_spill] sm:$0xff]  ;;  %v10930_v26 = vld [vmem:[%s7738_s12 + $0x50] sm:$0xff] }
 0xdd1   : > { %v3973_v15 = vmul.f32 %v10823_v5, %v3961_v28  ;;  %v3974_v46 = vmul.f32 %v10823_v5, %v10892_v16  ;;  %v3977_v37 = vadd.f32 %v3972_v41, %v3860_v27  ;;  %v3988_v62 = vadd.f32 %v3983_v9, %v3976_v20  ;;  %v13035_v49 = vld [vmem:[#allocation349_spill] sm:$0xff]  ;;  %13036 = vst [vmem:[#allocation44_spill] sm:$0xff] %v10930_v26  ;;  %v13038_v41 = vld [vmem:[#allocation364_spill] sm:$0xff] }
 0xdd2   : > { %v10919_v33 = vadd.f32 %v3925_v11, %v3899_v29  ;;  %v3996_v1 = vmul.f32 %v10843_v48, %v3960_v45  ;;  %v4108_v4 = vsel %vm1000_vm10, %v13035_v49, %v13034_v47  ;;  %v10925_v19 = vadd.f32 %v3995_v61, %v3931_v60  ;;  %v13037_v45 = vld [vmem:[#allocation346_spill] sm:$0xff] }
 0xdd3   : > { %v3984_v59 = vmul.f32 %v10837_v18, %v3965_v44  ;;  %v3985_v24 = vmul.f32 %v10837_v18, %v3966_v58  ;;  %v10933_v5 = vmul.f32 %v10930_v26, %v3953_v0  ;;  %v4081_v9 = vadd.f32 %v4072_v3, %v3988_v62  ;;  %v13039_v60 = vld [vmem:[#allocation362_spill] sm:$0xff]  ;;  %v10945_v26 = vpop.permute.xlu2 %4631 }
 0xdd4   : > { %v10936_v20 = vmul.f32 %v10843_v48, %v3961_v28  ;;  %v4008_v27 = vmul.f32 %v10851_v63, %v3965_v44  ;;  %v4073_v61 = vsel %vm1000_vm10, %v13032_v25, %v13037_v45  ;;  %v4249_v11 = vsel %vm1179_vm13, %v13039_v60, %v13038_v41  ;;  %v13040_v28 = vld [vmem:[#allocation350_spill] sm:$0xff]  ;;  %v13042_v25 = vld [vmem:[#allocation369_spill] sm:$0xff] }
 0xdd5   : > { %v4596_v29 = vpop.permute.xlu0 %4595  ;;  %v3978_v49 = vadd.f32 %v3973_v15, %v3861_v6  ;;  %v3989_v7 = vadd.f32 %v3984_v59, %v3977_v37  ;;  %v4117_v57 = vadd.f32 %v4108_v4, %v4081_v9  ;;  %v3979_v0 = vadd.f32 %v3974_v46, %v3862_v8  ;;  %v13044_v37 = vld [vmem:[#allocation347_spill] sm:$0xff] }
 0xdd6   : > { %v10948_v3 = vmul.f32 %v10851_v63, %v3966_v58  ;;  %v4109_v44 = vsel %vm1000_vm10, %v13034_v47, %v13040_v28  ;;  %v4001_v62 = vadd.f32 %v3996_v1, %v3932_v13  ;;  %v4285_v51 = vsel %vm1179_vm13, %v13042_v25, %v13041_v14  ;;  %v13045_v47 = vld [vmem:[#allocation366_spill] sm:$0xff]  ;;  %v13046_v1 = vld [vmem:[#allocation24_spill] sm:$0xff]  ;;  %v13047_v59 = vld [vmem:[#allocation391_spill] sm:$0xff] }
 0xdd7   : > { %v4074_v6 = vsel %vm1000_vm10, %v13037_v45, %v13043_v30  ;;  %v4082_v15 = vadd.f32 %v4073_v61, %v3989_v7  ;;  %v3986_v8 = vmul.f32 %v10837_v18, %v10933_v5  ;;  %v4258_v46 = vadd.f32 %v4249_v11, %v4117_v57  ;;  %v13048_v11 = vld [vmem:[#allocation348_spill] sm:$0xff]  ;;  %v13049_v25 = vld [vmem:[#allocation351_spill] sm:$0xff]  ;;  %v13051_v18 = vld [vmem:[#allocation394_spill] sm:$0xff] }
 0xdd8   : > { %v4075_v4 = vsel %vm1000_vm10, %v13043_v30, %v13044_v37  ;;  %v4250_v13 = vsel %vm1179_vm13, %v13038_v41, %v13045_v47  ;;  %v4426_v9 = vsel %vm1358_vm8, %v13047_v59, %v13046_v1  ;;  %v3990_v45 = vadd.f32 %v3985_v24, %v3978_v49  ;;  %v13050_v37 = vld [vmem:[#allocation370_spill] sm:$0xff] }
 0xdd9   : > { %v3991_v61 = vadd.f32 %v3986_v8, %v3979_v0  ;;  %v4118_v57 = vadd.f32 %v4109_v44, %v4082_v15  ;;  %v4294_v60 = vadd.f32 %v4285_v51, %v4258_v46  ;;  %v4111_v30 = vsel %vm1000_vm10, %v13049_v25, %v13048_v11  ;;  %v13052_v15 = vld [vmem:[#allocation363_spill] sm:$0xff] }
 0xdda   : > { %v4110_v41 = vsel %vm1000_vm10, %v13040_v28, %v13049_v25  ;;  %v4286_v59 = vsel %vm1179_vm13, %v13041_v14, %v13050_v37  ;;  %v4462_v17 = vsel %vm1358_vm8, %v9888_v55, %v13051_v18  ;;  %v4083_v24 = vadd.f32 %v4074_v6, %v3990_v45  ;;  %v13053_v46 = vld [vmem:[#allocation367_spill] sm:$0xff] }
 0xddb   : > { %v4084_v49 = vadd.f32 %v4075_v4, %v3991_v61  ;;  %v4259_v0 = vadd.f32 %v4250_v13, %v4118_v57  ;;  %v4435_v51 = vadd.f32 %v4426_v9, %v4294_v60  ;;  %v4251_v8 = vsel %vm1179_vm13, %v13045_v47, %v13052_v15  ;;  %v13054_v25 = vld [vmem:[#allocation395_spill] sm:$0xff]  ;;  %v13056_v57 = vld [vmem:[#allocation368_spill] sm:$0xff] }
 0xddc   : > { %v4598_v58 = vpop.permute.xlu1 %4597  ;;  %v4252_v28 = vsel %vm1179_vm13, %v13052_v15, %v13053_v46  ;;  %v4427_v14 = vsel %vm1358_vm8, %v13046_v1, %v13054_v25  ;;  %v4603_v55 = vsel %vm1537_vm7, %v10796_v36, %v4596_v29  ;;  %v4119_v4 = vadd.f32 %v4110_v41, %v4083_v24  ;;  %v13055_v61 = vld [vmem:[#allocation371_spill] sm:$0xff] }
 0xddd   : > { %v10972_v7 = vsel %vm1537_vm7, %v4598_v58, %v10872_v53  ;;  %v10986_v44 = vpop.permute.xlu0 %4601  ;;  %v4120_v6 = vadd.f32 %v4111_v30, %v4084_v49  ;;  %v4295_v13 = vadd.f32 %v4286_v59, %v4259_v0  ;;  %v4471_v9 = vadd.f32 %v4462_v17, %v4435_v51  ;;  %v11010_v59 = vpop.permute.xlu2 %4637 }
 0xdde   : > { %v3998_v45 = vmul.f32 %v10843_v48, %v10892_v16  ;;  %v4287_v47 = vsel %vm1179_vm13, %v13050_v37, %v13055_v61  ;;  %v4288_v60 = vsel %vm1179_vm13, %v13055_v61, %v13056_v57  ;;  %v4463_v1 = vsel %vm1358_vm8, %v13051_v18, %v9911_v35  ;;  %v13057_v16 = vld [vmem:[#allocation392_spill] sm:$0xff] }
 0xddf   : > { %v4260_v36 = vadd.f32 %v4251_v8, %v4119_v4  ;;  %v4261_v30 = vadd.f32 %v4252_v28, %v4120_v6  ;;  %v4436_v41 = vadd.f32 %v4427_v14, %v4295_v13  ;;  %v4612_v17 = vadd.f32 %v4603_v55, %v4471_v9  ;;  %v13058_v55 = vld [vmem:[#allocation352_spill] sm:$0xff]  ;;  %v13059_v6 = vld [vmem:[#allocation354_spill] sm:$0xff] }
 0xde0   : > { %v4428_v49 = vsel %vm1358_vm8, %v13054_v25, %v13057_v16  ;;  %v4429_v37 = vsel %vm1358_vm8, %v13057_v16, %v9863_v31  ;;  %v4604_v0 = vsel %vm1537_vm7, %v4596_v29, %v4598_v58  ;;  %v4013_v14 = vadd.f32 %v4008_v27, %v4001_v62  ;;  %v11035_v27 = vld [vmem:[%s7738_s12 + $0x28] sm:$0xff]  ;;  %v13062_v16 = vld [vmem:[#allocation356_spill] sm:$0xff] }
 0xde1   : > { %v4296_v51 = vadd.f32 %v4287_v47, %v4260_v36  ;;  %v4297_v15 = vadd.f32 %v4288_v60, %v4261_v30  ;;  %v4472_v8 = vadd.f32 %v4463_v1, %v4436_v41  ;;  %v4145_v25 = vsel %vm1000_vm10, %v13059_v6, %v13058_v55  ;;  %v13060_v60 = vld [vmem:[#allocation360_spill] sm:$0xff]  ;;  %v13061_v1 = vld [vmem:[#allocation358_spill] sm:$0xff] }
 0xde2   : > { %v4465_v4 = vsel %vm1358_vm8, %v9934_v50, %v9886_v34  ;;  %v4464_v29 = vsel %vm1358_vm8, %v9911_v35, %v9934_v50  ;;  %v4002_v58 = vadd.f32 %v10936_v20, %v10909_v54  ;;  %v11039_v62 = vmul.f32 %v11035_v27, %v13019_v40 }
 0xde3   : > { %v4437_v13 = vadd.f32 %v4428_v49, %v4296_v51  ;;  %v4438_v9 = vadd.f32 %v4429_v37, %v4297_v15  ;;  %v4613_v61 = vadd.f32 %v4604_v0, %v4472_v8  ;;  %v4181_v36 = vsel %vm1000_vm10, %v13061_v1, %v13060_v60  ;;  %v13063_v37 = vld [vmem:[#allocation372_spill] sm:$0xff]  ;;  %v13064_v0 = vld [vmem:[#allocation374_spill] sm:$0xff] }
 0xde4   : > { %v4630_v24 = vpop.permute.xlu1 %4629  ;;  %v4606_v35 = vsel %vm1537_vm7, %v10872_v53, %v10986_v44  ;;  %v4154_v54 = vadd.f32 %v4145_v25, %v4013_v14  ;;  %v4146_v49 = vsel %vm1000_vm10, %v13058_v55, %v13062_v16  ;;  %v4322_v53 = vsel %vm1179_vm13, %v13064_v0, %v13063_v37  ;;  %v13065_v14 = vld [vmem:[#allocation359_spill] sm:$0xff] }
 0xde5   : > { %v4639_v18 = vsel %vm1537_vm7, %v4630_v24, %v10945_v26  ;;  %v4474_v20 = vadd.f32 %v4465_v4, %v4438_v9  ;;  %v4473_v30 = vadd.f32 %v4464_v29, %v4437_v13  ;;  %v4010_v24 = vmul.f32 %v10851_v63, %v10933_v5  ;;  %v13066_v5 = vld [vmem:[#allocation380_spill] sm:$0xff] }
 0xde6   : > { %v11021_v28 = vadd.f32 %v4639_v18, %v4612_v17  ;;  %v4634_v47 = vpop.permute.xlu0 %4633  ;;  %v4003_v17 = vadd.f32 %v3998_v45, %v10911_v10  ;;  %v4190_v18 = vadd.f32 %v4181_v36, %v4154_v54  ;;  %v4182_v10 = vsel %vm1000_vm10, %v13060_v60, %v13065_v14  ;;  %v13067_v45 = vld [vmem:[#allocation378_spill] sm:$0xff]  ;;  %v13069_v36 = vld [vmem:[#allocation376_spill] sm:$0xff] }
 0xde7   : > { %v4640_v50 = vsel %vm1537_vm7, %v10945_v26, %v4634_v47  ;;  %v4014_v26 = vadd.f32 %v10948_v3, %v4002_v58  ;;  %v4614_v51 = vadd.f32 %v10972_v7, %v4473_v30  ;;  %v4615_v15 = vadd.f32 %v4606_v35, %v4474_v20  ;;  %v4670_v58 = vpop.permute.xlu2 %4669 }
 0xde8   : > { %v11049_v41 = vadd.f32 %v4640_v50, %v4613_v61  ;;  %v4358_v25 = vsel %vm1179_vm13, %v13067_v45, %v13066_v5  ;;  %v4331_v3 = vadd.f32 %v4322_v53, %v4190_v18  ;;  %v4007_v9 = vmul.f32 %v10851_v63, %v10870_v32  ;;  %v13068_v61 = vld [vmem:[#allocation357_spill] sm:$0xff] }
 0xde9   : > { %v4155_v29 = vadd.f32 %v4146_v49, %v4014_v26  ;;  %v4147_v60 = vsel %vm1000_vm10, %v13062_v16, %v13068_v61  ;;  %v4499_v35 = vsel %vm1358_vm8, %v9993_v39, %v9954_v56  ;;  %v3999_v50 = vmul.f32 %v10843_v48, %v11039_v62  ;;  %v13070_v49 = vld [vmem:[#allocation353_spill] sm:$0xff] }
 0xdea   : > { %v4015_v54 = vadd.f32 %v4010_v24, %v4003_v17  ;;  %v4367_v30 = vadd.f32 %v4358_v25, %v4331_v3  ;;  %v4144_v16 = vsel %vm1000_vm10, %v13070_v49, %v13059_v6  ;;  %v13071_v53 = vld [vmem:[#allocation361_spill] sm:$0xff]  ;;  %v4535_v48 = vsel %vm1358_vm8, %v10070_v21, %v10096_v43  ;;  %v13077_v49 = vld [vmem:[#allocation375_spill] sm:$0xff] }
 0xdeb   : > { %v4191_v20 = vadd.f32 %v4182_v10, %v4155_v29  ;;  %v4183_v26 = vsel %vm1000_vm10, %v13065_v14, %v13071_v53  ;;  %v4012_v17 = vadd.f32 %v4007_v9, %v10925_v19  ;;  %v13073_v14 = vld [vmem:[#allocation355_spill] sm:$0xff]  ;;  %v4500_v43 = vsel %vm1358_vm8, %v9954_v56, %v10019_v12  ;;  %v13075_v9 = vld [vmem:[#allocation373_spill] sm:$0xff] }
 0xdec   : > { %v4636_v8 = vpop.permute.xlu1 %4635  ;;  %v4156_v24 = vadd.f32 %v4147_v60, %v4015_v54  ;;  %v4180_v10 = vsel %vm1000_vm10, %v13073_v14, %v13061_v1  ;;  %v4321_v60 = vsel %vm1179_vm13, %v13075_v9, %v13064_v0  ;;  %v13076_v1 = vld [vmem:[#allocation381_spill] sm:$0xff]  ;;  %v4501_v0 = vsel %vm1358_vm8, %v10019_v12, %v10046_v23 }
 0xded   : > { %v4641_v55 = vsel %vm1537_vm7, %v4634_v47, %v4636_v8  ;;  %v4642_v4 = vsel %vm1537_vm7, %v4636_v8, %v11010_v59  ;;  %v4323_v47 = vsel %vm1179_vm13, %v13063_v37, %v13069_v36  ;;  %v13072_v37 = vld [vmem:[#allocation379_spill] sm:$0xff]  ;;  %v4153_v19 = vadd.f32 %v4144_v16, %v4012_v17 }
 0xdee   : > { %v11071_v13 = vadd.f32 %v4641_v55, %v4614_v51  ;;  %v11073_v7 = vadd.f32 %v4642_v4, %v4615_v15  ;;  %v4666_v32 = vpop.permute.xlu0 %4665  ;;  %v4359_v18 = vsel %vm1179_vm13, %v13066_v5, %v13072_v37  ;;  %v4332_v51 = vadd.f32 %v4323_v47, %v4191_v20  ;;  %v11102_v8 = vld [vmem:[%s7738_s12 + $0x58] sm:$0xff]  ;;  %v13074_v5 = vld [vmem:[#allocation377_spill] sm:$0xff] }
 0xdef   : > { %v4508_v15 = vadd.f32 %v4499_v35, %v4367_v30  ;;  %v11106_v6 = vmul.f32 %v11102_v8, %v13019_v40  ;;  %v4324_v25 = vsel %vm1179_vm13, %v13069_v36, %v13074_v5  ;;  %v4192_v55 = vadd.f32 %v4183_v26, %v4156_v24 }
 0xdf0   : > { %v4368_v4 = vadd.f32 %v4359_v18, %v4332_v51  ;;  %v4004_v40 = vadd.f32 %v3999_v50, %v10919_v33  ;;  %v4360_v47 = vsel %vm1179_vm13, %v13072_v37, %v13076_v1  ;;  %v4189_v35 = vadd.f32 %v4180_v10, %v4153_v19  ;;  %v4702_v37 = vpop.permute.xlu2 %4701 }
 0xdf1   : > { %v4544_v29 = vadd.f32 %v4535_v48, %v4508_v15  ;;  %v4333_v54 = vadd.f32 %v4324_v25, %v4192_v55  ;;  %v4011_v30 = vmul.f32 %v10851_v63, %v11106_v6  ;;  %v4357_v33 = vsel %vm1179_vm13, %v13077_v49, %v13067_v45  ;;  %v13078_v49 = vld [vmem:[#allocation36_spill] sm:$0xff] }
 0xdf2   : > { %v4509_v56 = vadd.f32 %v4500_v43, %v4368_v4  ;;  %v4330_v50 = vadd.f32 %v4321_v60, %v4189_v35  ;;  %v4498_v17 = vsel %vm1358_vm8, %v9968_v52, %v9993_v39  ;;  %v4537_v63 = vsel %vm1358_vm8, %v10087_v38, %v10133_v2 }
 0xdf3   : > { %v4369_v16 = vadd.f32 %v4360_v47, %v4333_v54  ;;  %v4016_v48 = vadd.f32 %v4011_v30, %v4004_v40 }
 0xdf4   : > { %v4668_v3 = vpop.permute.xlu1 %4667  ;;  %v4545_v26 = vadd.f32 %v10106_v22, %v4509_v56  ;;  %v4366_v24 = vadd.f32 %v4357_v33, %v4330_v50  ;;  %v4534_v22 = vsel %vm1358_vm8, %v10017_v42, %v10070_v21  ;;  %v4759_v56 = vstv %s6856_s2  ;;  %s6865_s2 = sld [smem:[#allocation5 + $0x34]] }
 0xdf5   : > { %v4676_v36 = vsel %vm1537_vm7, %v4668_v3, %v4670_v58  ;;  %v4510_v51 = vadd.f32 %v4501_v0, %v4369_v16  ;;  %v4157_v15 = vadd.f32 %v13068_v61, %v4016_v48  ;;  %v4675_v39 = vsel %vm1537_vm7, %v4666_v32, %v4668_v3  ;;  %v13079_v0 = vld [vmem:[#allocation39_spill] sm:$0xff] }
 0xdf6   : > { %v4685_v20 = vadd.f32 %v4676_v36, %v4544_v29  ;;  %v4672_v18 = vpop.permute.xlu0 %4671  ;;  %v4507_v14 = vadd.f32 %v4498_v17, %v4366_v24 }
 0xdf7   : > { %v4677_v45 = vsel %vm1537_vm7, %v4670_v58, %v4672_v18  ;;  %v4546_v10 = vadd.f32 %v4537_v63, %v4510_v51  ;;  %v4193_v52 = vadd.f32 %v13071_v53, %v4157_v15  ;;  %v13081_v51 = vld [vmem:[#allocation38_spill] sm:$0xff]  ;;  %v13082_v15 = vld [vmem:[#allocation40_spill] sm:$0xff] }
 0xdf8   : > { %v4686_v12 = vadd.f32 %v4677_v45, %v4545_v26  ;;  %v4543_v43 = vadd.f32 %v4534_v22, %v4507_v14  ;;  %v4708_v42 = vpop.permute.xlu2 %4707 }
 0xdf9   : > { %v4334_v19 = vadd.f32 %v13074_v5, %v4193_v52 }
 0xdfa   : > { %v4684_v55 = vadd.f32 %v4675_v39, %v4543_v43  ;;  %v13083_v39 = vld [vmem:[#allocation41_spill] sm:$0xff]  ;;  %v13084_v43 = vld [vmem:[#allocation46_spill] sm:$0xff] }
 0xdfb   : > { %v4370_v61 = vadd.f32 %v13076_v1, %v4334_v19 }
 0xdfc   : > { %v4674_v25 = vpop.permute.xlu1 %4673 }
 0xdfd   : > { %v4678_v38 = vsel %vm1537_vm7, %v4672_v18, %v4674_v25  ;;  %v4511_v40 = vadd.f32 %v10046_v23, %v4370_v61  ;;  %v13080_v18 = vld [vmem:[#allocation35_spill] sm:$0xff] }
 0xdfe   : > { %v4687_v58 = vadd.f32 %v4678_v38, %v4546_v10  ;;  %v4704_v4 = vpop.permute.xlu0 %4703 }
 0xdff   : > { %v4711_v29 = vsel %vm1537_vm7, %v4702_v37, %v4704_v4  ;;  %v4547_v32 = vadd.f32 %v10133_v2, %v4511_v40 }
 0xe00   : > { %v11151_v21 = vadd.f32 %v4711_v29, %v4684_v55  ;;  %v4735_v23 = vpop.permute.xlu2 %4734  ;;  %v13086_v29 = vld [vmem:[#allocation27_spill] sm:$0xff] }
 0xe01   : > { %v4688_v1 = vadd.f32 %v4674_v25, %v4547_v32  ;;  %v4795_v25 = vstv %s6857_s16  ;;  %v13089_v32 = vld [vmem:[#allocation393_spill] sm:$0xff]  ;;  %s6867_s16 = sld [smem:[#allocation5 + $0x6a]] }
 0xe04   : > { %v4706_v53 = vpop.permute.xlu1 %4705 }
 0xe05   : > { %v4712_v3 = vsel %vm1537_vm7, %v4704_v4, %v4706_v53  ;;  %v4713_v9 = vsel %vm1537_vm7, %v4706_v53, %v4708_v42  ;;  %v13085_v4 = vld [vmem:[#allocation44_spill] sm:$0xff]  ;;  %v13088_v53 = vld [vmem:[#allocation25_spill] sm:$0xff] }
 0xe06   : > { %v11157_v5 = vadd.f32 %v4712_v3, %v4685_v20  ;;  %v11159_v60 = vadd.f32 %v4713_v9, %v4686_v12  ;;  %v4710_v47 = vpop.permute.xlu0 %4709  ;;  %v914_v3 = vmul.f32 %v13089_v32, %v13088_v53  ;;  %v13098_v32 = vld [vmem:[#allocation89_spill] sm:$0xff] }
 0xe07   : > { %v4714_v36 = vsel %vm1537_vm7, %v4708_v42, %v4710_v47  ;;  %v11162_v35 = vadd.f32 %v4710_v47, %v4688_v1  ;;  %v13087_v42 = vld [vmem:[#allocation26_spill] sm:$0xff] }
 0xe08   : > { %v11164_v54 = vadd.f32 %v4714_v36, %v4687_v58  ;;  %v902_v40 = vmul.f32 %v13087_v42, %v13086_v29  ;;  %v13090_v36 = vld [vmem:[#allocation30_spill] sm:$0xff]  ;;  %v4867_v29 = vstv %s6859_s27  ;;  %s6870_s27 = sld [smem:[#allocation5 + $0x50]] }
 0xe0a   : > { %v919_v47 = vadd.f32 %v914_v3, %v902_v40 }
 0xe0c   : > { %v4733_v30 = vpop.permute.xlu1 %4732 }
 0xe0d   : > { %v4740_v2 = vsel %vm1675_vm1, %v4733_v30, %v4735_v23  ;;  %v4748_v33 = vmul.f32 %v13078_v49, %v4733_v30  ;;  %v4753_v12 = vmul.f32 %v13081_v51, %v4733_v30 }
 0xe0e   : > { %v4749_v20 = vmul.f32 %v13079_v0, %v4740_v2  ;;  %v4737_v26 = vpop.permute.xlu0 %4736  ;;  %v4754_v38 = vmul.f32 %v13083_v39, %v4740_v2 }
 0xe0f   : > { %v4760_v50 = vmul.f32 %v4759_v56, %v4748_v33  ;;  %v4741_v37 = vsel %vm1675_vm1, %v4735_v23, %v4737_v26  ;;  %v4796_v52 = vmul.f32 %v4795_v25, %v4753_v12  ;;  %v1014_v23 = vadd.f32 %v13090_v36, %v919_v47  ;;  %v13099_v47 = vld [vmem:[#allocation94_spill] sm:$0xff]  ;;  %v13100_v36 = vld [vmem:[#allocation109_spill] sm:$0xff] }
 0xe10   : > { %v4761_v16 = vmul.f32 %v4759_v56, %v4749_v20  ;;  %v4750_v48 = vmul.f32 %v13080_v18, %v4741_v37  ;;  %v4755_v58 = vmul.f32 %v13084_v43, %v4741_v37  ;;  %v4797_v19 = vmul.f32 %v4795_v25, %v4754_v38  ;;  %v13092_v37 = vld [vmem:[#allocation33_spill] sm:$0xff] }
 0xe11   : > { %4770 = vrot.lane.b32.xlu2 %v4760_v50, %s7522_s26  ;;  %v13091_v50 = vld [vmem:[#allocation31_spill] sm:$0xff]  ;;  %v4868_v40 = vmul.f32 %v4867_v29, %v4753_v12  ;;  %v4869_v53 = vmul.f32 %v4867_v29, %v4754_v38  ;;  %v13101_v12 = vld [vmem:[#allocation114_spill] sm:$0xff] }
 0xe12   : > { %4772 = vrot.lane.b32.xlu0 %v4761_v16, %s7522_s26  ;;  %v4762_v17 = vmul.f32 %v4759_v56, %v4750_v48  ;;  %v4798_v55 = vmul.f32 %v4795_v25, %v4755_v58  ;;  %v1050_v16 = vadd.f32 %v13091_v50, %v1014_v23 }
 0xe14   : > { %v4739_v63 = vpop.permute.xlu1 %4738  ;;  %4774 = vrot.lane.b32.xlu1 %v4762_v17, %s7522_s26  ;;  %v1193_v17 = vadd.f32 %v13092_v37, %v1050_v16  ;;  %v13102_v16 = vld [vmem:[#allocation129_spill] sm:$0xff]  ;;  %v13103_v37 = vld [vmem:[#allocation134_spill] sm:$0xff] }
 0xe15   : > { %v4742_v45 = vsel %vm1675_vm1, %v4737_v26, %v4739_v63  ;;  %v4752_v24 = vmul.f32 %v11035_v27, %v4739_v63  ;;  %v4757_v9 = vmul.f32 %v11102_v8, %v4739_v63 }
 0xe16   : > { %v4751_v22 = vmul.f32 %v13082_v15, %v4742_v45  ;;  %v4756_v61 = vmul.f32 %v13085_v4, %v4742_v45 }
 0xe17   : > { %v4764_v14 = vmul.f32 %v4759_v56, %v4752_v24  ;;  %v4800_v2 = vmul.f32 %v4795_v25, %v4757_v9 }
 0xe18   : > { %v4763_v10 = vmul.f32 %v4759_v56, %v4751_v22  ;;  %v4799_v1 = vmul.f32 %v4795_v25, %v4756_v61  ;;  %v4831_v56 = vstv %s6858_s18  ;;  %s6868_s18 = sld [smem:[#allocation5 + $0x1a]] }
 0xe19   : > { %v4832_v30 = vmul.f32 %v4831_v56, %v4748_v33  ;;  %v4833_v26 = vmul.f32 %v4831_v56, %v4749_v20  ;;  %v4834_v63 = vmul.f32 %v4831_v56, %v4750_v48  ;;  %v4835_v45 = vmul.f32 %v4831_v56, %v4751_v22  ;;  %v13094_v33 = vld [vmem:[#allocation49_spill] sm:$0xff]  ;;  %v13097_v48 = vld [vmem:[#allocation74_spill] sm:$0xff] }
 0xe1a   : > { %4778 = vrot.lane.b32.xlu0 %v4764_v14, %s7522_s26  ;;  %4776 = vrot.lane.b32.xlu2 %v4763_v10, %s7522_s26  ;;  %v13093_v14 = vld [vmem:[#allocation34_spill] sm:$0xff]  ;;  %v13096_v20 = vld [vmem:[#allocation69_spill] sm:$0xff] }
 0xe1b   : > { %v1229_v10 = vadd.f32 %v13093_v14, %v1193_v17 }
 0xe1c   : > { %4806 = vrot.lane.b32.xlu1 %v4796_v52, %s7522_s26  ;;  %v4836_v52 = vmul.f32 %v4831_v56, %v4752_v24  ;;  %v4903_v56 = vld [vmem:[#allocation17 + $0x60] ss:$8 sm:$0xf] }
 0xe1d   : > { %v1372_v25 = vadd.f32 %v13094_v33, %v1229_v10  ;;  %v4905_v50 = vperm.slane %v4903_v56, 0  ;;  %v4907_v17 = vperm.slane %v4903_v56, 2  ;;  %v13105_v10 = vld [vmem:[#allocation153_spill] sm:$0xff] }
 0xe1e   : > { %v13106_v33 = vld [vmem:[#allocation169_spill] sm:$0xff] }
 0xe22   : > { %4808 = vrot.lane.b32.xlu2 %v4797_v19, %s7522_s26  ;;  %4810 = vrot.lane.b32.xlu0 %v4798_v55, %s7522_s26  ;;  %v13095_v19 = vld [vmem:[#allocation54_spill] sm:$0xff] }
 0xe23   : > { %v1408_v55 = vadd.f32 %v13095_v19, %v1372_v25 }
 0xe24   : > { %4812 = vrot.lane.b32.xlu1 %v4799_v1, %s7522_s26  ;;  %v4870_v1 = vmul.f32 %v4867_v29, %v4755_v58 }
 0xe25   : > { %v1551_v42 = vadd.f32 %v13096_v20, %v1408_v55  ;;  %v13108_v55 = vld [vmem:[#allocation189_spill] sm:$0xff] }
 0xe26   : > { %v13109_v20 = vld [vmem:[#allocation193_spill] sm:$0xff] }
 0xe27   : > { %v1587_v22 = vadd.f32 %v13097_v48, %v1551_v42  ;;  %v13111_v48 = vld [vmem:[#allocation214_spill] sm:$0xff] }
 0xe29   : > { %v1730_v3 = vadd.f32 %v13098_v32, %v1587_v22  ;;  %v13112_v32 = vld [vmem:[#allocation229_spill] sm:$0xff] }
 0xe2a   : > { %4814 = vrot.lane.b32.xlu2 %v4800_v2, %s7522_s26  ;;  %4842 = vrot.lane.b32.xlu0 %v4832_v30, %s7522_s26  ;;  %v4871_v30 = vmul.f32 %v4867_v29, %v4756_v61  ;;  %v4872_v2 = vmul.f32 %v4867_v29, %v4757_v9  ;;  %v4908_v9 = vperm.slane %v4903_v56, 3 }
 0xe2b   : > { %v1766_v24 = vadd.f32 %v13099_v47, %v1730_v3 }
 0xe2c   : > { %4844 = vrot.lane.b32.xlu1 %v4833_v26, %s7522_s26 }
 0xe2d   : > { %v1909_v23 = vadd.f32 %v13100_v36, %v1766_v24  ;;  %v13114_v24 = vld [vmem:[#allocation242_spill] sm:$0xff] }
 0xe2f   : > { %v1945_v38 = vadd.f32 %v13101_v12, %v1909_v23  ;;  %v13115_v23 = vld [vmem:[#allocation259_spill] sm:$0xff] }
 0xe31   : > { %v2088_v26 = vadd.f32 %v13102_v16, %v1945_v38  ;;  %v13118_v38 = vld [vmem:[#allocation268_spill] sm:$0xff] }
 0xe32   : > { %4848 = vrot.lane.b32.xlu0 %v4835_v45, %s7522_s26  ;;  %4846 = vrot.lane.b32.xlu2 %v4834_v63, %s7522_s26  ;;  %v4906_v63 = vperm.slane %v4903_v56, 1  ;;  %v13104_v45 = vld [vmem:[#allocation149_spill] sm:$0xff]  ;;  %v13116_v56 = vld [vmem:[#allocation263_spill] sm:$0xff] }
 0xe33   : > { %v2124_v58 = vadd.f32 %v13103_v37, %v2088_v26  ;;  %v13120_v37 = vld [vmem:[#allocation279_spill] sm:$0xff] }
 0xe34   : > { %4850 = vrot.lane.b32.xlu1 %v4836_v52, %s7522_s26  ;;  %v13107_v52 = vld [vmem:[#allocation174_spill] sm:$0xff] }
 0xe35   : > { %v2267_v14 = vadd.f32 %v13104_v45, %v2124_v58  ;;  %v13121_v58 = vld [vmem:[#allocation283_spill] sm:$0xff]  ;;  %v13122_v45 = vld [vmem:[#allocation288_spill] sm:$0xff] }
 0xe37   : > { %v2303_v61 = vadd.f32 %v13105_v10, %v2267_v14  ;;  %v13123_v14 = vld [vmem:[#allocation287_spill] sm:$0xff] }
 0xe38   : > { %v3495_v10 = vsel %vm3455_vm14, %v13123_v14, %v13122_v45 }
 0xe39   : > { %v2444_v25 = vadd.f32 %v13106_v33, %v2303_v61  ;;  %v13125_v33 = vld [vmem:[#allocation303_spill] sm:$0xff] }
 0xe3a   : > { %4880 = vrot.lane.b32.xlu0 %v4869_v53, %s7522_s26  ;;  %4878 = vrot.lane.b32.xlu2 %v4868_v40, %s7522_s26  ;;  %v13110_v40 = vld [vmem:[#allocation209_spill] sm:$0xff] }
 0xe3b   : > { %v2480_v19 = vadd.f32 %v13107_v52, %v2444_v25 }
 0xe3c   : > { %4882 = vrot.lane.b32.xlu1 %v4870_v1, %s7522_s26  ;;  %v13113_v1 = vld [vmem:[#allocation232_spill] sm:$0xff] }
 0xe3d   : > { %v2621_v29 = vadd.f32 %v13108_v55, %v2480_v19  ;;  %v13126_v19 = vld [vmem:[#allocation308_spill] sm:$0xff]  ;;  %v13127_v55 = vld [vmem:[#allocation307_spill] sm:$0xff] }
 0xe3f   : > { %v2657_v42 = vadd.f32 %v13109_v20, %v2621_v29  ;;  %v3674_v29 = vsel %vm3634_vm15, %v13127_v55, %v13126_v19 }
 0xe41   : > { %v2800_v53 = vadd.f32 %v13110_v40, %v2657_v42  ;;  %v13128_v42 = vld [vmem:[#allocation319_spill] sm:$0xff] }
 0xe42   : > { %4886 = vrot.lane.b32.xlu0 %v4872_v2, %s7522_s26  ;;  %4884 = vrot.lane.b32.xlu2 %v4871_v30, %s7522_s26  ;;  %v3280_v30 = vsel %vm3276_vm0, %v13116_v56, %v13115_v23  ;;  %v13117_v2 = vld [vmem:[#allocation249_spill] sm:$0xff]  ;;  %v13129_v40 = vld [vmem:[#allocation323_spill] sm:$0xff]  ;;  %s13135_s26 = smov 72  }
 0xe43   : > { %v2836_v22 = vadd.f32 %v13111_v48, %v2800_v53  ;;  %v3817_v53 = vsel %vm3813_vm6, %v13129_v40, %v13128_v42 }
 0xe44   : > { %4909 = vrot.lane.b32.xlu1 %v4905_v50, %s7523_s25  ;;  %v13119_v50 = vld [vmem:[#allocation267_spill] sm:$0xff] }
 0xe45   : > { %v2977_v3 = vadd.f32 %v13112_v32, %v2836_v22  ;;  %v3316_v16 = vsel %vm3276_vm0, %v13119_v50, %v13118_v38  ;;  %v13130_v22 = vld [vmem:[#allocation329_spill] sm:$0xff]  ;;  %v13131_v32 = vld [vmem:[#allocation327_spill] sm:$0xff] }
 0xe46   : > { %v13134_v38 = vld [vmem:[#allocation347_spill] sm:$0xff] }
 0xe47   : > { %v3013_v47 = vadd.f32 %v13113_v1, %v2977_v3  ;;  %v3853_v3 = vsel %vm3813_vm6, %v13131_v32, %v13130_v22 }
 0xe49   : > { %v3116_v36 = vadd.f32 %v13114_v24, %v3013_v47  ;;  %v13132_v47 = vld [vmem:[#allocation37_spill] sm:$0xff] }
 0xe4a   : > { %4913 = vrot.lane.b32.xlu0 %v4907_v17, %s7523_s25  ;;  %4911 = vrot.lane.b32.xlu2 %v4906_v63, %s7523_s25  ;;  %v3459_v17 = vsel %vm3455_vm14, %v13121_v58, %v13120_v37  ;;  %v3975_v24 = vmul.f32 %v13132_v47, %v11039_v62  ;;  %v11297_v47 = vld [vmem:[#allocation17 + $0x62] ss:$8 sm:$0xf] }
 0xe4b   : > { %v3147_v12 = vadd.f32 %v13117_v2, %v3116_v36 }
 0xe4c   : > { %4915 = vrot.lane.b32.xlu1 %v4908_v9, %s7523_s25  ;;  %v13124_v9 = vld [vmem:[#allocation299_spill] sm:$0xff]  ;;  %s13136_s25 = smov 73  }
 0xe4d   : > { %v3290_v26 = vadd.f32 %v3280_v30, %v3147_v12  ;;  %v3638_v25 = vsel %vm3634_vm15, %v13125_v33, %v13124_v9  ;;  %v13133_v30 = vld [vmem:[#allocation32_spill] sm:$0xff] }
 0xe4e   : > { %v3987_v2 = vmul.f32 %v13133_v30, %v11106_v6 }
 0xe4f   : > { %v3326_v63 = vadd.f32 %v3316_v16, %v3290_v26 }
 0xe51   : > { %v3469_v61 = vadd.f32 %v3459_v17, %v3326_v63 }
 0xe53   : > { %v3505_v52 = vadd.f32 %v3495_v10, %v3469_v61 }
 0xe55   : > { %v3648_v20 = vadd.f32 %v3638_v25, %v3505_v52 }
 0xe57   : > { %v3684_v48 = vadd.f32 %v3674_v29, %v3648_v20 }
 0xe59   : > { %v3827_v1 = vadd.f32 %v3817_v53, %v3684_v48 }
 0xe5b   : > { %v3863_v36 = vadd.f32 %v3853_v3, %v3827_v1 }
 0xe5d   : > { %v3980_v23 = vadd.f32 %v3975_v24, %v3863_v36  ;;  %v5261_v24 = vperm.slane %v11297_v47, 2 }
 0xe5f   : > { %v3992_v12 = vadd.f32 %v3987_v2, %v3980_v23 }
 0xe61   : > { %v4085_v50 = vadd.f32 %v13134_v38, %v3992_v12 }
 0xe63   : > { %v4121_v16 = vadd.f32 %v13048_v11, %v4085_v50 }
 0xe65   : > { %v4262_v37 = vadd.f32 %v13053_v46, %v4121_v16 }
 0xe67   : > { %v4298_v58 = vadd.f32 %v13056_v57, %v4262_v37 }
 0xe69   : > { %v4439_v17 = vadd.f32 %v9863_v31, %v4298_v58  ;;  %v11274_v31 = vld [vmem:[#allocation17 + $0x61] ss:$8 sm:$0xf] }
 0xe6b   : > { %v4771_v56 = vpop.permute.xlu2 %4770  ;;  %v4475_v45 = vadd.f32 %v9886_v34, %v4439_v17  ;;  %v5082_v34 = vperm.slane %v11274_v31, 0 }
 0xe6d   : > { %v4616_v10 = vadd.f32 %v10986_v44, %v4475_v45  ;;  %5086 = vrot.lane.b32.xlu1 %v5082_v34, %s13135_s26 }
 0xe6f   : > { %v4652_v33 = vadd.f32 %v11010_v59, %v4616_v10  ;;  %v5085_v59 = vperm.slane %v11274_v31, 3 }
 0xe74   : > { %v4777_v26 = vpop.permute.xlu2 %4776 }
 0xe75   : > { %5092 = vrot.lane.b32.xlu1 %v5085_v59, %s13135_s26 }
 0xe7c   : > { %v4809_v63 = vpop.permute.xlu2 %4808 }
 0xe7d   : > { %5267 = vrot.lane.b32.xlu1 %v5261_v24, %s13136_s25 }
 0xe84   : > { %v4773_v62 = vpop.permute.xlu0 %4772  ;;  %v4815_v44 = vpop.permute.xlu2 %4814 }
 0xe85   : > { %v4780_v14 = vsel %vm1716_vm9, %v4771_v56, %v4773_v62 }
 0xe86   : > { %v4789_v6 = vadd.f32 %v4780_v14, %v11021_v28  ;;  %v4775_v61 = vpop.permute.xlu1 %4774 }
 0xe87   : > { %v4782_v11 = vsel %vm1716_vm9, %v4775_v61, %v4777_v26  ;;  %v4781_v9 = vsel %vm1716_vm9, %v4773_v62, %v4775_v61 }
 0xe88   : > { %v4791_v46 = vadd.f32 %v4782_v11, %v11071_v13  ;;  %v4790_v57 = vadd.f32 %v4781_v9, %v11049_v41 }
 0xe8c   : > { %v4779_v25 = vpop.permute.xlu0 %4778  ;;  %v4847_v22 = vpop.permute.xlu2 %4846 }
 0xe8d   : > { %v4783_v28 = vsel %vm1716_vm9, %v4777_v26, %v4779_v25  ;;  %v4793_v52 = vadd.f32 %v4779_v25, %v4652_v33 }
 0xe8e   : > { %v4792_v19 = vadd.f32 %v4783_v28, %v11073_v7  ;;  %v4807_v13 = vpop.permute.xlu1 %4806 }
 0xe8f   : > { %v11281_v55 = vadd.f32 %v4815_v44, %v4793_v52  ;;  %v4816_v41 = vsel %vm1716_vm9, %v4807_v13, %v4809_v63 }
 0xe90   : > { %v11284_v29 = vadd.f32 %v4816_v41, %v4789_v6  ;;  %v5083_v41 = vperm.slane %v11274_v31, 1 }
 0xe94   : > { %v4811_v20 = vpop.permute.xlu0 %4810  ;;  %v4879_v12 = vpop.permute.xlu2 %4878 }
 0xe95   : > { %v4817_v42 = vsel %vm1716_vm9, %v4809_v63, %v4811_v20 }
 0xe96   : > { %v11289_v40 = vadd.f32 %v4817_v42, %v4790_v57  ;;  %v4813_v53 = vpop.permute.xlu1 %4812 }
 0xe97   : > { %v4819_v48 = vsel %vm1716_vm9, %v4813_v53, %v4815_v44  ;;  %v4818_v7 = vsel %vm1716_vm9, %v4811_v20, %v4813_v53  ;;  %v5084_v20 = vperm.slane %v11274_v31, 2 }
 0xe98   : > { %v11293_v32 = vadd.f32 %v4819_v48, %v4792_v19  ;;  %v11295_v3 = vadd.f32 %v4818_v7, %v4791_v46  ;;  %v4936_v46 = vstv %s6860_s30  ;;  %v4972_v48 = vstv %s6861_s28  ;;  %s6869_s30 = sld [smem:[#allocation5 + $0x35]] }
 0xe99   : > { %v5259_v7 = vperm.slane %v11297_v47, 0  ;;  %s5852_s28 = sld [smem:[#allocation6]] }
 0xe9c   : > { %v4843_v1 = vpop.permute.xlu0 %4842  ;;  %v4885_v45 = vpop.permute.xlu2 %4884 }
 0xe9e   : > { %v4845_v36 = vpop.permute.xlu1 %4844 }
 0xe9f   : > { %v4853_v23 = vsel %vm1716_vm9, %v4845_v36, %v4847_v22  ;;  %v4852_v56 = vsel %vm1716_vm9, %v4843_v1, %v4845_v36  ;;  %v5262_v36 = vperm.slane %v11297_v47, 3 }
 0xea0   : > { %v4862_v30 = vadd.f32 %v4853_v23, %v11157_v5  ;;  %v4861_v2 = vadd.f32 %v4852_v56, %v11151_v21  ;;  %v5008_v23 = vstv %s6862_s21  ;;  %s6910_s21 = sld [smem:[#allocation6 + $0x1]] }
 0xea4   : > { %v4849_v38 = vpop.permute.xlu0 %4848  ;;  %v4912_v11 = vpop.permute.xlu2 %4911 }
 0xea5   : > { %v4854_v50 = vsel %vm1716_vm9, %v4847_v22, %v4849_v38  ;;  %v5260_v22 = vperm.slane %v11297_v47, 1  ;;  %v5044_v47 = vstv %s6863_s29  ;;  %s5834_s29 = sld [smem:[#allocation7]] }
 0xea6   : > { %v4863_v16 = vadd.f32 %v4854_v50, %v11159_v60  ;;  %v4851_v26 = vpop.permute.xlu1 %4850 }
 0xea7   : > { %v4865_v37 = vadd.f32 %v4851_v26, %v11162_v35  ;;  %v4855_v58 = vsel %vm1716_vm9, %v4849_v38, %v4851_v26 }
 0xea8   : > { %v4864_v17 = vadd.f32 %v4855_v58, %v11164_v54 }
 0xeac   : > { %v4881_v63 = vpop.permute.xlu0 %4880 }
 0xead   : > { %v4888_v62 = vsel %vm1716_vm9, %v4879_v12, %v4881_v63 }
 0xeae   : > { %v11311_v5 = vadd.f32 %v4888_v62, %v4861_v2  ;;  %v4883_v21 = vpop.permute.xlu1 %4882 }
 0xeaf   : > { %v4890_v14 = vsel %vm1716_vm9, %v4883_v21, %v4885_v45  ;;  %v4889_v6 = vsel %vm1716_vm9, %v4881_v63, %v4883_v21 }
 0xeb0   : > { %v11315_v60 = vadd.f32 %v4890_v14, %v4863_v16  ;;  %v11317_v10 = vadd.f32 %v4889_v6, %v4862_v30 }
 0xeb4   : > { %v4887_v35 = vpop.permute.xlu0 %4886 }
 0xeb5   : > { %v4891_v61 = vsel %vm1716_vm9, %v4885_v45, %v4887_v35  ;;  %v11320_v54 = vadd.f32 %v4887_v35, %v4865_v37 }
 0xeb6   : > { %v11322_v9 = vadd.f32 %v4891_v61, %v4864_v17  ;;  %v4910_v57 = vpop.permute.xlu1 %4909 }
 0xeb7   : > { %v4917_v33 = vsel %vm1854_vm2, %v4910_v57, %v4912_v11  ;;  %v4925_v34 = vmul.f32 %v13078_v49, %v4910_v57  ;;  %v4930_v38 = vmul.f32 %v13081_v51, %v4910_v57 }
 0xeb8   : > { %v4926_v25 = vmul.f32 %v13079_v0, %v4917_v33  ;;  %v4931_v53 = vmul.f32 %v13083_v39, %v4917_v33 }
 0xeb9   : > { %v4937_v28 = vmul.f32 %v4936_v46, %v4925_v34  ;;  %v4973_v26 = vmul.f32 %v4972_v48, %v4930_v38  ;;  %v5009_v37 = vmul.f32 %v5008_v23, %v4925_v34  ;;  %v5045_v14 = vmul.f32 %v5044_v47, %v4930_v38 }
 0xeba   : > { %v4938_v52 = vmul.f32 %v4936_v46, %v4926_v25  ;;  %v4974_v1 = vmul.f32 %v4972_v48, %v4931_v53  ;;  %v5010_v58 = vmul.f32 %v5008_v23, %v4926_v25 }
 0xebb   : > { %4947 = vrot.lane.b32.xlu2 %v4937_v28, %s13137_s13 }
 0xebc   : > { %4949 = vrot.lane.b32.xlu0 %v4938_v52, %s13137_s13  ;;  %v4914_v44 = vpop.permute.xlu0 %4913 }
 0xebd   : > { %v4918_v24 = vsel %vm1854_vm2, %v4912_v11, %v4914_v44 }
 0xebe   : > { %v4916_v19 = vpop.permute.xlu1 %4915  ;;  %v4927_v31 = vmul.f32 %v13080_v18, %v4918_v24  ;;  %v4932_v51 = vmul.f32 %v13084_v43, %v4918_v24  ;;  %v11366_v43 = vstv %s6864_s24  ;;  %s5840_s24 = sld [smem:[#allocation8]] }
 0xebf   : > { %v4919_v13 = vsel %vm1854_vm2, %v4914_v44, %v4916_v19  ;;  %v4929_v2 = vmul.f32 %v11035_v27, %v4916_v19  ;;  %v4934_v17 = vmul.f32 %v11102_v8, %v4916_v19 }
 0xec0   : > { %v4928_v59 = vmul.f32 %v13082_v15, %v4919_v13  ;;  %v4939_v56 = vmul.f32 %v4936_v46, %v4927_v31  ;;  %v5011_v30 = vmul.f32 %v5008_v23, %v4927_v31  ;;  %v4933_v12 = vmul.f32 %v13085_v4, %v4919_v13 }
 0xec1   : > { %v4941_v50 = vmul.f32 %v4936_v46, %v4929_v2  ;;  %v5046_v4 = vmul.f32 %v5044_v47, %v4931_v53  ;;  %v4977_v62 = vmul.f32 %v4972_v48, %v4934_v17  ;;  %v4975_v45 = vmul.f32 %v4972_v48, %v4932_v51 }
 0xec2   : > { %v4940_v42 = vmul.f32 %v4936_v46, %v4928_v59  ;;  %v4976_v16 = vmul.f32 %v4972_v48, %v4933_v12  ;;  %v5012_v63 = vmul.f32 %v5008_v23, %v4928_v59  ;;  %v5013_v21 = vmul.f32 %v5008_v23, %v4929_v2 }
 0xec3   : > { %5088 = vrot.lane.b32.xlu2 %v5083_v41, %s13135_s26  ;;  %v5048_v6 = vmul.f32 %v5044_v47, %v4933_v12  ;;  %v5047_v35 = vmul.f32 %v5044_v47, %v4932_v51  ;;  %v5049_v46 = vmul.f32 %v5044_v47, %v4934_v17  ;;  %v11416_v47 = vld [vmem:[%s7738_s12 + $0x38] sm:$0xff] }
 0xec4   : > { %5090 = vrot.lane.b32.xlu0 %v5084_v20, %s13135_s26  ;;  %4953 = vrot.lane.b32.xlu1 %v4940_v42, %s13137_s13  ;;  %s13139_s26 = smov 110  }
 0xecb   : > { %5263 = vrot.lane.b32.xlu2 %v5259_v7, %s13136_s25 }
 0xecc   : > { %5265 = vrot.lane.b32.xlu0 %v5260_v22, %s13136_s25  ;;  %4985 = vrot.lane.b32.xlu1 %v4974_v1, %s13137_s13 }
 0xed3   : > { %5269 = vrot.lane.b32.xlu2 %v5262_v36, %s13136_s25 }
 0xed4   : > { %5023 = vrot.lane.b32.xlu1 %v5011_v30, %s13137_s13  ;;  %4951 = vrot.lane.b32.xlu0 %v4939_v56, %s13137_s13 }
 0xedb   : > { %4955 = vrot.lane.b32.xlu2 %v4941_v50, %s13137_s13 }
 0xedc   : > { %4989 = vrot.lane.b32.xlu1 %v4976_v16, %s13137_s13  ;;  %4983 = vrot.lane.b32.xlu0 %v4973_v26, %s13137_s13 }
 0xedf   : > { %v5087_v61 = vpop.permute.xlu1 %5086 }
 0xee0   : > { %v5102_v11 = vmul.f32 %v13078_v49, %v5087_v61  ;;  %v5185_v49 = vstv %s6866_s17  ;;  %s6909_s17 = sld [smem:[#allocation8 + $0x1]] }
 0xee2   : > { %v5114_v57 = vmul.f32 %v11366_v43, %v5102_v11  ;;  %v5186_v13 = vmul.f32 %v5185_v49, %v5102_v11 }
 0xee3   : > { %5019 = vrot.lane.b32.xlu2 %v5009_v37, %s13137_s13  ;;  %v5107_v37 = vmul.f32 %v11416_v47, %v5087_v61 }
 0xee4   : > { %5057 = vrot.lane.b32.xlu1 %v5046_v4, %s13137_s13  ;;  %5021 = vrot.lane.b32.xlu0 %v5010_v58, %s13137_s13 }
 0xee7   : > { %v11375_v44 = vpop.permute.xlu1 %5092 }
 0xeeb   : > { %5025 = vrot.lane.b32.xlu2 %v5012_v63, %s13137_s13 }
 0xeec   : > { %4991 = vrot.lane.b32.xlu1 %v4977_v62, %s13137_s13  ;;  %4987 = vrot.lane.b32.xlu0 %v4975_v45, %s13137_s13 }
 0xeef   : > { %v11381_v41 = vpop.permute.xlu1 %5267 }
 0xef3   : > { %5027 = vrot.lane.b32.xlu2 %v5013_v21, %s13137_s13 }
 0xef4   : > { %5055 = vrot.lane.b32.xlu0 %v5045_v14, %s13137_s13 }
 0xefb   : > { %5059 = vrot.lane.b32.xlu2 %v5047_v35, %s13137_s13 }
 0xefc   : > { %5061 = vrot.lane.b32.xlu0 %v5048_v6, %s13137_s13 }
 0xf03   : > { %5063 = vrot.lane.b32.xlu2 %v5049_v46, %s13137_s13  ;;  %s6871_s13 = sld [smem:[#allocation5 + $0x6b]] }
 0xf04   : > { %5124 = vrot.lane.b32.xlu0 %v5114_v57, %s13138_s1 }
 0xf15   : > { %v4948_v33 = vpop.permute.xlu2 %4947 }
 0xf1d   : > { %v5089_v34 = vpop.permute.xlu2 %5088 }
 0xf1e   : > { %v5094_v25 = vsel %vm2033_vm3, %v5087_v61, %v5089_v34  ;;  %v11435_v61 = vld [vmem:[%s7738_s12 + $0x48] sm:$0xff] }
 0xf1f   : > { %v5103_v28 = vmul.f32 %v13079_v0, %v5094_v25 }
 0xf21   : > { %v5115_v52 = vmul.f32 %v11366_v43, %v5103_v28  ;;  %v5187_v38 = vmul.f32 %v5185_v49, %v5103_v28  ;;  %v5221_v28 = vstv %s6867_s16 }
 0xf23   : > { %5126 = vrot.lane.b32.xlu1 %v5115_v52, %s13138_s1 }
 0xf25   : > { %v11378_v19 = vpop.permute.xlu2 %5263 }
 0xf2b   : > { %5196 = vrot.lane.b32.xlu1 %v5186_v13, %s13138_s1 }
 0xf2d   : > { %v11383_v59 = vpop.permute.xlu2 %5269 }
 0xf2e   : > { %v4950_v20 = vpop.permute.xlu0 %4949 }
 0xf2f   : > { %v4957_v42 = vsel %vm1895_vm11, %v4948_v33, %v4950_v20 }
 0xf30   : > { %v4966_v0 = vadd.f32 %v4957_v42, %v11284_v29  ;;  %v5111_v42 = vmul.f32 %v11102_v8, %v11375_v44  ;;  %v7178_v8 = vld [vmem:[%s7738_s12 + $0x18] sm:$0xff] }
 0xf35   : > { %v4956_v53 = vpop.permute.xlu2 %4955 }
 0xf36   : > { %v11388_v48 = vadd.f32 %v4956_v53, %v11281_v55  ;;  %v4954_v7 = vpop.permute.xlu1 %4953  ;;  %v5091_v22 = vpop.permute.xlu0 %5090 }
 0xf37   : > { %v4960_v1 = vsel %vm1895_vm11, %v4954_v7, %v4956_v53  ;;  %v5095_v24 = vsel %vm2033_vm3, %v5089_v34, %v5091_v22  ;;  %v5096_v31 = vsel %vm2033_vm3, %v5091_v22, %v11375_v44 }
 0xf38   : > { %v11395_v36 = vadd.f32 %v4960_v1, %v11293_v32  ;;  %v5104_v23 = vmul.f32 %v13080_v18, %v5095_v24  ;;  %v5105_v29 = vmul.f32 %v13082_v15, %v5096_v31  ;;  %v5108_v18 = vmul.f32 %v13083_v39, %v5094_v25 }
 0xf39   : > { %v11409_v15 = vstv %s6865_s2  ;;  %v5106_v39 = vmul.f32 %v11035_v27, %v11375_v44  ;;  %s6925_s2 = sshll.u32 %s7641_s20, 5 }
 0xf3a   : > { %v5116_v55 = vmul.f32 %v11366_v43, %v5104_v23  ;;  %v5117_v56 = vmul.f32 %v11366_v43, %v5105_v29  ;;  %v5189_v30 = vmul.f32 %v5185_v49, %v5105_v29  ;;  %v5188_v50 = vmul.f32 %v5185_v49, %v5104_v23 }
 0xf3b   : > { %v5151_v16 = vmul.f32 %v11409_v15, %v5108_v18  ;;  %v5150_v27 = vmul.f32 %v11409_v15, %v5107_v37  ;;  %v5118_v14 = vmul.f32 %v11366_v43, %v5106_v39  ;;  %v5190_v6 = vmul.f32 %v5185_v49, %v5106_v39 }
 0xf3c   : > { %5130 = vrot.lane.b32.xlu0 %v5117_v56, %s13138_s1  ;;  %5128 = vrot.lane.b32.xlu2 %v5116_v55, %s13138_s1  ;;  %v5226_v55 = vmul.f32 %v5221_v28, %v5111_v42  ;;  %v5290_v56 = vstv %s6868_s18 }
 0xf3d   : > { %5202 = vrot.lane.b32.xlu1 %v5189_v30, %s13138_s1  ;;  %v5020_v2 = vpop.permute.xlu2 %5019 }
 0xf3e   : > { %v11404_v12 = vpop.permute.xlu1 %4985  ;;  %v11406_v32 = vpop.permute.xlu0 %5265 }
 0xf3f   : > { %v5272_v23 = vsel %vm2212_vm5, %v11406_v32, %v11381_v41 }
 0xf40   : > { %v5281_v44 = vmul.f32 %v7178_v8, %v5272_v23 }
 0xf44   : > { %5200 = vrot.lane.b32.xlu0 %v5188_v50, %s13138_s1  ;;  %5198 = vrot.lane.b32.xlu2 %v5187_v38, %s13138_s1 }
 0xf45   : > { %5162 = vrot.lane.b32.xlu1 %v5151_v16, %s13138_s1  ;;  %v5026_v26 = vpop.permute.xlu2 %5025 }
 0xf46   : > { %v5024_v58 = vpop.permute.xlu1 %5023  ;;  %v4952_v4 = vpop.permute.xlu0 %4951 }
 0xf47   : > { %v5031_v17 = vsel %vm1895_vm11, %v5024_v58, %v5026_v26  ;;  %v4958_v51 = vsel %vm1895_vm11, %v4950_v20, %v4952_v4  ;;  %v4959_v63 = vsel %vm1895_vm11, %v4952_v4, %v4954_v7  ;;  %v5293_v4 = vmul.f32 %v5290_v56, %v5281_v44 }
 0xf48   : > { %v11425_v62 = vadd.f32 %v5031_v17, %v11315_v60  ;;  %v4967_v45 = vadd.f32 %v4958_v51, %v11289_v40  ;;  %v4968_v21 = vadd.f32 %v4959_v63, %v11295_v3  ;;  %v5109_v60 = vmul.f32 %v11435_v61, %v5095_v24  ;;  %v11439_v40 = vld [vmem:[%s7738_s12 + $0x50] sm:$0xff]  ;;  %v7179_v51 = vld [vmem:[%s7738_s12 + $0x8] sm:$0xff] }
 0xf49   : > { %v5110_v3 = vmul.f32 %v11439_v40, %v5096_v31  ;;  %v5222_v24 = vmul.f32 %v5221_v28, %v5107_v37  ;;  %v5223_v31 = vmul.f32 %v5221_v28, %v5108_v18  ;;  %v7180_v63 = vld [vmem:[%s7738_s12 + $0x10] sm:$0xff] }
 0xf4a   : > { %v5152_v52 = vmul.f32 %v11409_v15, %v5109_v60  ;;  %v5224_v13 = vmul.f32 %v5221_v28, %v5109_v60  ;;  %v7181_v60 = vld [vmem:[%s7738_s12 + $0x20] sm:$0xff] }
 0xf4b   : > { %v5153_v49 = vmul.f32 %v11409_v15, %v5110_v3  ;;  %v5225_v17 = vmul.f32 %v5221_v28, %v5110_v3 }
 0xf4c   : > { %5160 = vrot.lane.b32.xlu0 %v5150_v27, %s13138_s1  ;;  %5132 = vrot.lane.b32.xlu2 %v5118_v14, %s13138_s1 }
 0xf4d   : > { %5204 = vrot.lane.b32.xlu1 %v5190_v6, %s13138_s1  ;;  %v5028_v35 = vpop.permute.xlu2 %5027  ;;  %v5273_v6 = vsel %vm2212_vm5, %v11381_v41, %v11383_v59 }
 0xf4e   : > { %v5032_v11 = vsel %vm1895_vm11, %v5026_v26, %v5028_v35  ;;  %v5042_v43 = vadd.f32 %v5028_v35, %v11320_v54  ;;  %v4990_v46 = vpop.permute.xlu1 %4989  ;;  %v4984_v57 = vpop.permute.xlu0 %4983  ;;  %v5282_v3 = vmul.f32 %v7181_v60, %v5273_v6 }
 0xf4f   : > { %v11445_v33 = vadd.f32 %v5032_v11, %v11322_v9  ;;  %v4993_v34 = vsel %vm1895_vm11, %v4984_v57, %v11404_v12  ;;  %v7182_v11 = vld [vmem:[%s7738_s12 + $0x28] sm:$0xff] }
 0xf50   : > { %v11449_v25 = vadd.f32 %v4993_v34, %v4966_v0  ;;  %v5294_v28 = vmul.f32 %v5290_v56, %v5282_v3 }
 0xf54   : > { %5166 = vrot.lane.b32.xlu0 %v5153_v49, %s13138_s1  ;;  %5164 = vrot.lane.b32.xlu2 %v5152_v52, %s13138_s1 }
 0xf55   : > { %5236 = vrot.lane.b32.xlu1 %v5224_v13, %s13138_s1  ;;  %v5060_v54 = vpop.permute.xlu2 %5059 }
 0xf56   : > { %v5058_v9 = vpop.permute.xlu1 %5057  ;;  %v5022_v20 = vpop.permute.xlu0 %5021 }
 0xf57   : > { %v5066_v0 = vsel %vm1895_vm11, %v5058_v9, %v5060_v54  ;;  %v5029_v53 = vsel %vm1895_vm11, %v5020_v2, %v5022_v20  ;;  %v5030_v7 = vsel %vm1895_vm11, %v5022_v20, %v5024_v58  ;;  %v5271_v58 = vsel %vm2212_vm5, %v11378_v19, %v11406_v32 }
 0xf58   : > { %v5038_v22 = vadd.f32 %v5029_v53, %v11311_v5  ;;  %v5039_v1 = vadd.f32 %v5030_v7, %v11317_v10  ;;  %v5280_v27 = vmul.f32 %v7180_v63, %v5271_v58  ;;  %v11527_v53 = vpop.f32.mrf.mxu1 }
 0xf5a   : > { %v11466_v29 = vadd.f32 %v5066_v0, %v5039_v1  ;;  %v7183_v1 = vld [vmem:[%s7738_s12 + $0x40] sm:$0xff] }
 0xf5c   : > { %5234 = vrot.lane.b32.xlu0 %v5223_v31, %s13138_s1  ;;  %5232 = vrot.lane.b32.xlu2 %v5222_v24, %s13138_s1  ;;  %v5285_v24 = vmul.f32 %v7183_v1, %v5271_v58  ;;  %v5398_v31 = vstv %s6871_s13 }
 0xf5d   : > { %5240 = vrot.lane.b32.xlu1 %v5226_v55, %s13138_s1  ;;  %v5064_v5 = vpop.permute.xlu2 %5063 }
 0xf5e   : > { %v11472_v10 = vadd.f32 %v5064_v5, %v5042_v43  ;;  %v4992_v30 = vpop.permute.xlu1 %4991  ;;  %v4988_v2 = vpop.permute.xlu0 %4987  ;;  %v5283_v43 = vmul.f32 %v7182_v11, %v11383_v59 }
 0xf5f   : > { %v4996_v18 = vsel %vm1895_vm11, %v4990_v46, %v4992_v30  ;;  %v11476_v38 = vadd.f32 %v4992_v30, %v11388_v48  ;;  %v4994_v50 = vsel %vm1895_vm11, %v11404_v12, %v4988_v2  ;;  %v4995_v16 = vsel %vm1895_vm11, %v4988_v2, %v4990_v46 }
 0xf60   : > { %v11482_v26 = vadd.f32 %v4996_v18, %v11395_v36  ;;  %v11484_v37 = vadd.f32 %v4994_v50, %v4967_v45  ;;  %v11486_v39 = vadd.f32 %v4995_v16, %v4968_v21  ;;  %v5154_v48 = vmul.f32 %v11409_v15, %v5111_v42  ;;  %v5634_v2 = vpop.f32.mrf.mxu1 }
 0xf61   : > { %v5279_v12 = vmul.f32 %v7179_v51, %v11378_v19  ;;  %v5362_v36 = vstv %s6870_s27  ;;  %v5292_v15 = vmul.f32 %v5290_v56, %v5280_v27  ;;  %v5295_v49 = vmul.f32 %v5290_v56, %v5283_v43  ;;  %s6626_s27 = scalar_lea.hbm %s11972_s11, %s6925_s2 }
 0xf62   : > { %v5364_v35 = vmul.f32 %v5362_v36, %v5280_v27  ;;  %v11523_v42 = vstv %s6869_s30  ;;  %v5365_v0 = vmul.f32 %v5362_v36, %v5281_v44  ;;  %v11540_v44 = vpop.f32.mrf.mxu3  ;;  %v5367_v16 = vmul.f32 %v5362_v36, %v5283_v43  ;;  %s6629_s20 = sshll.u32 %s6626_s27, 4  ;;  %s6615_s30 = scalar_lea.sflag [#allocation11], %s7734_s7  ;;  %s6630_s20 = int_to_ptr.hbm [resolvable:$true] %s6629_s20 }
 0xf63   : > { %v5291_v21 = vmul.f32 %v5290_v56, %v5279_v12  ;;  %v5363_v13 = vmul.f32 %v5362_v36, %v5279_v12  ;;  %v5328_v8 = vmul.f32 %v11523_v42, %v5285_v24  ;;  %s7433_s13 = sshra.s32 %s6630_s20, 4  ;;  %s7434_s13 = int_to_ptr.hbm [resolvable:$true] %s7433_s13 }
 0xf64   : > { %5168 = vrot.lane.b32.xlu0 %v5154_v48, %s13138_s1  ;;  %5238 = vrot.lane.b32.xlu2 %v5225_v17, %s13138_s1  ;;  %s6908_s1 = sld [smem:[#allocation7 + $0x1]]  ;;  %p7440_p9 = scmp.lt.s32.totalorder %s7434_s13, %s11972_s11 }
 0xf65   : > { %5305 = vrot.lane.b32.xlu1 %v5293_v4, %s13139_s26 }
 0xf66   : > { %v5056_v45 = vpop.permute.xlu0 %5055 }
 0xf67   : > { %v5065_v32 = vsel %vm1895_vm11, %v5056_v45, %v5058_v9  ;;  %v13140_v9 = vld [vmem:[#allocation28_spill] sm:$0xff] }
 0xf68   : > { %v11499_v14 = vadd.f32 %v5065_v32, %v5038_v22  ;;  %v6888_v20 = vmul.f32 -1.442695, %v13140_v9  ;;  %v5284_v22 = vmul.f32 %v11416_v47, %v11378_v19  ;;  %v5287_v19 = vmul.f32 %v11439_v40, %v5273_v6  ;;  %v13141_v47 = vld [vmem:[#allocation29_spill] sm:$0xff]  ;;  %v5717_v51 = vpop.f32.mrf.mxu1 }
 0xf69   : > { %v6907_v18 = vmul.f32 -1.442695, %v13141_v47  ;;  %v7185_v47 = vld [vmem:[%s7738_s12 + $0x8] sm:$0xff] }
 0xf6a   : > { %7081 = vpow2.f32 %v6888_v20  ;;  %v5327_v55 = vmul.f32 %v11523_v42, %v5284_v22  ;;  %v5330_v58 = vmul.f32 %v11523_v42, %v5287_v19  ;;  %v5402_v4 = vmul.f32 %v5398_v31, %v5287_v19  ;;  %v11553_v48 = vpop.f32.mrf.mxu3 }
 0xf6c   : > { %5301 = vrot.lane.b32.xlu2 %v5291_v21, %s13139_s26  ;;  %5303 = vrot.lane.b32.xlu0 %v5292_v15, %s13139_s26 }
 0xf6d   : > { %5375 = vrot.lane.b32.xlu1 %v5364_v35, %s13139_s26  ;;  %v7184_v35 = vld [vmem:[%s7738_s12 + $0x58] sm:$0xff] }
 0xf6e   : > { %v5062_v46 = vpop.permute.xlu0 %5061  ;;  %v5288_v60 = vmul.f32 %v7184_v35, %v11383_v59 }
 0xf6f   : > { %v5067_v57 = vsel %vm1895_vm11, %v5060_v54, %v5062_v46  ;;  %v5068_v34 = vsel %vm1895_vm11, %v5062_v46, %v5064_v5  ;;  %v5286_v54 = vmul.f32 %v11435_v61, %v5272_v23  ;;  %v11533_v61 = vpop.f32.mrf.mxu2  ;;  %v5399_v5 = vmul.f32 %v5398_v31, %v5284_v22 }
 0xf70   : > { %v11513_v41 = vadd.f32 %v5067_v57, %v11425_v62  ;;  %v11516_v52 = vadd.f32 %v5068_v34, %v11445_v33  ;;  %v5366_v62 = vmul.f32 %v5362_v36, %v5282_v3  ;;  %v11525_v33 = vpop.f32.mrf.mxu0  ;;  %v7082_v23 = vpop.eup %7081  ;;  %v5400_v36 = vmul.f32 %v5398_v31, %v5285_v24 }
 0xf71   : > { %v5329_v7 = vmul.f32 %v11523_v42, %v5286_v54  ;;  %v11544_v56 = vadd.f32 1.0, %v7082_v23  ;;  %v5401_v45 = vmul.f32 %v5398_v31, %v5286_v54  ;;  %v5331_v59 = vmul.f32 %v11523_v42, %v5288_v60 }
 0xf72   : > { %v5757_v43 = vpop.f32.mrf.mxu3  ;;  %v5403_v54 = vmul.f32 %v5398_v31, %v5288_v60  ;;  %vm13142_vm11 = vcmask 900096  }
 0xf73   : > { %7083 = vrcp.f32 %v11544_v56  ;;  %v5775_v42 = vand.u32 2147483648, %v11544_v56  ;;  %vm5769_vm2 = vweird.f32 %v11544_v56  ;;  %v5773_v1 = vand.u32 2147483647, %v11544_v56  ;;  %vm13143_vm6 = vmmov %vm13142_vm11 }
 0xf74   : > { %5307 = vrot.lane.b32.xlu2 %v5294_v28, %s13139_s26  ;;  %5373 = vrot.lane.b32.xlu0 %v5363_v13, %s13139_s26  ;;  %7085 = vpow2.f32 %v6907_v18  ;;  %v5779_v18 = vmul.f32 %v7185_v47, %v7185_v47  ;;  %vm13144_vm0 = vmmov %vm13143_vm6 }
 0xf75   : > { %5309 = vrot.lane.b32.xlu1 %v5295_v49, %s13139_s26  ;;  %v6011_v49 = vpop.f32.mrf.mxu1  ;;  %vm5774_vm7 = vcmp.eq.f32.partialorder %v5773_v1, 8.507059e+37  ;;  %vm13145_vm14 = vmmov %vm13144_vm0 }
 0xf76   : > { %v5125_v32 = vpop.permute.xlu0 %5124  ;;  %vm13147_vm15 = vmmov %vm13144_vm0 }
 0xf77   : > { %v5654_v50 = vpop.f32.mrf.mxu2 }
 0xf78   : > { %v5614_v30 = vpop.f32.mrf.mxu0 }
 0xf79   : > { %v7084_v40 = vpop.eup %7083 }
 0xf7a   : > { %v7086_v12 = vpop.eup %7085  ;;  %v5765_v63 = vmul.f32 %v7084_v40, %v11544_v56  ;;  %vm5770_vm1 = vweird.f32 %v7084_v40  ;;  %v11597_v31 = vpop.f32.mrf.mxu3 }
 0xf7b   : > { %v11557_v21 = vadd.f32 1.0, %v7086_v12  ;;  %vm5771_vm3 = vmor %vm5769_vm2, %vm5770_vm1 }
 0xf7c   : > { %5377 = vrot.lane.b32.xlu2 %v5365_v0, %s13139_s26  ;;  %5379 = vrot.lane.b32.xlu0 %v5366_v62, %s13139_s26  ;;  %v5766_v6 = vsub.f32 1.0, %v5765_v63  ;;  %v5783_v62 = vmul.f32 %v5614_v30, %v11525_v33  ;;  %vm13148_vm1 = vmmov %vm13144_vm0 }
 0xf7d   : > { %5341 = vrot.lane.b32.xlu1 %v5329_v7, %s13139_s26  ;;  %7087 = vrcp.f32 %v11557_v21  ;;  %v6094_v56 = vpop.f32.mrf.mxu1  ;;  %vm6229_vm8 = vweird.f32 %v11557_v21  ;;  %vm13149_vm2 = vmmov %vm13144_vm0 }
 0xf7e   : > { %v5767_v13 = vmul.f32 %v7084_v40, %v5766_v6 }
 0xf7f   : > { %v5737_v27 = vpop.f32.mrf.mxu2 }
 0xf80   : > { %v5697_v17 = vpop.f32.mrf.mxu0  ;;  %v5768_v0 = vadd.f32 %v7084_v40, %v5767_v13  ;;  %v7188_v13 = vld [vmem:[%s7738_s12 + $0x20] sm:$0xff] }
 0xf82   : > { %v5772_v23 = vsel %vm5771_vm3, %v7084_v40, %v5768_v0  ;;  %v5786_v40 = vmul.f32 %v11553_v48, %v11540_v44  ;;  %v6134_v6 = vpop.f32.mrf.mxu3  ;;  %v6244_v48 = vmul.f32 %v6094_v56, %v6011_v49  ;;  %vm13150_vm3 = vmmov %vm13144_vm0 }
 0xf83   : > { %v11580_v20 = vpop.eup %7087  ;;  %v6246_v56 = vmul.f32 %v6134_v6, %v11597_v31 }
 0xf84   : > { %5337 = vrot.lane.b32.xlu2 %v5327_v55, %s13139_s26  ;;  %5339 = vrot.lane.b32.xlu0 %v5328_v8, %s13139_s26  ;;  %v6225_v33 = vmul.f32 %v11580_v20, %v11557_v21  ;;  %v5787_v55 = vmul.f32 %v5783_v62, %v5697_v17  ;;  %vm6230_vm10 = vweird.f32 %v11580_v20 }
 0xf85   : > { %5409 = vrot.lane.b32.xlu1 %v5399_v5, %s13139_s26  ;;  %v5776_v5 = vor.u32 1.1754944e-38, %v5775_v42  ;;  %vm6231_vm13 = vmor %vm6229_vm8, %vm6230_vm10 }
 0xf86   : > { %vm13152_vm8 = vmmov %vm13144_vm0 }
 0xf87   : > { %v11576_v9 = vpop.f32.mrf.mxu2  ;;  %vm13153_vm10 = vmmov %vm13144_vm0 }
 0xf88   : > { %v5991_v28 = vpop.f32.mrf.mxu0 }
 0xf8c   : > { %5343 = vrot.lane.b32.xlu2 %v5330_v58, %s13139_s26  ;;  %5381 = vrot.lane.b32.xlu0 %v5367_v16, %s13139_s26  ;;  %v7186_v58 = vld [vmem:[%s7738_s12 + $0x10] sm:$0xff] }
 0xf8d   : > { %5415 = vrot.lane.b32.xlu1 %v5402_v4, %s13139_s26 }
 0xf8f   : > { %v6114_v4 = vpop.f32.mrf.mxu2 }
 0xf90   : > { %v6074_v30 = vpop.f32.mrf.mxu0 }
 0xf94   : > { %5411 = vrot.lane.b32.xlu2 %v5400_v36, %s13139_s26  ;;  %5413 = vrot.lane.b32.xlu0 %v5401_v45, %s13139_s26 }
 0xf95   : > { %v5127_v15 = vpop.permute.xlu1 %5126 }
 0xf96   : > { %v5134_v3 = vsel %vm2074_vm12, %v5125_v32, %v5127_v15  ;;  %v11564_v11 = vpop.permute.xlu2 %5128 }
 0xf97   : > { %v11567_v46 = vadd.f32 %v5134_v3, %v11449_v25  ;;  %v5135_v57 = vsel %vm2074_vm12, %v5127_v15, %v11564_v11  ;;  %v5790_v15 = vmul.f32 %v5786_v40, %v5757_v43  ;;  %v6177_v3 = vpop.f32.mrf.mxu1  ;;  %v6233_v43 = vand.u32 2147483647, %v11557_v21 }
 0xf98   : > { %v11573_v34 = vadd.f32 %v5135_v57, %v11484_v37  ;;  %v5784_v37 = vmul.f32 %v5634_v2, %v11527_v53  ;;  %v5785_v53 = vmul.f32 %v5654_v50, %v11533_v61  ;;  %v6226_v2 = vsub.f32 1.0, %v6225_v33  ;;  %v6157_v35 = vpop.f32.mrf.mxu0 }
 0xf99   : > { %v5780_v61 = vmul.f32 %v7186_v58, %v7186_v58  ;;  %vm6234_vm9 = vcmp.eq.f32.partialorder %v6233_v43, 8.507059e+37  ;;  %v11653_v58 = vld [vmem:[%s7738_s12 + $0x48] sm:$0xff] }
 0xf9a   : > { %v5788_v8 = vmul.f32 %v5784_v37, %v5717_v51  ;;  %v5789_v19 = vmul.f32 %v5785_v53, %v5737_v27  ;;  %v7187_v51 = vld [vmem:[%s7738_s12 + $0x18] sm:$0xff]  ;;  %v6227_v27 = vmul.f32 %v11580_v20, %v6226_v2 }
 0xf9b   : > { %v5781_v63 = vmul.f32 %v7187_v51, %v7187_v51 }
 0xf9c   : > { %5345 = vrot.lane.b32.xlu2 %v5331_v59, %s13139_s26  ;;  %5417 = vrot.lane.b32.xlu0 %v5403_v54, %s13139_s26  ;;  %v6228_v60 = vadd.f32 %v11580_v20, %v6227_v27  ;;  %v5782_v59 = vmul.f32 %v7188_v13, %v7188_v13  ;;  %v6235_v54 = vand.u32 2147483648, %v11557_v21 }
 0xf9d   : > { %v5197_v25 = vpop.permute.xlu1 %5196 }
 0xf9e   : > { %v11584_v7 = vpop.permute.xlu2 %5198 }
 0xf9f   : > { %v5206_v22 = vsel %vm2074_vm12, %v5197_v25, %v11584_v7 }
 0xfa0   : > { %v11592_v24 = vadd.f32 %v5206_v22, %v11499_v14  ;;  %v5777_v14 = vsel %vm5774_vm7, %v5776_v5, %v5772_v23  ;;  %v6197_v22 = vpop.f32.mrf.mxu2  ;;  %v6248_v23 = vmul.f32 %v6244_v48, %v6177_v3  ;;  %v11676_v48 = vld [vmem:[%s7738_s12 + $0x50] sm:$0xff]  ;;  %vm13151_vm7 = vmmov %vm13144_vm0 }
 0xfa1   : > { %v5791_v16 = vmul.f32 %v5787_v55, %v5777_v14  ;;  %v5792_v50 = vmul.f32 %v5788_v8, %v5777_v14  ;;  %v5793_v36 = vmul.f32 %v5789_v19, %v5777_v14  ;;  %v5794_v37 = vmul.f32 %v5790_v15, %v5777_v14  ;;  %v6217_v19 = vpop.f32.mrf.mxu3 }
 0xfa2   : > { %v6236_v55 = vor.u32 1.1754944e-38, %v6235_v54  ;;  %v6250_v15 = vmul.f32 %v6246_v56, %v6217_v19 }
 0xfa3   : > { %v11608_v45 = vmul.f32 %v5791_v16, %v5779_v18  ;;  %v11610_v32 = vmul.f32 %v5792_v50, %v5780_v61  ;;  %v11614_v44 = vmul.f32 %v5793_v36, %v5781_v63  ;;  %v11638_v8 = vmul.f32 %v5794_v37, %v5782_v59 }
 0xfa4   : > { %v6241_v61 = vmul.f32 %v11653_v58, %v11653_v58 }
 0xfa5   : > { %v5799_v57 = vadd.f32 %v11610_v32, %v11608_v45 }
 0xfa6   : > { %v5133_v12 = vpop.permute.xlu2 %5132 }
 0xfa7   : > { %v11604_v17 = vadd.f32 %v5133_v12, %v11476_v38  ;;  %v6243_v38 = vmul.f32 %v6074_v30, %v5991_v28  ;;  %v6245_v28 = vmul.f32 %v6114_v4, %v11576_v9  ;;  %v6232_v9 = vsel %vm6231_vm13, %v11580_v20, %v6228_v60  ;;  %v11641_v30 = vld [vmem:[%s7738_s12 + $0x38] sm:$0xff]  ;;  %vm13154_vm13 = vmmov %vm13144_vm0 }
 0xfa8   : > { %v6237_v5 = vsel %vm6234_vm9, %v6236_v55, %v6232_v9  ;;  %vm13155_vm9 = vmmov %vm13144_vm0 }
 0xfa9   : > { %v6247_v53 = vmul.f32 %v6243_v38, %v6157_v35  ;;  %v6249_v21 = vmul.f32 %v6245_v28, %v6197_v22  ;;  %v6252_v14 = vmul.f32 %v6248_v23, %v6237_v5  ;;  %v6254_v35 = vmul.f32 %v6250_v15, %v6237_v5 }
 0xfab   : > { %v6251_v2 = vmul.f32 %v6247_v53, %v6237_v5  ;;  %v6253_v50 = vmul.f32 %v6249_v21, %v6237_v5 }
 0xfad   : > { %v11671_v38 = vmul.f32 %v6253_v50, %v6241_v61 }
 0xfae   : > { %v11622_v25 = vpop.permute.xlu2 %5164  ;;  %v5131_v62 = vpop.permute.xlu0 %5130 }
 0xfaf   : > { %v5203_v49 = vpop.permute.xlu1 %5202  ;;  %v5136_v0 = vsel %vm2074_vm12, %v11564_v11, %v5131_v62  ;;  %v5137_v42 = vsel %vm2074_vm12, %v5131_v62, %v5133_v12  ;;  %v5800_v11 = vadd.f32 %v5799_v57, %v11614_v44 }
 0xfb0   : > { %v5145_v1 = vadd.f32 %v5136_v0, %v11486_v39  ;;  %v11634_v33 = vadd.f32 %v5137_v42, %v11482_v26  ;;  %v6239_v39 = vmul.f32 %v11641_v30, %v11641_v30  ;;  %v11646_v26 = vld [vmem:[%s7738_s12 + $0x40] sm:$0xff] }
 0xfb1   : > { %v6240_v20 = vmul.f32 %v11646_v26, %v11646_v26  ;;  %v5801_v47 = vadd.f32 %v5800_v11, %v11638_v8 }
 0xfb2   : > { %v11664_v36 = vmul.f32 %v6251_v2, %v6239_v39 }
 0xfb3   : > { %v11666_v27 = vmul.f32 %v6252_v14, %v6240_v20 }
 0xfb6   : > { %v5233_v18 = vpop.permute.xlu2 %5232  ;;  %v5201_v16 = vpop.permute.xlu0 %5200 }
 0xfb7   : > { %v5163_v4 = vpop.permute.xlu1 %5162  ;;  %v5207_v12 = vsel %vm2074_vm12, %v11584_v7, %v5201_v16  ;;  %v5208_v31 = vsel %vm2074_vm12, %v5201_v16, %v5203_v49  ;;  %5802 = vadd.xlane.f32.xlu1 %v5801_v47  ;;  %v6259_v7 = vadd.f32 %v11666_v27, %v11664_v36 }
 0xfb8   : > { %v5171_v40 = vsel %vm2074_vm12, %v5163_v4, %v11622_v25  ;;  %v5216_v51 = vadd.f32 %v5207_v12, %v11466_v29  ;;  %v5217_v63 = vadd.f32 %v5208_v31, %v11513_v41  ;;  %v6242_v29 = vmul.f32 %v11676_v48, %v11676_v48 }
 0xfb9   : > { %v11669_v6 = vadd.f32 %v5171_v40, %v11573_v34  ;;  %v6260_v57 = vadd.f32 %v6259_v7, %v11671_v38 }
 0xfba   : > { %v11683_v59 = vmul.f32 %v6254_v35, %v6242_v29 }
 0xfbc   : > { %v6261_v54 = vadd.f32 %v6260_v57, %v11683_v59 }
 0xfbe   : > { %v5239_v41 = vpop.permute.xlu2 %5238  ;;  %v5161_v60 = vpop.permute.xlu0 %5160 }
 0xfbf   : > { %v5205_v3 = vpop.permute.xlu1 %5204  ;;  %v5170_v50 = vsel %vm2074_vm12, %v5161_v60, %v5163_v4 }
 0xfc0   : > { %v5209_v13 = vsel %vm2074_vm12, %v5203_v49, %v5205_v3  ;;  %v5219_v34 = vadd.f32 %v5205_v3, %v11472_v10 }
 0xfc1   : > { %v5218_v43 = vadd.f32 %v5209_v13, %v11516_v52  ;;  %v5853_v13 = vstv %s5852_s28  ;;  %s7435_s28 = scalar_lea.hbm %s7434_s13, 64 }
 0xfc2   : > { %p7436_p1 = scmp.ne.s32.totalorder %s7434_s13, %s7435_s28 }
 0xfc4   : > { %p7437_p4 = pnand %p7436_p1, %p7707_p5 }
 0xfc5   : > { %6262 = vadd.xlane.f32.xlu2 %v6261_v54 }
 0xfc6   : > { %v5302_v62 = vpop.permute.xlu2 %5301  ;;  %v5167_v37 = vpop.permute.xlu0 %5166  ;;  %p7438_p8 = pneg %p7437_p4 }
 0xfc7   : > { %v5237_v28 = vpop.permute.xlu1 %5236  ;;  %v5172_v0 = vsel %vm2074_vm12, %v11622_v25, %v5167_v37 }
 0xfc8   : > { %v5244_v42 = vsel %vm2074_vm12, %v5237_v28, %v5239_v41  ;;  %v5181_v22 = vadd.f32 %v5172_v0, %v5145_v1 }
 0xfc9   : > { %v5253_v9 = vadd.f32 %v5244_v42, %v5217_v63 }
 0xfce   : > { %v5308_v49 = vpop.permute.xlu2 %5307  ;;  %v5235_v53 = vpop.permute.xlu0 %5234 }
 0xfcf   : > { %v5241_v10 = vpop.permute.xlu1 %5240  ;;  %v5242_v23 = vsel %vm2074_vm12, %v5233_v18, %v5235_v53  ;;  %v5243_v52 = vsel %vm2074_vm12, %v5235_v53, %v5237_v28 }
 0xfd0   : > { %v5245_v11 = vsel %vm2074_vm12, %v5239_v41, %v5241_v10  ;;  %v11693_v55 = vadd.f32 %v5241_v10, %v5219_v34  ;;  %v11696_v21 = vadd.f32 %v5242_v23, %v11592_v24  ;;  %v11698_v5 = vadd.f32 %v5243_v52, %v5216_v51 }
 0xfd1   : > { %v11700_v25 = vadd.f32 %v5245_v11, %v5218_v43  ;;  %v5179_v51 = vadd.f32 %v5170_v50, %v11567_v46  ;;  %v6313_v50 = vstv %s6910_s21 }
 0xfd6   : > { %v11702_v1 = vpop.permute.xlu2 %5377  ;;  %v5169_v39 = vpop.permute.xlu0 %5168 }
 0xfd7   : > { %v5306_v20 = vpop.permute.xlu1 %5305  ;;  %v11705_v56 = vadd.f32 %v5169_v39, %v11604_v17  ;;  %v5173_v12 = vsel %vm2074_vm12, %v5167_v37, %v5169_v39  ;;  %vm13146_vm12 = vmmov %vm13144_vm0 }
 0xfd8   : > { %v5182_v63 = vadd.f32 %v5173_v12, %v11634_v33 }
 0xfde   : > { %v5338_v2 = vpop.permute.xlu2 %5337  ;;  %v5304_v14 = vpop.permute.xlu0 %5303 }
 0xfdf   : > { %v5376_v19 = vpop.permute.xlu1 %5375  ;;  %v5311_v40 = vsel %vm13142_vm11, %v5302_v62, %v5304_v14  ;;  %v5312_v41 = vsel %vm13144_vm0, %v5304_v14, %v5306_v20  ;;  %vm13156_vm11 = vmmov %vm13144_vm0 }
 0xfe0   : > { %v5320_v15 = vadd.f32 %v5311_v40, %v5179_v51  ;;  %v5321_v43 = vadd.f32 %v5312_v41, %v11669_v6  ;;  %v5313_v6 = vsel %vm13148_vm1, %v5306_v20, %v5308_v49 }
 0xfe1   : > { %v5322_v10 = vadd.f32 %v5313_v6, %v5181_v22 }
 0xfe6   : > { %v5344_v47 = vpop.permute.xlu2 %5343  ;;  %v5374_v18 = vpop.permute.xlu0 %5373 }
 0xfe7   : > { %v11707_v16 = vpop.permute.xlu1 %5309  ;;  %v5383_v20 = vsel %vm13151_vm7, %v5374_v18, %v5376_v19  ;;  %v5384_v18 = vsel %vm13154_vm13, %v5376_v19, %v11702_v1 }
 0xfe8   : > { %v5314_v17 = vsel %vm13143_vm6, %v5308_v49, %v11707_v16  ;;  %vm13157_vm6 = vmmov %vm13144_vm0 }
 0xfe9   : > { %v5323_v7 = vadd.f32 %v5314_v17, %v5182_v63 }
 0xfee   : > { %v5412_v24 = vpop.permute.xlu2 %5411  ;;  %v11709_v61 = vpop.permute.xlu0 %5379 }
 0xfef   : > { %v5342_v31 = vpop.permute.xlu1 %5341  ;;  %v5385_v23 = vsel %vm13150_vm3, %v11702_v1, %v11709_v61 }
 0xff0   : > { %v5349_v53 = vsel %vm13149_vm2, %v5342_v31, %v5344_v47  ;;  %v5394_v39 = vadd.f32 %v5385_v23, %v5253_v9 }
 0xff1   : > { %v5358_v52 = vadd.f32 %v5349_v53, %v5322_v10 }
 0xff6   : > { %v5346_v29 = vpop.permute.xlu2 %5345  ;;  %v5340_v35 = vpop.permute.xlu0 %5339 }
 0xff7   : > { %v5350_v4 = vsel %vm13145_vm14, %v5344_v47, %v5346_v29  ;;  %v5347_v60 = vsel %vm13146_vm12, %v5338_v2, %v5340_v35  ;;  %v5348_v34 = vsel %vm13147_vm15, %v5340_v35, %v5342_v31  ;;  %v5410_v62 = vpop.permute.xlu1 %5409  ;;  %v11748_v47 = vadd.f32 %v5853_v13, %v5358_v52 }
 0xff8   : > { %v5359_v3 = vadd.f32 %v5350_v4, %v5323_v7  ;;  %v5356_v57 = vadd.f32 %v5347_v60, %v5320_v15  ;;  %v5357_v37 = vadd.f32 %v5348_v34, %v5321_v43  ;;  %v5419_v12 = vsel %vm13153_vm10, %v5410_v62, %v5412_v24 }
 0xff9   : > { %v5392_v31 = vadd.f32 %v5383_v20, %v11696_v21  ;;  %v5861_v9 = vmax.f32 %v11748_v47, 0.0  ;;  %v5393_v15 = vadd.f32 %v5384_v18, %v11698_v5 }
 0xffa   : > { %v11723_v46 = vadd.f32 %v5853_v13, %v5359_v3  ;;  %v11725_v33 = vadd.f32 %v5853_v13, %v5356_v57  ;;  %v11736_v42 = vadd.f32 %v5853_v13, %v5357_v37  ;;  %v5324_v57 = vadd.f32 %v11707_v16, %v11705_v56 }
 0xffb   : > { %v5428_v17 = vadd.f32 %v5419_v12, %v5392_v31 }
 0xffc   : > { %v5862_v54 = vmax.f32 %v11723_v46, 0.0  ;;  %v5859_v28 = vmax.f32 %v11725_v33, 0.0  ;;  %v5860_v11 = vmax.f32 %v11736_v42, 0.0  ;;  %v5360_v34 = vadd.f32 %v5346_v29, %v5324_v57 }
 0xffd   : > { %v11764_v63 = vadd.f32 %v6313_v50, %v5428_v17 }
 0xffe   : > { %5869 = vrot.lane.b32.xlu0 %v5859_v28, %s13136_s25  ;;  %v5382_v0 = vpop.permute.xlu0 %5381  ;;  %5875 = vrot.lane.b32.xlu1 %v5862_v54, %s13136_s25 }
 0xfff   : > { %v5416_v2 = vpop.permute.xlu1 %5415  ;;  %v6319_v7 = vmax.f32 %v11764_v63, 0.0  ;;  %v5386_v4 = vsel %vm13156_vm11, %v11709_v61, %v5382_v0  ;;  %v5396_v43 = vadd.f32 %v5382_v0, %v11693_v55 }
0x1000   : > { %v5395_v19 = vadd.f32 %v5386_v4, %v11700_v25  ;;  %v11790_v25 = vadd.f32 %v5853_v13, %v5360_v34 }
0x1002   : > { %v5863_v6 = vmax.f32 %v11790_v25, 0.0 }
0x1006   : > { %5871 = vrot.lane.b32.xlu0 %v5860_v11, %s13136_s25  ;;  %v5414_v49 = vpop.permute.xlu0 %5413 }
0x1007   : > { %v5421_v14 = vsel %vm13152_vm8, %v5414_v49, %v5416_v2  ;;  %v5420_v21 = vsel %vm13155_vm9, %v5412_v24, %v5414_v49 }
0x1008   : > { %v5430_v22 = vadd.f32 %v5421_v14, %v5394_v39  ;;  %v5429_v35 = vadd.f32 %v5420_v21, %v5393_v15 }
0x100a   : > { %v11752_v40 = vadd.f32 %v6313_v50, %v5430_v22  ;;  %v11774_v60 = vadd.f32 %v6313_v50, %v5429_v35 }
0x100c   : > { %v6321_v51 = vmax.f32 %v11752_v40, 0.0  ;;  %v6320_v24 = vmax.f32 %v11774_v60, 0.0 }
0x100e   : > { %5873 = vrot.lane.b32.xlu0 %v5861_v9, %s13136_s25  ;;  %6333 = vrot.lane.b32.xlu2 %v6321_v51, %s13136_s25  ;;  %v5418_v41 = vpop.permute.xlu0 %5417 }
0x100f   : > { %v5422_v1 = vsel %vm13157_vm6, %v5416_v2, %v5418_v41  ;;  %v5432_v53 = vadd.f32 %v5418_v41, %v5396_v43 }
0x1010   : > { %v5431_v5 = vadd.f32 %v5422_v1, %v5395_v19 }
0x1011   : > { %v11813_v13 = vadd.f32 %v6313_v50, %v5432_v53 }
0x1012   : > { %v11782_v3 = vadd.f32 %v6313_v50, %v5431_v5 }
0x1013   : > { %v6323_v52 = vmax.f32 %v11813_v13, 0.0 }
0x1014   : > { %v6322_v61 = vmax.f32 %v11782_v3, 0.0 }
0x1016   : > { %6329 = vrot.lane.b32.xlu0 %v6319_v7, %s13136_s25 }
0x101e   : > { %6331 = vrot.lane.b32.xlu0 %v6320_v24, %s13136_s25 }
0x1026   : > { %6335 = vrot.lane.b32.xlu0 %v6322_v61, %s13136_s25 }
0x102a   : > { %v5803_v62 = vpop.xlane.xlu1 %5802 }
0x102b   : > { %v5804_v37 = vmul.f32 0.001953125, %v5803_v62 }
0x102d   : > { %v11795_v10 = vsub.f32 %v11608_v45, %v5804_v37  ;;  %v11798_v56 = vsub.f32 %v11610_v32, %v5804_v37  ;;  %v11801_v16 = vsub.f32 %v11614_v44, %v5804_v37  ;;  %v11807_v55 = vsub.f32 %v11638_v8, %v5804_v37 }
0x102e   : > { %5877 = vrot.lane.b32.xlu0 %v5863_v6, %s13136_s25 }
0x102f   : > { %v5809_v29 = vmul.f32 %v11795_v10, %v11795_v10  ;;  %v5810_v45 = vmul.f32 %v11798_v56, %v11798_v56  ;;  %v5811_v32 = vmul.f32 %v11801_v16, %v11801_v16  ;;  %v5812_v0 = vmul.f32 %v11807_v55, %v11807_v55 }
0x1031   : > { %v5813_v44 = vadd.f32 %v5810_v45, %v5809_v29 }
0x1033   : > { %v5814_v23 = vadd.f32 %v5813_v44, %v5811_v32 }
0x1035   : > { %v5815_v8 = vadd.f32 %v5814_v23, %v5812_v0 }
0x1036   : > { %6337 = vrot.lane.b32.xlu0 %v6323_v52, %s13136_s25 }
0x1037   : > { %5816 = vadd.xlane.f32.xlu2 %v5815_v8 }
0x1038   : > { %v6263_v39 = vpop.xlane.xlu2 %6262 }
0x1039   : > { %v6264_v2 = vmul.f32 0.001953125, %v6263_v39 }
0x103b   : > { %v11824_v49 = vsub.f32 %v11664_v36, %v6264_v2  ;;  %v11827_v20 = vsub.f32 %v11666_v27, %v6264_v2  ;;  %v11830_v14 = vsub.f32 %v11671_v38, %v6264_v2  ;;  %v11833_v22 = vsub.f32 %v11683_v59, %v6264_v2 }
0x103d   : > { %v6269_v50 = vmul.f32 %v11824_v49, %v11824_v49  ;;  %v6270_v12 = vmul.f32 %v11827_v20, %v11827_v20  ;;  %v6271_v31 = vmul.f32 %v11830_v14, %v11830_v14  ;;  %v6272_v27 = vmul.f32 %v11833_v22, %v11833_v22 }
0x103f   : > { %v6273_v36 = vadd.f32 %v6270_v12, %v6269_v50 }
0x1041   : > { %v6274_v17 = vadd.f32 %v6273_v36, %v6271_v31 }
0x1043   : > { %v6275_v18 = vadd.f32 %v6274_v17, %v6272_v27 }
0x1045   : > { %6276 = vadd.xlane.f32.xlu1 %v6275_v18 }
0x1068   : > { %v6334_v37 = vpop.permute.xlu2 %6333 }
0x1070   : > { %v5870_v38 = vpop.permute.xlu0 %5869  ;;  %v5876_v5 = vpop.permute.xlu1 %5875 }
0x1078   : > { %v5872_v21 = vpop.permute.xlu0 %5871 }
0x1079   : > { %v5879_v1 = vsel %vm2212_vm5, %v5870_v38, %v5872_v21 }
0x1080   : > { %v5874_v59 = vpop.permute.xlu0 %5873 }
0x1081   : > { %v5880_v4 = vsel %vm2212_vm5, %v5872_v21, %v5874_v59  ;;  %v5881_v57 = vsel %vm2212_vm5, %v5874_v59, %v5876_v5 }
0x1082   : > { %v5887_v19 = vadd.f32 %v5880_v4, %v5879_v1 }
0x1084   : > { %v5888_v34 = vadd.f32 %v5887_v19, %v5881_v57  ;;  %v5841_v57 = vstv %s5840_s24 }
0x1088   : > { %v6330_v15 = vpop.permute.xlu0 %6329 }
0x1090   : > { %v6332_v35 = vpop.permute.xlu0 %6331 }
0x1091   : > { %v6339_v29 = vsel %vm2212_vm5, %v6330_v15, %v6332_v35  ;;  %v6340_v45 = vsel %vm2212_vm5, %v6332_v35, %v6334_v37 }
0x1092   : > { %v6347_v44 = vadd.f32 %v6340_v45, %v6339_v29 }
0x1098   : > { %v6336_v41 = vpop.permute.xlu0 %6335 }
0x1099   : > { %v6341_v32 = vsel %vm2212_vm5, %v6334_v37, %v6336_v41 }
0x109a   : > { %v6348_v0 = vadd.f32 %v6347_v44, %v6341_v32 }
0x10a0   : > { %v5878_v43 = vpop.permute.xlu0 %5877 }
0x10a1   : > { %v5882_v62 = vsel %vm2212_vm5, %v5876_v5, %v5878_v43 }
0x10a2   : > { %v5889_v53 = vadd.f32 %v5888_v34, %v5882_v62 }
0x10a4   : > { %5890 = vadd.xlane.f32.xlu0 %v5889_v53 }
0x10a8   : > { %v6338_v23 = vpop.permute.xlu0 %6337 }
0x10a9   : > { %v6342_v8 = vsel %vm2212_vm5, %v6336_v41, %v6338_v23  ;;  %v5835_v41 = vstv %s5834_s29  ;;  %s7439_s29 = scalar_lea.hbm %s11972_s11, 128 }
0x10aa   : > { %v6349_v39 = vadd.f32 %v6348_v0, %v6342_v8  ;;  %v5817_v2 = vpop.xlane.xlu2 %5816  ;;  %p7441_p10 = scmp.lt.s32.totalorder %s7439_s29, %s7435_s28 }
0x10ab   : > { %v5818_v50 = vmul.f32 0.001953125, %v5817_v2 }
0x10ac   : > { %6350 = vadd.xlane.f32.xlu2 %v6349_v39  ;;  %p7442_p2 = por %p7441_p10, %p7440_p9 }
0x10ad   : > { %v5819_v12 = vadd.f32 1e-05, %v5818_v50  ;;  %v6295_v50 = vstv %s6908_s1 }
0x10ae   : > { %p7443_p11 = pnand %p7442_p2, %p7438_p8 }
0x10af   : > { %7089 = vrsqrt.f32 %v5819_v12  ;;  %vm5826_vm14 = vweird.f32 %v5819_v12 }
0x10b5   : > { %v7090_v31 = vpop.eup %7089 }
0x10b6   : > { %v5821_v36 = vmul.f32 %v7090_v31, %v5819_v12  ;;  %vm5827_vm0 = vweird.f32 %v7090_v31 }
0x10b7   : > { %vm5828_vm12 = vmor %vm5826_vm14, %vm5827_vm0 }
0x10b8   : > { %v5822_v27 = vmul.f32 %v7090_v31, %v5821_v36  ;;  %v6277_v17 = vpop.xlane.xlu1 %6276 }
0x10b9   : > { %v6278_v18 = vmul.f32 0.001953125, %v6277_v17  ;;  %v6301_v17 = vstv %s6909_s17 }
0x10ba   : > { %v5823_v38 = vmul.f32 0.5, %v5822_v27 }
0x10bb   : > { %v6279_v21 = vadd.f32 1e-05, %v6278_v18 }
0x10bc   : > { %v5824_v59 = vsub.f32 1.5, %v5823_v38 }
0x10bd   : > { %7091 = vrsqrt.f32 %v6279_v21  ;;  %vm6286_vm1 = vweird.f32 %v6279_v21 }
0x10be   : > { %v5825_v15 = vmul.f32 %v7090_v31, %v5824_v59 }
0x10c0   : > { %v5829_v35 = vsel %vm5828_vm12, %v7090_v31, %v5825_v15 }
0x10c1   : > { %v5830_v4 = vmul.f32 %v5829_v35, %v11795_v10  ;;  %v5831_v1 = vmul.f32 %v5829_v35, %v11798_v56  ;;  %v5832_v19 = vmul.f32 %v5829_v35, %v11801_v16  ;;  %v5833_v5 = vmul.f32 %v5829_v35, %v11807_v55 }
0x10c3   : > { %v7092_v34 = vpop.eup %7091  ;;  %v5836_v43 = vmul.f32 %v5835_v41, %v5830_v4  ;;  %v5837_v62 = vmul.f32 %v5835_v41, %v5831_v1  ;;  %v5838_v37 = vmul.f32 %v5835_v41, %v5832_v19  ;;  %v5839_v29 = vmul.f32 %v5835_v41, %v5833_v5 }
0x10c4   : > { %v6281_v53 = vmul.f32 %v7092_v34, %v6279_v21  ;;  %vm6287_vm15 = vweird.f32 %v7092_v34 }
0x10c5   : > { %v11855_v45 = vadd.f32 %v5841_v57, %v5836_v43  ;;  %v11857_v32 = vadd.f32 %v5841_v57, %v5837_v62  ;;  %v11859_v10 = vadd.f32 %v5841_v57, %v5838_v37  ;;  %v11863_v55 = vadd.f32 %v5841_v57, %v5839_v29  ;;  %vm6288_vm2 = vmor %vm6286_vm1, %vm6287_vm15 }
0x10c6   : > { %v6282_v44 = vmul.f32 %v7092_v34, %v6281_v53 }
0x10c7   : > { %v5846_v56 = vadd.f32 %v11857_v32, %v11855_v45 }
0x10c8   : > { %v6283_v16 = vmul.f32 0.5, %v6282_v44 }
0x10c9   : > { %v5847_v0 = vadd.f32 %v5846_v56, %v11859_v10 }
0x10ca   : > { %v6284_v23 = vsub.f32 1.5, %v6283_v16 }
0x10cb   : > { %v5848_v8 = vadd.f32 %v5847_v0, %v11863_v55 }
0x10cc   : > { %v6285_v39 = vmul.f32 %v7092_v34, %v6284_v23 }
0x10cd   : > { %5849 = vadd.xlane.f32.xlu1 %v5848_v8 }
0x10ce   : > { %v6289_v2 = vsel %vm6288_vm2, %v7092_v34, %v6285_v39 }
0x10cf   : > { %v6290_v12 = vmul.f32 %v6289_v2, %v11824_v49  ;;  %v6291_v31 = vmul.f32 %v6289_v2, %v11827_v20  ;;  %v6292_v36 = vmul.f32 %v6289_v2, %v11830_v14  ;;  %v6293_v27 = vmul.f32 %v6289_v2, %v11833_v22 }
0x10d1   : > { %v6296_v18 = vmul.f32 %v6295_v50, %v6290_v12  ;;  %v6297_v38 = vmul.f32 %v6295_v50, %v6291_v31  ;;  %v6298_v59 = vmul.f32 %v6295_v50, %v6292_v36  ;;  %v6299_v15 = vmul.f32 %v6295_v50, %v6293_v27 }
0x10d3   : > { %v6302_v35 = vadd.f32 %v6301_v17, %v6296_v18  ;;  %v6303_v41 = vadd.f32 %v6301_v17, %v6297_v38  ;;  %v6304_v21 = vadd.f32 %v6301_v17, %v6298_v59  ;;  %v6305_v1 = vadd.f32 %v6301_v17, %v6299_v15 }
0x10d5   : > { %v6306_v4 = vadd.f32 %v6303_v41, %v6302_v35 }
0x10d7   : > { %v6307_v19 = vadd.f32 %v6306_v4, %v6304_v21 }
0x10d9   : > { %v6308_v5 = vadd.f32 %v6307_v19, %v6305_v1 }
0x10db   : > { %6309 = vadd.xlane.f32.xlu0 %v6308_v5 }
0x1117   : > { %v5891_v49 = vpop.xlane.xlu0 %5890 }
0x1118   : > { %v5892_v20 = vmul.f32 0.001953125, %v5891_v49 }
0x111f   : > { %v6351_v57 = vpop.xlane.xlu2 %6350 }
0x1120   : > { %v6352_v34 = vmul.f32 0.001953125, %v6351_v57 }
0x1122   : > { %v6354_v14 = vmax.f32 %v5892_v20, %v6352_v34 }
0x1124   : > { %v6361_v43 = vsub.f32 %v5892_v20, %v6354_v14  ;;  %v6364_v22 = vsub.f32 %v6352_v34, %v6354_v14 }
0x1126   : > { %v6362_v62 = vmul.f32 1.442695, %v6361_v43  ;;  %v6365_v37 = vmul.f32 1.442695, %v6364_v22 }
0x1128   : > { %7093 = vpow2.f32 %v6362_v62 }
0x1129   : > { %7095 = vpow2.f32 %v6365_v37 }
0x112e   : > { %v7094_v53 = vpop.eup %7093 }
0x112f   : > { %v7096_v29 = vpop.eup %7095 }
0x1130   : > { %v6368_v44 = vadd.f32 %v7096_v29, %v7094_v53 }
0x1132   : > { %7097 = vrcp.f32 %v6368_v44  ;;  %v6394_v23 = vand.u32 2147483648, %v6368_v44  ;;  %v6392_v39 = vand.u32 2147483647, %v6368_v44  ;;  %vm6388_vm7 = vweird.f32 %v6368_v44 }
0x1134   : > { %v6395_v50 = vor.u32 1.1754944e-38, %v6394_v23  ;;  %vm6393_vm10 = vcmp.eq.f32.partialorder %v6392_v39, 8.507059e+37 }
0x1138   : > { %v7098_v56 = vpop.eup %7097 }
0x1139   : > { %v6384_v16 = vmul.f32 %v7098_v56, %v6368_v44  ;;  %vm6389_vm3 = vweird.f32 %v7098_v56 }
0x113a   : > { %vm6390_vm8 = vmor %vm6388_vm7, %vm6389_vm3 }
0x113b   : > { %v6385_v0 = vsub.f32 1.0, %v6384_v16 }
0x113d   : > { %v6386_v8 = vmul.f32 %v7098_v56, %v6385_v0 }
0x113f   : > { %v6387_v2 = vadd.f32 %v7098_v56, %v6386_v8 }
0x1140   : > { %v5850_v19 = vpop.xlane.xlu1 %5849 }
0x1141   : > { %v6391_v12 = vsel %vm6390_vm8, %v7098_v56, %v6387_v2  ;;  %v5851_v49 = vmul.f32 0.001953125, %v5850_v19 }
0x1142   : > { %v6396_v31 = vsel %vm6393_vm10, %v6395_v50, %v6391_v12 }
0x1143   : > { %v6408_v36 = vmul.f32 %v7094_v53, %v6396_v31  ;;  %v6449_v38 = vmul.f32 %v7096_v29, %v6396_v31 }
0x1145   : > { %v6410_v27 = vmul.f32 %v6408_v36, %v11857_v32  ;;  %v6409_v17 = vmul.f32 %v6408_v36, %v11855_v45  ;;  %v6411_v18 = vmul.f32 %v6408_v36, %v11859_v10  ;;  %v6451_v59 = vmul.f32 %v6449_v38, %v6303_v41 }
0x1146   : > { %v6450_v15 = vmul.f32 %v6449_v38, %v6302_v35  ;;  %v6412_v4 = vmul.f32 %v6408_v36, %v11863_v55  ;;  %v6453_v45 = vmul.f32 %v6449_v38, %v6305_v1  ;;  %v6452_v32 = vmul.f32 %v6449_v38, %v6304_v21 }
0x1147   : > { %6419 = vrot.lane.b32.xlu1 %v6410_v27, %s7512_s22  ;;  %6417 = vrot.lane.b32.xlu2 %v6409_v17, %s7512_s22 }
0x1148   : > { %6421 = vrot.lane.b32.xlu0 %v6411_v18, %s7512_s22 }
0x114e   : > { %v6310_v10 = vpop.xlane.xlu0 %6309 }
0x114f   : > { %6460 = vrot.lane.b32.xlu1 %v6451_v59, %s7512_s22  ;;  %6458 = vrot.lane.b32.xlu2 %v6450_v15, %s7512_s22  ;;  %v6311_v5 = vmul.f32 0.001953125, %v6310_v10 }
0x1150   : > { %6423 = vrot.lane.b32.xlu0 %v6412_v4, %s7512_s22 }
0x1151   : > { %v6353_v41 = vmax.f32 %v5851_v49, %v6311_v5 }
0x1153   : > { %v6355_v35 = vsub.f32 %v5851_v49, %v6353_v41  ;;  %v6358_v57 = vsub.f32 %v6311_v5, %v6353_v41 }
0x1155   : > { %v6356_v55 = vmul.f32 1.442695, %v6355_v35  ;;  %v6359_v20 = vmul.f32 1.442695, %v6358_v57 }
0x1157   : > { %6464 = vrot.lane.b32.xlu2 %v6453_v45, %s7512_s22  ;;  %7099 = vpow2.f32 %v6356_v55 }
0x1158   : > { %6462 = vrot.lane.b32.xlu0 %v6452_v32, %s7512_s22  ;;  %7101 = vpow2.f32 %v6359_v20  ;;  %s6754_s22 = sshll.u32 %s7734_s7, 6 }
0x115d   : > { %v7100_v34 = vpop.eup %7099 }
0x115e   : > { %v7102_v14 = vpop.eup %7101 }
0x115f   : > { %v6367_v43 = vadd.f32 %v7102_v14, %v7100_v34 }
0x1161   : > { %7103 = vrcp.f32 %v6367_v43  ;;  %v6380_v53 = vand.u32 2147483648, %v6367_v43  ;;  %vm6374_vm9 = vweird.f32 %v6367_v43  ;;  %v6378_v29 = vand.u32 2147483647, %v6367_v43 }
0x1163   : > { %v6381_v56 = vor.u32 1.1754944e-38, %v6380_v53  ;;  %vm6379_vm6 = vcmp.eq.f32.partialorder %v6378_v29, 8.507059e+37 }
0x1167   : > { %v7104_v21 = vpop.eup %7103 }
0x1168   : > { %v6370_v1 = vmul.f32 %v7104_v21, %v6367_v43  ;;  %vm6375_vm13 = vweird.f32 %v7104_v21 }
0x1169   : > { %vm6376_vm11 = vmor %vm6374_vm9, %vm6375_vm13 }
0x116a   : > { %v6371_v22 = vsub.f32 1.0, %v6370_v1 }
0x116c   : > { %v6372_v62 = vmul.f32 %v7104_v21, %v6371_v22 }
0x116e   : > { %v6373_v37 = vadd.f32 %v7104_v21, %v6372_v62 }
0x1170   : > { %v6377_v44 = vsel %vm6376_vm11, %v7104_v21, %v6373_v37 }
0x1171   : > { %v6382_v16 = vsel %vm6379_vm6, %v6381_v56, %v6377_v44 }
0x1172   : > { %v6397_v0 = vmul.f32 %v7100_v34, %v6382_v16  ;;  %v6438_v8 = vmul.f32 %v7102_v14, %v6382_v16 }
0x1174   : > { %v6398_v39 = vmul.f32 %v6397_v0, %v5859_v28  ;;  %v6439_v50 = vmul.f32 %v6438_v8, %v6319_v7  ;;  %v6399_v33 = vmul.f32 %v6397_v0, %v5860_v11  ;;  %v6440_v63 = vmul.f32 %v6438_v8, %v6320_v24 }
0x1175   : > { %v6402_v32 = vmul.f32 %v6397_v0, %v5863_v6  ;;  %v6443_v10 = vmul.f32 %v6438_v8, %v6323_v52  ;;  %v6400_v25 = vmul.f32 %v6397_v0, %v5861_v9  ;;  %v6401_v6 = vmul.f32 %v6397_v0, %v5862_v54 }
0x1176   : > { %v6441_v46 = vmul.f32 %v6438_v8, %v6321_v51  ;;  %v6442_v54 = vmul.f32 %v6438_v8, %v6322_v61 }
0x11a1   : > { %v6418_v23 = vpop.permute.xlu2 %6417 }
0x11a2   : > { %v6433_v2 = vadd.f32 %v6418_v23, %v6398_v39 }
0x11a4   : > { %v6444_v12 = vadd.f32 %v6439_v50, %v6433_v2 }
0x11a9   : > { %v6459_v31 = vpop.permute.xlu2 %6458 }
0x11aa   : > { %v6474_v36 = vadd.f32 %v6459_v31, %v6444_v12 }
0x11ac   : > { %v6911_v27 = vmul.f32 -1.442695, %v6474_v36 }
0x11ae   : > { %7105 = vpow2.f32 %v6911_v27 }
0x11b1   : > { %v6465_v14 = vpop.permute.xlu2 %6464 }
0x11b4   : > { %v7106_v17 = vpop.eup %7105 }
0x11b5   : > { %v6494_v18 = vadd.f32 1.0, %v7106_v17 }
0x11b7   : > { %7107 = vrcp.f32 %v6494_v18  ;;  %v6510_v49 = vand.u32 2147483648, %v6494_v18  ;;  %v6508_v35 = vand.u32 2147483647, %v6494_v18  ;;  %vm6504_vm14 = vweird.f32 %v6494_v18 }
0x11b9   : > { %v6420_v38 = vpop.permute.xlu1 %6419  ;;  %v6511_v34 = vor.u32 1.1754944e-38, %v6510_v49  ;;  %vm6509_vm15 = vcmp.eq.f32.partialorder %v6508_v35, 8.507059e+37 }
0x11ba   : > { %v6422_v59 = vpop.permute.xlu0 %6421  ;;  %v6425_v15 = vsel %vm876_vm4, %v6418_v23, %v6420_v38 }
0x11bb   : > { %v6434_v4 = vadd.f32 %v6425_v15, %v6399_v33  ;;  %v6426_v57 = vsel %vm876_vm4, %v6420_v38, %v6422_v59 }
0x11bc   : > { %v6435_v43 = vadd.f32 %v6426_v57, %v6400_v25 }
0x11bd   : > { %v7108_v28 = vpop.eup %7107  ;;  %v6445_v19 = vadd.f32 %v6440_v63, %v6434_v4 }
0x11be   : > { %v6500_v45 = vmul.f32 %v7108_v28, %v6494_v18  ;;  %vm6505_vm0 = vweird.f32 %v7108_v28  ;;  %v6446_v37 = vadd.f32 %v6441_v46, %v6435_v43 }
0x11bf   : > { %vm6506_vm12 = vmor %vm6504_vm14, %vm6505_vm0 }
0x11c0   : > { %v6501_v7 = vsub.f32 1.0, %v6500_v45 }
0x11c1   : > { %v6461_v5 = vpop.permute.xlu1 %6460 }
0x11c2   : > { %v6424_v41 = vpop.permute.xlu0 %6423  ;;  %v6466_v42 = vsel %vm876_vm4, %v6459_v31, %v6461_v5  ;;  %v6502_v11 = vmul.f32 %v7108_v28, %v6501_v7 }
0x11c3   : > { %v6427_v60 = vsel %vm876_vm4, %v6422_v59, %v6424_v41  ;;  %v6437_v24 = vadd.f32 %v6424_v41, %v6402_v32  ;;  %v6475_v55 = vadd.f32 %v6466_v42, %v6445_v19 }
0x11c4   : > { %v6503_v13 = vadd.f32 %v7108_v28, %v6502_v11  ;;  %v6436_v21 = vadd.f32 %v6427_v60, %v6401_v6 }
0x11c5   : > { %v6448_v52 = vadd.f32 %v6443_v10, %v6437_v24  ;;  %v6912_v20 = vmul.f32 -1.442695, %v6475_v55 }
0x11c6   : > { %v6507_v1 = vsel %vm6506_vm12, %v7108_v28, %v6503_v13  ;;  %v6447_v53 = vadd.f32 %v6442_v54, %v6436_v21 }
0x11c7   : > { %v6478_v22 = vadd.f32 %v6465_v14, %v6448_v52  ;;  %7109 = vpow2.f32 %v6912_v20  ;;  %v6512_v62 = vsel %vm6509_vm15, %v6511_v34, %v6507_v1 }
0x11c8   : > { %6579 = vrot.lane.b32.xlu1 %v6512_v62, %s13136_s25 }
0x11c9   : > { %v6915_v47 = vmul.f32 -1.442695, %v6478_v22 }
0x11ca   : > { %v6463_v9 = vpop.permute.xlu0 %6462 }
0x11cb   : > { %7111 = vpow2.f32 %v6915_v47  ;;  %v6467_v29 = vsel %vm876_vm4, %v6461_v5, %v6463_v9  ;;  %v6468_v44 = vsel %vm876_vm4, %v6463_v9, %v6465_v14 }
0x11cc   : > { %v6476_v56 = vadd.f32 %v6467_v29, %v6446_v37  ;;  %v6477_v16 = vadd.f32 %v6468_v44, %v6447_v53  ;;  %v7193_v29 = vld [vmem:[%s7738_s12 + $0x8] sm:$0xff] }
0x11cd   : > { %v7110_v0 = vpop.eup %7109 }
0x11ce   : > { %v6495_v23 = vadd.f32 1.0, %v7110_v0  ;;  %v6913_v39 = vmul.f32 -1.442695, %v6476_v56  ;;  %v6914_v2 = vmul.f32 -1.442695, %v6477_v16  ;;  %v7194_v56 = vld [vmem:[%s7738_s12 + $0x10] sm:$0xff] }
0x11d0   : > { %7113 = vrcp.f32 %v6495_v23  ;;  %v6525_v17 = vand.u32 2147483648, %v6495_v23  ;;  %v6523_v38 = vand.u32 2147483647, %v6495_v23  ;;  %vm6519_vm1 = vweird.f32 %v6495_v23 }
0x11d1   : > { %v7112_v40 = vpop.eup %7111  ;;  %7115 = vpow2.f32 %v6913_v39 }
0x11d2   : > { %v6498_v51 = vadd.f32 1.0, %v7112_v40  ;;  %7117 = vpow2.f32 %v6914_v2  ;;  %v6526_v33 = vor.u32 1.1754944e-38, %v6525_v17  ;;  %vm6524_vm3 = vcmp.eq.f32.partialorder %v6523_v38, 8.507059e+37 }
0x11d4   : > { %7119 = vrcp.f32 %v6498_v51  ;;  %v6570_v49 = vand.u32 2147483648, %v6498_v51  ;;  %vm6564_vm8 = vweird.f32 %v6498_v51  ;;  %v6568_v42 = vand.u32 2147483647, %v6498_v51 }
0x11d6   : > { %v7114_v3 = vpop.eup %7113  ;;  %v6571_v52 = vor.u32 1.1754944e-38, %v6570_v49  ;;  %vm6569_vm6 = vcmp.eq.f32.partialorder %v6568_v42, 8.507059e+37 }
0x11d7   : > { %v7116_v61 = vpop.eup %7115  ;;  %v6515_v8 = vmul.f32 %v7114_v3, %v6495_v23  ;;  %vm6520_vm4 = vweird.f32 %v7114_v3 }
0x11d8   : > { %v7118_v50 = vpop.eup %7117  ;;  %v6496_v12 = vadd.f32 1.0, %v7116_v61  ;;  %vm6521_vm2 = vmor %vm6519_vm1, %vm6520_vm4 }
0x11d9   : > { %v6497_v31 = vadd.f32 1.0, %v7118_v50  ;;  %v6516_v36 = vsub.f32 1.0, %v6515_v8 }
0x11da   : > { %v7120_v27 = vpop.eup %7119  ;;  %7121 = vrcp.f32 %v6496_v12  ;;  %v6538_v35 = vand.u32 2147483647, %v6496_v12  ;;  %v6540_v57 = vand.u32 2147483648, %v6496_v12  ;;  %vm6534_vm11 = vweird.f32 %v6496_v12 }
0x11db   : > { %7123 = vrcp.f32 %v6497_v31  ;;  %v6517_v18 = vmul.f32 %v7114_v3, %v6516_v36  ;;  %v6560_v59 = vmul.f32 %v7120_v27, %v6498_v51  ;;  %vm6565_vm7 = vweird.f32 %v7120_v27  ;;  %v7195_v51 = vld [vmem:[%s7738_s12 + $0x18] sm:$0xff] }
0x11dc   : > { %vm11911_vm10 = vmor %vm6564_vm8, %vm6565_vm7  ;;  %v6555_v24 = vand.u32 2147483648, %v6497_v31  ;;  %v6553_v13 = vand.u32 2147483647, %v6497_v31  ;;  %vm6549_vm0 = vweird.f32 %v6497_v31  ;;  %v6541_v14 = vor.u32 1.1754944e-38, %v6540_v57 }
0x11dd   : > { %v6518_v15 = vadd.f32 %v7114_v3, %v6517_v18  ;;  %v6561_v28 = vsub.f32 1.0, %v6560_v59  ;;  %vm6539_vm15 = vcmp.eq.f32.partialorder %v6538_v35, 8.507059e+37 }
0x11de   : > { %v6556_v21 = vor.u32 1.1754944e-38, %v6555_v24  ;;  %vm6554_vm4 = vcmp.eq.f32.partialorder %v6553_v13, 8.507059e+37 }
0x11df   : > { %v6522_v4 = vsel %vm6521_vm2, %v7114_v3, %v6518_v15  ;;  %v6562_v7 = vmul.f32 %v7120_v27, %v6561_v28  ;;  %v7196_v3 = vld [vmem:[%s7738_s12 + $0x20] sm:$0xff] }
0x11e0   : > { %v7122_v45 = vpop.eup %7121  ;;  %v6527_v63 = vsel %vm6524_vm3, %v6526_v33, %v6522_v4 }
0x11e1   : > { %v7124_v32 = vpop.eup %7123  ;;  %6581 = vrot.lane.b32.xlu0 %v6527_v63, %s13136_s25  ;;  %v6530_v10 = vmul.f32 %v7122_v45, %v6496_v12  ;;  %v6563_v5 = vadd.f32 %v7120_v27, %v6562_v7  ;;  %vm6535_vm13 = vweird.f32 %v7122_v45 }
0x11e2   : > { %v6545_v19 = vmul.f32 %v7124_v32, %v6497_v31  ;;  %vm6550_vm9 = vweird.f32 %v7124_v32  ;;  %vm6536_vm14 = vmor %vm6534_vm11, %vm6535_vm13 }
0x11e3   : > { %v6531_v41 = vsub.f32 1.0, %v6530_v10  ;;  %v6567_v25 = vsel %vm11911_vm10, %v7120_v27, %v6563_v5  ;;  %vm6551_vm12 = vmor %vm6549_vm0, %vm6550_vm9 }
0x11e4   : > { %v6546_v11 = vsub.f32 1.0, %v6545_v19  ;;  %v6572_v43 = vsel %vm6569_vm6, %v6571_v52, %v6567_v25 }
0x11e5   : > { %v6532_v55 = vmul.f32 %v7122_v45, %v6531_v41 }
0x11e6   : > { %v6547_v6 = vmul.f32 %v7124_v32, %v6546_v11 }
0x11e7   : > { %v6533_v20 = vadd.f32 %v7122_v45, %v6532_v55 }
0x11e8   : > { %v6548_v34 = vadd.f32 %v7124_v32, %v6547_v6 }
0x11e9   : > { %v6537_v1 = vsel %vm6536_vm14, %v7122_v45, %v6533_v20  ;;  %6587 = vrot.lane.b32.xlu0 %v6572_v43, %s13136_s25 }
0x11ea   : > { %v6552_v22 = vsel %vm6551_vm12, %v7124_v32, %v6548_v34  ;;  %v6542_v62 = vsel %vm6539_vm15, %v6541_v14, %v6537_v1 }
0x11eb   : > { %v6557_v46 = vsel %vm6554_vm4, %v6556_v21, %v6552_v22  ;;  %6583 = vrot.lane.b32.xlu2 %v6542_v62, %s13136_s25 }
0x11ec   : > { %6585 = vrot.lane.b32.xlu1 %v6557_v46, %s13136_s25  ;;  %s343_s25 = scalar_lea.vmem [#allocation18], %s6754_s22 }
0x11ed   : > { %s6627_s26 = sshll.u32 %s343_s25, 4  ;;  %s6628_s26 = int_to_ptr.vmem [resolvable:$true] %s6627_s26 }
0x123a   : > { %v6580_v54 = vpop.permute.xlu1 %6579 }
0x1245   : > { %v6584_v47 = vpop.permute.xlu2 %6583 }
0x1253   : > { %v6582_v9 = vpop.permute.xlu0 %6581 }
0x1254   : > { %v6589_v37 = vsel %vm2212_vm5, %v6580_v54, %v6582_v9  ;;  %v6590_v53 = vsel %vm2212_vm5, %v6582_v9, %v6584_v47 }
0x1255   : > { %v6597_v44 = vmul.f32 %v7193_v29, %v6589_v37  ;;  %v6598_v16 = vmul.f32 %v7194_v56, %v6590_v53  ;;  %v6605_v0 = vmul.f32 %v11641_v30, %v6589_v37  ;;  %v6606_v23 = vmul.f32 %v11646_v26, %v6590_v53 }
0x1257   : > { %6601 = vst [vmem:[%s343_s25] sm:$0xff] %v6597_v44 }
0x1258   : > { %6602 = vst [vmem:[%s343_s25 + $0x8] sm:$0xff] %v6598_v16 }
0x1259   : > { %6916 = vst [vmem:[%s343_s25 + $0x20] sm:$0xff] %v6605_v0 }
0x125a   : > { %6917 = vst [vmem:[%s343_s25 + $0x28] sm:$0xff] %v6606_v23 }
0x125b   : > { %v6588_v39 = vpop.permute.xlu0 %6587 }
0x125e   : > { %v6586_v2 = vpop.permute.xlu1 %6585 }
0x125f   : > { %v6591_v40 = vsel %vm2212_vm5, %v6584_v47, %v6586_v2  ;;  %v6592_v30 = vsel %vm2212_vm5, %v6586_v2, %v6588_v39 }
0x1260   : > { %v6599_v26 = vmul.f32 %v7195_v51, %v6591_v40  ;;  %v6600_v61 = vmul.f32 %v7196_v3, %v6592_v30  ;;  %v6607_v8 = vmul.f32 %v11653_v58, %v6591_v40  ;;  %v6608_v50 = vmul.f32 %v11676_v48, %v6592_v30 }
0x1262   : > { %6603 = vst [vmem:[%s343_s25 + $0x10] sm:$0xff] %v6599_v26 }
0x1263   : > { %6604 = vst [vmem:[%s343_s25 + $0x18] sm:$0xff] %v6600_v61 }
0x1264   : > { %6918 = vst [vmem:[%s343_s25 + $0x30] sm:$0xff] %v6607_v8 }
0x1265   : > { %6919 = vst [vmem:[%s343_s25 + $0x38] sm:$0xff] %v6608_v50 }
0x1266   : > { %7446 = shalt.err (!%p7443_p11)
}
0x1267   : > { %s7539_s7 = smov 512   ;;  %s7540_s17 = smov 1024  }
0x1268   : > { %s7541_s22 = smov 32  }
0x1269   : > { %6947 = dma.vmem_to_hbm [thread:$0]  (%p7707_p5), %s6628_s26, 1024, %s6630_s20, %s6615_s30, %s7539_s7, %s7540_s17, %s7541_s22  }
0x126a PF: > { %s6644_s25 = sand.u32 1, %s7483_s3   ;;  %p13160_p12 = scmp.ge.s32.totalorder %s7495_s5, 2 }
0x126b   : > { %s6645_s2 = scalar_lea.sflag [#allocation11], %s6644_s25 }
0x126c   : > { %p6967_p13 = pnand %p13160_p12, %p7655_p6 }
0x126e   : > { %p6968_p0 = pneg %p6967_p13 }
0x1270   : > { %7478 = dma.done.wait (%p6968_p0), %s6645_s2, 1024  }
0x1271   : > { %7480 = vsyncadd (%p6968_p0), %s6645_s2, 4294966272  ;;  %p59_p3 = scmp.ge.s32.totalorder %s7694_s0, 4   ;;  %s13161_s3 = smov %s7487_s4 }
0x1272   : > { %s13162_s4 = smov %s7491_s19  ;;  %s13163_s19 = smov %s7703_s14 }
0x1273   : > { %s13164_s5 = smov %s7694_s0  ;;  %61 = sbr.rel (!%p59_p3) target bundleno = 23 (0x17), region = 128 }
0x1278   :  { %6651 = vsyncpa [#allocation10], 1 }
0x1279   :  { %6653 = vsyncpa [#allocation10 + $0x1], 1 }
0x127a   :  { %6654 = vsyncpa [#allocation13], 1 }
0x127b   :  { %6655 = vsyncpa [#allocation16], 1 }
0x127c   :  { %6656 = vsyncpa [#allocation11], 1 }
0x127d   :  { %6658 = vsyncpa [#allocation11 + $0x1], 1 }

</bundles_post_ra>
